<compile_context>
chip_gen: v7x
topology: tpu7x:2x2x1
jax: 0.10.0
libtpu: 0.0.40
codegen_flags: <defaults>
</compile_context>

<pallas_src>
import functools

import jax
import jax.numpy as jnp
from jax.experimental import pallas as pl
from jax.experimental.pallas import tpu as pltpu

_LANES = 128  # images packed per lane tile


# ----------------------------- Fused Pallas kernel ---------------------------
def _scnn_fused_kernel(w1_ref, b1_ref, w2_ref, b2_ref, w3_ref, b3_ref,   # SMEM (flat)
                       xpad_ref, mem1_ref, mem2_ref, mem3_ref,           # VMEM in
                       spk2_ref, spk3_ref,                               # VMEM out
                       mem1_out_ref, mem2_out_ref, mem3_out_ref,         # VMEM out
                       pad2_ref,                                         # VMEM scratch
                       *, h, w, k3, beta, th1, th2, th3):
    h3, w3d = h - k3 + 1, w - k3 + 1
    nt = xpad_ref.shape[-1]

    def lif(cur, mem_prev, th):
        reset = (mem_prev > th).astype(jnp.float32)      # reset from previous mem
        mem_new = beta * mem_prev + cur - reset * th     # subtract reset
        spk = (mem_new > th).astype(jnp.float32)         # Heaviside fire on new mem
        return spk, mem_new

    def conv3x3_rows(src_ref, w_ref, b_ref, y0, hc):
        # Output rows y0..y0+hc-1 of a 'same' 3x3 conv; src_ref is the zero-padded
        # (h+2, w+2, nt) buffer.  Taps are loaded straight from VMEM (vld), bias is
        # folded into the accumulator init; hc*ceil(w/8) independent vregs give
        # plenty of ILP with a single accumulator.
        acc = jnp.full((hc, w, nt), b_ref[0], jnp.float32)
        for i in range(3):
            for j in range(3):
                tap = src_ref[y0 + i:y0 + i + hc, j:j + w, :]
                acc = acc + w_ref[i * 3 + j] * tap
        return acc

    # Zero only the 1-px border of the spk1 pad scratch every step (the interior
    # is fully rewritten below); cheap, and correct even if the "parallel" grid
    # axis is sharded across TensorCores with per-core scratch.
    zrow = jnp.zeros((1, w + 2, nt), jnp.float32)
    zcol = jnp.zeros((h + 2, 1, nt), jnp.float32)
    pad2_ref[0:1, :, :] = zrow
    pad2_ref[h + 1:h + 2, :, :] = zrow
    pad2_ref[:, 0:1, :] = zcol
    pad2_ref[:, w + 1:w + 2, :] = zcol

    # 8-row output chunks bound vreg liveness (~2*hc vregs per accumulator).
    chunks = []
    y = 0
    while y < h:
        s = min(8, h - y)
        chunks.append((y, s))
        y += s

    # ---- layer 1: conv 3x3 (pad 1) + LIF(th1); spk1 goes straight into pad2 ----
    for (y0, hc) in chunks:
        cur1 = conv3x3_rows(xpad_ref, w1_ref, b1_ref, y0, hc)
        spk1, mem1_new = lif(cur1, mem1_ref[y0:y0 + hc, :, :], th1)
        mem1_out_ref[y0:y0 + hc, :, :] = mem1_new
        pad2_ref[1 + y0:1 + y0 + hc, 1:1 + w, :] = spk1

    # ---- layer 2: conv 3x3 (pad 1) + LIF(th2) ----
    for (y0, hc) in chunks:
        cur2 = conv3x3_rows(pad2_ref, w2_ref, b2_ref, y0, hc)
        spk2, mem2_new = lif(cur2, mem2_ref[y0:y0 + hc, :, :], th2)
        mem2_out_ref[y0:y0 + hc, :, :] = mem2_new
        spk2_ref[y0:y0 + hc, :, :] = spk2

    # ---- layer 3: conv k3 x k3 (valid) + LIF(th3).  Taps are read back from the
    # just-written spk2 output ref so vreg pressure stays at 2 small accumulators
    # (2 x h3 vregs) instead of keeping spk2 live across 100 taps. ----
    accs = [jnp.full((h3, w3d, nt), b3_ref[0], jnp.float32),
            jnp.zeros((h3, w3d, nt), jnp.float32)]
    t = 0
    for i in range(k3):
        for j in range(k3):
            tap = spk2_ref[i:i + h3, j:j + w3d, :]
            accs[t & 1] = accs[t & 1] + w3_ref[i * k3 + j] * tap
            t += 1
    cur3 = accs[0] + accs[1]
    spk3, mem3_new = lif(cur3, mem3_ref[...], th3)
    spk3_ref[...] = spk3
    mem3_out_ref[...] = mem3_new


def make_scnn_step(beta, th1, th2, th3, k3=10):
    """Build the jitted single-dispatch forward step (all 3 layers fused)."""
    beta, th1, th2, th3 = float(beta), float(th1), float(th2), float(th3)

    def step(params, x_nchw, mem1, mem2, mem3):
        w1, b1, w2, b2, w3, b3 = params
        n, c, h, w = x_nchw.shape
        h3, w3d = h - k3 + 1, w - k3 + 1
        np_ = mem1.shape[-1]          # batch already padded to a multiple of 128
        nt = _LANES
        n_tiles = np_ // nt

        # NCHW (c==1) -> lane-packed (H, W, Npad), plus the 1-px spatial zero pad
        # conv1 needs (done once here instead of a VMEM round-trip in-kernel).
        x = jnp.transpose(x_nchw[:, 0].astype(jnp.float32), (1, 2, 0))
        x = jnp.pad(x, ((1, 1), (1, 1), (0, np_ - n)))

        kernel = functools.partial(_scnn_fused_kernel, h=h, w=w, k3=k3,
                                   beta=beta, th1=th1, th2=th2, th3=th3)

        smem = pl.BlockSpec(memory_space=pltpu.MemorySpace.SMEM)
        spk2, spk3, mem1_n, mem2_n, mem3_n = pl.pallas_call(
            kernel,
            out_shape=(
                jax.ShapeDtypeStruct((h, w, np_), jnp.float32),      # spk2
                jax.ShapeDtypeStruct((h3, w3d, np_), jnp.float32),   # spk3
                jax.ShapeDtypeStruct((h, w, np_), jnp.float32),      # mem1_new
                jax.ShapeDtypeStruct((h, w, np_), jnp.float32),      # mem2_new
                jax.ShapeDtypeStruct((h3, w3d, np_), jnp.float32),   # mem3_new
            ),
            grid_spec=pltpu.PrefetchScalarGridSpec(
                num_scalar_prefetch=0,
                grid=(n_tiles,),                                     # 128-image lane tiles
                in_specs=[
                    smem, smem, smem, smem, smem, smem,              # w1,b1,w2,b2,w3,b3
                    pl.BlockSpec((h + 2, w + 2, nt), lambda i: (0, 0, i)),  # x (padded)
                    pl.BlockSpec((h, w, nt), lambda i: (0, 0, i)),          # mem1
                    pl.BlockSpec((h, w, nt), lambda i: (0, 0, i)),          # mem2
                    pl.BlockSpec((h3, w3d, nt), lambda i: (0, 0, i)),       # mem3
                ],
                out_specs=[
                    pl.BlockSpec((h, w, nt), lambda i: (0, 0, i)),          # spk2
                    pl.BlockSpec((h3, w3d, nt), lambda i: (0, 0, i)),       # spk3
                    pl.BlockSpec((h, w, nt), lambda i: (0, 0, i)),          # mem1_new
                    pl.BlockSpec((h, w, nt), lambda i: (0, 0, i)),          # mem2_new
                    pl.BlockSpec((h3, w3d, nt), lambda i: (0, 0, i)),       # mem3_new
                ],
                scratch_shapes=[pltpu.VMEM((h + 2, w + 2, nt), jnp.float32)],  # spk1 pad
            ),
            # Update membrane state in place (mem1/mem2/mem3 -> outputs 2/3/4).
            input_output_aliases={7: 2, 8: 3, 9: 4},
            compiler_params=pltpu.CompilerParams(dimension_semantics=("parallel",)),
        )(w1.reshape(-1), b1, w2.reshape(-1), b2, w3.reshape(-1), b3,
          x, mem1, mem2, mem3)

        # Back to NCHW for the module-level API / host bookkeeping, inside the jit.
        def to_nchw(a):
            return jnp.transpose(a, (2, 0, 1))[:n, None]

        return (to_nchw(spk2), to_nchw(spk3), to_nchw(mem3_n),
                mem1_n, mem2_n, mem3_n)

    # Donate the membrane state so the in-kernel aliasing is in place end-to-end.
    return jax.jit(step, donate_argnums=(2, 3, 4))


# ----------------------------- Module wrapper --------------------------------
class SpikeTrainsHistory:
    """Mirror of spike_trains_history (pure Python bookkeeping)."""
    def __init__(self, layer=None):
        self.r_pre = []
        self.r_post = []
        self.layer = layer


layer3 = SpikeTrainsHistory(layer=3)


class SCNNPallas:
    def __init__(self, key):
        threshold = 2.0
        ks = jax.random.split(key, 6)

        def init_conv(kw_key, kb_key, ksize):
            fan_in = 1 * ksize * ksize                    # in_channels == 1
            bound = 1.0 / (fan_in ** 0.5)                 # PyTorch default init bound
            wgt = jax.random.uniform(kw_key, (ksize, ksize), jnp.float32, -bound, bound)
            b = jax.random.uniform(kb_key, (1,), jnp.float32, -bound, bound)
            return wgt, b

        self.w1, self.b1 = init_conv(ks[0], ks[1], 3)
        self.w2, self.b2 = init_conv(ks[2], ks[3], 3)
        self.w3, self.b3 = init_conv(ks[4], ks[5], 10)
        self.beta = 0.8
        self.th1, self.th2, self.th3 = threshold, threshold * 3.0, threshold
        self.mem1 = self.mem2 = self.mem3 = None          # init_leaky() -> zeros
        self._step = make_scnn_step(self.beta, self.th1, self.th2, self.th3)

    def forward(self, x_nchw):
        global layer3
        n, c, h, w = x_nchw.shape
        assert c == 1 and h >= 10 and w >= 10
        if self.mem1 is None:
            np_ = ((n + _LANES - 1) // _LANES) * _LANES   # lane-pad the batch
            self.mem1 = jnp.zeros((h, w, np_), jnp.float32)
            self.mem2 = jnp.zeros((h, w, np_), jnp.float32)
            self.mem3 = jnp.zeros((h - 9, w - 9, np_), jnp.float32)

        params = (self.w1, self.b1, self.w2, self.b2, self.w3, self.b3)
        spk2_c, spk3_c, mem3_c, self.mem1, self.mem2, self.mem3 = self._step(
            params, x_nchw, self.mem1, self.mem2, self.mem3)

        # TODO(synk): global spike-history append is host-side Python bookkeeping,
        # not kernel work (grows unboundedly, exactly like the PyTorch original).
        layer3.r_pre = layer3.r_pre + [[spk2_c]]
        layer3.r_post = layer3.r_post + [[spk3_c]]
        return spk3_c, mem3_c                             # NCHW, like the module


# ----------------------------- Reference (plain JAX) -------------------------
def _ref_forward(x_nchw, model):
    def conv(x, wgt, b, pad):
        out = jax.lax.conv_general_dilated(
            x, wgt[None, None], window_strides=(1, 1),
            padding=((pad, pad), (pad, pad)),
            dimension_numbers=("NCHW", "OIHW", "NCHW"))
        return out + b[0]

    def lif(cur, mem, th):
        reset = (mem > th).astype(jnp.float32)
        mem_new = model.beta * mem + cur - reset * th
        return (mem_new > th).astype(jnp.float32), mem_new

    n, _, h, w = x_nchw.shape
    m1 = jnp.zeros((n, 1, h, w), jnp.float32)
    m2 = jnp.zeros((n, 1, h, w), jnp.float32)
    m3 = jnp.zeros((n, 1, h - 9, w - 9), jnp.float32)
    spk1, m1 = lif(conv(x_nchw, model.w1, model.b1, 1), m1, model.th1)
    spk2, m2 = lif(conv(spk1, model.w2, model.b2, 1), m2, model.th2)
    spk3, m3 = lif(conv(spk2, model.w3, model.b3, 0), m3, model.th3)
    return spk3, m3


# --------------------------------- main --------------------------------------
if __name__ == "__main__":
    key = jax.random.PRNGKey(0)
    k_model, k_x = jax.random.split(key)
    model = SCNNPallas(k_model)

    # batch=2, channels=1, spatial=16x16 (conv3 has kernel 10, so H,W >= 10)
    x = jax.random.uniform(k_x, (2, 1, 16, 16), jnp.float32, 0.0, 30.0)

    spk3, mem3 = model.forward(x)
    spk3, mem3 = jax.block_until_ready((spk3, mem3))

    spk3_ref, mem3_ref = _ref_forward(x, model)
    assert spk3.shape == (2, 1, 7, 7) and mem3.shape == (2, 1, 7, 7)
    assert jnp.allclose(mem3, mem3_ref, rtol=1e-4, atol=1e-4)
    assert jnp.allclose(spk3, spk3_ref, rtol=0, atol=1e-6)

    print("KERNEL_OK")
</pallas_src>

<mosaic_0001>
module attributes {stable_mosaic.version = 11 : i64} {
  func.func @_scnn_fused_kernel(%arg0: i32, %arg1: memref<9xf32, #tpu.memory_space<smem>>, %arg2: memref<1xf32, #tpu.memory_space<smem>>, %arg3: memref<9xf32, #tpu.memory_space<smem>>, %arg4: memref<1xf32, #tpu.memory_space<smem>>, %arg5: memref<100xf32, #tpu.memory_space<smem>>, %arg6: memref<1xf32, #tpu.memory_space<smem>>, %arg7: memref<18x18x128xf32, #tpu.memory_space<vmem>>, %arg8: memref<16x16x128xf32, #tpu.memory_space<vmem>>, %arg9: memref<16x16x128xf32, #tpu.memory_space<vmem>>, %arg10: memref<7x7x128xf32, #tpu.memory_space<vmem>>, %arg11: memref<16x16x128xf32, #tpu.memory_space<vmem>>, %arg12: memref<7x7x128xf32, #tpu.memory_space<vmem>>, %arg13: memref<16x16x128xf32, #tpu.memory_space<vmem>>, %arg14: memref<16x16x128xf32, #tpu.memory_space<vmem>>, %arg15: memref<7x7x128xf32, #tpu.memory_space<vmem>>, %arg16: memref<18x18x128xf32, #tpu.memory_space<vmem>>) attributes {dimension_semantics = [#tpu.dimension_semantics<parallel>], iteration_bounds = array<i64: 1>, scalar_prefetch = 0 : i64, scratch_operands = 1 : i64, tpu.core_type = #tpu.core_type<tc>, window_params = [{transform_indices = @transform_0, window_bounds = array<i64: 9>}, {transform_indices = @transform_1, window_bounds = array<i64: 1>}, {transform_indices = @transform_2, window_bounds = array<i64: 9>}, {transform_indices = @transform_3, window_bounds = array<i64: 1>}, {transform_indices = @transform_4, window_bounds = array<i64: 100>}, {transform_indices = @transform_5, window_bounds = array<i64: 1>}, {transform_indices = @transform_6, window_bounds = array<i64: 18, 18, 128>}, {transform_indices = @transform_7, window_bounds = array<i64: 16, 16, 128>}, {transform_indices = @transform_8, window_bounds = array<i64: 16, 16, 128>}, {transform_indices = @transform_9, window_bounds = array<i64: 7, 7, 128>}, {transform_indices = @transform_10, window_bounds = array<i64: 16, 16, 128>}, {transform_indices = @transform_11, window_bounds = array<i64: 7, 7, 128>}, {transform_indices = @transform_12, window_bounds = array<i64: 16, 16, 128>}, {transform_indices = @transform_13, window_bounds = array<i64: 16, 16, 128>}, {transform_indices = @transform_14, window_bounds = array<i64: 7, 7, 128>}]} {
    %cst = arith.constant 0.000000e+00 : f32
    %0 = vector.broadcast %cst : f32 to vector<1x18x128xf32>
    %cst_0 = arith.constant 0.000000e+00 : f32
    %1 = vector.broadcast %cst_0 : f32 to vector<18x1x128xf32>
    %c0 = arith.constant 0 : index
    %c0_1 = arith.constant 0 : index
    %c0_2 = arith.constant 0 : index
    %2 = vector.load %arg16[%c0, %c0_1, %c0_2] : memref<18x18x128xf32, #tpu.memory_space<vmem>>, vector<1x18x128xf32>
    tpu.vector_store %arg16[%c0, %c0_1, %c0_2], %0 {strides = array<i32>} : memref<18x18x128xf32, #tpu.memory_space<vmem>>, vector<1x18x128xf32>,
    %c17 = arith.constant 17 : index
    %c0_3 = arith.constant 0 : index
    %c0_4 = arith.constant 0 : index
    %3 = vector.load %arg16[%c17, %c0_3, %c0_4] : memref<18x18x128xf32, #tpu.memory_space<vmem>>, vector<1x18x128xf32>
    tpu.vector_store %arg16[%c17, %c0_3, %c0_4], %0 {strides = array<i32>} : memref<18x18x128xf32, #tpu.memory_space<vmem>>, vector<1x18x128xf32>,
    %c0_5 = arith.constant 0 : index
    %c0_6 = arith.constant 0 : index
    %c0_7 = arith.constant 0 : index
    %4 = vector.load %arg16[%c0_5, %c0_6, %c0_7] : memref<18x18x128xf32, #tpu.memory_space<vmem>>, vector<18x1x128xf32>
    tpu.vector_store %arg16[%c0_5, %c0_6, %c0_7], %1 {strides = array<i32>} : memref<18x18x128xf32, #tpu.memory_space<vmem>>, vector<18x1x128xf32>,
    %c0_8 = arith.constant 0 : index
    %c17_9 = arith.constant 17 : index
    %c0_10 = arith.constant 0 : index
    %5 = vector.load %arg16[%c0_8, %c17_9, %c0_10] : memref<18x18x128xf32, #tpu.memory_space<vmem>>, vector<18x1x128xf32>
    tpu.vector_store %arg16[%c0_8, %c17_9, %c0_10], %1 {strides = array<i32>} : memref<18x18x128xf32, #tpu.memory_space<vmem>>, vector<18x1x128xf32>,
    %c0_11 = arith.constant 0 : index
    %6 = memref.load %arg2[%c0_11] : memref<1xf32, #tpu.memory_space<smem>>
    %7 = vector.broadcast %6 : f32 to vector<8x16x128xf32>
    %c0_12 = arith.constant 0 : index
    %c0_13 = arith.constant 0 : index
    %c0_14 = arith.constant 0 : index
    %8 = vector.load %arg7[%c0_12, %c0_13, %c0_14] : memref<18x18x128xf32, #tpu.memory_space<vmem>>, vector<8x16x128xf32>
    %c0_15 = arith.constant 0 : index
    %9 = memref.load %arg1[%c0_15] : memref<9xf32, #tpu.memory_space<smem>>
    %10 = vector.broadcast %9 : f32 to vector<8x16x128xf32>
    %11 = arith.mulf %10, %8 : vector<8x16x128xf32>
    %12 = arith.addf %7, %11 : vector<8x16x128xf32>
    %c0_16 = arith.constant 0 : index
    %c1 = arith.constant 1 : index
    %c0_17 = arith.constant 0 : index
    %13 = vector.load %arg7[%c0_16, %c1, %c0_17] : memref<18x18x128xf32, #tpu.memory_space<vmem>>, vector<8x16x128xf32>
    %c1_18 = arith.constant 1 : index
    %14 = memref.load %arg1[%c1_18] : memref<9xf32, #tpu.memory_space<smem>>
    %15 = vector.broadcast %14 : f32 to vector<8x16x128xf32>
    %16 = arith.mulf %15, %13 : vector<8x16x128xf32>
    %17 = arith.addf %12, %16 : vector<8x16x128xf32>
    %c0_19 = arith.constant 0 : index
    %c2 = arith.constant 2 : index
    %c0_20 = arith.constant 0 : index
    %18 = vector.load %arg7[%c0_19, %c2, %c0_20] : memref<18x18x128xf32, #tpu.memory_space<vmem>>, vector<8x16x128xf32>
    %c2_21 = arith.constant 2 : index
    %19 = memref.load %arg1[%c2_21] : memref<9xf32, #tpu.memory_space<smem>>
    %20 = vector.broadcast %19 : f32 to vector<8x16x128xf32>
    %21 = arith.mulf %20, %18 : vector<8x16x128xf32>
    %22 = arith.addf %17, %21 : vector<8x16x128xf32>
    %c1_22 = arith.constant 1 : index
    %c0_23 = arith.constant 0 : index
    %c0_24 = arith.constant 0 : index
    %23 = vector.load %arg7[%c1_22, %c0_23, %c0_24] : memref<18x18x128xf32, #tpu.memory_space<vmem>>, vector<8x16x128xf32>
    %c3 = arith.constant 3 : index
    %24 = memref.load %arg1[%c3] : memref<9xf32, #tpu.memory_space<smem>>
    %25 = vector.broadcast %24 : f32 to vector<8x16x128xf32>
    %26 = arith.mulf %25, %23 : vector<8x16x128xf32>
    %27 = arith.addf %22, %26 : vector<8x16x128xf32>
    %c1_25 = arith.constant 1 : index
    %c1_26 = arith.constant 1 : index
    %c0_27 = arith.constant 0 : index
    %28 = vector.load %arg7[%c1_25, %c1_26, %c0_27] : memref<18x18x128xf32, #tpu.memory_space<vmem>>, vector<8x16x128xf32>
    %c4 = arith.constant 4 : index
    %29 = memref.load %arg1[%c4] : memref<9xf32, #tpu.memory_space<smem>>
    %30 = vector.broadcast %29 : f32 to vector<8x16x128xf32>
    %31 = arith.mulf %30, %28 : vector<8x16x128xf32>
    %32 = arith.addf %27, %31 : vector<8x16x128xf32>
    %c1_28 = arith.constant 1 : index
    %c2_29 = arith.constant 2 : index
    %c0_30 = arith.constant 0 : index
    %33 = vector.load %arg7[%c1_28, %c2_29, %c0_30] : memref<18x18x128xf32, #tpu.memory_space<vmem>>, vector<8x16x128xf32>
    %c5 = arith.constant 5 : index
    %34 = memref.load %arg1[%c5] : memref<9xf32, #tpu.memory_space<smem>>
    %35 = vector.broadcast %34 : f32 to vector<8x16x128xf32>
    %36 = arith.mulf %35, %33 : vector<8x16x128xf32>
    %37 = arith.addf %32, %36 : vector<8x16x128xf32>
    %c2_31 = arith.constant 2 : index
    %c0_32 = arith.constant 0 : index
    %c0_33 = arith.constant 0 : index
    %38 = vector.load %arg7[%c2_31, %c0_32, %c0_33] : memref<18x18x128xf32, #tpu.memory_space<vmem>>, vector<8x16x128xf32>
    %c6 = arith.constant 6 : index
    %39 = memref.load %arg1[%c6] : memref<9xf32, #tpu.memory_space<smem>>
    %40 = vector.broadcast %39 : f32 to vector<8x16x128xf32>
    %41 = arith.mulf %40, %38 : vector<8x16x128xf32>
    %42 = arith.addf %37, %41 : vector<8x16x128xf32>
    %c2_34 = arith.constant 2 : index
    %c1_35 = arith.constant 1 : index
    %c0_36 = arith.constant 0 : index
    %43 = vector.load %arg7[%c2_34, %c1_35, %c0_36] : memref<18x18x128xf32, #tpu.memory_space<vmem>>, vector<8x16x128xf32>
    %c7 = arith.constant 7 : index
    %44 = memref.load %arg1[%c7] : memref<9xf32, #tpu.memory_space<smem>>
    %45 = vector.broadcast %44 : f32 to vector<8x16x128xf32>
    %46 = arith.mulf %45, %43 : vector<8x16x128xf32>
    %47 = arith.addf %42, %46 : vector<8x16x128xf32>
    %c2_37 = arith.constant 2 : index
    %c2_38 = arith.constant 2 : index
    %c0_39 = arith.constant 0 : index
    %48 = vector.load %arg7[%c2_37, %c2_38, %c0_39] : memref<18x18x128xf32, #tpu.memory_space<vmem>>, vector<8x16x128xf32>
    %c8 = arith.constant 8 : index
    %49 = memref.load %arg1[%c8] : memref<9xf32, #tpu.memory_space<smem>>
    %50 = vector.broadcast %49 : f32 to vector<8x16x128xf32>
    %51 = arith.mulf %50, %48 : vector<8x16x128xf32>
    %52 = arith.addf %47, %51 : vector<8x16x128xf32>
    %c0_40 = arith.constant 0 : index
    %c0_41 = arith.constant 0 : index
    %c0_42 = arith.constant 0 : index
    %53 = vector.load %arg8[%c0_40, %c0_41, %c0_42] : memref<16x16x128xf32, #tpu.memory_space<vmem>>, vector<8x16x128xf32>
    %cst_43 = arith.constant 2.000000e+00 : f32
    %54 = vector.broadcast %cst_43 : f32 to vector<8x16x128xf32>
    %55 = arith.cmpf ogt, %53, %54 : vector<8x16x128xf32>
    %56 = arith.extui %55 : vector<8x16x128xi1> to vector<8x16x128xi32>
    %57 = arith.sitofp %56 : vector<8x16x128xi32> to vector<8x16x128xf32>
    %cst_44 = arith.constant 8.000000e-01 : f32
    %58 = vector.broadcast %cst_44 : f32 to vector<8x16x128xf32>
    %59 = arith.mulf %58, %53 : vector<8x16x128xf32>
    %60 = arith.addf %59, %52 : vector<8x16x128xf32>
    %cst_45 = arith.constant 2.000000e+00 : f32
    %61 = vector.broadcast %cst_45 : f32 to vector<8x16x128xf32>
    %62 = arith.mulf %57, %61 : vector<8x16x128xf32>
    %63 = arith.subf %60, %62 : vector<8x16x128xf32>
    %cst_46 = arith.constant 2.000000e+00 : f32
    %64 = vector.broadcast %cst_46 : f32 to vector<8x16x128xf32>
    %65 = arith.cmpf ogt, %63, %64 : vector<8x16x128xf32>
    %66 = arith.extui %65 : vector<8x16x128xi1> to vector<8x16x128xi32>
    %67 = arith.sitofp %66 : vector<8x16x128xi32> to vector<8x16x128xf32>
    %c0_47 = arith.constant 0 : index
    %c0_48 = arith.constant 0 : index
    %c0_49 = arith.constant 0 : index
    %68 = vector.load %arg13[%c0_47, %c0_48, %c0_49] : memref<16x16x128xf32, #tpu.memory_space<vmem>>, vector<8x16x128xf32>
    tpu.vector_store %arg13[%c0_47, %c0_48, %c0_49], %63 {strides = array<i32>} : memref<16x16x128xf32, #tpu.memory_space<vmem>>, vector<8x16x128xf32>,
    %c1_50 = arith.constant 1 : index
    %c1_51 = arith.constant 1 : index
    %c0_52 = arith.constant 0 : index
    %69 = vector.load %arg16[%c1_50, %c1_51, %c0_52] : memref<18x18x128xf32, #tpu.memory_space<vmem>>, vector<8x16x128xf32>
    tpu.vector_store %arg16[%c1_50, %c1_51, %c0_52], %67 {strides = array<i32>} : memref<18x18x128xf32, #tpu.memory_space<vmem>>, vector<8x16x128xf32>,
    %c0_53 = arith.constant 0 : index
    %70 = memref.load %arg2[%c0_53] : memref<1xf32, #tpu.memory_space<smem>>
    %71 = vector.broadcast %70 : f32 to vector<8x16x128xf32>
    %c8_54 = arith.constant 8 : index
    %c0_55 = arith.constant 0 : index
    %c0_56 = arith.constant 0 : index
    %72 = vector.load %arg7[%c8_54, %c0_55, %c0_56] : memref<18x18x128xf32, #tpu.memory_space<vmem>>, vector<8x16x128xf32>
    %c0_57 = arith.constant 0 : index
    %73 = memref.load %arg1[%c0_57] : memref<9xf32, #tpu.memory_space<smem>>
    %74 = vector.broadcast %73 : f32 to vector<8x16x128xf32>
    %75 = arith.mulf %74, %72 : vector<8x16x128xf32>
    %76 = arith.addf %71, %75 : vector<8x16x128xf32>
    %c8_58 = arith.constant 8 : index
    %c1_59 = arith.constant 1 : index
    %c0_60 = arith.constant 0 : index
    %77 = vector.load %arg7[%c8_58, %c1_59, %c0_60] : memref<18x18x128xf32, #tpu.memory_space<vmem>>, vector<8x16x128xf32>
    %c1_61 = arith.constant 1 : index
    %78 = memref.load %arg1[%c1_61] : memref<9xf32, #tpu.memory_space<smem>>
    %79 = vector.broadcast %78 : f32 to vector<8x16x128xf32>
    %80 = arith.mulf %79, %77 : vector<8x16x128xf32>
    %81 = arith.addf %76, %80 : vector<8x16x128xf32>
    %c8_62 = arith.constant 8 : index
    %c2_63 = arith.constant 2 : index
    %c0_64 = arith.constant 0 : index
    %82 = vector.load %arg7[%c8_62, %c2_63, %c0_64] : memref<18x18x128xf32, #tpu.memory_space<vmem>>, vector<8x16x128xf32>
    %c2_65 = arith.constant 2 : index
    %83 = memref.load %arg1[%c2_65] : memref<9xf32, #tpu.memory_space<smem>>
    %84 = vector.broadcast %83 : f32 to vector<8x16x128xf32>
    %85 = arith.mulf %84, %82 : vector<8x16x128xf32>
    %86 = arith.addf %81, %85 : vector<8x16x128xf32>
    %c9 = arith.constant 9 : index
    %c0_66 = arith.constant 0 : index
    %c0_67 = arith.constant 0 : index
    %87 = vector.load %arg7[%c9, %c0_66, %c0_67] : memref<18x18x128xf32, #tpu.memory_space<vmem>>, vector<8x16x128xf32>
    %c3_68 = arith.constant 3 : index
    %88 = memref.load %arg1[%c3_68] : memref<9xf32, #tpu.memory_space<smem>>
    %89 = vector.broadcast %88 : f32 to vector<8x16x128xf32>
    %90 = arith.mulf %89, %87 : vector<8x16x128xf32>
    %91 = arith.addf %86, %90 : vector<8x16x128xf32>
    %c9_69 = arith.constant 9 : index
    %c1_70 = arith.constant 1 : index
    %c0_71 = arith.constant 0 : index
    %92 = vector.load %arg7[%c9_69, %c1_70, %c0_71] : memref<18x18x128xf32, #tpu.memory_space<vmem>>, vector<8x16x128xf32>
    %c4_72 = arith.constant 4 : index
    %93 = memref.load %arg1[%c4_72] : memref<9xf32, #tpu.memory_space<smem>>
    %94 = vector.broadcast %93 : f32 to vector<8x16x128xf32>
    %95 = arith.mulf %94, %92 : vector<8x16x128xf32>
    %96 = arith.addf %91, %95 : vector<8x16x128xf32>
    %c9_73 = arith.constant 9 : index
    %c2_74 = arith.constant 2 : index
    %c0_75 = arith.constant 0 : index
    %97 = vector.load %arg7[%c9_73, %c2_74, %c0_75] : memref<18x18x128xf32, #tpu.memory_space<vmem>>, vector<8x16x128xf32>
    %c5_76 = arith.constant 5 : index
    %98 = memref.load %arg1[%c5_76] : memref<9xf32, #tpu.memory_space<smem>>
    %99 = vector.broadcast %98 : f32 to vector<8x16x128xf32>
    %100 = arith.mulf %99, %97 : vector<8x16x128xf32>
    %101 = arith.addf %96, %100 : vector<8x16x128xf32>
    %c10 = arith.constant 10 : index
    %c0_77 = arith.constant 0 : index
    %c0_78 = arith.constant 0 : index
    %102 = vector.load %arg7[%c10, %c0_77, %c0_78] : memref<18x18x128xf32, #tpu.memory_space<vmem>>, vector<8x16x128xf32>
    %c6_79 = arith.constant 6 : index
    %103 = memref.load %arg1[%c6_79] : memref<9xf32, #tpu.memory_space<smem>>
    %104 = vector.broadcast %103 : f32 to vector<8x16x128xf32>
    %105 = arith.mulf %104, %102 : vector<8x16x128xf32>
    %106 = arith.addf %101, %105 : vector<8x16x128xf32>
    %c10_80 = arith.constant 10 : index
    %c1_81 = arith.constant 1 : index
    %c0_82 = arith.constant 0 : index
    %107 = vector.load %arg7[%c10_80, %c1_81, %c0_82] : memref<18x18x128xf32, #tpu.memory_space<vmem>>, vector<8x16x128xf32>
    %c7_83 = arith.constant 7 : index
    %108 = memref.load %arg1[%c7_83] : memref<9xf32, #tpu.memory_space<smem>>
    %109 = vector.broadcast %108 : f32 to vector<8x16x128xf32>
    %110 = arith.mulf %109, %107 : vector<8x16x128xf32>
    %111 = arith.addf %106, %110 : vector<8x16x128xf32>
    %c10_84 = arith.constant 10 : index
    %c2_85 = arith.constant 2 : index
    %c0_86 = arith.constant 0 : index
    %112 = vector.load %arg7[%c10_84, %c2_85, %c0_86] : memref<18x18x128xf32, #tpu.memory_space<vmem>>, vector<8x16x128xf32>
    %c8_87 = arith.constant 8 : index
    %113 = memref.load %arg1[%c8_87] : memref<9xf32, #tpu.memory_space<smem>>
    %114 = vector.broadcast %113 : f32 to vector<8x16x128xf32>
    %115 = arith.mulf %114, %112 : vector<8x16x128xf32>
    %116 = arith.addf %111, %115 : vector<8x16x128xf32>
    %c8_88 = arith.constant 8 : index
    %c0_89 = arith.constant 0 : index
    %c0_90 = arith.constant 0 : index
    %117 = vector.load %arg8[%c8_88, %c0_89, %c0_90] : memref<16x16x128xf32, #tpu.memory_space<vmem>>, vector<8x16x128xf32>
    %cst_91 = arith.constant 2.000000e+00 : f32
    %118 = vector.broadcast %cst_91 : f32 to vector<8x16x128xf32>
    %119 = arith.cmpf ogt, %117, %118 : vector<8x16x128xf32>
    %120 = arith.extui %119 : vector<8x16x128xi1> to vector<8x16x128xi32>
    %121 = arith.sitofp %120 : vector<8x16x128xi32> to vector<8x16x128xf32>
    %cst_92 = arith.constant 8.000000e-01 : f32
    %122 = vector.broadcast %cst_92 : f32 to vector<8x16x128xf32>
    %123 = arith.mulf %122, %117 : vector<8x16x128xf32>
    %124 = arith.addf %123, %116 : vector<8x16x128xf32>
    %cst_93 = arith.constant 2.000000e+00 : f32
    %125 = vector.broadcast %cst_93 : f32 to vector<8x16x128xf32>
    %126 = arith.mulf %121, %125 : vector<8x16x128xf32>
    %127 = arith.subf %124, %126 : vector<8x16x128xf32>
    %cst_94 = arith.constant 2.000000e+00 : f32
    %128 = vector.broadcast %cst_94 : f32 to vector<8x16x128xf32>
    %129 = arith.cmpf ogt, %127, %128 : vector<8x16x128xf32>
    %130 = arith.extui %129 : vector<8x16x128xi1> to vector<8x16x128xi32>
    %131 = arith.sitofp %130 : vector<8x16x128xi32> to vector<8x16x128xf32>
    %c8_95 = arith.constant 8 : index
    %c0_96 = arith.constant 0 : index
    %c0_97 = arith.constant 0 : index
    %132 = vector.load %arg13[%c8_95, %c0_96, %c0_97] : memref<16x16x128xf32, #tpu.memory_space<vmem>>, vector<8x16x128xf32>
    tpu.vector_store %arg13[%c8_95, %c0_96, %c0_97], %127 {strides = array<i32>} : memref<16x16x128xf32, #tpu.memory_space<vmem>>, vector<8x16x128xf32>,
    %c9_98 = arith.constant 9 : index
    %c1_99 = arith.constant 1 : index
    %c0_100 = arith.constant 0 : index
    %133 = vector.load %arg16[%c9_98, %c1_99, %c0_100] : memref<18x18x128xf32, #tpu.memory_space<vmem>>, vector<8x16x128xf32>
    tpu.vector_store %arg16[%c9_98, %c1_99, %c0_100], %131 {strides = array<i32>} : memref<18x18x128xf32, #tpu.memory_space<vmem>>, vector<8x16x128xf32>,
    %c0_101 = arith.constant 0 : index
    %134 = memref.load %arg4[%c0_101] : memref<1xf32, #tpu.memory_space<smem>>
    %135 = vector.broadcast %134 : f32 to vector<8x16x128xf32>
    %c0_102 = arith.constant 0 : index
    %c0_103 = arith.constant 0 : index
    %c0_104 = arith.constant 0 : index
    %136 = vector.load %arg16[%c0_102, %c0_103, %c0_104] : memref<18x18x128xf32, #tpu.memory_space<vmem>>, vector<8x16x128xf32>
    %c0_105 = arith.constant 0 : index
    %137 = memref.load %arg3[%c0_105] : memref<9xf32, #tpu.memory_space<smem>>
    %138 = vector.broadcast %137 : f32 to vector<8x16x128xf32>
    %139 = arith.mulf %138, %136 : vector<8x16x128xf32>
    %140 = arith.addf %135, %139 : vector<8x16x128xf32>
    %c0_106 = arith.constant 0 : index
    %c1_107 = arith.constant 1 : index
    %c0_108 = arith.constant 0 : index
    %141 = vector.load %arg16[%c0_106, %c1_107, %c0_108] : memref<18x18x128xf32, #tpu.memory_space<vmem>>, vector<8x16x128xf32>
    %c1_109 = arith.constant 1 : index
    %142 = memref.load %arg3[%c1_109] : memref<9xf32, #tpu.memory_space<smem>>
    %143 = vector.broadcast %142 : f32 to vector<8x16x128xf32>
    %144 = arith.mulf %143, %141 : vector<8x16x128xf32>
    %145 = arith.addf %140, %144 : vector<8x16x128xf32>
    %c0_110 = arith.constant 0 : index
    %c2_111 = arith.constant 2 : index
    %c0_112 = arith.constant 0 : index
    %146 = vector.load %arg16[%c0_110, %c2_111, %c0_112] : memref<18x18x128xf32, #tpu.memory_space<vmem>>, vector<8x16x128xf32>
    %c2_113 = arith.constant 2 : index
    %147 = memref.load %arg3[%c2_113] : memref<9xf32, #tpu.memory_space<smem>>
    %148 = vector.broadcast %147 : f32 to vector<8x16x128xf32>
    %149 = arith.mulf %148, %146 : vector<8x16x128xf32>
    %150 = arith.addf %145, %149 : vector<8x16x128xf32>
    %c1_114 = arith.constant 1 : index
    %c0_115 = arith.constant 0 : index
    %c0_116 = arith.constant 0 : index
    %151 = vector.load %arg16[%c1_114, %c0_115, %c0_116] : memref<18x18x128xf32, #tpu.memory_space<vmem>>, vector<8x16x128xf32>
    %c3_117 = arith.constant 3 : index
    %152 = memref.load %arg3[%c3_117] : memref<9xf32, #tpu.memory_space<smem>>
    %153 = vector.broadcast %152 : f32 to vector<8x16x128xf32>
    %154 = arith.mulf %153, %151 : vector<8x16x128xf32>
    %155 = arith.addf %150, %154 : vector<8x16x128xf32>
    %c1_118 = arith.constant 1 : index
    %c1_119 = arith.constant 1 : index
    %c0_120 = arith.constant 0 : index
    %156 = vector.load %arg16[%c1_118, %c1_119, %c0_120] : memref<18x18x128xf32, #tpu.memory_space<vmem>>, vector<8x16x128xf32>
    %c4_121 = arith.constant 4 : index
    %157 = memref.load %arg3[%c4_121] : memref<9xf32, #tpu.memory_space<smem>>
    %158 = vector.broadcast %157 : f32 to vector<8x16x128xf32>
    %159 = arith.mulf %158, %156 : vector<8x16x128xf32>
    %160 = arith.addf %155, %159 : vector<8x16x128xf32>
    %c1_122 = arith.constant 1 : index
    %c2_123 = arith.constant 2 : index
    %c0_124 = arith.constant 0 : index
    %161 = vector.load %arg16[%c1_122, %c2_123, %c0_124] : memref<18x18x128xf32, #tpu.memory_space<vmem>>, vector<8x16x128xf32>
    %c5_125 = arith.constant 5 : index
    %162 = memref.load %arg3[%c5_125] : memref<9xf32, #tpu.memory_space<smem>>
    %163 = vector.broadcast %162 : f32 to vector<8x16x128xf32>
    %164 = arith.mulf %163, %161 : vector<8x16x128xf32>
    %165 = arith.addf %160, %164 : vector<8x16x128xf32>
    %c2_126 = arith.constant 2 : index
    %c0_127 = arith.constant 0 : index
    %c0_128 = arith.constant 0 : index
    %166 = vector.load %arg16[%c2_126, %c0_127, %c0_128] : memref<18x18x128xf32, #tpu.memory_space<vmem>>, vector<8x16x128xf32>
    %c6_129 = arith.constant 6 : index
    %167 = memref.load %arg3[%c6_129] : memref<9xf32, #tpu.memory_space<smem>>
    %168 = vector.broadcast %167 : f32 to vector<8x16x128xf32>
    %169 = arith.mulf %168, %166 : vector<8x16x128xf32>
    %170 = arith.addf %165, %169 : vector<8x16x128xf32>
    %c2_130 = arith.constant 2 : index
    %c1_131 = arith.constant 1 : index
    %c0_132 = arith.constant 0 : index
    %171 = vector.load %arg16[%c2_130, %c1_131, %c0_132] : memref<18x18x128xf32, #tpu.memory_space<vmem>>, vector<8x16x128xf32>
    %c7_133 = arith.constant 7 : index
    %172 = memref.load %arg3[%c7_133] : memref<9xf32, #tpu.memory_space<smem>>
    %173 = vector.broadcast %172 : f32 to vector<8x16x128xf32>
    %174 = arith.mulf %173, %171 : vector<8x16x128xf32>
    %175 = arith.addf %170, %174 : vector<8x16x128xf32>
    %c2_134 = arith.constant 2 : index
    %c2_135 = arith.constant 2 : index
    %c0_136 = arith.constant 0 : index
    %176 = vector.load %arg16[%c2_134, %c2_135, %c0_136] : memref<18x18x128xf32, #tpu.memory_space<vmem>>, vector<8x16x128xf32>
    %c8_137 = arith.constant 8 : index
    %177 = memref.load %arg3[%c8_137] : memref<9xf32, #tpu.memory_space<smem>>
    %178 = vector.broadcast %177 : f32 to vector<8x16x128xf32>
    %179 = arith.mulf %178, %176 : vector<8x16x128xf32>
    %180 = arith.addf %175, %179 : vector<8x16x128xf32>
    %c0_138 = arith.constant 0 : index
    %c0_139 = arith.constant 0 : index
    %c0_140 = arith.constant 0 : index
    %181 = vector.load %arg9[%c0_138, %c0_139, %c0_140] : memref<16x16x128xf32, #tpu.memory_space<vmem>>, vector<8x16x128xf32>
    %cst_141 = arith.constant 6.000000e+00 : f32
    %182 = vector.broadcast %cst_141 : f32 to vector<8x16x128xf32>
    %183 = arith.cmpf ogt, %181, %182 : vector<8x16x128xf32>
    %184 = arith.extui %183 : vector<8x16x128xi1> to vector<8x16x128xi32>
    %185 = arith.sitofp %184 : vector<8x16x128xi32> to vector<8x16x128xf32>
    %cst_142 = arith.constant 8.000000e-01 : f32
    %186 = vector.broadcast %cst_142 : f32 to vector<8x16x128xf32>
    %187 = arith.mulf %186, %181 : vector<8x16x128xf32>
    %188 = arith.addf %187, %180 : vector<8x16x128xf32>
    %cst_143 = arith.constant 6.000000e+00 : f32
    %189 = vector.broadcast %cst_143 : f32 to vector<8x16x128xf32>
    %190 = arith.mulf %185, %189 : vector<8x16x128xf32>
    %191 = arith.subf %188, %190 : vector<8x16x128xf32>
    %cst_144 = arith.constant 6.000000e+00 : f32
    %192 = vector.broadcast %cst_144 : f32 to vector<8x16x128xf32>
    %193 = arith.cmpf ogt, %191, %192 : vector<8x16x128xf32>
    %194 = arith.extui %193 : vector<8x16x128xi1> to vector<8x16x128xi32>
    %195 = arith.sitofp %194 : vector<8x16x128xi32> to vector<8x16x128xf32>
    %c0_145 = arith.constant 0 : index
    %c0_146 = arith.constant 0 : index
    %c0_147 = arith.constant 0 : index
    %196 = vector.load %arg14[%c0_145, %c0_146, %c0_147] : memref<16x16x128xf32, #tpu.memory_space<vmem>>, vector<8x16x128xf32>
    tpu.vector_store %arg14[%c0_145, %c0_146, %c0_147], %191 {strides = array<i32>} : memref<16x16x128xf32, #tpu.memory_space<vmem>>, vector<8x16x128xf32>,
    %c0_148 = arith.constant 0 : index
    %c0_149 = arith.constant 0 : index
    %c0_150 = arith.constant 0 : index
    %197 = vector.load %arg11[%c0_148, %c0_149, %c0_150] : memref<16x16x128xf32, #tpu.memory_space<vmem>>, vector<8x16x128xf32>
    tpu.vector_store %arg11[%c0_148, %c0_149, %c0_150], %195 {strides = array<i32>} : memref<16x16x128xf32, #tpu.memory_space<vmem>>, vector<8x16x128xf32>,
    %c0_151 = arith.constant 0 : index
    %198 = memref.load %arg4[%c0_151] : memref<1xf32, #tpu.memory_space<smem>>
    %199 = vector.broadcast %198 : f32 to vector<8x16x128xf32>
    %c8_152 = arith.constant 8 : index
    %c0_153 = arith.constant 0 : index
    %c0_154 = arith.constant 0 : index
    %200 = vector.load %arg16[%c8_152, %c0_153, %c0_154] : memref<18x18x128xf32, #tpu.memory_space<vmem>>, vector<8x16x128xf32>
    %c0_155 = arith.constant 0 : index
    %201 = memref.load %arg3[%c0_155] : memref<9xf32, #tpu.memory_space<smem>>
    %202 = vector.broadcast %201 : f32 to vector<8x16x128xf32>
    %203 = arith.mulf %202, %200 : vector<8x16x128xf32>
    %204 = arith.addf %199, %203 : vector<8x16x128xf32>
    %c8_156 = arith.constant 8 : index
    %c1_157 = arith.constant 1 : index
    %c0_158 = arith.constant 0 : index
    %205 = vector.load %arg16[%c8_156, %c1_157, %c0_158] : memref<18x18x128xf32, #tpu.memory_space<vmem>>, vector<8x16x128xf32>
    %c1_159 = arith.constant 1 : index
    %206 = memref.load %arg3[%c1_159] : memref<9xf32, #tpu.memory_space<smem>>
    %207 = vector.broadcast %206 : f32 to vector<8x16x128xf32>
    %208 = arith.mulf %207, %205 : vector<8x16x128xf32>
    %209 = arith.addf %204, %208 : vector<8x16x128xf32>
    %c8_160 = arith.constant 8 : index
    %c2_161 = arith.constant 2 : index
    %c0_162 = arith.constant 0 : index
    %210 = vector.load %arg16[%c8_160, %c2_161, %c0_162] : memref<18x18x128xf32, #tpu.memory_space<vmem>>, vector<8x16x128xf32>
    %c2_163 = arith.constant 2 : index
    %211 = memref.load %arg3[%c2_163] : memref<9xf32, #tpu.memory_space<smem>>
    %212 = vector.broadcast %211 : f32 to vector<8x16x128xf32>
    %213 = arith.mulf %212, %210 : vector<8x16x128xf32>
    %214 = arith.addf %209, %213 : vector<8x16x128xf32>
    %c9_164 = arith.constant 9 : index
    %c0_165 = arith.constant 0 : index
    %c0_166 = arith.constant 0 : index
    %215 = vector.load %arg16[%c9_164, %c0_165, %c0_166] : memref<18x18x128xf32, #tpu.memory_space<vmem>>, vector<8x16x128xf32>
    %c3_167 = arith.constant 3 : index
    %216 = memref.load %arg3[%c3_167] : memref<9xf32, #tpu.memory_space<smem>>
    %217 = vector.broadcast %216 : f32 to vector<8x16x128xf32>
    %218 = arith.mulf %217, %215 : vector<8x16x128xf32>
    %219 = arith.addf %214, %218 : vector<8x16x128xf32>
    %c9_168 = arith.constant 9 : index
    %c1_169 = arith.constant 1 : index
    %c0_170 = arith.constant 0 : index
    %220 = vector.load %arg16[%c9_168, %c1_169, %c0_170] : memref<18x18x128xf32, #tpu.memory_space<vmem>>, vector<8x16x128xf32>
    %c4_171 = arith.constant 4 : index
    %221 = memref.load %arg3[%c4_171] : memref<9xf32, #tpu.memory_space<smem>>
    %222 = vector.broadcast %221 : f32 to vector<8x16x128xf32>
    %223 = arith.mulf %222, %220 : vector<8x16x128xf32>
    %224 = arith.addf %219, %223 : vector<8x16x128xf32>
    %c9_172 = arith.constant 9 : index
    %c2_173 = arith.constant 2 : index
    %c0_174 = arith.constant 0 : index
    %225 = vector.load %arg16[%c9_172, %c2_173, %c0_174] : memref<18x18x128xf32, #tpu.memory_space<vmem>>, vector<8x16x128xf32>
    %c5_175 = arith.constant 5 : index
    %226 = memref.load %arg3[%c5_175] : memref<9xf32, #tpu.memory_space<smem>>
    %227 = vector.broadcast %226 : f32 to vector<8x16x128xf32>
    %228 = arith.mulf %227, %225 : vector<8x16x128xf32>
    %229 = arith.addf %224, %228 : vector<8x16x128xf32>
    %c10_176 = arith.constant 10 : index
    %c0_177 = arith.constant 0 : index
    %c0_178 = arith.constant 0 : index
    %230 = vector.load %arg16[%c10_176, %c0_177, %c0_178] : memref<18x18x128xf32, #tpu.memory_space<vmem>>, vector<8x16x128xf32>
    %c6_179 = arith.constant 6 : index
    %231 = memref.load %arg3[%c6_179] : memref<9xf32, #tpu.memory_space<smem>>
    %232 = vector.broadcast %231 : f32 to vector<8x16x128xf32>
    %233 = arith.mulf %232, %230 : vector<8x16x128xf32>
    %234 = arith.addf %229, %233 : vector<8x16x128xf32>
    %c10_180 = arith.constant 10 : index
    %c1_181 = arith.constant 1 : index
    %c0_182 = arith.constant 0 : index
    %235 = vector.load %arg16[%c10_180, %c1_181, %c0_182] : memref<18x18x128xf32, #tpu.memory_space<vmem>>, vector<8x16x128xf32>
    %c7_183 = arith.constant 7 : index
    %236 = memref.load %arg3[%c7_183] : memref<9xf32, #tpu.memory_space<smem>>
    %237 = vector.broadcast %236 : f32 to vector<8x16x128xf32>
    %238 = arith.mulf %237, %235 : vector<8x16x128xf32>
    %239 = arith.addf %234, %238 : vector<8x16x128xf32>
    %c10_184 = arith.constant 10 : index
    %c2_185 = arith.constant 2 : index
    %c0_186 = arith.constant 0 : index
    %240 = vector.load %arg16[%c10_184, %c2_185, %c0_186] : memref<18x18x128xf32, #tpu.memory_space<vmem>>, vector<8x16x128xf32>
    %c8_187 = arith.constant 8 : index
    %241 = memref.load %arg3[%c8_187] : memref<9xf32, #tpu.memory_space<smem>>
    %242 = vector.broadcast %241 : f32 to vector<8x16x128xf32>
    %243 = arith.mulf %242, %240 : vector<8x16x128xf32>
    %244 = arith.addf %239, %243 : vector<8x16x128xf32>
    %c8_188 = arith.constant 8 : index
    %c0_189 = arith.constant 0 : index
    %c0_190 = arith.constant 0 : index
    %245 = vector.load %arg9[%c8_188, %c0_189, %c0_190] : memref<16x16x128xf32, #tpu.memory_space<vmem>>, vector<8x16x128xf32>
    %cst_191 = arith.constant 6.000000e+00 : f32
    %246 = vector.broadcast %cst_191 : f32 to vector<8x16x128xf32>
    %247 = arith.cmpf ogt, %245, %246 : vector<8x16x128xf32>
    %248 = arith.extui %247 : vector<8x16x128xi1> to vector<8x16x128xi32>
    %249 = arith.sitofp %248 : vector<8x16x128xi32> to vector<8x16x128xf32>
    %cst_192 = arith.constant 8.000000e-01 : f32
    %250 = vector.broadcast %cst_192 : f32 to vector<8x16x128xf32>
    %251 = arith.mulf %250, %245 : vector<8x16x128xf32>
    %252 = arith.addf %251, %244 : vector<8x16x128xf32>
    %cst_193 = arith.constant 6.000000e+00 : f32
    %253 = vector.broadcast %cst_193 : f32 to vector<8x16x128xf32>
    %254 = arith.mulf %249, %253 : vector<8x16x128xf32>
    %255 = arith.subf %252, %254 : vector<8x16x128xf32>
    %cst_194 = arith.constant 6.000000e+00 : f32
    %256 = vector.broadcast %cst_194 : f32 to vector<8x16x128xf32>
    %257 = arith.cmpf ogt, %255, %256 : vector<8x16x128xf32>
    %258 = arith.extui %257 : vector<8x16x128xi1> to vector<8x16x128xi32>
    %259 = arith.sitofp %258 : vector<8x16x128xi32> to vector<8x16x128xf32>
    %c8_195 = arith.constant 8 : index
    %c0_196 = arith.constant 0 : index
    %c0_197 = arith.constant 0 : index
    %260 = vector.load %arg14[%c8_195, %c0_196, %c0_197] : memref<16x16x128xf32, #tpu.memory_space<vmem>>, vector<8x16x128xf32>
    tpu.vector_store %arg14[%c8_195, %c0_196, %c0_197], %255 {strides = array<i32>} : memref<16x16x128xf32, #tpu.memory_space<vmem>>, vector<8x16x128xf32>,
    %c8_198 = arith.constant 8 : index
    %c0_199 = arith.constant 0 : index
    %c0_200 = arith.constant 0 : index
    %261 = vector.load %arg11[%c8_198, %c0_199, %c0_200] : memref<16x16x128xf32, #tpu.memory_space<vmem>>, vector<8x16x128xf32>
    tpu.vector_store %arg11[%c8_198, %c0_199, %c0_200], %259 {strides = array<i32>} : memref<16x16x128xf32, #tpu.memory_space<vmem>>, vector<8x16x128xf32>,
    %c0_201 = arith.constant 0 : index
    %262 = memref.load %arg6[%c0_201] : memref<1xf32, #tpu.memory_space<smem>>
    %263 = vector.broadcast %262 : f32 to vector<7x7x128xf32>
    %cst_202 = arith.constant 0.000000e+00 : f32
    %264 = vector.broadcast %cst_202 : f32 to vector<7x7x128xf32>
    %c0_203 = arith.constant 0 : index
    %c0_204 = arith.constant 0 : index
    %c0_205 = arith.constant 0 : index
    %265 = vector.load %arg11[%c0_203, %c0_204, %c0_205] : memref<16x16x128xf32, #tpu.memory_space<vmem>>, vector<7x7x128xf32>
    %c0_206 = arith.constant 0 : index
    %266 = memref.load %arg5[%c0_206] : memref<100xf32, #tpu.memory_space<smem>>
    %267 = vector.broadcast %266 : f32 to vector<7x7x128xf32>
    %268 = arith.mulf %267, %265 : vector<7x7x128xf32>
    %269 = arith.addf %263, %268 : vector<7x7x128xf32>
    %c0_207 = arith.constant 0 : index
    %c1_208 = arith.constant 1 : index
    %c0_209 = arith.constant 0 : index
    %270 = vector.load %arg11[%c0_207, %c1_208, %c0_209] : memref<16x16x128xf32, #tpu.memory_space<vmem>>, vector<7x7x128xf32>
    %c1_210 = arith.constant 1 : index
    %271 = memref.load %arg5[%c1_210] : memref<100xf32, #tpu.memory_space<smem>>
    %272 = vector.broadcast %271 : f32 to vector<7x7x128xf32>
    %273 = arith.mulf %272, %270 : vector<7x7x128xf32>
    %274 = arith.addf %264, %273 : vector<7x7x128xf32>
    %c0_211 = arith.constant 0 : index
    %c2_212 = arith.constant 2 : index
    %c0_213 = arith.constant 0 : index
    %275 = vector.load %arg11[%c0_211, %c2_212, %c0_213] : memref<16x16x128xf32, #tpu.memory_space<vmem>>, vector<7x7x128xf32>
    %c2_214 = arith.constant 2 : index
    %276 = memref.load %arg5[%c2_214] : memref<100xf32, #tpu.memory_space<smem>>
    %277 = vector.broadcast %276 : f32 to vector<7x7x128xf32>
    %278 = arith.mulf %277, %275 : vector<7x7x128xf32>
    %279 = arith.addf %269, %278 : vector<7x7x128xf32>
    %c0_215 = arith.constant 0 : index
    %c3_216 = arith.constant 3 : index
    %c0_217 = arith.constant 0 : index
    %280 = vector.load %arg11[%c0_215, %c3_216, %c0_217] : memref<16x16x128xf32, #tpu.memory_space<vmem>>, vector<7x7x128xf32>
    %c3_218 = arith.constant 3 : index
    %281 = memref.load %arg5[%c3_218] : memref<100xf32, #tpu.memory_space<smem>>
    %282 = vector.broadcast %281 : f32 to vector<7x7x128xf32>
    %283 = arith.mulf %282, %280 : vector<7x7x128xf32>
    %284 = arith.addf %274, %283 : vector<7x7x128xf32>
    %c0_219 = arith.constant 0 : index
    %c4_220 = arith.constant 4 : index
    %c0_221 = arith.constant 0 : index
    %285 = vector.load %arg11[%c0_219, %c4_220, %c0_221] : memref<16x16x128xf32, #tpu.memory_space<vmem>>, vector<7x7x128xf32>
    %c4_222 = arith.constant 4 : index
    %286 = memref.load %arg5[%c4_222] : memref<100xf32, #tpu.memory_space<smem>>
    %287 = vector.broadcast %286 : f32 to vector<7x7x128xf32>
    %288 = arith.mulf %287, %285 : vector<7x7x128xf32>
    %289 = arith.addf %279, %288 : vector<7x7x128xf32>
    %c0_223 = arith.constant 0 : index
    %c5_224 = arith.constant 5 : index
    %c0_225 = arith.constant 0 : index
    %290 = vector.load %arg11[%c0_223, %c5_224, %c0_225] : memref<16x16x128xf32, #tpu.memory_space<vmem>>, vector<7x7x128xf32>
    %c5_226 = arith.constant 5 : index
    %291 = memref.load %arg5[%c5_226] : memref<100xf32, #tpu.memory_space<smem>>
    %292 = vector.broadcast %291 : f32 to vector<7x7x128xf32>
    %293 = arith.mulf %292, %290 : vector<7x7x128xf32>
    %294 = arith.addf %284, %293 : vector<7x7x128xf32>
    %c0_227 = arith.constant 0 : index
    %c6_228 = arith.constant 6 : index
    %c0_229 = arith.constant 0 : index
    %295 = vector.load %arg11[%c0_227, %c6_228, %c0_229] : memref<16x16x128xf32, #tpu.memory_space<vmem>>, vector<7x7x128xf32>
    %c6_230 = arith.constant 6 : index
    %296 = memref.load %arg5[%c6_230] : memref<100xf32, #tpu.memory_space<smem>>
    %297 = vector.broadcast %296 : f32 to vector<7x7x128xf32>
    %298 = arith.mulf %297, %295 : vector<7x7x128xf32>
    %299 = arith.addf %289, %298 : vector<7x7x128xf32>
    %c0_231 = arith.constant 0 : index
    %c7_232 = arith.constant 7 : index
    %c0_233 = arith.constant 0 : index
    %300 = vector.load %arg11[%c0_231, %c7_232, %c0_233] : memref<16x16x128xf32, #tpu.memory_space<vmem>>, vector<7x7x128xf32>
    %c7_234 = arith.constant 7 : index
    %301 = memref.load %arg5[%c7_234] : memref<100xf32, #tpu.memory_space<smem>>
    %302 = vector.broadcast %301 : f32 to vector<7x7x128xf32>
    %303 = arith.mulf %302, %300 : vector<7x7x128xf32>
    %304 = arith.addf %294, %303 : vector<7x7x128xf32>
    %c0_235 = arith.constant 0 : index
    %c8_236 = arith.constant 8 : index
    %c0_237 = arith.constant 0 : index
    %305 = vector.load %arg11[%c0_235, %c8_236, %c0_237] : memref<16x16x128xf32, #tpu.memory_space<vmem>>, vector<7x7x128xf32>
    %c8_238 = arith.constant 8 : index
    %306 = memref.load %arg5[%c8_238] : memref<100xf32, #tpu.memory_space<smem>>
    %307 = vector.broadcast %306 : f32 to vector<7x7x128xf32>
    %308 = arith.mulf %307, %305 : vector<7x7x128xf32>
    %309 = arith.addf %299, %308 : vector<7x7x128xf32>
    %c0_239 = arith.constant 0 : index
    %c9_240 = arith.constant 9 : index
    %c0_241 = arith.constant 0 : index
    %310 = vector.load %arg11[%c0_239, %c9_240, %c0_241] : memref<16x16x128xf32, #tpu.memory_space<vmem>>, vector<7x7x128xf32>
    %c9_242 = arith.constant 9 : index
    %311 = memref.load %arg5[%c9_242] : memref<100xf32, #tpu.memory_space<smem>>
    %312 = vector.broadcast %311 : f32 to vector<7x7x128xf32>
    %313 = arith.mulf %312, %310 : vector<7x7x128xf32>
    %314 = arith.addf %304, %313 : vector<7x7x128xf32>
    %c1_243 = arith.constant 1 : index
    %c0_244 = arith.constant 0 : index
    %c0_245 = arith.constant 0 : index
    %315 = vector.load %arg11[%c1_243, %c0_244, %c0_245] : memref<16x16x128xf32, #tpu.memory_space<vmem>>, vector<7x7x128xf32>
    %c10_246 = arith.constant 10 : index
    %316 = memref.load %arg5[%c10_246] : memref<100xf32, #tpu.memory_space<smem>>
    %317 = vector.broadcast %316 : f32 to vector<7x7x128xf32>
    %318 = arith.mulf %317, %315 : vector<7x7x128xf32>
    %319 = arith.addf %309, %318 : vector<7x7x128xf32>
    %c1_247 = arith.constant 1 : index
    %c1_248 = arith.constant 1 : index
    %c0_249 = arith.constant 0 : index
    %320 = vector.load %arg11[%c1_247, %c1_248, %c0_249] : memref<16x16x128xf32, #tpu.memory_space<vmem>>, vector<7x7x128xf32>
    %c11 = arith.constant 11 : index
    %321 = memref.load %arg5[%c11] : memref<100xf32, #tpu.memory_space<smem>>
    %322 = vector.broadcast %321 : f32 to vector<7x7x128xf32>
    %323 = arith.mulf %322, %320 : vector<7x7x128xf32>
    %324 = arith.addf %314, %323 : vector<7x7x128xf32>
    %c1_250 = arith.constant 1 : index
    %c2_251 = arith.constant 2 : index
    %c0_252 = arith.constant 0 : index
    %325 = vector.load %arg11[%c1_250, %c2_251, %c0_252] : memref<16x16x128xf32, #tpu.memory_space<vmem>>, vector<7x7x128xf32>
    %c12 = arith.constant 12 : index
    %326 = memref.load %arg5[%c12] : memref<100xf32, #tpu.memory_space<smem>>
    %327 = vector.broadcast %326 : f32 to vector<7x7x128xf32>
    %328 = arith.mulf %327, %325 : vector<7x7x128xf32>
    %329 = arith.addf %319, %328 : vector<7x7x128xf32>
    %c1_253 = arith.constant 1 : index
    %c3_254 = arith.constant 3 : index
    %c0_255 = arith.constant 0 : index
    %330 = vector.load %arg11[%c1_253, %c3_254, %c0_255] : memref<16x16x128xf32, #tpu.memory_space<vmem>>, vector<7x7x128xf32>
    %c13 = arith.constant 13 : index
    %331 = memref.load %arg5[%c13] : memref<100xf32, #tpu.memory_space<smem>>
    %332 = vector.broadcast %331 : f32 to vector<7x7x128xf32>
    %333 = arith.mulf %332, %330 : vector<7x7x128xf32>
    %334 = arith.addf %324, %333 : vector<7x7x128xf32>
    %c1_256 = arith.constant 1 : index
    %c4_257 = arith.constant 4 : index
    %c0_258 = arith.constant 0 : index
    %335 = vector.load %arg11[%c1_256, %c4_257, %c0_258] : memref<16x16x128xf32, #tpu.memory_space<vmem>>, vector<7x7x128xf32>
    %c14 = arith.constant 14 : index
    %336 = memref.load %arg5[%c14] : memref<100xf32, #tpu.memory_space<smem>>
    %337 = vector.broadcast %336 : f32 to vector<7x7x128xf32>
    %338 = arith.mulf %337, %335 : vector<7x7x128xf32>
    %339 = arith.addf %329, %338 : vector<7x7x128xf32>
    %c1_259 = arith.constant 1 : index
    %c5_260 = arith.constant 5 : index
    %c0_261 = arith.constant 0 : index
    %340 = vector.load %arg11[%c1_259, %c5_260, %c0_261] : memref<16x16x128xf32, #tpu.memory_space<vmem>>, vector<7x7x128xf32>
    %c15 = arith.constant 15 : index
    %341 = memref.load %arg5[%c15] : memref<100xf32, #tpu.memory_space<smem>>
    %342 = vector.broadcast %341 : f32 to vector<7x7x128xf32>
    %343 = arith.mulf %342, %340 : vector<7x7x128xf32>
    %344 = arith.addf %334, %343 : vector<7x7x128xf32>
    %c1_262 = arith.constant 1 : index
    %c6_263 = arith.constant 6 : index
    %c0_264 = arith.constant 0 : index
    %345 = vector.load %arg11[%c1_262, %c6_263, %c0_264] : memref<16x16x128xf32, #tpu.memory_space<vmem>>, vector<7x7x128xf32>
    %c16 = arith.constant 16 : index
    %346 = memref.load %arg5[%c16] : memref<100xf32, #tpu.memory_space<smem>>
    %347 = vector.broadcast %346 : f32 to vector<7x7x128xf32>
    %348 = arith.mulf %347, %345 : vector<7x7x128xf32>
    %349 = arith.addf %339, %348 : vector<7x7x128xf32>
    %c1_265 = arith.constant 1 : index
    %c7_266 = arith.constant 7 : index
    %c0_267 = arith.constant 0 : index
    %350 = vector.load %arg11[%c1_265, %c7_266, %c0_267] : memref<16x16x128xf32, #tpu.memory_space<vmem>>, vector<7x7x128xf32>
    %c17_268 = arith.constant 17 : index
    %351 = memref.load %arg5[%c17_268] : memref<100xf32, #tpu.memory_space<smem>>
    %352 = vector.broadcast %351 : f32 to vector<7x7x128xf32>
    %353 = arith.mulf %352, %350 : vector<7x7x128xf32>
    %354 = arith.addf %344, %353 : vector<7x7x128xf32>
    %c1_269 = arith.constant 1 : index
    %c8_270 = arith.constant 8 : index
    %c0_271 = arith.constant 0 : index
    %355 = vector.load %arg11[%c1_269, %c8_270, %c0_271] : memref<16x16x128xf32, #tpu.memory_space<vmem>>, vector<7x7x128xf32>
    %c18 = arith.constant 18 : index
    %356 = memref.load %arg5[%c18] : memref<100xf32, #tpu.memory_space<smem>>
    %357 = vector.broadcast %356 : f32 to vector<7x7x128xf32>
    %358 = arith.mulf %357, %355 : vector<7x7x128xf32>
    %359 = arith.addf %349, %358 : vector<7x7x128xf32>
    %c1_272 = arith.constant 1 : index
    %c9_273 = arith.constant 9 : index
    %c0_274 = arith.constant 0 : index
    %360 = vector.load %arg11[%c1_272, %c9_273, %c0_274] : memref<16x16x128xf32, #tpu.memory_space<vmem>>, vector<7x7x128xf32>
    %c19 = arith.constant 19 : index
    %361 = memref.load %arg5[%c19] : memref<100xf32, #tpu.memory_space<smem>>
    %362 = vector.broadcast %361 : f32 to vector<7x7x128xf32>
    %363 = arith.mulf %362, %360 : vector<7x7x128xf32>
    %364 = arith.addf %354, %363 : vector<7x7x128xf32>
    %c2_275 = arith.constant 2 : index
    %c0_276 = arith.constant 0 : index
    %c0_277 = arith.constant 0 : index
    %365 = vector.load %arg11[%c2_275, %c0_276, %c0_277] : memref<16x16x128xf32, #tpu.memory_space<vmem>>, vector<7x7x128xf32>
    %c20 = arith.constant 20 : index
    %366 = memref.load %arg5[%c20] : memref<100xf32, #tpu.memory_space<smem>>
    %367 = vector.broadcast %366 : f32 to vector<7x7x128xf32>
    %368 = arith.mulf %367, %365 : vector<7x7x128xf32>
    %369 = arith.addf %359, %368 : vector<7x7x128xf32>
    %c2_278 = arith.constant 2 : index
    %c1_279 = arith.constant 1 : index
    %c0_280 = arith.constant 0 : index
    %370 = vector.load %arg11[%c2_278, %c1_279, %c0_280] : memref<16x16x128xf32, #tpu.memory_space<vmem>>, vector<7x7x128xf32>
    %c21 = arith.constant 21 : index
    %371 = memref.load %arg5[%c21] : memref<100xf32, #tpu.memory_space<smem>>
    %372 = vector.broadcast %371 : f32 to vector<7x7x128xf32>
    %373 = arith.mulf %372, %370 : vector<7x7x128xf32>
    %374 = arith.addf %364, %373 : vector<7x7x128xf32>
    %c2_281 = arith.constant 2 : index
    %c2_282 = arith.constant 2 : index
    %c0_283 = arith.constant 0 : index
    %375 = vector.load %arg11[%c2_281, %c2_282, %c0_283] : memref<16x16x128xf32, #tpu.memory_space<vmem>>, vector<7x7x128xf32>
    %c22 = arith.constant 22 : index
    %376 = memref.load %arg5[%c22] : memref<100xf32, #tpu.memory_space<smem>>
    %377 = vector.broadcast %376 : f32 to vector<7x7x128xf32>
    %378 = arith.mulf %377, %375 : vector<7x7x128xf32>
    %379 = arith.addf %369, %378 : vector<7x7x128xf32>
    %c2_284 = arith.constant 2 : index
    %c3_285 = arith.constant 3 : index
    %c0_286 = arith.constant 0 : index
    %380 = vector.load %arg11[%c2_284, %c3_285, %c0_286] : memref<16x16x128xf32, #tpu.memory_space<vmem>>, vector<7x7x128xf32>
    %c23 = arith.constant 23 : index
    %381 = memref.load %arg5[%c23] : memref<100xf32, #tpu.memory_space<smem>>
    %382 = vector.broadcast %381 : f32 to vector<7x7x128xf32>
    %383 = arith.mulf %382, %380 : vector<7x7x128xf32>
    %384 = arith.addf %374, %383 : vector<7x7x128xf32>
    %c2_287 = arith.constant 2 : index
    %c4_288 = arith.constant 4 : index
    %c0_289 = arith.constant 0 : index
    %385 = vector.load %arg11[%c2_287, %c4_288, %c0_289] : memref<16x16x128xf32, #tpu.memory_space<vmem>>, vector<7x7x128xf32>
    %c24 = arith.constant 24 : index
    %386 = memref.load %arg5[%c24] : memref<100xf32, #tpu.memory_space<smem>>
    %387 = vector.broadcast %386 : f32 to vector<7x7x128xf32>
    %388 = arith.mulf %387, %385 : vector<7x7x128xf32>
    %389 = arith.addf %379, %388 : vector<7x7x128xf32>
    %c2_290 = arith.constant 2 : index
    %c5_291 = arith.constant 5 : index
    %c0_292 = arith.constant 0 : index
    %390 = vector.load %arg11[%c2_290, %c5_291, %c0_292] : memref<16x16x128xf32, #tpu.memory_space<vmem>>, vector<7x7x128xf32>
    %c25 = arith.constant 25 : index
    %391 = memref.load %arg5[%c25] : memref<100xf32, #tpu.memory_space<smem>>
    %392 = vector.broadcast %391 : f32 to vector<7x7x128xf32>
    %393 = arith.mulf %392, %390 : vector<7x7x128xf32>
    %394 = arith.addf %384, %393 : vector<7x7x128xf32>
    %c2_293 = arith.constant 2 : index
    %c6_294 = arith.constant 6 : index
    %c0_295 = arith.constant 0 : index
    %395 = vector.load %arg11[%c2_293, %c6_294, %c0_295] : memref<16x16x128xf32, #tpu.memory_space<vmem>>, vector<7x7x128xf32>
    %c26 = arith.constant 26 : index
    %396 = memref.load %arg5[%c26] : memref<100xf32, #tpu.memory_space<smem>>
    %397 = vector.broadcast %396 : f32 to vector<7x7x128xf32>
    %398 = arith.mulf %397, %395 : vector<7x7x128xf32>
    %399 = arith.addf %389, %398 : vector<7x7x128xf32>
    %c2_296 = arith.constant 2 : index
    %c7_297 = arith.constant 7 : index
    %c0_298 = arith.constant 0 : index
    %400 = vector.load %arg11[%c2_296, %c7_297, %c0_298] : memref<16x16x128xf32, #tpu.memory_space<vmem>>, vector<7x7x128xf32>
    %c27 = arith.constant 27 : index
    %401 = memref.load %arg5[%c27] : memref<100xf32, #tpu.memory_space<smem>>
    %402 = vector.broadcast %401 : f32 to vector<7x7x128xf32>
    %403 = arith.mulf %402, %400 : vector<7x7x128xf32>
    %404 = arith.addf %394, %403 : vector<7x7x128xf32>
    %c2_299 = arith.constant 2 : index
    %c8_300 = arith.constant 8 : index
    %c0_301 = arith.constant 0 : index
    %405 = vector.load %arg11[%c2_299, %c8_300, %c0_301] : memref<16x16x128xf32, #tpu.memory_space<vmem>>, vector<7x7x128xf32>
    %c28 = arith.constant 28 : index
    %406 = memref.load %arg5[%c28] : memref<100xf32, #tpu.memory_space<smem>>
    %407 = vector.broadcast %406 : f32 to vector<7x7x128xf32>
    %408 = arith.mulf %407, %405 : vector<7x7x128xf32>
    %409 = arith.addf %399, %408 : vector<7x7x128xf32>
    %c2_302 = arith.constant 2 : index
    %c9_303 = arith.constant 9 : index
    %c0_304 = arith.constant 0 : index
    %410 = vector.load %arg11[%c2_302, %c9_303, %c0_304] : memref<16x16x128xf32, #tpu.memory_space<vmem>>, vector<7x7x128xf32>
    %c29 = arith.constant 29 : index
    %411 = memref.load %arg5[%c29] : memref<100xf32, #tpu.memory_space<smem>>
    %412 = vector.broadcast %411 : f32 to vector<7x7x128xf32>
    %413 = arith.mulf %412, %410 : vector<7x7x128xf32>
    %414 = arith.addf %404, %413 : vector<7x7x128xf32>
    %c3_305 = arith.constant 3 : index
    %c0_306 = arith.constant 0 : index
    %c0_307 = arith.constant 0 : index
    %415 = vector.load %arg11[%c3_305, %c0_306, %c0_307] : memref<16x16x128xf32, #tpu.memory_space<vmem>>, vector<7x7x128xf32>
    %c30 = arith.constant 30 : index
    %416 = memref.load %arg5[%c30] : memref<100xf32, #tpu.memory_space<smem>>
    %417 = vector.broadcast %416 : f32 to vector<7x7x128xf32>
    %418 = arith.mulf %417, %415 : vector<7x7x128xf32>
    %419 = arith.addf %409, %418 : vector<7x7x128xf32>
    %c3_308 = arith.constant 3 : index
    %c1_309 = arith.constant 1 : index
    %c0_310 = arith.constant 0 : index
    %420 = vector.load %arg11[%c3_308, %c1_309, %c0_310] : memref<16x16x128xf32, #tpu.memory_space<vmem>>, vector<7x7x128xf32>
    %c31 = arith.constant 31 : index
    %421 = memref.load %arg5[%c31] : memref<100xf32, #tpu.memory_space<smem>>
    %422 = vector.broadcast %421 : f32 to vector<7x7x128xf32>
    %423 = arith.mulf %422, %420 : vector<7x7x128xf32>
    %424 = arith.addf %414, %423 : vector<7x7x128xf32>
    %c3_311 = arith.constant 3 : index
    %c2_312 = arith.constant 2 : index
    %c0_313 = arith.constant 0 : index
    %425 = vector.load %arg11[%c3_311, %c2_312, %c0_313] : memref<16x16x128xf32, #tpu.memory_space<vmem>>, vector<7x7x128xf32>
    %c32 = arith.constant 32 : index
    %426 = memref.load %arg5[%c32] : memref<100xf32, #tpu.memory_space<smem>>
    %427 = vector.broadcast %426 : f32 to vector<7x7x128xf32>
    %428 = arith.mulf %427, %425 : vector<7x7x128xf32>
    %429 = arith.addf %419, %428 : vector<7x7x128xf32>
    %c3_314 = arith.constant 3 : index
    %c3_315 = arith.constant 3 : index
    %c0_316 = arith.constant 0 : index
    %430 = vector.load %arg11[%c3_314, %c3_315, %c0_316] : memref<16x16x128xf32, #tpu.memory_space<vmem>>, vector<7x7x128xf32>
    %c33 = arith.constant 33 : index
    %431 = memref.load %arg5[%c33] : memref<100xf32, #tpu.memory_space<smem>>
    %432 = vector.broadcast %431 : f32 to vector<7x7x128xf32>
    %433 = arith.mulf %432, %430 : vector<7x7x128xf32>
    %434 = arith.addf %424, %433 : vector<7x7x128xf32>
    %c3_317 = arith.constant 3 : index
    %c4_318 = arith.constant 4 : index
    %c0_319 = arith.constant 0 : index
    %435 = vector.load %arg11[%c3_317, %c4_318, %c0_319] : memref<16x16x128xf32, #tpu.memory_space<vmem>>, vector<7x7x128xf32>
    %c34 = arith.constant 34 : index
    %436 = memref.load %arg5[%c34] : memref<100xf32, #tpu.memory_space<smem>>
    %437 = vector.broadcast %436 : f32 to vector<7x7x128xf32>
    %438 = arith.mulf %437, %435 : vector<7x7x128xf32>
    %439 = arith.addf %429, %438 : vector<7x7x128xf32>
    %c3_320 = arith.constant 3 : index
    %c5_321 = arith.constant 5 : index
    %c0_322 = arith.constant 0 : index
    %440 = vector.load %arg11[%c3_320, %c5_321, %c0_322] : memref<16x16x128xf32, #tpu.memory_space<vmem>>, vector<7x7x128xf32>
    %c35 = arith.constant 35 : index
    %441 = memref.load %arg5[%c35] : memref<100xf32, #tpu.memory_space<smem>>
    %442 = vector.broadcast %441 : f32 to vector<7x7x128xf32>
    %443 = arith.mulf %442, %440 : vector<7x7x128xf32>
    %444 = arith.addf %434, %443 : vector<7x7x128xf32>
    %c3_323 = arith.constant 3 : index
    %c6_324 = arith.constant 6 : index
    %c0_325 = arith.constant 0 : index
    %445 = vector.load %arg11[%c3_323, %c6_324, %c0_325] : memref<16x16x128xf32, #tpu.memory_space<vmem>>, vector<7x7x128xf32>
    %c36 = arith.constant 36 : index
    %446 = memref.load %arg5[%c36] : memref<100xf32, #tpu.memory_space<smem>>
    %447 = vector.broadcast %446 : f32 to vector<7x7x128xf32>
    %448 = arith.mulf %447, %445 : vector<7x7x128xf32>
    %449 = arith.addf %439, %448 : vector<7x7x128xf32>
    %c3_326 = arith.constant 3 : index
    %c7_327 = arith.constant 7 : index
    %c0_328 = arith.constant 0 : index
    %450 = vector.load %arg11[%c3_326, %c7_327, %c0_328] : memref<16x16x128xf32, #tpu.memory_space<vmem>>, vector<7x7x128xf32>
    %c37 = arith.constant 37 : index
    %451 = memref.load %arg5[%c37] : memref<100xf32, #tpu.memory_space<smem>>
    %452 = vector.broadcast %451 : f32 to vector<7x7x128xf32>
    %453 = arith.mulf %452, %450 : vector<7x7x128xf32>
    %454 = arith.addf %444, %453 : vector<7x7x128xf32>
    %c3_329 = arith.constant 3 : index
    %c8_330 = arith.constant 8 : index
    %c0_331 = arith.constant 0 : index
    %455 = vector.load %arg11[%c3_329, %c8_330, %c0_331] : memref<16x16x128xf32, #tpu.memory_space<vmem>>, vector<7x7x128xf32>
    %c38 = arith.constant 38 : index
    %456 = memref.load %arg5[%c38] : memref<100xf32, #tpu.memory_space<smem>>
    %457 = vector.broadcast %456 : f32 to vector<7x7x128xf32>
    %458 = arith.mulf %457, %455 : vector<7x7x128xf32>
    %459 = arith.addf %449, %458 : vector<7x7x128xf32>
    %c3_332 = arith.constant 3 : index
    %c9_333 = arith.constant 9 : index
    %c0_334 = arith.constant 0 : index
    %460 = vector.load %arg11[%c3_332, %c9_333, %c0_334] : memref<16x16x128xf32, #tpu.memory_space<vmem>>, vector<7x7x128xf32>
    %c39 = arith.constant 39 : index
    %461 = memref.load %arg5[%c39] : memref<100xf32, #tpu.memory_space<smem>>
    %462 = vector.broadcast %461 : f32 to vector<7x7x128xf32>
    %463 = arith.mulf %462, %460 : vector<7x7x128xf32>
    %464 = arith.addf %454, %463 : vector<7x7x128xf32>
    %c4_335 = arith.constant 4 : index
    %c0_336 = arith.constant 0 : index
    %c0_337 = arith.constant 0 : index
    %465 = vector.load %arg11[%c4_335, %c0_336, %c0_337] : memref<16x16x128xf32, #tpu.memory_space<vmem>>, vector<7x7x128xf32>
    %c40 = arith.constant 40 : index
    %466 = memref.load %arg5[%c40] : memref<100xf32, #tpu.memory_space<smem>>
    %467 = vector.broadcast %466 : f32 to vector<7x7x128xf32>
    %468 = arith.mulf %467, %465 : vector<7x7x128xf32>
    %469 = arith.addf %459, %468 : vector<7x7x128xf32>
    %c4_338 = arith.constant 4 : index
    %c1_339 = arith.constant 1 : index
    %c0_340 = arith.constant 0 : index
    %470 = vector.load %arg11[%c4_338, %c1_339, %c0_340] : memref<16x16x128xf32, #tpu.memory_space<vmem>>, vector<7x7x128xf32>
    %c41 = arith.constant 41 : index
    %471 = memref.load %arg5[%c41] : memref<100xf32, #tpu.memory_space<smem>>
    %472 = vector.broadcast %471 : f32 to vector<7x7x128xf32>
    %473 = arith.mulf %472, %470 : vector<7x7x128xf32>
    %474 = arith.addf %464, %473 : vector<7x7x128xf32>
    %c4_341 = arith.constant 4 : index
    %c2_342 = arith.constant 2 : index
    %c0_343 = arith.constant 0 : index
    %475 = vector.load %arg11[%c4_341, %c2_342, %c0_343] : memref<16x16x128xf32, #tpu.memory_space<vmem>>, vector<7x7x128xf32>
    %c42 = arith.constant 42 : index
    %476 = memref.load %arg5[%c42] : memref<100xf32, #tpu.memory_space<smem>>
    %477 = vector.broadcast %476 : f32 to vector<7x7x128xf32>
    %478 = arith.mulf %477, %475 : vector<7x7x128xf32>
    %479 = arith.addf %469, %478 : vector<7x7x128xf32>
    %c4_344 = arith.constant 4 : index
    %c3_345 = arith.constant 3 : index
    %c0_346 = arith.constant 0 : index
    %480 = vector.load %arg11[%c4_344, %c3_345, %c0_346] : memref<16x16x128xf32, #tpu.memory_space<vmem>>, vector<7x7x128xf32>
    %c43 = arith.constant 43 : index
    %481 = memref.load %arg5[%c43] : memref<100xf32, #tpu.memory_space<smem>>
    %482 = vector.broadcast %481 : f32 to vector<7x7x128xf32>
    %483 = arith.mulf %482, %480 : vector<7x7x128xf32>
    %484 = arith.addf %474, %483 : vector<7x7x128xf32>
    %c4_347 = arith.constant 4 : index
    %c4_348 = arith.constant 4 : index
    %c0_349 = arith.constant 0 : index
    %485 = vector.load %arg11[%c4_347, %c4_348, %c0_349] : memref<16x16x128xf32, #tpu.memory_space<vmem>>, vector<7x7x128xf32>
    %c44 = arith.constant 44 : index
    %486 = memref.load %arg5[%c44] : memref<100xf32, #tpu.memory_space<smem>>
    %487 = vector.broadcast %486 : f32 to vector<7x7x128xf32>
    %488 = arith.mulf %487, %485 : vector<7x7x128xf32>
    %489 = arith.addf %479, %488 : vector<7x7x128xf32>
    %c4_350 = arith.constant 4 : index
    %c5_351 = arith.constant 5 : index
    %c0_352 = arith.constant 0 : index
    %490 = vector.load %arg11[%c4_350, %c5_351, %c0_352] : memref<16x16x128xf32, #tpu.memory_space<vmem>>, vector<7x7x128xf32>
    %c45 = arith.constant 45 : index
    %491 = memref.load %arg5[%c45] : memref<100xf32, #tpu.memory_space<smem>>
    %492 = vector.broadcast %491 : f32 to vector<7x7x128xf32>
    %493 = arith.mulf %492, %490 : vector<7x7x128xf32>
    %494 = arith.addf %484, %493 : vector<7x7x128xf32>
    %c4_353 = arith.constant 4 : index
    %c6_354 = arith.constant 6 : index
    %c0_355 = arith.constant 0 : index
    %495 = vector.load %arg11[%c4_353, %c6_354, %c0_355] : memref<16x16x128xf32, #tpu.memory_space<vmem>>, vector<7x7x128xf32>
    %c46 = arith.constant 46 : index
    %496 = memref.load %arg5[%c46] : memref<100xf32, #tpu.memory_space<smem>>
    %497 = vector.broadcast %496 : f32 to vector<7x7x128xf32>
    %498 = arith.mulf %497, %495 : vector<7x7x128xf32>
    %499 = arith.addf %489, %498 : vector<7x7x128xf32>
    %c4_356 = arith.constant 4 : index
    %c7_357 = arith.constant 7 : index
    %c0_358 = arith.constant 0 : index
    %500 = vector.load %arg11[%c4_356, %c7_357, %c0_358] : memref<16x16x128xf32, #tpu.memory_space<vmem>>, vector<7x7x128xf32>
    %c47 = arith.constant 47 : index
    %501 = memref.load %arg5[%c47] : memref<100xf32, #tpu.memory_space<smem>>
    %502 = vector.broadcast %501 : f32 to vector<7x7x128xf32>
    %503 = arith.mulf %502, %500 : vector<7x7x128xf32>
    %504 = arith.addf %494, %503 : vector<7x7x128xf32>
    %c4_359 = arith.constant 4 : index
    %c8_360 = arith.constant 8 : index
    %c0_361 = arith.constant 0 : index
    %505 = vector.load %arg11[%c4_359, %c8_360, %c0_361] : memref<16x16x128xf32, #tpu.memory_space<vmem>>, vector<7x7x128xf32>
    %c48 = arith.constant 48 : index
    %506 = memref.load %arg5[%c48] : memref<100xf32, #tpu.memory_space<smem>>
    %507 = vector.broadcast %506 : f32 to vector<7x7x128xf32>
    %508 = arith.mulf %507, %505 : vector<7x7x128xf32>
    %509 = arith.addf %499, %508 : vector<7x7x128xf32>
    %c4_362 = arith.constant 4 : index
    %c9_363 = arith.constant 9 : index
    %c0_364 = arith.constant 0 : index
    %510 = vector.load %arg11[%c4_362, %c9_363, %c0_364] : memref<16x16x128xf32, #tpu.memory_space<vmem>>, vector<7x7x128xf32>
    %c49 = arith.constant 49 : index
    %511 = memref.load %arg5[%c49] : memref<100xf32, #tpu.memory_space<smem>>
    %512 = vector.broadcast %511 : f32 to vector<7x7x128xf32>
    %513 = arith.mulf %512, %510 : vector<7x7x128xf32>
    %514 = arith.addf %504, %513 : vector<7x7x128xf32>
    %c5_365 = arith.constant 5 : index
    %c0_366 = arith.constant 0 : index
    %c0_367 = arith.constant 0 : index
    %515 = vector.load %arg11[%c5_365, %c0_366, %c0_367] : memref<16x16x128xf32, #tpu.memory_space<vmem>>, vector<7x7x128xf32>
    %c50 = arith.constant 50 : index
    %516 = memref.load %arg5[%c50] : memref<100xf32, #tpu.memory_space<smem>>
    %517 = vector.broadcast %516 : f32 to vector<7x7x128xf32>
    %518 = arith.mulf %517, %515 : vector<7x7x128xf32>
    %519 = arith.addf %509, %518 : vector<7x7x128xf32>
    %c5_368 = arith.constant 5 : index
    %c1_369 = arith.constant 1 : index
    %c0_370 = arith.constant 0 : index
    %520 = vector.load %arg11[%c5_368, %c1_369, %c0_370] : memref<16x16x128xf32, #tpu.memory_space<vmem>>, vector<7x7x128xf32>
    %c51 = arith.constant 51 : index
    %521 = memref.load %arg5[%c51] : memref<100xf32, #tpu.memory_space<smem>>
    %522 = vector.broadcast %521 : f32 to vector<7x7x128xf32>
    %523 = arith.mulf %522, %520 : vector<7x7x128xf32>
    %524 = arith.addf %514, %523 : vector<7x7x128xf32>
    %c5_371 = arith.constant 5 : index
    %c2_372 = arith.constant 2 : index
    %c0_373 = arith.constant 0 : index
    %525 = vector.load %arg11[%c5_371, %c2_372, %c0_373] : memref<16x16x128xf32, #tpu.memory_space<vmem>>, vector<7x7x128xf32>
    %c52 = arith.constant 52 : index
    %526 = memref.load %arg5[%c52] : memref<100xf32, #tpu.memory_space<smem>>
    %527 = vector.broadcast %526 : f32 to vector<7x7x128xf32>
    %528 = arith.mulf %527, %525 : vector<7x7x128xf32>
    %529 = arith.addf %519, %528 : vector<7x7x128xf32>
    %c5_374 = arith.constant 5 : index
    %c3_375 = arith.constant 3 : index
    %c0_376 = arith.constant 0 : index
    %530 = vector.load %arg11[%c5_374, %c3_375, %c0_376] : memref<16x16x128xf32, #tpu.memory_space<vmem>>, vector<7x7x128xf32>
    %c53 = arith.constant 53 : index
    %531 = memref.load %arg5[%c53] : memref<100xf32, #tpu.memory_space<smem>>
    %532 = vector.broadcast %531 : f32 to vector<7x7x128xf32>
    %533 = arith.mulf %532, %530 : vector<7x7x128xf32>
    %534 = arith.addf %524, %533 : vector<7x7x128xf32>
    %c5_377 = arith.constant 5 : index
    %c4_378 = arith.constant 4 : index
    %c0_379 = arith.constant 0 : index
    %535 = vector.load %arg11[%c5_377, %c4_378, %c0_379] : memref<16x16x128xf32, #tpu.memory_space<vmem>>, vector<7x7x128xf32>
    %c54 = arith.constant 54 : index
    %536 = memref.load %arg5[%c54] : memref<100xf32, #tpu.memory_space<smem>>
    %537 = vector.broadcast %536 : f32 to vector<7x7x128xf32>
    %538 = arith.mulf %537, %535 : vector<7x7x128xf32>
    %539 = arith.addf %529, %538 : vector<7x7x128xf32>
    %c5_380 = arith.constant 5 : index
    %c5_381 = arith.constant 5 : index
    %c0_382 = arith.constant 0 : index
    %540 = vector.load %arg11[%c5_380, %c5_381, %c0_382] : memref<16x16x128xf32, #tpu.memory_space<vmem>>, vector<7x7x128xf32>
    %c55 = arith.constant 55 : index
    %541 = memref.load %arg5[%c55] : memref<100xf32, #tpu.memory_space<smem>>
    %542 = vector.broadcast %541 : f32 to vector<7x7x128xf32>
    %543 = arith.mulf %542, %540 : vector<7x7x128xf32>
    %544 = arith.addf %534, %543 : vector<7x7x128xf32>
    %c5_383 = arith.constant 5 : index
    %c6_384 = arith.constant 6 : index
    %c0_385 = arith.constant 0 : index
    %545 = vector.load %arg11[%c5_383, %c6_384, %c0_385] : memref<16x16x128xf32, #tpu.memory_space<vmem>>, vector<7x7x128xf32>
    %c56 = arith.constant 56 : index
    %546 = memref.load %arg5[%c56] : memref<100xf32, #tpu.memory_space<smem>>
    %547 = vector.broadcast %546 : f32 to vector<7x7x128xf32>
    %548 = arith.mulf %547, %545 : vector<7x7x128xf32>
    %549 = arith.addf %539, %548 : vector<7x7x128xf32>
    %c5_386 = arith.constant 5 : index
    %c7_387 = arith.constant 7 : index
    %c0_388 = arith.constant 0 : index
    %550 = vector.load %arg11[%c5_386, %c7_387, %c0_388] : memref<16x16x128xf32, #tpu.memory_space<vmem>>, vector<7x7x128xf32>
    %c57 = arith.constant 57 : index
    %551 = memref.load %arg5[%c57] : memref<100xf32, #tpu.memory_space<smem>>
    %552 = vector.broadcast %551 : f32 to vector<7x7x128xf32>
    %553 = arith.mulf %552, %550 : vector<7x7x128xf32>
    %554 = arith.addf %544, %553 : vector<7x7x128xf32>
    %c5_389 = arith.constant 5 : index
    %c8_390 = arith.constant 8 : index
    %c0_391 = arith.constant 0 : index
    %555 = vector.load %arg11[%c5_389, %c8_390, %c0_391] : memref<16x16x128xf32, #tpu.memory_space<vmem>>, vector<7x7x128xf32>
    %c58 = arith.constant 58 : index
    %556 = memref.load %arg5[%c58] : memref<100xf32, #tpu.memory_space<smem>>
    %557 = vector.broadcast %556 : f32 to vector<7x7x128xf32>
    %558 = arith.mulf %557, %555 : vector<7x7x128xf32>
    %559 = arith.addf %549, %558 : vector<7x7x128xf32>
    %c5_392 = arith.constant 5 : index
    %c9_393 = arith.constant 9 : index
    %c0_394 = arith.constant 0 : index
    %560 = vector.load %arg11[%c5_392, %c9_393, %c0_394] : memref<16x16x128xf32, #tpu.memory_space<vmem>>, vector<7x7x128xf32>
    %c59 = arith.constant 59 : index
    %561 = memref.load %arg5[%c59] : memref<100xf32, #tpu.memory_space<smem>>
    %562 = vector.broadcast %561 : f32 to vector<7x7x128xf32>
    %563 = arith.mulf %562, %560 : vector<7x7x128xf32>
    %564 = arith.addf %554, %563 : vector<7x7x128xf32>
    %c6_395 = arith.constant 6 : index
    %c0_396 = arith.constant 0 : index
    %c0_397 = arith.constant 0 : index
    %565 = vector.load %arg11[%c6_395, %c0_396, %c0_397] : memref<16x16x128xf32, #tpu.memory_space<vmem>>, vector<7x7x128xf32>
    %c60 = arith.constant 60 : index
    %566 = memref.load %arg5[%c60] : memref<100xf32, #tpu.memory_space<smem>>
    %567 = vector.broadcast %566 : f32 to vector<7x7x128xf32>
    %568 = arith.mulf %567, %565 : vector<7x7x128xf32>
    %569 = arith.addf %559, %568 : vector<7x7x128xf32>
    %c6_398 = arith.constant 6 : index
    %c1_399 = arith.constant 1 : index
    %c0_400 = arith.constant 0 : index
    %570 = vector.load %arg11[%c6_398, %c1_399, %c0_400] : memref<16x16x128xf32, #tpu.memory_space<vmem>>, vector<7x7x128xf32>
    %c61 = arith.constant 61 : index
    %571 = memref.load %arg5[%c61] : memref<100xf32, #tpu.memory_space<smem>>
    %572 = vector.broadcast %571 : f32 to vector<7x7x128xf32>
    %573 = arith.mulf %572, %570 : vector<7x7x128xf32>
    %574 = arith.addf %564, %573 : vector<7x7x128xf32>
    %c6_401 = arith.constant 6 : index
    %c2_402 = arith.constant 2 : index
    %c0_403 = arith.constant 0 : index
    %575 = vector.load %arg11[%c6_401, %c2_402, %c0_403] : memref<16x16x128xf32, #tpu.memory_space<vmem>>, vector<7x7x128xf32>
    %c62 = arith.constant 62 : index
    %576 = memref.load %arg5[%c62] : memref<100xf32, #tpu.memory_space<smem>>
    %577 = vector.broadcast %576 : f32 to vector<7x7x128xf32>
    %578 = arith.mulf %577, %575 : vector<7x7x128xf32>
    %579 = arith.addf %569, %578 : vector<7x7x128xf32>
    %c6_404 = arith.constant 6 : index
    %c3_405 = arith.constant 3 : index
    %c0_406 = arith.constant 0 : index
    %580 = vector.load %arg11[%c6_404, %c3_405, %c0_406] : memref<16x16x128xf32, #tpu.memory_space<vmem>>, vector<7x7x128xf32>
    %c63 = arith.constant 63 : index
    %581 = memref.load %arg5[%c63] : memref<100xf32, #tpu.memory_space<smem>>
    %582 = vector.broadcast %581 : f32 to vector<7x7x128xf32>
    %583 = arith.mulf %582, %580 : vector<7x7x128xf32>
    %584 = arith.addf %574, %583 : vector<7x7x128xf32>
    %c6_407 = arith.constant 6 : index
    %c4_408 = arith.constant 4 : index
    %c0_409 = arith.constant 0 : index
    %585 = vector.load %arg11[%c6_407, %c4_408, %c0_409] : memref<16x16x128xf32, #tpu.memory_space<vmem>>, vector<7x7x128xf32>
    %c64 = arith.constant 64 : index
    %586 = memref.load %arg5[%c64] : memref<100xf32, #tpu.memory_space<smem>>
    %587 = vector.broadcast %586 : f32 to vector<7x7x128xf32>
    %588 = arith.mulf %587, %585 : vector<7x7x128xf32>
    %589 = arith.addf %579, %588 : vector<7x7x128xf32>
    %c6_410 = arith.constant 6 : index
    %c5_411 = arith.constant 5 : index
    %c0_412 = arith.constant 0 : index
    %590 = vector.load %arg11[%c6_410, %c5_411, %c0_412] : memref<16x16x128xf32, #tpu.memory_space<vmem>>, vector<7x7x128xf32>
    %c65 = arith.constant 65 : index
    %591 = memref.load %arg5[%c65] : memref<100xf32, #tpu.memory_space<smem>>
    %592 = vector.broadcast %591 : f32 to vector<7x7x128xf32>
    %593 = arith.mulf %592, %590 : vector<7x7x128xf32>
    %594 = arith.addf %584, %593 : vector<7x7x128xf32>
    %c6_413 = arith.constant 6 : index
    %c6_414 = arith.constant 6 : index
    %c0_415 = arith.constant 0 : index
    %595 = vector.load %arg11[%c6_413, %c6_414, %c0_415] : memref<16x16x128xf32, #tpu.memory_space<vmem>>, vector<7x7x128xf32>
    %c66 = arith.constant 66 : index
    %596 = memref.load %arg5[%c66] : memref<100xf32, #tpu.memory_space<smem>>
    %597 = vector.broadcast %596 : f32 to vector<7x7x128xf32>
    %598 = arith.mulf %597, %595 : vector<7x7x128xf32>
    %599 = arith.addf %589, %598 : vector<7x7x128xf32>
    %c6_416 = arith.constant 6 : index
    %c7_417 = arith.constant 7 : index
    %c0_418 = arith.constant 0 : index
    %600 = vector.load %arg11[%c6_416, %c7_417, %c0_418] : memref<16x16x128xf32, #tpu.memory_space<vmem>>, vector<7x7x128xf32>
    %c67 = arith.constant 67 : index
    %601 = memref.load %arg5[%c67] : memref<100xf32, #tpu.memory_space<smem>>
    %602 = vector.broadcast %601 : f32 to vector<7x7x128xf32>
    %603 = arith.mulf %602, %600 : vector<7x7x128xf32>
    %604 = arith.addf %594, %603 : vector<7x7x128xf32>
    %c6_419 = arith.constant 6 : index
    %c8_420 = arith.constant 8 : index
    %c0_421 = arith.constant 0 : index
    %605 = vector.load %arg11[%c6_419, %c8_420, %c0_421] : memref<16x16x128xf32, #tpu.memory_space<vmem>>, vector<7x7x128xf32>
    %c68 = arith.constant 68 : index
    %606 = memref.load %arg5[%c68] : memref<100xf32, #tpu.memory_space<smem>>
    %607 = vector.broadcast %606 : f32 to vector<7x7x128xf32>
    %608 = arith.mulf %607, %605 : vector<7x7x128xf32>
    %609 = arith.addf %599, %608 : vector<7x7x128xf32>
    %c6_422 = arith.constant 6 : index
    %c9_423 = arith.constant 9 : index
    %c0_424 = arith.constant 0 : index
    %610 = vector.load %arg11[%c6_422, %c9_423, %c0_424] : memref<16x16x128xf32, #tpu.memory_space<vmem>>, vector<7x7x128xf32>
    %c69 = arith.constant 69 : index
    %611 = memref.load %arg5[%c69] : memref<100xf32, #tpu.memory_space<smem>>
    %612 = vector.broadcast %611 : f32 to vector<7x7x128xf32>
    %613 = arith.mulf %612, %610 : vector<7x7x128xf32>
    %614 = arith.addf %604, %613 : vector<7x7x128xf32>
    %c7_425 = arith.constant 7 : index
    %c0_426 = arith.constant 0 : index
    %c0_427 = arith.constant 0 : index
    %615 = vector.load %arg11[%c7_425, %c0_426, %c0_427] : memref<16x16x128xf32, #tpu.memory_space<vmem>>, vector<7x7x128xf32>
    %c70 = arith.constant 70 : index
    %616 = memref.load %arg5[%c70] : memref<100xf32, #tpu.memory_space<smem>>
    %617 = vector.broadcast %616 : f32 to vector<7x7x128xf32>
    %618 = arith.mulf %617, %615 : vector<7x7x128xf32>
    %619 = arith.addf %609, %618 : vector<7x7x128xf32>
    %c7_428 = arith.constant 7 : index
    %c1_429 = arith.constant 1 : index
    %c0_430 = arith.constant 0 : index
    %620 = vector.load %arg11[%c7_428, %c1_429, %c0_430] : memref<16x16x128xf32, #tpu.memory_space<vmem>>, vector<7x7x128xf32>
    %c71 = arith.constant 71 : index
    %621 = memref.load %arg5[%c71] : memref<100xf32, #tpu.memory_space<smem>>
    %622 = vector.broadcast %621 : f32 to vector<7x7x128xf32>
    %623 = arith.mulf %622, %620 : vector<7x7x128xf32>
    %624 = arith.addf %614, %623 : vector<7x7x128xf32>
    %c7_431 = arith.constant 7 : index
    %c2_432 = arith.constant 2 : index
    %c0_433 = arith.constant 0 : index
    %625 = vector.load %arg11[%c7_431, %c2_432, %c0_433] : memref<16x16x128xf32, #tpu.memory_space<vmem>>, vector<7x7x128xf32>
    %c72 = arith.constant 72 : index
    %626 = memref.load %arg5[%c72] : memref<100xf32, #tpu.memory_space<smem>>
    %627 = vector.broadcast %626 : f32 to vector<7x7x128xf32>
    %628 = arith.mulf %627, %625 : vector<7x7x128xf32>
    %629 = arith.addf %619, %628 : vector<7x7x128xf32>
    %c7_434 = arith.constant 7 : index
    %c3_435 = arith.constant 3 : index
    %c0_436 = arith.constant 0 : index
    %630 = vector.load %arg11[%c7_434, %c3_435, %c0_436] : memref<16x16x128xf32, #tpu.memory_space<vmem>>, vector<7x7x128xf32>
    %c73 = arith.constant 73 : index
    %631 = memref.load %arg5[%c73] : memref<100xf32, #tpu.memory_space<smem>>
    %632 = vector.broadcast %631 : f32 to vector<7x7x128xf32>
    %633 = arith.mulf %632, %630 : vector<7x7x128xf32>
    %634 = arith.addf %624, %633 : vector<7x7x128xf32>
    %c7_437 = arith.constant 7 : index
    %c4_438 = arith.constant 4 : index
    %c0_439 = arith.constant 0 : index
    %635 = vector.load %arg11[%c7_437, %c4_438, %c0_439] : memref<16x16x128xf32, #tpu.memory_space<vmem>>, vector<7x7x128xf32>
    %c74 = arith.constant 74 : index
    %636 = memref.load %arg5[%c74] : memref<100xf32, #tpu.memory_space<smem>>
    %637 = vector.broadcast %636 : f32 to vector<7x7x128xf32>
    %638 = arith.mulf %637, %635 : vector<7x7x128xf32>
    %639 = arith.addf %629, %638 : vector<7x7x128xf32>
    %c7_440 = arith.constant 7 : index
    %c5_441 = arith.constant 5 : index
    %c0_442 = arith.constant 0 : index
    %640 = vector.load %arg11[%c7_440, %c5_441, %c0_442] : memref<16x16x128xf32, #tpu.memory_space<vmem>>, vector<7x7x128xf32>
    %c75 = arith.constant 75 : index
    %641 = memref.load %arg5[%c75] : memref<100xf32, #tpu.memory_space<smem>>
    %642 = vector.broadcast %641 : f32 to vector<7x7x128xf32>
    %643 = arith.mulf %642, %640 : vector<7x7x128xf32>
    %644 = arith.addf %634, %643 : vector<7x7x128xf32>
    %c7_443 = arith.constant 7 : index
    %c6_444 = arith.constant 6 : index
    %c0_445 = arith.constant 0 : index
    %645 = vector.load %arg11[%c7_443, %c6_444, %c0_445] : memref<16x16x128xf32, #tpu.memory_space<vmem>>, vector<7x7x128xf32>
    %c76 = arith.constant 76 : index
    %646 = memref.load %arg5[%c76] : memref<100xf32, #tpu.memory_space<smem>>
    %647 = vector.broadcast %646 : f32 to vector<7x7x128xf32>
    %648 = arith.mulf %647, %645 : vector<7x7x128xf32>
    %649 = arith.addf %639, %648 : vector<7x7x128xf32>
    %c7_446 = arith.constant 7 : index
    %c7_447 = arith.constant 7 : index
    %c0_448 = arith.constant 0 : index
    %650 = vector.load %arg11[%c7_446, %c7_447, %c0_448] : memref<16x16x128xf32, #tpu.memory_space<vmem>>, vector<7x7x128xf32>
    %c77 = arith.constant 77 : index
    %651 = memref.load %arg5[%c77] : memref<100xf32, #tpu.memory_space<smem>>
    %652 = vector.broadcast %651 : f32 to vector<7x7x128xf32>
    %653 = arith.mulf %652, %650 : vector<7x7x128xf32>
    %654 = arith.addf %644, %653 : vector<7x7x128xf32>
    %c7_449 = arith.constant 7 : index
    %c8_450 = arith.constant 8 : index
    %c0_451 = arith.constant 0 : index
    %655 = vector.load %arg11[%c7_449, %c8_450, %c0_451] : memref<16x16x128xf32, #tpu.memory_space<vmem>>, vector<7x7x128xf32>
    %c78 = arith.constant 78 : index
    %656 = memref.load %arg5[%c78] : memref<100xf32, #tpu.memory_space<smem>>
    %657 = vector.broadcast %656 : f32 to vector<7x7x128xf32>
    %658 = arith.mulf %657, %655 : vector<7x7x128xf32>
    %659 = arith.addf %649, %658 : vector<7x7x128xf32>
    %c7_452 = arith.constant 7 : index
    %c9_453 = arith.constant 9 : index
    %c0_454 = arith.constant 0 : index
    %660 = vector.load %arg11[%c7_452, %c9_453, %c0_454] : memref<16x16x128xf32, #tpu.memory_space<vmem>>, vector<7x7x128xf32>
    %c79 = arith.constant 79 : index
    %661 = memref.load %arg5[%c79] : memref<100xf32, #tpu.memory_space<smem>>
    %662 = vector.broadcast %661 : f32 to vector<7x7x128xf32>
    %663 = arith.mulf %662, %660 : vector<7x7x128xf32>
    %664 = arith.addf %654, %663 : vector<7x7x128xf32>
    %c8_455 = arith.constant 8 : index
    %c0_456 = arith.constant 0 : index
    %c0_457 = arith.constant 0 : index
    %665 = vector.load %arg11[%c8_455, %c0_456, %c0_457] : memref<16x16x128xf32, #tpu.memory_space<vmem>>, vector<7x7x128xf32>
    %c80 = arith.constant 80 : index
    %666 = memref.load %arg5[%c80] : memref<100xf32, #tpu.memory_space<smem>>
    %667 = vector.broadcast %666 : f32 to vector<7x7x128xf32>
    %668 = arith.mulf %667, %665 : vector<7x7x128xf32>
    %669 = arith.addf %659, %668 : vector<7x7x128xf32>
    %c8_458 = arith.constant 8 : index
    %c1_459 = arith.constant 1 : index
    %c0_460 = arith.constant 0 : index
    %670 = vector.load %arg11[%c8_458, %c1_459, %c0_460] : memref<16x16x128xf32, #tpu.memory_space<vmem>>, vector<7x7x128xf32>
    %c81 = arith.constant 81 : index
    %671 = memref.load %arg5[%c81] : memref<100xf32, #tpu.memory_space<smem>>
    %672 = vector.broadcast %671 : f32 to vector<7x7x128xf32>
    %673 = arith.mulf %672, %670 : vector<7x7x128xf32>
    %674 = arith.addf %664, %673 : vector<7x7x128xf32>
    %c8_461 = arith.constant 8 : index
    %c2_462 = arith.constant 2 : index
    %c0_463 = arith.constant 0 : index
    %675 = vector.load %arg11[%c8_461, %c2_462, %c0_463] : memref<16x16x128xf32, #tpu.memory_space<vmem>>, vector<7x7x128xf32>
    %c82 = arith.constant 82 : index
    %676 = memref.load %arg5[%c82] : memref<100xf32, #tpu.memory_space<smem>>
    %677 = vector.broadcast %676 : f32 to vector<7x7x128xf32>
    %678 = arith.mulf %677, %675 : vector<7x7x128xf32>
    %679 = arith.addf %669, %678 : vector<7x7x128xf32>
    %c8_464 = arith.constant 8 : index
    %c3_465 = arith.constant 3 : index
    %c0_466 = arith.constant 0 : index
    %680 = vector.load %arg11[%c8_464, %c3_465, %c0_466] : memref<16x16x128xf32, #tpu.memory_space<vmem>>, vector<7x7x128xf32>
    %c83 = arith.constant 83 : index
    %681 = memref.load %arg5[%c83] : memref<100xf32, #tpu.memory_space<smem>>
    %682 = vector.broadcast %681 : f32 to vector<7x7x128xf32>
    %683 = arith.mulf %682, %680 : vector<7x7x128xf32>
    %684 = arith.addf %674, %683 : vector<7x7x128xf32>
    %c8_467 = arith.constant 8 : index
    %c4_468 = arith.constant 4 : index
    %c0_469 = arith.constant 0 : index
    %685 = vector.load %arg11[%c8_467, %c4_468, %c0_469] : memref<16x16x128xf32, #tpu.memory_space<vmem>>, vector<7x7x128xf32>
    %c84 = arith.constant 84 : index
    %686 = memref.load %arg5[%c84] : memref<100xf32, #tpu.memory_space<smem>>
    %687 = vector.broadcast %686 : f32 to vector<7x7x128xf32>
    %688 = arith.mulf %687, %685 : vector<7x7x128xf32>
    %689 = arith.addf %679, %688 : vector<7x7x128xf32>
    %c8_470 = arith.constant 8 : index
    %c5_471 = arith.constant 5 : index
    %c0_472 = arith.constant 0 : index
    %690 = vector.load %arg11[%c8_470, %c5_471, %c0_472] : memref<16x16x128xf32, #tpu.memory_space<vmem>>, vector<7x7x128xf32>
    %c85 = arith.constant 85 : index
    %691 = memref.load %arg5[%c85] : memref<100xf32, #tpu.memory_space<smem>>
    %692 = vector.broadcast %691 : f32 to vector<7x7x128xf32>
    %693 = arith.mulf %692, %690 : vector<7x7x128xf32>
    %694 = arith.addf %684, %693 : vector<7x7x128xf32>
    %c8_473 = arith.constant 8 : index
    %c6_474 = arith.constant 6 : index
    %c0_475 = arith.constant 0 : index
    %695 = vector.load %arg11[%c8_473, %c6_474, %c0_475] : memref<16x16x128xf32, #tpu.memory_space<vmem>>, vector<7x7x128xf32>
    %c86 = arith.constant 86 : index
    %696 = memref.load %arg5[%c86] : memref<100xf32, #tpu.memory_space<smem>>
    %697 = vector.broadcast %696 : f32 to vector<7x7x128xf32>
    %698 = arith.mulf %697, %695 : vector<7x7x128xf32>
    %699 = arith.addf %689, %698 : vector<7x7x128xf32>
    %c8_476 = arith.constant 8 : index
    %c7_477 = arith.constant 7 : index
    %c0_478 = arith.constant 0 : index
    %700 = vector.load %arg11[%c8_476, %c7_477, %c0_478] : memref<16x16x128xf32, #tpu.memory_space<vmem>>, vector<7x7x128xf32>
    %c87 = arith.constant 87 : index
    %701 = memref.load %arg5[%c87] : memref<100xf32, #tpu.memory_space<smem>>
    %702 = vector.broadcast %701 : f32 to vector<7x7x128xf32>
    %703 = arith.mulf %702, %700 : vector<7x7x128xf32>
    %704 = arith.addf %694, %703 : vector<7x7x128xf32>
    %c8_479 = arith.constant 8 : index
    %c8_480 = arith.constant 8 : index
    %c0_481 = arith.constant 0 : index
    %705 = vector.load %arg11[%c8_479, %c8_480, %c0_481] : memref<16x16x128xf32, #tpu.memory_space<vmem>>, vector<7x7x128xf32>
    %c88 = arith.constant 88 : index
    %706 = memref.load %arg5[%c88] : memref<100xf32, #tpu.memory_space<smem>>
    %707 = vector.broadcast %706 : f32 to vector<7x7x128xf32>
    %708 = arith.mulf %707, %705 : vector<7x7x128xf32>
    %709 = arith.addf %699, %708 : vector<7x7x128xf32>
    %c8_482 = arith.constant 8 : index
    %c9_483 = arith.constant 9 : index
    %c0_484 = arith.constant 0 : index
    %710 = vector.load %arg11[%c8_482, %c9_483, %c0_484] : memref<16x16x128xf32, #tpu.memory_space<vmem>>, vector<7x7x128xf32>
    %c89 = arith.constant 89 : index
    %711 = memref.load %arg5[%c89] : memref<100xf32, #tpu.memory_space<smem>>
    %712 = vector.broadcast %711 : f32 to vector<7x7x128xf32>
    %713 = arith.mulf %712, %710 : vector<7x7x128xf32>
    %714 = arith.addf %704, %713 : vector<7x7x128xf32>
    %c9_485 = arith.constant 9 : index
    %c0_486 = arith.constant 0 : index
    %c0_487 = arith.constant 0 : index
    %715 = vector.load %arg11[%c9_485, %c0_486, %c0_487] : memref<16x16x128xf32, #tpu.memory_space<vmem>>, vector<7x7x128xf32>
    %c90 = arith.constant 90 : index
    %716 = memref.load %arg5[%c90] : memref<100xf32, #tpu.memory_space<smem>>
    %717 = vector.broadcast %716 : f32 to vector<7x7x128xf32>
    %718 = arith.mulf %717, %715 : vector<7x7x128xf32>
    %719 = arith.addf %709, %718 : vector<7x7x128xf32>
    %c9_488 = arith.constant 9 : index
    %c1_489 = arith.constant 1 : index
    %c0_490 = arith.constant 0 : index
    %720 = vector.load %arg11[%c9_488, %c1_489, %c0_490] : memref<16x16x128xf32, #tpu.memory_space<vmem>>, vector<7x7x128xf32>
    %c91 = arith.constant 91 : index
    %721 = memref.load %arg5[%c91] : memref<100xf32, #tpu.memory_space<smem>>
    %722 = vector.broadcast %721 : f32 to vector<7x7x128xf32>
    %723 = arith.mulf %722, %720 : vector<7x7x128xf32>
    %724 = arith.addf %714, %723 : vector<7x7x128xf32>
    %c9_491 = arith.constant 9 : index
    %c2_492 = arith.constant 2 : index
    %c0_493 = arith.constant 0 : index
    %725 = vector.load %arg11[%c9_491, %c2_492, %c0_493] : memref<16x16x128xf32, #tpu.memory_space<vmem>>, vector<7x7x128xf32>
    %c92 = arith.constant 92 : index
    %726 = memref.load %arg5[%c92] : memref<100xf32, #tpu.memory_space<smem>>
    %727 = vector.broadcast %726 : f32 to vector<7x7x128xf32>
    %728 = arith.mulf %727, %725 : vector<7x7x128xf32>
    %729 = arith.addf %719, %728 : vector<7x7x128xf32>
    %c9_494 = arith.constant 9 : index
    %c3_495 = arith.constant 3 : index
    %c0_496 = arith.constant 0 : index
    %730 = vector.load %arg11[%c9_494, %c3_495, %c0_496] : memref<16x16x128xf32, #tpu.memory_space<vmem>>, vector<7x7x128xf32>
    %c93 = arith.constant 93 : index
    %731 = memref.load %arg5[%c93] : memref<100xf32, #tpu.memory_space<smem>>
    %732 = vector.broadcast %731 : f32 to vector<7x7x128xf32>
    %733 = arith.mulf %732, %730 : vector<7x7x128xf32>
    %734 = arith.addf %724, %733 : vector<7x7x128xf32>
    %c9_497 = arith.constant 9 : index
    %c4_498 = arith.constant 4 : index
    %c0_499 = arith.constant 0 : index
    %735 = vector.load %arg11[%c9_497, %c4_498, %c0_499] : memref<16x16x128xf32, #tpu.memory_space<vmem>>, vector<7x7x128xf32>
    %c94 = arith.constant 94 : index
    %736 = memref.load %arg5[%c94] : memref<100xf32, #tpu.memory_space<smem>>
    %737 = vector.broadcast %736 : f32 to vector<7x7x128xf32>
    %738 = arith.mulf %737, %735 : vector<7x7x128xf32>
    %739 = arith.addf %729, %738 : vector<7x7x128xf32>
    %c9_500 = arith.constant 9 : index
    %c5_501 = arith.constant 5 : index
    %c0_502 = arith.constant 0 : index
    %740 = vector.load %arg11[%c9_500, %c5_501, %c0_502] : memref<16x16x128xf32, #tpu.memory_space<vmem>>, vector<7x7x128xf32>
    %c95 = arith.constant 95 : index
    %741 = memref.load %arg5[%c95] : memref<100xf32, #tpu.memory_space<smem>>
    %742 = vector.broadcast %741 : f32 to vector<7x7x128xf32>
    %743 = arith.mulf %742, %740 : vector<7x7x128xf32>
    %744 = arith.addf %734, %743 : vector<7x7x128xf32>
    %c9_503 = arith.constant 9 : index
    %c6_504 = arith.constant 6 : index
    %c0_505 = arith.constant 0 : index
    %745 = vector.load %arg11[%c9_503, %c6_504, %c0_505] : memref<16x16x128xf32, #tpu.memory_space<vmem>>, vector<7x7x128xf32>
    %c96 = arith.constant 96 : index
    %746 = memref.load %arg5[%c96] : memref<100xf32, #tpu.memory_space<smem>>
    %747 = vector.broadcast %746 : f32 to vector<7x7x128xf32>
    %748 = arith.mulf %747, %745 : vector<7x7x128xf32>
    %749 = arith.addf %739, %748 : vector<7x7x128xf32>
    %c9_506 = arith.constant 9 : index
    %c7_507 = arith.constant 7 : index
    %c0_508 = arith.constant 0 : index
    %750 = vector.load %arg11[%c9_506, %c7_507, %c0_508] : memref<16x16x128xf32, #tpu.memory_space<vmem>>, vector<7x7x128xf32>
    %c97 = arith.constant 97 : index
    %751 = memref.load %arg5[%c97] : memref<100xf32, #tpu.memory_space<smem>>
    %752 = vector.broadcast %751 : f32 to vector<7x7x128xf32>
    %753 = arith.mulf %752, %750 : vector<7x7x128xf32>
    %754 = arith.addf %744, %753 : vector<7x7x128xf32>
    %c9_509 = arith.constant 9 : index
    %c8_510 = arith.constant 8 : index
    %c0_511 = arith.constant 0 : index
    %755 = vector.load %arg11[%c9_509, %c8_510, %c0_511] : memref<16x16x128xf32, #tpu.memory_space<vmem>>, vector<7x7x128xf32>
    %c98 = arith.constant 98 : index
    %756 = memref.load %arg5[%c98] : memref<100xf32, #tpu.memory_space<smem>>
    %757 = vector.broadcast %756 : f32 to vector<7x7x128xf32>
    %758 = arith.mulf %757, %755 : vector<7x7x128xf32>
    %759 = arith.addf %749, %758 : vector<7x7x128xf32>
    %c9_512 = arith.constant 9 : index
    %c9_513 = arith.constant 9 : index
    %c0_514 = arith.constant 0 : index
    %760 = vector.load %arg11[%c9_512, %c9_513, %c0_514] : memref<16x16x128xf32, #tpu.memory_space<vmem>>, vector<7x7x128xf32>
    %c99 = arith.constant 99 : index
    %761 = memref.load %arg5[%c99] : memref<100xf32, #tpu.memory_space<smem>>
    %762 = vector.broadcast %761 : f32 to vector<7x7x128xf32>
    %763 = arith.mulf %762, %760 : vector<7x7x128xf32>
    %764 = arith.addf %754, %763 : vector<7x7x128xf32>
    %765 = arith.addf %759, %764 : vector<7x7x128xf32>
    %c0_515 = arith.constant 0 : index
    %c0_516 = arith.constant 0 : index
    %c0_517 = arith.constant 0 : index
    %766 = vector.load %arg10[%c0_515, %c0_516, %c0_517] : memref<7x7x128xf32, #tpu.memory_space<vmem>>, vector<7x7x128xf32>
    %cst_518 = arith.constant 2.000000e+00 : f32
    %767 = vector.broadcast %cst_518 : f32 to vector<7x7x128xf32>
    %768 = arith.cmpf ogt, %766, %767 : vector<7x7x128xf32>
    %769 = arith.extui %768 : vector<7x7x128xi1> to vector<7x7x128xi32>
    %770 = arith.sitofp %769 : vector<7x7x128xi32> to vector<7x7x128xf32>
    %cst_519 = arith.constant 8.000000e-01 : f32
    %771 = vector.broadcast %cst_519 : f32 to vector<7x7x128xf32>
    %772 = arith.mulf %771, %766 : vector<7x7x128xf32>
    %773 = arith.addf %772, %765 : vector<7x7x128xf32>
    %cst_520 = arith.constant 2.000000e+00 : f32
    %774 = vector.broadcast %cst_520 : f32 to vector<7x7x128xf32>
    %775 = arith.mulf %770, %774 : vector<7x7x128xf32>
    %776 = arith.subf %773, %775 : vector<7x7x128xf32>
    %cst_521 = arith.constant 2.000000e+00 : f32
    %777 = vector.broadcast %cst_521 : f32 to vector<7x7x128xf32>
    %778 = arith.cmpf ogt, %776, %777 : vector<7x7x128xf32>
    %779 = arith.extui %778 : vector<7x7x128xi1> to vector<7x7x128xi32>
    %780 = arith.sitofp %779 : vector<7x7x128xi32> to vector<7x7x128xf32>
    %c0_522 = arith.constant 0 : index
    %c0_523 = arith.constant 0 : index
    %c0_524 = arith.constant 0 : index
    %781 = vector.load %arg12[%c0_522, %c0_523, %c0_524] : memref<7x7x128xf32, #tpu.memory_space<vmem>>, vector<7x7x128xf32>
    tpu.vector_store %arg12[%c0_522, %c0_523, %c0_524], %780 {strides = array<i32>} : memref<7x7x128xf32, #tpu.memory_space<vmem>>, vector<7x7x128xf32>,
    %c0_525 = arith.constant 0 : index
    %c0_526 = arith.constant 0 : index
    %c0_527 = arith.constant 0 : index
    %782 = vector.load %arg15[%c0_525, %c0_526, %c0_527] : memref<7x7x128xf32, #tpu.memory_space<vmem>>, vector<7x7x128xf32>
    tpu.vector_store %arg15[%c0_525, %c0_526, %c0_527], %776 {strides = array<i32>} : memref<7x7x128xf32, #tpu.memory_space<vmem>>, vector<7x7x128xf32>,
    return
  }
  func.func @transform_0(%arg0: i32) -> i32 {
    %c0_i32 = arith.constant 0 : i32
    %c0_i32_0 = arith.constant 0 : i32
    return %c0_i32 : i32
  }
  func.func @transform_1(%arg0: i32) -> i32 {
    %c0_i32 = arith.constant 0 : i32
    %c0_i32_0 = arith.constant 0 : i32
    return %c0_i32 : i32
  }
  func.func @transform_2(%arg0: i32) -> i32 {
    %c0_i32 = arith.constant 0 : i32
    %c0_i32_0 = arith.constant 0 : i32
    return %c0_i32 : i32
  }
  func.func @transform_3(%arg0: i32) -> i32 {
    %c0_i32 = arith.constant 0 : i32
    %c0_i32_0 = arith.constant 0 : i32
    return %c0_i32 : i32
  }
  func.func @transform_4(%arg0: i32) -> i32 {
    %c0_i32 = arith.constant 0 : i32
    %c0_i32_0 = arith.constant 0 : i32
    return %c0_i32 : i32
  }
  func.func @transform_5(%arg0: i32) -> i32 {
    %c0_i32 = arith.constant 0 : i32
    %c0_i32_0 = arith.constant 0 : i32
    return %c0_i32 : i32
  }
  func.func @transform_6(%arg0: i32) -> (i32, i32, i32) {
    %c0_i32 = arith.constant 0 : i32
    %c0_i32_0 = arith.constant 0 : i32
    %c0_i32_1 = arith.constant 0 : i32
    return %c0_i32, %c0_i32_0, %arg0 : i32, i32, i32
  }
  func.func @transform_7(%arg0: i32) -> (i32, i32, i32) {
    %c0_i32 = arith.constant 0 : i32
    %c0_i32_0 = arith.constant 0 : i32
    %c0_i32_1 = arith.constant 0 : i32
    return %c0_i32, %c0_i32_0, %arg0 : i32, i32, i32
  }
  func.func @transform_8(%arg0: i32) -> (i32, i32, i32) {
    %c0_i32 = arith.constant 0 : i32
    %c0_i32_0 = arith.constant 0 : i32
    %c0_i32_1 = arith.constant 0 : i32
    return %c0_i32, %c0_i32_0, %arg0 : i32, i32, i32
  }
  func.func @transform_9(%arg0: i32) -> (i32, i32, i32) {
    %c0_i32 = arith.constant 0 : i32
    %c0_i32_0 = arith.constant 0 : i32
    %c0_i32_1 = arith.constant 0 : i32
    return %c0_i32, %c0_i32_0, %arg0 : i32, i32, i32
  }
  func.func @transform_10(%arg0: i32) -> (i32, i32, i32) {
    %c0_i32 = arith.constant 0 : i32
    %c0_i32_0 = arith.constant 0 : i32
    %c0_i32_1 = arith.constant 0 : i32
    return %c0_i32, %c0_i32_0, %arg0 : i32, i32, i32
  }
  func.func @transform_11(%arg0: i32) -> (i32, i32, i32) {
    %c0_i32 = arith.constant 0 : i32
    %c0_i32_0 = arith.constant 0 : i32
    %c0_i32_1 = arith.constant 0 : i32
    return %c0_i32, %c0_i32_0, %arg0 : i32, i32, i32
  }
  func.func @transform_12(%arg0: i32) -> (i32, i32, i32) {
    %c0_i32 = arith.constant 0 : i32
    %c0_i32_0 = arith.constant 0 : i32
    %c0_i32_1 = arith.constant 0 : i32
    return %c0_i32, %c0_i32_0, %arg0 : i32, i32, i32
  }
  func.func @transform_13(%arg0: i32) -> (i32, i32, i32) {
    %c0_i32 = arith.constant 0 : i32
    %c0_i32_0 = arith.constant 0 : i32
    %c0_i32_1 = arith.constant 0 : i32
    return %c0_i32, %c0_i32_0, %arg0 : i32, i32, i32
  }
  func.func @transform_14(%arg0: i32) -> (i32, i32, i32) {
    %c0_i32 = arith.constant 0 : i32
    %c0_i32_0 = arith.constant 0 : i32
    %c0_i32_1 = arith.constant 0 : i32
    return %c0_i32, %c0_i32_0, %arg0 : i32, i32, i32
  }
}

</mosaic_0001>

<bundles_post_ra>
// kernel: step.1
= control target key start
LH: loop header
LB: loop body
LE: loop exit
PB: predicated region body
PF: predicated region fallthrough
CT: control target
= control target key end

     0   :  { %s13639_s0 = inlined_call_operand.vmem [shape: f32[9], index: 0, kind: input, shape index: {}]   ;;  %s13640_s1 = inlined_call_operand.<no memory space> [shape: f32[1], index: 1, kind: input, shape index: {}]   ;;  %s13641_s2 = inlined_call_operand.vmem [shape: f32[9], index: 2, kind: input, shape index: {}]   ;;  %s13642_s3 = inlined_call_operand.<no memory space> [shape: f32[1], index: 3, kind: input, shape index: {}]   ;;  %s13643_s4 = inlined_call_operand.vmem [shape: f32[100], index: 4, kind: input, shape index: {}]   ;;  %s13644_s5 = inlined_call_operand.<no memory space> [shape: f32[1], index: 5, kind: input, shape index: {}]   ;;  %s13645_s6 = inlined_call_operand.vmem [shape: f32[18,18,128], index: 6, kind: input, shape index: {}]   ;;  %s13646_s7 = inlined_call_operand.vmem [shape: f32[16,16,128], index: 7, kind: input, shape index: {}, may-alias: {7,12}]   ;;  %s13647_s8 = inlined_call_operand.vmem [shape: f32[16,16,128], index: 8, kind: input, shape index: {}, may-alias: {8,13}]   ;;  %s13648_s9 = inlined_call_operand.vmem [shape: f32[7,7,128], index: 9, kind: input, shape index: {}, may-alias: {9,14}]   ;;  %s13649_s10 = inlined_call_operand.vmem [shape: f32[16,16,128], index: 10, kind: output, shape index: {0}]   ;;  %s13650_s11 = inlined_call_operand.vmem [shape: f32[7,7,128], index: 11, kind: output, shape index: {1}]   ;;  %s13651_s12 = inlined_call_operand.vmem [shape: f32[16,16,128], index: 12, kind: output, shape index: {2}, may-alias: {7,12}]   ;;  %s13652_s13 = inlined_call_operand.vmem [shape: f32[16,16,128], index: 13, kind: output, shape index: {3}, may-alias: {8,13}]   ;;  %s13653_s14 = inlined_call_operand.vmem [shape: f32[7,7,128], index: 14, kind: output, shape index: {4}, may-alias: {9,14}]  }
   0x1   :  { %13966 = sst [smem:[#allocation110_spill]] %s13648_s9 }
   0x2   :  { %13967 = sst [smem:[#allocation111_spill]] %s13650_s11 }
   0x3   :  { %13968 = sst [smem:[#allocation112_spill]] %s13653_s14 }
   0x4   :  { %23 = vsyncpa [#allocation7], 0 }
   0x5   :  { %24 = vsyncpa [#allocation9], 0  ;;  %s43_s15 = sshll.u32 %s13641_s2, 4  ;;  %s31_s18 = sshll.u32 %s13639_s0, 4  ;;  %s44_s15 = int_to_ptr.vmem [resolvable:$true] %s43_s15  ;;  %s32_s18 = int_to_ptr.vmem [resolvable:$true] %s31_s18 }
   0x6   :  { %s6452_s19 = scalar_lea.vmem %s44_s15, 16  ;;  %p6457_p1 = scmp.lt.s32.totalorder %s44_s15, %s44_s15 }
   0x7   :  { %p6453_p0 = scmp.ne.s32.totalorder %s44_s15, %s6452_s19  ;;  %p6458_p2 = scmp.lt.s32.totalorder %s6452_s19, %s6452_s19 }
   0x9   :  { %p6459_p3 = por %p6458_p2, %p6457_p1 }
   0xb   :  { %p6460_p4 = pnand %p6459_p3, %p6453_p0 }
   0xd   :  { %6463 = shalt.err (!%p6460_p4)
}
   0xe   :  { %s6492_s20 = smov [#allocation8]   ;;  %s6464_s21 = scalar_lea.vmem %s32_s18, 16 }
   0xf   :  { %46 = dma.vmem_to_smem %s44_s15, 16, %s6492_s20, [#allocation9]  }
  0x10   :  { %p6465_p5 = scmp.ne.s32.totalorder %s32_s18, %s6464_s21  ;;  %p6469_p6 = scmp.lt.s32.totalorder %s32_s18, %s32_s18 }
  0x11   :  { %p6470_p7 = scmp.lt.s32.totalorder %s6464_s21, %s6464_s21 }
  0x13   :  { %p6471_p8 = por %p6470_p7, %p6469_p6 }
  0x15   :  { %p6472_p9 = pnand %p6471_p8, %p6465_p5 }
  0x17   :  { %6475 = shalt.err (!%p6472_p9)
}
  0x18   :  { %s6493_s2 = smov [#allocation6]   ;;  %s55_s23 = sshll.u32 %s13643_s4, 4  ;;  %s56_s23 = int_to_ptr.vmem [resolvable:$true] %s55_s23 }
  0x19   :  { %34 = dma.vmem_to_smem %s32_s18, 16, %s6493_s2, [#allocation7]  }
  0x1a   :  { %s6476_s24 = scalar_lea.vmem %s56_s23, 16  ;;  %p6481_p11 = scmp.lt.s32.totalorder %s56_s23, %s56_s23 }
  0x1b   :  { %p6477_p10 = scmp.ne.s32.totalorder %s56_s23, %s6476_s24  ;;  %p6482_p12 = scmp.lt.s32.totalorder %s6476_s24, %s6476_s24 }
  0x1d   :  { %p6483_p13 = por %p6482_p12, %p6481_p11 }
  0x1f   :  { %p6484_p0 = pnand %p6483_p13, %p6477_p10 }
  0x21   :  { %6487 = shalt.err (!%p6484_p0)
}
  0x22   :  { %s6494_s25 = smov [#allocation10]  }
  0x23   :  { %58 = dma.vmem_to_smem %s56_s23, 16, %s6494_s25, [#allocation9]  }
  0x24   :  { %6488 = dma.done.wait [#allocation7], 16  }
  0x25   :  { %6489 = vsyncadd [#allocation7], 4294967280 }
  0x26   :  { %6490 = dma.done.wait [#allocation9], 32  }
  0x27   :  { %6491 = vsyncadd [#allocation9], 4294967264 }
  0x28   :  { %78 = sfence }
  0x29   :  { %s6580_s26 = sld [smem:[#allocation6]]  ;;  %v6495_v0 = vmov 0.0   ;;  %s5207_s4 = sld [smem:[#allocation6 + $0x1]]  ;;  %v124_v1 = vld [vmem:[%s13645_s6] sm:$0xff]  ;;  %v6636_v4 = vstv %s13640_s1  ;;  %v5209_v11 = vld [vmem:[%s13645_s6 + $0x18] sm:$0xff]  ;;  %v125_v18 = vld [vmem:[%s13645_s6 + $0x8] sm:$0xff] }
  0x2a   :  { %79 = vst [vmem:[#allocation2] sm:$0xff] %v6495_v0  ;;  %80 = vst [vmem:[#allocation2 + $0x8] sm:$0xff] %v6495_v0  ;;  %s5208_s27 = sld [smem:[#allocation6 + $0x2]]  ;;  %s5225_s28 = sld [smem:[#allocation6 + $0x3]]  ;;  %v576_v2 = vld [vmem:[%s13646_s7] sm:$0xff]  ;;  %v175_v19 = vld [vmem:[%s13645_s6 + $0x9] sm:$0xff] }
  0x2b   :  { %81 = vst [vmem:[#allocation2 + $0x10] sm:$0x3] %v6495_v0  ;;  %83 = vst [vmem:[#allocation2 + $0x198] sm:$0xff] %v6495_v0  ;;  %s5242_s29 = sld [smem:[#allocation6 + $0x4]]  ;;  %s5259_s30 = sld [smem:[#allocation6 + $0x5]]  ;;  %v174_v3 = vld [vmem:[%s13645_s6 + $0x1] sm:$0xff] }
  0x2c   :  { %84 = vst [vmem:[#allocation2 + $0x1a0] sm:$0xff] %v6495_v0  ;;  %85 = vst [vmem:[#allocation2 + $0x1a8] sm:$0x3] %v6495_v0  ;;  %s5276_s15 = sld [smem:[#allocation6 + $0x6]]  ;;  %s5293_s18 = sld [smem:[#allocation6 + $0x7]]  ;;  %vm592_vm0 = vcmp.gt.f32.partialorder %v576_v2, 2.0 }
  0x2d   :  { %87 = vst [vmem:[#allocation2 + $0x18] sm:$0x1] %v6495_v0  ;;  %88 = vst [vmem:[#allocation2 + $0x30] sm:$0x1] %v6495_v0  ;;  %s5310_s19 = sld [smem:[#allocation6 + $0x8]]  ;;  %v224_v6 = vld [vmem:[%s13645_s6 + $0x2] sm:$0xff] }
  0x2e   :  { %89 = vst [vmem:[#allocation2 + $0x48] sm:$0x1] %v6495_v0  ;;  %90 = vst [vmem:[#allocation2 + $0x60] sm:$0x1] %v6495_v0  ;;  %v5311_v13 = vsel %vm592_vm0, 1.0, %v6495_v0  ;;  %v5226_v20 = vld [vmem:[%s13645_s6 + $0x19] sm:$0xff] }
  0x2f   :  { %91 = vst [vmem:[#allocation2 + $0x78] sm:$0x1] %v6495_v0  ;;  %92 = vst [vmem:[#allocation2 + $0x90] sm:$0x1] %v6495_v0  ;;  %v6639_v5 = vstv %s6580_s26  ;;  %v6645_v8 = vstv %s5207_s4  ;;  %v5243_v26 = vld [vmem:[%s13645_s6 + $0x1a] sm:$0xff]  ;;  %v6683_v28 = vmul.f32 2.0, %v5311_v13 }
  0x30   :  { %93 = vst [vmem:[#allocation2 + $0xa8] sm:$0x1] %v6495_v0  ;;  %94 = vst [vmem:[#allocation2 + $0xc0] sm:$0x1] %v6495_v0  ;;  %v142_v7 = vmul.f32 %v6639_v5, %v124_v1  ;;  %v6647_v9 = vstv %s5208_s27  ;;  %v192_v10 = vmul.f32 %v6645_v8, %v174_v3  ;;  %v6653_v12 = vstv %s5225_s28  ;;  %v225_v29 = vld [vmem:[%s13645_s6 + $0xa] sm:$0xff]  ;;  %v6706_v35 = vld [vmem:[%s13645_s6 + $0x32] sm:$0xff] }
  0x31   :  { %95 = vst [vmem:[#allocation2 + $0xd8] sm:$0x1] %v6495_v0  ;;  %96 = vst [vmem:[#allocation2 + $0xf0] sm:$0x1] %v6495_v0  ;;  %v242_v15 = vmul.f32 %v6647_v9, %v224_v6  ;;  %v6658_v16 = vstv %s5242_s29  ;;  %v6660_v17 = vstv %s5259_s30  ;;  %v293_v25 = vmul.f32 %v5209_v11, %v6653_v12  ;;  %v577_v30 = vld [vmem:[%s13646_s7 + $0x8] sm:$0xff]  ;;  %v6696_v33 = vld [vmem:[%s13645_s6 + $0x30] sm:$0xff] }
  0x32   :  { %97 = vst [vmem:[#allocation2 + $0x108] sm:$0x1] %v6495_v0  ;;  %98 = vst [vmem:[#allocation2 + $0x120] sm:$0x1] %v6495_v0  ;;  %v158_v14 = vadd.f32 %v142_v7, %v6636_v4  ;;  %v6671_v21 = vstv %s5276_s15  ;;  %v6673_v22 = vstv %s5293_s18  ;;  %v6681_v27 = vmul.f32 0.8, %v576_v2 }
  0x33   :  { %99 = vst [vmem:[#allocation2 + $0x138] sm:$0x1] %v6495_v0  ;;  %100 = vst [vmem:[#allocation2 + $0x150] sm:$0x1] %v6495_v0  ;;  %v6675_v23 = vstv %s5310_s19  ;;  %v343_v31 = vmul.f32 %v5226_v20, %v6658_v16  ;;  %v393_v32 = vmul.f32 %v5243_v26, %v6660_v17  ;;  %v6701_v34 = vld [vmem:[%s13645_s6 + $0x31] sm:$0xff]  ;;  %v143_v36 = vmul.f32 %v6639_v5, %v125_v18  ;;  %v5210_v42 = vld [vmem:[%s13645_s6 + $0x20] sm:$0xff] }
  0x34   :  { %101 = vst [vmem:[#allocation2 + $0x168] sm:$0x1] %v6495_v0  ;;  %102 = vst [vmem:[#allocation2 + $0x180] sm:$0x1] %v6495_v0  ;;  %v208_v24 = vadd.f32 %v192_v10, %v158_v14  ;;  %v193_v37 = vmul.f32 %v6645_v8, %v175_v19  ;;  %v444_v39 = vmul.f32 %v6696_v33, %v6671_v21  ;;  %v5227_v46 = vld [vmem:[%s13645_s6 + $0x21] sm:$0xff]  ;;  %vm593_vm1 = vcmp.gt.f32.partialorder %v577_v30, 2.0 }
  0x35   :  { %105 = vst [vmem:[#allocation2 + $0x29] sm:$0x1] %v6495_v0  ;;  %106 = vst [vmem:[#allocation2 + $0x41] sm:$0x1] %v6495_v0  ;;  %v494_v40 = vmul.f32 %v6701_v34, %v6673_v22  ;;  %v544_v41 = vmul.f32 %v6706_v35, %v6675_v23  ;;  %v159_v43 = vadd.f32 %v143_v36, %v6636_v4  ;;  %v5244_v49 = vld [vmem:[%s13645_s6 + $0x22] sm:$0xff]  ;;  %v6732_v50 = vld [vmem:[%s13645_s6 + $0x38] sm:$0xff] }
  0x36   :  { %107 = vst [vmem:[#allocation2 + $0x59] sm:$0x1] %v6495_v0  ;;  %108 = vst [vmem:[#allocation2 + $0x71] sm:$0x1] %v6495_v0  ;;  %v258_v38 = vadd.f32 %v242_v15, %v208_v24  ;;  %v243_v44 = vmul.f32 %v6647_v9, %v225_v29  ;;  %v294_v45 = vmul.f32 %v5210_v42, %v6653_v12  ;;  %v5312_v51 = vsel %vm593_vm1, 1.0, %v6495_v0  ;;  %v6742_v56 = vld [vmem:[%s13645_s6 + $0x39] sm:$0xff] }
  0x37   :  { %109 = vst [vmem:[#allocation2 + $0x89] sm:$0x1] %v6495_v0  ;;  %110 = vst [vmem:[#allocation2 + $0xa1] sm:$0x1] %v6495_v0  ;;  %v344_v48 = vmul.f32 %v5227_v46, %v6658_v16  ;;  %v144_v52 = vmul.f32 %v5209_v11, %v6639_v5  ;;  %v209_v53 = vadd.f32 %v193_v37, %v159_v43  ;;  %v578_v58 = vld [vmem:[%s13646_s7 + $0x10] sm:$0xff]  ;;  %v6753_v61 = vld [vmem:[%s13645_s6 + $0x3a] sm:$0xff] }
  0x38   :  { %111 = vst [vmem:[#allocation2 + $0xb9] sm:$0x1] %v6495_v0  ;;  %112 = vst [vmem:[#allocation2 + $0xd1] sm:$0x1] %v6495_v0  ;;  %v309_v47 = vadd.f32 %v293_v25, %v258_v38  ;;  %v394_v54 = vmul.f32 %v5244_v49, %v6660_v17  ;;  %v445_v55 = vmul.f32 %v6732_v50, %v6671_v21  ;;  %v6759_v3 = vmul.f32 0.8, %v577_v30 }
  0x39   :  { %113 = vst [vmem:[#allocation2 + $0xe9] sm:$0x1] %v6495_v0  ;;  %114 = vst [vmem:[#allocation2 + $0x101] sm:$0x1] %v6495_v0  ;;  %v194_v57 = vmul.f32 %v5226_v20, %v6645_v8  ;;  %v495_v60 = vmul.f32 %v6742_v56, %v6673_v22  ;;  %v160_v62 = vadd.f32 %v144_v52, %v6636_v4  ;;  %v6761_v6 = vmul.f32 2.0, %v5312_v51  ;;  %v6772_v18 = vld [vmem:[%s13645_s6 + $0x48] sm:$0xff] }
  0x3a   :  { %115 = vst [vmem:[#allocation2 + $0x119] sm:$0x1] %v6495_v0  ;;  %116 = vst [vmem:[#allocation2 + $0x131] sm:$0x1] %v6495_v0  ;;  %v359_v59 = vadd.f32 %v343_v31, %v309_v47  ;;  %v244_v63 = vmul.f32 %v5243_v26, %v6647_v9  ;;  %v259_v1 = vadd.f32 %v243_v44, %v209_v53  ;;  %vm594_vm2 = vcmp.gt.f32.partialorder %v578_v58, 2.0  ;;  %v6781_v30 = vld [vmem:[%s13645_s6 + $0x49] sm:$0xff] }
  0x3b   :  { %117 = vst [vmem:[#allocation2 + $0x149] sm:$0x1] %v6495_v0  ;;  %118 = vst [vmem:[#allocation2 + $0x161] sm:$0x1] %v6495_v0  ;;  %v545_v2 = vmul.f32 %v6753_v61, %v6675_v23  ;;  %v210_v10 = vadd.f32 %v194_v57, %v160_v62  ;;  %v295_v11 = vmul.f32 %v6696_v33, %v6653_v12  ;;  %v6786_v31 = vld [vmem:[%s13645_s6 + $0x4a] sm:$0xff]  ;;  %s7282_s24 = sld [smem:[#allocation6]] }
  0x3c   :  { %119 = vst [vmem:[#allocation2 + $0x179] sm:$0x1] %v6495_v0  ;;  %120 = vst [vmem:[#allocation2 + $0x191] sm:$0x1] %v6495_v0  ;;  %v409_v7 = vadd.f32 %v393_v32, %v359_v59  ;;  %v310_v13 = vadd.f32 %v294_v45, %v259_v1  ;;  %v345_v14 = vmul.f32 %v6701_v34, %v6658_v16  ;;  %v5313_v32 = vsel %vm594_vm2, 1.0, %v6495_v0  ;;  %v6805_v53 = vld [vmem:[%s13645_s6 + $0x50] sm:$0xff] }
  0x3d   :  { %86 = vst [vmem:[#allocation2] sm:$0x1] %v6495_v0  ;;  %103 = vst [vmem:[#allocation2 + $0x198] sm:$0x1] %v6495_v0  ;;  %v395_v15 = vmul.f32 %v6706_v35, %v6660_v17  ;;  %v145_v19 = vmul.f32 %v5210_v42, %v6639_v5  ;;  %v260_v24 = vadd.f32 %v244_v63, %v210_v10  ;;  %v642_v45 = vmul.f32 0.8, %v578_v58 }
  0x3e   :  { %104 = vst [vmem:[#allocation2 + $0x11] sm:$0x1] %v6495_v0  ;;  %121 = vst [vmem:[#allocation2 + $0x1a9] sm:$0x1] %v6495_v0  ;;  %v460_v20 = vadd.f32 %v444_v39, %v409_v7  ;;  %v446_v25 = vmul.f32 %v6772_v18, %v6671_v21  ;;  %v195_v26 = vmul.f32 %v5227_v46, %v6645_v8  ;;  %v6815_v63 = vld [vmem:[%s13645_s6 + $0x51] sm:$0xff]  ;;  %s7291_s25 = sld [smem:[#allocation6 + $0x1]] }
  0x3f   :  { %13969 = vst [vmem:[#allocation13_spill] sm:$0xff] %v6636_v4  ;;  %v360_v29 = vadd.f32 %v344_v48, %v310_v13  ;;  %v161_v36 = vadd.f32 %v145_v19, %v6636_v4  ;;  %v245_v37 = vmul.f32 %v5244_v49, %v6647_v9  ;;  %v311_v39 = vadd.f32 %v295_v11, %v260_v24  ;;  %v579_v48 = vld [vmem:[%s13646_s7 + $0x18] sm:$0xff]  ;;  %s7301_s1 = sld [smem:[#allocation6 + $0x2]]  ;;  %s7309_s26 = sld [smem:[#allocation6 + $0x3]] }
  0x40   :  { %v510_v38 = vadd.f32 %v494_v40, %v460_v20  ;;  %v496_v42 = vmul.f32 %v6781_v30, %v6673_v22  ;;  %v546_v43 = vmul.f32 %v6786_v31, %v6675_v23  ;;  %v296_v47 = vmul.f32 %v6732_v50, %v6653_v12  ;;  %s7314_s4 = sld [smem:[#allocation6 + $0x4]]  ;;  %s7333_s2 = sld [smem:[#allocation6 + $0x5]] }
  0x41   :  { %v410_v44 = vadd.f32 %v394_v54, %v360_v29  ;;  %v211_v46 = vadd.f32 %v195_v26, %v161_v36  ;;  %v361_v49 = vadd.f32 %v345_v14, %v311_v39  ;;  %v674_v40 = vmul.f32 2.0, %v5313_v32  ;;  %v6827_v14 = vld [vmem:[%s13645_s6 + $0x52] sm:$0xff]  ;;  %v6850_v39 = vld [vmem:[%s13645_s6 + $0x60] sm:$0xff]  ;;  %s7345_s15 = sld [smem:[#allocation6 + $0x6]]  ;;  %s7357_s0 = sld [smem:[#allocation6 + $0x7]] }
  0x42   :  { %v560_v51 = vadd.f32 %v544_v41, %v510_v38  ;;  %v346_v52 = vmul.f32 %v6742_v56, %v6658_v16  ;;  %v396_v58 = vmul.f32 %v6753_v61, %v6660_v17  ;;  %v447_v59 = vmul.f32 %v6805_v53, %v6671_v21  ;;  %s7364_s22 = sld [smem:[#allocation6 + $0x8]]  ;;  %s7512_s20 = sld [smem:[#allocation8 + $0x2]] }
  0x43   :  { %v461_v54 = vadd.f32 %v445_v55, %v410_v44  ;;  %v261_v57 = vadd.f32 %v245_v37, %v211_v46  ;;  %v411_v62 = vadd.f32 %v395_v15, %v361_v49  ;;  %vm595_vm3 = vcmp.gt.f32.partialorder %v579_v48, 2.0  ;;  %s7514_s29 = sld [smem:[#allocation8 + $0x3]]  ;;  %s7611_s21 = sld [smem:[#allocation8 + $0x8]] }
  0x44   :  { %v656_v41 = vadd.f32 %v6681_v27, %v560_v51  ;;  %v146_v1 = vmul.f32 %v6696_v33, %v6639_v5  ;;  %v497_v10 = vmul.f32 %v6815_v63, %v6673_v22  ;;  %v196_v11 = vmul.f32 %v6701_v34, %v6645_v8  ;;  %s7662_s23 = sld [smem:[#allocation10]]  ;;  %s7670_s16 = sld [smem:[#allocation10 + $0x3]] }
  0x45   :  { %v511_v55 = vadd.f32 %v495_v60, %v461_v54  ;;  %v312_v7 = vadd.f32 %v296_v47, %v261_v57  ;;  %v462_v13 = vadd.f32 %v446_v25, %v411_v62  ;;  %v246_v33 = vmul.f32 %v6706_v35, %v6647_v9  ;;  %s7679_s17 = sld [smem:[#allocation10 + $0x4]]  ;;  %s7697_s28 = sld [smem:[#allocation10 + $0x5]] }
  0x46   :  { %v688_v27 = vsub.f32 %v656_v41, %v6683_v28  ;;  %v162_v15 = vadd.f32 %v146_v1, %v6636_v4  ;;  %v547_v20 = vmul.f32 %v6827_v14, %v6675_v23  ;;  %v5314_v34 = vsel %vm595_vm3, 1.0, %v6495_v0  ;;  %v580_v28 = vld [vmem:[%s13646_s7 + $0x20] sm:$0xff]  ;;  %s7718_s30 = sld [smem:[#allocation10 + $0x9]]  ;;  %s8263_s18 = sld [smem:[#allocation10 + $0xa]] }
  0x47   :  { %v561_v60 = vadd.f32 %v545_v2, %v511_v55  ;;  %v362_v19 = vadd.f32 %v346_v52, %v312_v7  ;;  %v512_v24 = vadd.f32 %v496_v42, %v462_v13  ;;  %v297_v35 = vmul.f32 %v6772_v18, %v6653_v12  ;;  %s8267_s19 = sld [smem:[#allocation10 + $0xb]]  ;;  %s8295_s27 = sld [smem:[#allocation10 + $0x10]] }
  0x48   :  { %vm704_vm4 = vcmp.gt.f32.partialorder %v688_v27, 2.0  ;;  %752 = vst [vmem:[%s13651_s12] sm:$0xff] %v688_v27  ;;  %v212_v25 = vadd.f32 %v196_v11, %v162_v15  ;;  %v643_v32 = vmul.f32 0.8, %v579_v48  ;;  %v347_v38 = vmul.f32 %v6781_v30, %v6658_v16  ;;  %s8685_s11 = sld [smem:[#allocation10 + $0x32]]  ;;  %s8713_s9 = sld [smem:[#allocation10 + $0x33]] }
  0x49   :  { %v5327_v2 = vsel %vm704_vm4, 1.0, %v6495_v0  ;;  %v657_v26 = vadd.f32 %v6759_v3, %v561_v60  ;;  %v412_v29 = vadd.f32 %v396_v58, %v362_v19  ;;  %v562_v36 = vadd.f32 %v546_v43, %v512_v24  ;;  %v6876_v58 = vld [vmem:[%s13645_s6 + $0x62] sm:$0xff]  ;;  %s9130_s14 = sld [smem:[#allocation10 + $0x3b]] }
  0x4a   :  { %769 = vst [vmem:[#allocation2 + $0x19] sm:$0xff] %v5327_v2  ;;  %v262_v37 = vadd.f32 %v246_v33, %v212_v25  ;;  %vm596_vm5 = vcmp.gt.f32.partialorder %v580_v28, 2.0  ;;  %v397_v3 = vmul.f32 %v6786_v31, %v6660_v17  ;;  %v448_v46 = vmul.f32 %v6850_v39, %v6671_v21 }
  0x4b   :  { %v689_v42 = vsub.f32 %v657_v26, %v6761_v6  ;;  %v463_v44 = vadd.f32 %v447_v59, %v412_v29  ;;  %v658_v43 = vadd.f32 %v642_v45, %v562_v36  ;;  %v5315_v48 = vsel %vm596_vm5, 1.0, %v6495_v0  ;;  %v6910_v26 = vld [vmem:[%s13645_s6 + $0x69] sm:$0xff] }
  0x4c   :  { %v313_v47 = vadd.f32 %v297_v35, %v262_v37  ;;  %v147_v51 = vmul.f32 %v6732_v50, %v6639_v5  ;;  %v197_v49 = vmul.f32 %v6742_v56, %v6645_v8  ;;  %v247_v52 = vmul.f32 %v6753_v61, %v6647_v9  ;;  %v6871_v50 = vld [vmem:[%s13645_s6 + $0x61] sm:$0xff] }
  0x4d   :  { %vm705_vm6 = vcmp.gt.f32.partialorder %v689_v42, 2.0  ;;  %753 = vst [vmem:[%s13651_s12 + $0x8] sm:$0xff] %v689_v42  ;;  %v513_v6 = vadd.f32 %v497_v10, %v463_v44  ;;  %v690_v54 = vsub.f32 %v658_v43, %v674_v40  ;;  %v675_v41 = vmul.f32 2.0, %v5314_v34  ;;  %v6899_v34 = vld [vmem:[%s13645_s6 + $0x68] sm:$0xff] }
  0x4e   :  { %v5328_v45 = vsel %vm705_vm6, 1.0, %v6495_v0  ;;  %v363_v57 = vadd.f32 %v347_v38, %v313_v47  ;;  %v163_v59 = vadd.f32 %v147_v51, %v6636_v4  ;;  %v498_v61 = vmul.f32 %v6871_v50, %v6673_v22 }
  0x4f   :  { %770 = vst [vmem:[#allocation2 + $0x21] sm:$0xff] %v5328_v45  ;;  %v563_v56 = vadd.f32 %v547_v20, %v513_v6  ;;  %v548_v40 = vmul.f32 %v6876_v58, %v6675_v23  ;;  %vm706_vm7 = vcmp.gt.f32.partialorder %v690_v54, 2.0  ;;  %v298_v7 = vmul.f32 %v6805_v53, %v6653_v12  ;;  %v6941_v45 = vld [vmem:[%s13645_s6 + $0x78] sm:$0xff] }
  0x50   :  { %v413_v1 = vadd.f32 %v397_v3, %v363_v57  ;;  %v213_v55 = vadd.f32 %v197_v49, %v163_v59  ;;  %v5329_v10 = vsel %vm706_vm7, 1.0, %v6495_v0  ;;  %v644_v27 = vmul.f32 0.8, %v580_v28 }
  0x51   :  { %v659_v11 = vadd.f32 %v643_v32, %v563_v56  ;;  %v676_v13 = vmul.f32 2.0, %v5315_v48  ;;  %771 = vst [vmem:[#allocation2 + $0x31] sm:$0xff] %v5329_v10  ;;  %v348_v60 = vmul.f32 %v6815_v63, %v6658_v16  ;;  %v398_v20 = vmul.f32 %v6827_v14, %v6660_v17 }
  0x52   :  { %v464_v15 = vadd.f32 %v448_v46, %v413_v1  ;;  %v263_v33 = vadd.f32 %v247_v52, %v213_v55  ;;  %v148_v28 = vmul.f32 %v6772_v18, %v6639_v5  ;;  %v198_v24 = vmul.f32 %v6781_v30, %v6645_v8  ;;  %v6921_v30 = vld [vmem:[%s13645_s6 + $0x6a] sm:$0xff]  ;;  %v6959_v1 = vld [vmem:[%s13645_s6 + $0x7a] sm:$0xff] }
  0x53   :  { %v691_v19 = vsub.f32 %v659_v11, %v675_v41  ;;  %v449_v2 = vmul.f32 %v6899_v34, %v6671_v21  ;;  %v499_v18 = vmul.f32 %v6910_v26, %v6673_v22  ;;  %v248_v36 = vmul.f32 %v6786_v31, %v6647_v9 }
  0x54   :  { %v581_v62 = vld [vmem:[%s13646_s7 + $0x28] sm:$0xff]  ;;  %v514_v25 = vadd.f32 %v498_v61, %v464_v15  ;;  %v314_v35 = vadd.f32 %v298_v7, %v263_v33  ;;  %v164_v32 = vadd.f32 %v148_v28, %v6636_v4  ;;  %v549_v3 = vmul.f32 %v6921_v30, %v6675_v23 }
  0x55   :  { %754 = vst [vmem:[%s13651_s12 + $0x10] sm:$0xff] %v690_v54  ;;  %vm597_vm8 = vcmp.gt.f32.partialorder %v581_v62, 2.0  ;;  %vm707_vm9 = vcmp.gt.f32.partialorder %v691_v19, 2.0  ;;  %755 = vst [vmem:[%s13651_s12 + $0x18] sm:$0xff] %v691_v19  ;;  %v645_v46 = vmul.f32 0.8, %v581_v62  ;;  %v299_v48 = vmul.f32 %v6850_v39, %v6653_v12 }
  0x56   :  { %v5316_v29 = vsel %vm597_vm8, 1.0, %v6495_v0  ;;  %v5330_v38 = vsel %vm707_vm9, 1.0, %v6495_v0  ;;  %v564_v42 = vadd.f32 %v548_v40, %v514_v25  ;;  %v364_v44 = vadd.f32 %v348_v60, %v314_v35  ;;  %v6946_v54 = vld [vmem:[%s13645_s6 + $0x79] sm:$0xff] }
  0x57   :  { %772 = vst [vmem:[#allocation2 + $0x39] sm:$0xff] %v5330_v38  ;;  %v677_v43 = vmul.f32 2.0, %v5316_v29  ;;  %v214_v47 = vadd.f32 %v198_v24, %v164_v32  ;;  %v349_v6 = vmul.f32 %v6871_v50, %v6658_v16  ;;  %v399_v52 = vmul.f32 %v6876_v58, %v6660_v17  ;;  %v6983_v35 = vld [vmem:[%s13645_s6 + $0x80] sm:$0xff] }
  0x58   :  { %v660_v51 = vadd.f32 %v644_v27, %v564_v42  ;;  %v414_v31 = vadd.f32 %v398_v20, %v364_v44  ;;  %v149_v57 = vmul.f32 %v6805_v53, %v6639_v5  ;;  %v199_v59 = vmul.f32 %v6815_v63, %v6645_v8  ;;  %v6995_v42 = vld [vmem:[%s13645_s6 + $0x81] sm:$0xff] }
  0x59   :  { %v264_v49 = vadd.f32 %v248_v36, %v214_v47  ;;  %v450_v61 = vmul.f32 %v6941_v45, %v6671_v21  ;;  %v500_v40 = vmul.f32 %v6946_v54, %v6673_v22  ;;  %v249_v63 = vmul.f32 %v6827_v14, %v6647_v9 }
  0x5a   :  { %v692_v56 = vsub.f32 %v660_v51, %v676_v13  ;;  %v465_v41 = vadd.f32 %v449_v2, %v414_v31  ;;  %v165_v53 = vadd.f32 %v149_v57, %v6636_v4  ;;  %v550_v11 = vmul.f32 %v6959_v1, %v6675_v23 }
  0x5b   :  { %v315_v62 = vadd.f32 %v299_v48, %v264_v49  ;;  %v300_v14 = vmul.f32 %v6899_v34, %v6653_v12  ;;  %v350_v20 = vmul.f32 %v6910_v26, %v6658_v16  ;;  %v400_v25 = vmul.f32 %v6921_v30, %v6660_v17 }
  0x5c   :  { %v582_v37 = vld [vmem:[%s13646_s7 + $0x30] sm:$0xff]  ;;  %v583_v7 = vld [vmem:[%s13646_s7 + $0x38] sm:$0xff]  ;;  %vm708_vm11 = vcmp.gt.f32.partialorder %v692_v56, 2.0  ;;  %v515_v10 = vadd.f32 %v499_v18, %v465_v41  ;;  %v215_v33 = vadd.f32 %v199_v59, %v165_v53  ;;  %v150_v2 = vmul.f32 %v6850_v39, %v6639_v5  ;;  %v7000_v39 = vld [vmem:[%s13645_s6 + $0x82] sm:$0xff] }
  0x5d   :  { %vm598_vm10 = vcmp.gt.f32.partialorder %v582_v37, 2.0  ;;  %756 = vst [vmem:[%s13651_s12 + $0x20] sm:$0xff] %v692_v56  ;;  %v646_v27 = vmul.f32 0.8, %v582_v37  ;;  %v5331_v13 = vsel %vm708_vm11, 1.0, %v6495_v0  ;;  %v365_v15 = vadd.f32 %v349_v6, %v315_v62 }
  0x5e   :  { %v5317_v55 = vsel %vm598_vm10, 1.0, %v6495_v0  ;;  %773 = vst [vmem:[#allocation2 + $0x49] sm:$0xff] %v5331_v13  ;;  %v565_v60 = vadd.f32 %v549_v3, %v515_v10  ;;  %vm599_vm12 = vcmp.gt.f32.partialorder %v583_v7, 2.0  ;;  %v265_v24 = vadd.f32 %v249_v63, %v215_v33  ;;  %v7041_v13 = vld [vmem:[%s13645_s6 + $0x92] sm:$0xff] }
  0x5f   :  { %v678_v19 = vmul.f32 2.0, %v5317_v55  ;;  %v415_v28 = vadd.f32 %v399_v52, %v365_v15  ;;  %v451_v18 = vmul.f32 %v6983_v35, %v6671_v21  ;;  %v5318_v32 = vsel %vm599_vm12, 1.0, %v6495_v0 }
  0x60   :  { %v661_v29 = vadd.f32 %v645_v46, %v565_v60  ;;  %v200_v36 = vmul.f32 %v6871_v50, %v6645_v8  ;;  %v316_v38 = vadd.f32 %v300_v14, %v265_v24  ;;  %v166_v44 = vadd.f32 %v150_v2, %v6636_v4 }
  0x61   :  { %v466_v37 = vadd.f32 %v450_v61, %v415_v28  ;;  %v250_v3 = vmul.f32 %v6876_v58, %v6647_v9  ;;  %v501_v47 = vmul.f32 %v6995_v42, %v6673_v22  ;;  %v551_v48 = vmul.f32 %v7000_v39, %v6675_v23  ;;  %v7023_v61 = vld [vmem:[%s13645_s6 + $0x90] sm:$0xff] }
  0x62   :  { %v693_v46 = vsub.f32 %v661_v29, %v677_v43  ;;  %v647_v51 = vmul.f32 0.8, %v583_v7  ;;  %v366_v6 = vadd.f32 %v350_v20, %v316_v38  ;;  %v216_v49 = vadd.f32 %v200_v36, %v166_v44 }
  0x63   :  { %v516_v31 = vadd.f32 %v500_v40, %v466_v37  ;;  %v301_v52 = vmul.f32 %v6941_v45, %v6653_v12  ;;  %v679_v58 = vmul.f32 2.0, %v5318_v32  ;;  %v351_v43 = vmul.f32 %v6946_v54, %v6658_v16 }
  0x64   :  { %v584_v50 = vld [vmem:[%s13646_s7 + $0x40] sm:$0xff]  ;;  %vm709_vm13 = vcmp.gt.f32.partialorder %v693_v46, 2.0  ;;  %v416_v56 = vadd.f32 %v400_v25, %v366_v6  ;;  %v266_v41 = vadd.f32 %v250_v3, %v216_v49  ;;  %v401_v40 = vmul.f32 %v6959_v1, %v6660_v17 }
  0x65   :  { %757 = vst [vmem:[%s13651_s12 + $0x28] sm:$0xff] %v693_v46  ;;  %vm600_vm14 = vcmp.gt.f32.partialorder %v584_v50, 2.0  ;;  %v5332_v57 = vsel %vm709_vm13, 1.0, %v6495_v0  ;;  %v566_v59 = vadd.f32 %v550_v11, %v516_v31  ;;  %v452_v62 = vmul.f32 %v7023_v61, %v6671_v21  ;;  %v7036_v11 = vld [vmem:[%s13645_s6 + $0x91] sm:$0xff]  ;;  %v7074_v46 = vld [vmem:[%s13645_s6 + $0x99] sm:$0xff] }
  0x66   :  { %774 = vst [vmem:[#allocation2 + $0x51] sm:$0xff] %v5332_v57  ;;  %v151_v55 = vmul.f32 %v6899_v34, %v6639_v5  ;;  %v201_v53 = vmul.f32 %v6910_v26, %v6645_v8  ;;  %v467_v7 = vadd.f32 %v451_v18, %v416_v56  ;;  %v317_v10 = vadd.f32 %v301_v52, %v266_v41 }
  0x67   :  { %v662_v63 = vadd.f32 %v646_v27, %v566_v59  ;;  %v5319_v15 = vsel %vm600_vm14, 1.0, %v6495_v0  ;;  %v502_v26 = vmul.f32 %v7036_v11, %v6673_v22  ;;  %v552_v27 = vmul.f32 %v7041_v13, %v6675_v23 }
  0x68   :  { %v167_v33 = vadd.f32 %v151_v55, %v6636_v4  ;;  %v251_v14 = vmul.f32 %v6921_v30, %v6647_v9  ;;  %v517_v20 = vadd.f32 %v501_v47, %v467_v7  ;;  %v367_v28 = vadd.f32 %v351_v43, %v317_v10  ;;  %v7079_v47 = vld [vmem:[%s13645_s6 + $0x9a] sm:$0xff] }
  0x69   :  { %v694_v60 = vsub.f32 %v662_v63, %v678_v19  ;;  %v648_v24 = vmul.f32 0.8, %v584_v50  ;;  %v680_v25 = vmul.f32 2.0, %v5319_v15  ;;  %v302_v29 = vmul.f32 %v6983_v35, %v6653_v12  ;;  %v7069_v50 = vld [vmem:[%s13645_s6 + $0x98] sm:$0xff] }
  0x6a   :  { %v217_v2 = vadd.f32 %v201_v53, %v167_v33  ;;  %v567_v18 = vadd.f32 %v551_v48, %v517_v20  ;;  %v417_v32 = vadd.f32 %v401_v40, %v367_v28  ;;  %v352_v30 = vmul.f32 %v6995_v42, %v6658_v16 }
  0x6b   :  { %vm710_vm0 = vcmp.gt.f32.partialorder %v694_v60, 2.0  ;;  %v402_v37 = vmul.f32 %v7000_v39, %v6660_v17  ;;  %v152_v48 = vmul.f32 %v6941_v45, %v6639_v5  ;;  %v453_v6 = vmul.f32 %v7069_v50, %v6671_v21 }
  0x6c   :  { %v585_v34 = vld [vmem:[%s13646_s7 + $0x48] sm:$0xff]  ;;  %v5333_v19 = vsel %vm710_vm0, 1.0, %v6495_v0  ;;  %v267_v36 = vadd.f32 %v251_v14, %v217_v2  ;;  %v663_v44 = vadd.f32 %v647_v51, %v567_v18  ;;  %v468_v3 = vadd.f32 %v452_v62, %v417_v32 }
  0x6d   :  { %vm601_vm15 = vcmp.gt.f32.partialorder %v585_v34, 2.0  ;;  %758 = vst [vmem:[%s13651_s12 + $0x30] sm:$0xff] %v694_v60  ;;  %775 = vst [vmem:[#allocation2 + $0x61] sm:$0xff] %v5333_v19  ;;  %v202_v51 = vmul.f32 %v6946_v54, %v6645_v8  ;;  %v503_v49 = vmul.f32 %v7074_v46, %v6673_v22  ;;  %v553_v52 = vmul.f32 %v7079_v47, %v6675_v23 }
  0x6e   :  { %v5320_v38 = vsel %vm601_vm15, 1.0, %v6495_v0  ;;  %v318_v31 = vadd.f32 %v302_v29, %v267_v36  ;;  %v695_v57 = vsub.f32 %v663_v44, %v679_v58  ;;  %v518_v59 = vadd.f32 %v502_v26, %v468_v3  ;;  %v7115_v26 = vld [vmem:[%s13645_s6 + $0xa9] sm:$0xff] }
  0x6f   :  { %v168_v45 = vadd.f32 %v152_v48, %v6636_v4  ;;  %v252_v54 = vmul.f32 %v6959_v1, %v6647_v9  ;;  %v649_v41 = vmul.f32 0.8, %v585_v34  ;;  %v681_v40 = vmul.f32 2.0, %v5320_v38  ;;  %v7110_v34 = vld [vmem:[%s13645_s6 + $0xa8] sm:$0xff] }
  0x70   :  { %v368_v56 = vadd.f32 %v352_v30, %v318_v31  ;;  %v303_v62 = vmul.f32 %v7023_v61, %v6653_v12  ;;  %vm711_vm1 = vcmp.gt.f32.partialorder %v695_v57, 2.0  ;;  %v568_v55 = vadd.f32 %v552_v27, %v518_v59  ;;  %v7129_v29 = vld [vmem:[%s13645_s6 + $0xaa] sm:$0xff] }
  0x71   :  { %v218_v53 = vadd.f32 %v202_v51, %v168_v45  ;;  %v5334_v58 = vsel %vm711_vm1, 1.0, %v6495_v0  ;;  %v353_v1 = vmul.f32 %v7036_v11, %v6658_v16  ;;  %v403_v7 = vmul.f32 %v7041_v13, %v6660_v17 }
  0x72   :  { %v418_v63 = vadd.f32 %v402_v37, %v368_v56  ;;  %776 = vst [vmem:[#allocation2 + $0x69] sm:$0xff] %v5334_v58  ;;  %v664_v10 = vadd.f32 %v648_v24, %v568_v55  ;;  %v153_v33 = vmul.f32 %v6983_v35, %v6639_v5  ;;  %v454_v60 = vmul.f32 %v7110_v34, %v6671_v21  ;;  %v7164_v56 = vld [vmem:[%s13645_s6 + $0xb1] sm:$0xff] }
  0x73   :  { %v268_v15 = vadd.f32 %v252_v54, %v218_v53  ;;  %v504_v20 = vmul.f32 %v7115_v26, %v6673_v22  ;;  %v203_v28 = vmul.f32 %v6995_v42, %v6645_v8  ;;  %v253_v35 = vmul.f32 %v7000_v39, %v6647_v9 }
  0x74   :  { %v586_v43 = vld [vmem:[%s13646_s7 + $0x50] sm:$0xff]  ;;  %v469_v14 = vadd.f32 %v453_v6, %v418_v63  ;;  %v696_v24 = vsub.f32 %v664_v10, %v680_v25  ;;  %v169_v18 = vadd.f32 %v153_v33, %v6636_v4  ;;  %v554_v42 = vmul.f32 %v7129_v29, %v6675_v23 }
  0x75   :  { %759 = vst [vmem:[%s13651_s12 + $0x38] sm:$0xff] %v695_v57  ;;  %vm602_vm2 = vcmp.gt.f32.partialorder %v586_v43, 2.0  ;;  %v319_v2 = vadd.f32 %v303_v62, %v268_v15  ;;  %v650_v25 = vmul.f32 0.8, %v586_v43  ;;  %v304_v39 = vmul.f32 %v7069_v50, %v6653_v12  ;;  %v7152_v6 = vld [vmem:[%s13645_s6 + $0xb0] sm:$0xff] }
  0x76   :  { %v5321_v27 = vsel %vm602_vm2, 1.0, %v6495_v0  ;;  %v519_v30 = vadd.f32 %v503_v49, %v469_v14  ;;  %vm712_vm3 = vcmp.gt.f32.partialorder %v696_v24, 2.0  ;;  %v219_v37 = vadd.f32 %v203_v28, %v169_v18  ;;  %v7197_v28 = vld [vmem:[%s13645_s6 + $0xc1] sm:$0xff] }
  0x77   :  { %v682_v19 = vmul.f32 2.0, %v5321_v27  ;;  %v369_v36 = vadd.f32 %v353_v1, %v319_v2  ;;  %v5335_v38 = vsel %vm712_vm3, 1.0, %v6495_v0  ;;  %v354_v3 = vmul.f32 %v7074_v46, %v6658_v16 }
  0x78   :  { %v569_v44 = vadd.f32 %v553_v52, %v519_v30  ;;  %777 = vst [vmem:[#allocation2 + $0x79] sm:$0xff] %v5335_v38  ;;  %v269_v51 = vadd.f32 %v253_v35, %v219_v37  ;;  %v404_v31 = vmul.f32 %v7079_v47, %v6660_v17  ;;  %v154_v49 = vmul.f32 %v7023_v61, %v6639_v5  ;;  %v7169_v61 = vld [vmem:[%s13645_s6 + $0xb2] sm:$0xff] }
  0x79   :  { %v419_v48 = vadd.f32 %v403_v7, %v369_v36  ;;  %v455_v52 = vmul.f32 %v7152_v6, %v6671_v21  ;;  %v204_v59 = vmul.f32 %v7036_v11, %v6645_v8  ;;  %v254_v62 = vmul.f32 %v7041_v13, %v6647_v9  ;;  %v7186_v13 = vld [vmem:[%s13645_s6 + $0xc0] sm:$0xff] }
  0x7a   :  { %v665_v43 = vadd.f32 %v649_v41, %v569_v44  ;;  %v320_v54 = vadd.f32 %v304_v39, %v269_v51  ;;  %v170_v41 = vadd.f32 %v154_v49, %v6636_v4  ;;  %v505_v53 = vmul.f32 %v7164_v56, %v6673_v22 }
  0x7b   :  { %v470_v45 = vadd.f32 %v454_v60, %v419_v48  ;;  %v555_v58 = vmul.f32 %v7169_v61, %v6675_v23  ;;  %v305_v15 = vmul.f32 %v7110_v34, %v6653_v12  ;;  %v355_v27 = vmul.f32 %v7115_v26, %v6658_v16 }
  0x7c   :  { %v587_v32 = vld [vmem:[%s13646_s7 + $0x58] sm:$0xff]  ;;  %v697_v55 = vsub.f32 %v665_v43, %v681_v40  ;;  %v370_v7 = vadd.f32 %v354_v3, %v320_v54  ;;  %v220_v10 = vadd.f32 %v204_v59, %v170_v41  ;;  %v405_v2 = vmul.f32 %v7129_v29, %v6660_v17  ;;  %v7238_v59 = vld [vmem:[%s13645_s6 + $0xc9] sm:$0xff] }
  0x7d   :  { %760 = vst [vmem:[%s13651_s12 + $0x40] sm:$0xff] %v696_v24  ;;  %vm603_vm4 = vcmp.gt.f32.partialorder %v587_v32, 2.0  ;;  %v651_v63 = vmul.f32 0.8, %v587_v32  ;;  %v520_v1 = vadd.f32 %v504_v20, %v470_v45  ;;  %v7202_v24 = vld [vmem:[%s13645_s6 + $0xc2] sm:$0xff]  ;;  %v456_v18 = vmul.f32 %v7186_v13, %v6671_v21  ;;  %v7243_v45 = vld [vmem:[%s13645_s6 + $0xca] sm:$0xff] }
  0x7e   :  { %v5322_v57 = vsel %vm603_vm4, 1.0, %v6495_v0  ;;  %vm713_vm5 = vcmp.gt.f32.partialorder %v697_v55, 2.0  ;;  %v420_v60 = vadd.f32 %v404_v31, %v370_v7  ;;  %v270_v20 = vadd.f32 %v254_v62, %v220_v10 }
  0x7f   :  { %v683_v40 = vmul.f32 2.0, %v5322_v57  ;;  %v5336_v33 = vsel %vm713_vm5, 1.0, %v6495_v0  ;;  %v570_v14 = vadd.f32 %v554_v42, %v520_v1  ;;  %v155_v35 = vmul.f32 %v7069_v50, %v6639_v5 }
  0x80   :  { %778 = vst [vmem:[#allocation2 + $0x81] sm:$0xff] %v5336_v33  ;;  %v205_v32 = vmul.f32 %v7074_v46, %v6645_v8  ;;  %v471_v42 = vadd.f32 %v455_v52, %v420_v60  ;;  %v321_v36 = vadd.f32 %v305_v15, %v270_v20  ;;  %v506_v38 = vmul.f32 %v7197_v28, %v6673_v22 }
  0x81   :  { %v666_v30 = vadd.f32 %v650_v25, %v570_v14  ;;  %v556_v44 = vmul.f32 %v7202_v24, %v6675_v23  ;;  %v171_v50 = vadd.f32 %v155_v35, %v6636_v4  ;;  %v255_v46 = vmul.f32 %v7079_v47, %v6647_v9  ;;  %v7275_v35 = vld [vmem:[%s13645_s6 + $0xd8] sm:$0xff] }
  0x82   :  { %v521_v3 = vadd.f32 %v505_v53, %v471_v42  ;;  %v371_v48 = vadd.f32 %v355_v27, %v321_v36  ;;  %v306_v43 = vmul.f32 %v7152_v6, %v6653_v12  ;;  %v356_v47 = vmul.f32 %v7164_v56, %v6658_v16 }
  0x83   :  { %v698_v25 = vsub.f32 %v666_v30, %v682_v19  ;;  %v221_v49 = vadd.f32 %v205_v32, %v171_v50  ;;  %v7233_v19 = vld [vmem:[%s13645_s6 + $0xc8] sm:$0xff]  ;;  %v406_v62 = vmul.f32 %v7169_v61, %v6660_v17  ;;  %v206_v1 = vmul.f32 %v7115_v26, %v6645_v8 }
  0x84   :  { %v588_v11 = vld [vmem:[%s13646_s7 + $0x60] sm:$0xff]  ;;  %v571_v52 = vadd.f32 %v555_v58, %v521_v3  ;;  %v421_v57 = vadd.f32 %v405_v2, %v371_v48  ;;  %v156_v58 = vmul.f32 %v7110_v34, %v6639_v5  ;;  %v457_v10 = vmul.f32 %v7233_v19, %v6671_v21  ;;  %v7284_v32 = vld [vmem:[#allocation2 + $0x8] sm:$0xff] }
  0x85   :  { %761 = vst [vmem:[%s13651_s12 + $0x48] sm:$0xff] %v697_v55  ;;  %vm604_vm6 = vcmp.gt.f32.partialorder %v588_v11, 2.0  ;;  %v652_v51 = vmul.f32 0.8, %v588_v11  ;;  %vm714_vm8 = vcmp.gt.f32.partialorder %v698_v25, 2.0  ;;  %v271_v41 = vadd.f32 %v255_v46, %v221_v49 }
  0x86   :  { %v5323_v37 = vsel %vm604_vm6, 1.0, %v6495_v0  ;;  %v5337_v54 = vsel %vm714_vm8, 1.0, %v6495_v0  ;;  %v667_v55 = vadd.f32 %v651_v63, %v571_v52  ;;  %v472_v53 = vadd.f32 %v456_v18, %v421_v57 }
  0x87   :  { %v684_v31 = vmul.f32 2.0, %v5323_v37  ;;  %779 = vst [vmem:[#allocation2 + $0x91] sm:$0xff] %v5337_v54  ;;  %v322_v7 = vadd.f32 %v306_v43, %v271_v41  ;;  %v507_v15 = vmul.f32 %v7238_v59, %v6673_v22  ;;  %v557_v27 = vmul.f32 %v7243_v45, %v6675_v23 }
  0x88   :  { %v699_v63 = vsub.f32 %v667_v55, %v683_v40  ;;  %v522_v33 = vadd.f32 %v506_v38, %v472_v53  ;;  %v172_v34 = vadd.f32 %v156_v58, %v6636_v4  ;;  %v256_v26 = vmul.f32 %v7129_v29, %v6647_v9  ;;  %v7280_v29 = vld [vmem:[%s13645_s6 + $0xd9] sm:$0xff] }
  0x89   :  { %v372_v14 = vadd.f32 %v356_v47, %v322_v7  ;;  %v307_v2 = vmul.f32 %v7186_v13, %v6653_v12  ;;  %v357_v36 = vmul.f32 %v7197_v28, %v6658_v16  ;;  %v407_v37 = vmul.f32 %v7202_v24, %v6660_v17 }
  0x8a   :  { %vm715_vm9 = vcmp.gt.f32.partialorder %v699_v63, 2.0  ;;  %v572_v18 = vadd.f32 %v556_v44, %v522_v33  ;;  %v222_v40 = vadd.f32 %v206_v1, %v172_v34  ;;  %v7296_v44 = vld [vmem:[%s13645_s6 + $0xda] sm:$0xff]  ;;  %v157_v46 = vmul.f32 %v7152_v6, %v6639_v5 }
  0x8b   :  { %v5338_v30 = vsel %vm715_vm9, 1.0, %v7284_v32  ;;  %v422_v42 = vadd.f32 %v406_v62, %v372_v14  ;;  %v458_v3 = vmul.f32 %v7275_v35, %v6671_v21  ;;  %v508_v48 = vmul.f32 %v7280_v29, %v6673_v22 }
  0x8c   :  { %v589_v39 = vld [vmem:[%s13646_s7 + $0x68] sm:$0xff]  ;;  %780 = vst [vmem:[#allocation2 + $0x99] sm:$0xff] %v5338_v30  ;;  %v272_v38 = vadd.f32 %v256_v26, %v222_v40  ;;  %v173_v52 = vadd.f32 %v157_v46, %v6636_v4  ;;  %v257_v5 = vmul.f32 %v7169_v61, %v6647_v9  ;;  %v558_v57 = vmul.f32 %v7296_v44, %v6675_v23 }
  0x8d   :  { %vm605_vm7 = vcmp.gt.f32.partialorder %v589_v39, 2.0  ;;  %762 = vst [vmem:[%s13651_s12 + $0x50] sm:$0xff] %v698_v25  ;;  %v653_v60 = vmul.f32 0.8, %v589_v39  ;;  %v668_v39 = vadd.f32 %v652_v51, %v572_v18  ;;  %v473_v25 = vadd.f32 %v457_v10, %v422_v42 }
  0x8e   :  { %v5324_v11 = vsel %vm605_vm7, 1.0, %v6495_v0  ;;  %v207_v51 = vmul.f32 %v7164_v56, %v6645_v8  ;;  %v323_v43 = vadd.f32 %v307_v2, %v272_v38  ;;  %v7323_v8 = vld [vmem:[%s13645_s6 + $0xe0] sm:$0xff]  ;;  %v308_v61 = vmul.f32 %v7233_v19, %v6653_v12 }
  0x8f   :  { %v7265_v20 = vmul.f32 2.0, %v5324_v11  ;;  %v700_v49 = vsub.f32 %v668_v39, %v684_v31  ;;  %v523_v6 = vadd.f32 %v507_v15, %v473_v25  ;;  %v358_v11 = vmul.f32 %v7238_v59, %v6658_v16  ;;  %v7350_v16 = vld [vmem:[%s13645_s6 + $0xe1] sm:$0xff] }
  0x90   :  { %v373_v9 = vadd.f32 %v357_v36, %v323_v43  ;;  %v223_v56 = vadd.f32 %v207_v51, %v173_v52  ;;  %v408_v55 = vmul.f32 %v7243_v45, %v6660_v17  ;;  %v459_v58 = vmul.f32 %v7323_v8, %v6671_v21 }
  0x91   :  { %vm716_vm11 = vcmp.gt.f32.partialorder %v700_v49, 2.0  ;;  %v573_v62 = vadd.f32 %v557_v27, %v523_v6  ;;  %v7343_v1 = vstv %s7282_s24  ;;  %v7355_v10 = vstv %s7291_s25  ;;  %v7418_v6 = vld [vmem:[%s13645_s6 + $0xf1] sm:$0xff]  ;;  %s7664_s24 = sld [smem:[#allocation10 + $0x1]]  ;;  %s7668_s25 = sld [smem:[#allocation10 + $0x2]] }
  0x92   :  { %v5339_v41 = vsel %vm716_vm11, 1.0, %v7284_v32  ;;  %v423_v53 = vadd.f32 %v407_v37, %v373_v9  ;;  %v273_v12 = vadd.f32 %v257_v5, %v223_v56  ;;  %13970 = vst [vmem:[#allocation14_spill] sm:$0xff] %v7343_v1  ;;  %v806_v17 = vmul.f32 %v7186_v13, %v7343_v1  ;;  %13971 = vst [vmem:[#allocation15_spill] sm:$0xff] %v7355_v10 }
  0x93   :  { %781 = vst [vmem:[#allocation2 + $0xa9] sm:$0xff] %v5339_v41  ;;  %v669_v7 = vadd.f32 %v653_v60, %v573_v62  ;;  %v856_v27 = vmul.f32 %v7197_v28, %v7355_v10  ;;  %v7371_v34 = vstv %s7309_s26  ;;  %v509_v60 = vmul.f32 %v7350_v16, %v6673_v22  ;;  %v7378_v28 = vld [vmem:[%s13645_s6 + $0xe2] sm:$0xff]  ;;  %v7436_v41 = vld [vmem:[%s13645_s6 + $0xf2] sm:$0xff]  ;;  %s7492_s26 = sld [smem:[#allocation8]] }
  0x94   :  { %v590_v0 = vld [vmem:[%s13646_s7 + $0x70] sm:$0xff]  ;;  %v474_v21 = vadd.f32 %v458_v3, %v423_v53  ;;  %v324_v15 = vadd.f32 %v308_v61, %v273_v12  ;;  %v822_v33 = vadd.f32 %v806_v17, %v6636_v4  ;;  %13973 = vst [vmem:[#allocation17_spill] sm:$0xff] %v7371_v34  ;;  %v7381_v2 = vstv %s7314_s4  ;;  %s7496_s4 = sld [smem:[#allocation8 + $0x1]] }
  0x95   :  { %763 = vst [vmem:[%s13651_s12 + $0x58] sm:$0xff] %v699_v63  ;;  %vm606_vm10 = vcmp.gt.f32.partialorder %v590_v0, 2.0  ;;  %v654_v47 = vmul.f32 0.8, %v590_v0  ;;  %764 = vst [vmem:[%s13651_s12 + $0x60] sm:$0xff] %v700_v49  ;;  %v7362_v0 = vstv %s7301_s1  ;;  %v701_v63 = vsub.f32 %v669_v7, %v7265_v20  ;;  %s7568_s1 = sld [smem:[#allocation8 + $0x5]] }
  0x96   :  { %v5325_v50 = vsel %vm606_vm10, 1.0, %v7284_v32  ;;  %13972 = vst [vmem:[#allocation16_spill] sm:$0xff] %v7362_v0  ;;  %v906_v13 = vmul.f32 %v7202_v24, %v7362_v0  ;;  %v524_v26 = vadd.f32 %v508_v48, %v474_v21  ;;  %v374_v14 = vadd.f32 %v358_v11, %v324_v15  ;;  %13974 = vst [vmem:[#allocation18_spill] sm:$0xff] %v7381_v2  ;;  %v7404_v48 = vld [vmem:[%s13645_s6 + $0xf0] sm:$0xff] }
  0x97   :  { %v7318_v54 = vmul.f32 2.0, %v5325_v50  ;;  %vm717_vm13 = vcmp.gt.f32.partialorder %v701_v63, 2.0  ;;  %v872_v20 = vadd.f32 %v856_v27, %v822_v33  ;;  %v957_v22 = vmul.f32 %v7275_v35, %v7371_v34 }
  0x98   :  { %v5340_v18 = vsel %vm717_vm13, 1.0, %v7284_v32  ;;  %v574_v40 = vadd.f32 %v558_v57, %v524_v26  ;;  %v424_v30 = vadd.f32 %v408_v55, %v374_v14  ;;  %v7392_v42 = vstv %s7333_s2  ;;  %v7461_v26 = vld [vmem:[%s13645_s6 + $0xf9] sm:$0xff]  ;;  %s8332_s2 = sld [smem:[#allocation10 + $0x14]] }
  0x99   :  { %13975 = vst [vmem:[#allocation19_spill] sm:$0xff] %v7392_v42  ;;  %782 = vst [vmem:[#allocation2 + $0xb1] sm:$0xff] %v5340_v18  ;;  %v559_v37 = vmul.f32 %v7378_v28, %v6675_v23  ;;  %v922_v38 = vadd.f32 %v906_v13, %v872_v20  ;;  %v1007_v50 = vmul.f32 %v7280_v29, %v7381_v2  ;;  %v7407_v51 = vstv %s7345_s15  ;;  %v7456_v13 = vld [vmem:[%s13645_s6 + $0xf8] sm:$0xff]  ;;  %s8421_s15 = sld [smem:[#allocation10 + $0x16]] }
  0x9a   :  { %v670_v46 = vadd.f32 %v654_v47, %v574_v40  ;;  %v475_v25 = vadd.f32 %v459_v58, %v424_v30  ;;  %13976 = vst [vmem:[#allocation20_spill] sm:$0xff] %v7407_v51  ;;  %v1057_v23 = vmul.f32 %v7296_v44, %v7392_v42  ;;  %v7412_v43 = vstv %s7357_s0  ;;  %v7470_v20 = vld [vmem:[%s13645_s6 + $0xfa] sm:$0xff]  ;;  %s7541_s0 = sld [smem:[#allocation8 + $0x4]] }
  0x9b   :  { %v973_v49 = vadd.f32 %v957_v22, %v922_v38  ;;  %13977 = vst [vmem:[#allocation21_spill] sm:$0xff] %v7412_v43  ;;  %v7421_v57 = vstv %s7364_s22  ;;  %v807_v47 = vmul.f32 %v7233_v19, %v7343_v1  ;;  %v1108_v56 = vmul.f32 %v7404_v48, %v7407_v51  ;;  %s8524_s22 = sld [smem:[#allocation10 + $0x1e]] }
  0x9c   :  { %v591_v31 = vld [vmem:[%s13646_s7 + $0x78] sm:$0xff]  ;;  %v702_v52 = vsub.f32 %v670_v46, %v7318_v54  ;;  %v525_v5 = vadd.f32 %v509_v60, %v475_v25  ;;  %13978 = vst [vmem:[#allocation22_spill] sm:$0xff] %v7421_v57  ;;  %v857_v54 = vmul.f32 %v7238_v59, %v7355_v10  ;;  %v907_v62 = vmul.f32 %v7243_v45, %v7362_v0 }
  0x9d   :  { %vm607_vm12 = vcmp.gt.f32.partialorder %v591_v31, 2.0  ;;  %765 = vst [vmem:[%s13651_s12 + $0x68] sm:$0xff] %v701_v63  ;;  %v655_v39 = vmul.f32 0.8, %v591_v31  ;;  %v1023_v9 = vadd.f32 %v1007_v50, %v973_v49  ;;  %v823_v19 = vadd.f32 %v807_v47, %v6636_v4  ;;  %v7503_v47 = vld [vmem:[%s13645_s6 + $0x108] sm:$0xff] }
  0x9e   :  { %v5326_v24 = vsel %vm607_vm12, 1.0, %v7284_v32  ;;  %vm718_vm15 = vcmp.gt.f32.partialorder %v702_v52, 2.0  ;;  %v575_v31 = vadd.f32 %v559_v37, %v525_v5  ;;  %v1158_v59 = vmul.f32 %v7418_v6, %v7412_v43 }
  0x9f   :  { %v687_v3 = vmul.f32 2.0, %v5326_v24  ;;  %v5341_v11 = vsel %vm718_vm15, 1.0, %v7284_v32  ;;  %v1073_v55 = vadd.f32 %v1057_v23, %v1023_v9  ;;  %v873_v12 = vadd.f32 %v857_v54, %v823_v19 }
  0xa0   :  { %783 = vst [vmem:[#allocation2 + $0xc1] sm:$0xff] %v5341_v11  ;;  %v671_v53 = vadd.f32 %v655_v39, %v575_v31  ;;  %v958_v58 = vmul.f32 %v7323_v8, %v7371_v34  ;;  %v1208_v45 = vmul.f32 %v7436_v41, %v7421_v57  ;;  %v1008_v33 = vmul.f32 %v7350_v16, %v7381_v2  ;;  %v7519_v11 = vld [vmem:[%s13645_s6 + $0x109] sm:$0xff] }
  0xa1   :  { %v1124_v17 = vadd.f32 %v1108_v56, %v1073_v55  ;;  %v923_v63 = vadd.f32 %v907_v62, %v873_v12  ;;  %v808_v14 = vmul.f32 %v7275_v35, %v7343_v1  ;;  %v1058_v24 = vmul.f32 %v7378_v28, %v7392_v42 }
  0xa2   :  { %v703_v27 = vsub.f32 %v671_v53, %v687_v3  ;;  %v858_v22 = vmul.f32 %v7280_v29, %v7355_v10  ;;  %v908_v40 = vmul.f32 %v7296_v44, %v7362_v0  ;;  %v1109_v29 = vmul.f32 %v7456_v13, %v7407_v51 }
  0xa3   :  { %v1174_v60 = vadd.f32 %v1158_v59, %v1124_v17  ;;  %v974_v18 = vadd.f32 %v958_v58, %v923_v63  ;;  %v824_v35 = vadd.f32 %v808_v14, %v6636_v4  ;;  %v1159_v39 = vmul.f32 %v7461_v26, %v7412_v43  ;;  %v1453_v63 = vld [vmem:[#allocation2] sm:$0xff] }
  0xa4   :  { %v5495_v36 = vld [vmem:[%s13646_s7 + $0x80] sm:$0xff]  ;;  %vm719_vm1 = vcmp.gt.f32.partialorder %v703_v27, 2.0  ;;  %v1209_v50 = vmul.f32 %v7470_v20, %v7421_v57  ;;  %v959_v44 = vmul.f32 %v7404_v48, %v7371_v34  ;;  %v1009_v5 = vmul.f32 %v7418_v6, %v7381_v2 }
  0xa5   :  { %vm1257_vm14 = vcmp.gt.f32.partialorder %v5495_v36, 2.0  ;;  %766 = vst [vmem:[%s13651_s12 + $0x70] sm:$0xff] %v702_v52  ;;  %v1305_v21 = vmul.f32 0.8, %v5495_v36  ;;  %v5342_v36 = vsel %vm719_vm1, 1.0, %v7284_v32  ;;  %v1224_v37 = vadd.f32 %v1208_v45, %v1174_v60 }
  0xa6   :  { %v5511_v61 = vsel %vm1257_vm14, 1.0, %v7284_v32  ;;  %784 = vst [vmem:[#allocation2 + $0xc9] sm:$0xff] %v5342_v36  ;;  %v1024_v38 = vadd.f32 %v1008_v33, %v974_v18  ;;  %v874_v46 = vadd.f32 %v858_v22, %v824_v35  ;;  %v809_v9 = vmul.f32 %v7323_v8, %v7343_v1  ;;  %v7524_v8 = vld [vmem:[%s13645_s6 + $0x10a] sm:$0xff]  ;;  %v1503_v18 = vld [vmem:[#allocation2 + $0x1] sm:$0xff] }
  0xa7   :  { %v1337_v15 = vmul.f32 2.0, %v5511_v61  ;;  %v1321_v25 = vadd.f32 %v1305_v21, %v1224_v37  ;;  %v1059_v61 = vmul.f32 %v7436_v41, %v7392_v42  ;;  %v859_v31 = vmul.f32 %v7350_v16, %v7355_v10  ;;  %v7548_v22 = vld [vmem:[%s13645_s6 + $0x110] sm:$0xff] }
  0xa8   :  { %v1074_v23 = vadd.f32 %v1058_v24, %v1024_v38  ;;  %v924_v52 = vadd.f32 %v908_v40, %v874_v46  ;;  %v825_v55 = vadd.f32 %v809_v9, %v6636_v4  ;;  %v909_v16 = vmul.f32 %v7378_v28, %v7362_v0  ;;  %v7555_v40 = vld [vmem:[%s13645_s6 + $0x111] sm:$0xff] }
  0xa9   :  { %v1353_v56 = vsub.f32 %v1321_v25, %v1337_v15  ;;  %v1110_v53 = vmul.f32 %v7503_v47, %v7407_v51  ;;  %v960_v12 = vmul.f32 %v7456_v13, %v7371_v34  ;;  %v1160_v28 = vmul.f32 %v7519_v11, %v7412_v43  ;;  %v7574_v25 = vld [vmem:[#allocation2 + $0x18] sm:$0xff] }
  0xaa   :  { %v1125_v19 = vadd.f32 %v1109_v29, %v1074_v23  ;;  %v975_v62 = vadd.f32 %v959_v44, %v924_v52  ;;  %v875_v45 = vadd.f32 %v859_v31, %v825_v55  ;;  %v1210_v21 = vmul.f32 %v7524_v8, %v7421_v57  ;;  %v1553_v44 = vld [vmem:[#allocation2 + $0x2] sm:$0xff] }
  0xab   :  { %vm1369_vm3 = vcmp.gt.f32.partialorder %v1353_v56, 2.0  ;;  %v1010_v24 = vmul.f32 %v7461_v26, %v7381_v2  ;;  %v1060_v35 = vmul.f32 %v7470_v20, %v7392_v42  ;;  %v7563_v36 = vstv %s7492_s26  ;;  %s7705_s26 = sld [smem:[#allocation10 + $0x7]] }
  0xac   :  { %v5496_v7 = vld [vmem:[%s13646_s7 + $0x88] sm:$0xff]  ;;  %v5527_v58 = vsel %vm1369_vm3, 1.0, %v7284_v32  ;;  %v1025_v17 = vadd.f32 %v1009_v5, %v975_v62  ;;  %v925_v60 = vadd.f32 %v909_v16, %v875_v45  ;;  %v7566_v37 = vstv %s7496_s4  ;;  %s7709_s4 = sld [smem:[#allocation10 + $0x8]] }
  0xad   :  { %vm1258_vm0 = vcmp.gt.f32.partialorder %v5496_v7, 2.0  ;;  %767 = vst [vmem:[%s13651_s12 + $0x78] sm:$0xff] %v703_v27  ;;  %v1306_v49 = vmul.f32 0.8, %v5496_v7  ;;  %v1175_v7 = vadd.f32 %v1159_v39, %v1125_v19  ;;  %1435 = vst [vmem:[#allocation2 + $0xd9] sm:$0xff] %v5527_v58  ;;  %v1471_v46 = vmul.f32 %v7563_v36, %v1453_v63  ;;  %v7606_v58 = vld [vmem:[#allocation2 + $0x19] sm:$0xff] }
  0xae   :  { %v5512_v3 = vsel %vm1258_vm0, 1.0, %v7284_v32  ;;  %v1075_v14 = vadd.f32 %v1059_v61, %v1025_v17  ;;  %v976_v38 = vadd.f32 %v960_v12, %v925_v60  ;;  %v1521_v23 = vmul.f32 %v7566_v37, %v1503_v18  ;;  %v7590_v61 = vld [vmem:[%s13645_s6 + $0x112] sm:$0xff]  ;;  %v1504_v63 = vld [vmem:[#allocation2 + $0x9] sm:$0xff] }
  0xaf   :  { %v1338_v59 = vmul.f32 2.0, %v5512_v3  ;;  %v1225_v33 = vadd.f32 %v1209_v50, %v1175_v7  ;;  %v1111_v3 = vmul.f32 %v7548_v22, %v7407_v51  ;;  %v7580_v52 = vstv %s7512_s20  ;;  %s7598_s20 = sld [smem:[#allocation8 + $0x7]] }
  0xb0   :  { %v1126_v39 = vadd.f32 %v1110_v53, %v1075_v14  ;;  %v7583_v5 = vstv %s7514_s29  ;;  %v1161_v31 = vmul.f32 %v7555_v40, %v7412_v43  ;;  %v1571_v19 = vmul.f32 %v7580_v52, %v1553_v44  ;;  %v7615_v14 = vld [vmem:[#allocation2 + $0x1a] sm:$0xff]  ;;  %s8308_s29 = sld [smem:[#allocation10 + $0x12]] }
  0xb1   :  { %v1322_v29 = vadd.f32 %v1306_v49, %v1225_v33  ;;  %v1621_v62 = vmul.f32 %v7583_v5, %v7574_v25  ;;  %v1211_v12 = vmul.f32 %v7590_v61, %v7421_v57  ;;  %v7609_v7 = vstv %s7541_s0  ;;  %s8269_s0 = sld [smem:[#allocation10 + $0xc]] }
  0xb2   :  { %v1176_v9 = vadd.f32 %v1160_v28, %v1126_v39  ;;  %13980 = vst [vmem:[#allocation24_spill] sm:$0xff] %v7609_v7  ;;  %v7618_v60 = vstv %s7568_s1  ;;  %v1554_v39 = vld [vmem:[#allocation2 + $0xa] sm:$0xff]  ;;  %v1472_v44 = vmul.f32 %v7284_v32, %v7563_v36  ;;  %s8290_s1 = sld [smem:[#allocation10 + $0xf]] }
  0xb3   :  { %v1354_v49 = vsub.f32 %v1322_v29, %v1338_v59  ;;  %13981 = vst [vmem:[#allocation25_spill] sm:$0xff] %v7618_v60  ;;  %v1671_v29 = vmul.f32 %v7609_v7, %v7606_v58 }
  0xb4   :  { %v5497_v30 = vld [vmem:[%s13646_s7 + $0x90] sm:$0xff]  ;;  %v1226_v55 = vadd.f32 %v1210_v21, %v1176_v9  ;;  %v7638_v9 = vld [vmem:[#allocation2 + $0x20] sm:$0xff] }
  0xb5   :  { %vm1259_vm2 = vcmp.gt.f32.partialorder %v5497_v30, 2.0  ;;  %5543 = vst [vmem:[%s13651_s12 + $0x80] sm:$0xff] %v1353_v56  ;;  %v1307_v15 = vmul.f32 0.8, %v5497_v30  ;;  %v7560_v30 = vstv %s13642_s3  ;;  %s7585_s3 = sld [smem:[#allocation8 + $0x6]]  ;;  %v1026_v56 = vadd.f32 %v1010_v24, %v976_v38  ;;  %v7622_v38 = vld [vmem:[#allocation2 + $0x30] sm:$0xff] }
  0xb6   :  { %v5513_v54 = vsel %vm1259_vm2, 1.0, %v7284_v32  ;;  %13979 = vst [vmem:[#allocation23_spill] sm:$0xff] %v7560_v30  ;;  %vm1370_vm5 = vcmp.gt.f32.partialorder %v1354_v49, 2.0 }
  0xb7   :  { %v1339_v27 = vmul.f32 2.0, %v5513_v54  ;;  %v1487_v54 = vadd.f32 %v1471_v46, %v7560_v30  ;;  %v1076_v16 = vadd.f32 %v1060_v35, %v1026_v56  ;;  %v5528_v53 = vsel %vm1370_vm5, 1.0, %v7284_v32 }
  0xb8   :  { %1436 = vst [vmem:[#allocation2 + $0xe1] sm:$0xff] %v5528_v53  ;;  %v1323_v17 = vadd.f32 %v1307_v15, %v1226_v55  ;;  %v1905_v55 = vld [vmem:[%s13647_s8 + $0x8] sm:$0xff] }
  0xb9   :  { %v1537_v59 = vadd.f32 %v1521_v23, %v1487_v54  ;;  %v1127_v45 = vadd.f32 %v1111_v3, %v1076_v16  ;;  %v7641_v54 = vld [vmem:[#allocation2 + $0x31] sm:$0xff]  ;;  %vm1921_vm8 = vcmp.gt.f32.partialorder %v1905_v55, 6.0 }
  0xba   :  { %v1355_v24 = vsub.f32 %v1323_v17, %v1339_v27  ;;  %v1522_v27 = vmul.f32 %v7566_v37, %v1504_v63  ;;  %v7655_v17 = vld [vmem:[#allocation2 + $0x32] sm:$0xff] }
  0xbb   :  { %v1587_v21 = vadd.f32 %v1571_v19, %v1537_v59  ;;  %v1177_v18 = vadd.f32 %v1161_v31, %v1127_v45  ;;  %v7625_v46 = vstv %s7585_s3  ;;  %v7644_v31 = vstv %s7598_s20  ;;  %s7699_s3 = sld [smem:[#allocation10 + $0x6]]  ;;  %s8632_s20 = sld [smem:[#allocation10 + $0x2b]] }
  0xbc   :  { %v5498_v50 = vld [vmem:[%s13646_s7 + $0x98] sm:$0xff]  ;;  %13982 = vst [vmem:[#allocation26_spill] sm:$0xff] %v7625_v46  ;;  %vm1371_vm6 = vcmp.gt.f32.partialorder %v1355_v24, 2.0  ;;  %13983 = vst [vmem:[#allocation27_spill] sm:$0xff] %v7644_v31  ;;  %v1488_v19 = vadd.f32 %v1472_v44, %v7560_v30  ;;  %v1772_v53 = vmul.f32 %v7625_v46, %v7622_v38  ;;  %v7658_v45 = vstv %s7611_s21  ;;  %s8615_s21 = sld [smem:[#allocation10 + $0x28]] }
  0xbd   :  { %vm1260_vm4 = vcmp.gt.f32.partialorder %v5498_v50, 2.0  ;;  %5544 = vst [vmem:[%s13651_s12 + $0x88] sm:$0xff] %v1354_v49  ;;  %v1308_v33 = vmul.f32 0.8, %v5498_v50  ;;  %v1637_v35 = vadd.f32 %v1621_v62, %v1587_v21  ;;  %v1904_v50 = vld [vmem:[%s13647_s8] sm:$0xff]  ;;  %5545 = vst [vmem:[%s13651_s12 + $0x90] sm:$0xff] %v1355_v24  ;;  %v1227_v3 = vadd.f32 %v1211_v12, %v1177_v18 }
  0xbe   :  { %v5514_v28 = vsel %vm1260_vm4, 1.0, %v7284_v32  ;;  %v1721_v49 = vmul.f32 %v7618_v60, %v7615_v14  ;;  %v5529_v56 = vsel %vm1371_vm6, 1.0, %v7284_v32  ;;  %v1572_v62 = vmul.f32 %v7580_v52, %v1554_v39  ;;  %v7653_v12 = vld [vmem:[#allocation2 + $0x21] sm:$0xff]  ;;  %13984 = vst [vmem:[#allocation28_spill] sm:$0xff] %v7658_v45  ;;  %v7677_v44 = vld [vmem:[#allocation2 + $0x38] sm:$0xff] }
  0xbf   :  { %v1340_v15 = vmul.f32 2.0, %v5514_v28  ;;  %v1687_v23 = vadd.f32 %v1671_v29, %v1637_v35  ;;  %1437 = vst [vmem:[#allocation2 + $0xf1] sm:$0xff] %v5529_v56  ;;  %v1324_v16 = vadd.f32 %v1308_v33, %v1227_v3  ;;  %vm1920_vm7 = vcmp.gt.f32.partialorder %v1904_v50, 6.0  ;;  %v7675_v39 = vld [vmem:[#allocation2 + $0x22] sm:$0xff] }
  0xc0   :  { %v1538_v28 = vadd.f32 %v1522_v27, %v1488_v19  ;;  %v1622_v21 = vmul.f32 %v7583_v5, %v7638_v9  ;;  %v1822_v24 = vmul.f32 %v7644_v31, %v7641_v54  ;;  %v5567_v18 = vsel %vm1920_vm7, 1.0, %v7284_v32 }
  0xc1   :  { %v1737_v59 = vadd.f32 %v1721_v49, %v1687_v23  ;;  %v1356_v63 = vsub.f32 %v1324_v16, %v1340_v15  ;;  %v1672_v29 = vmul.f32 %v7609_v7, %v7653_v12  ;;  %v1872_v27 = vmul.f32 %v7658_v45, %v7655_v17  ;;  %v7686_v23 = vld [vmem:[#allocation2 + $0x39] sm:$0xff] }
  0xc2   :  { %v1588_v35 = vadd.f32 %v1572_v62, %v1538_v28  ;;  %v1968_v3 = vmul.f32 0.8, %v1904_v50  ;;  %v7688_v49 = vld [vmem:[#allocation2 + $0x3a] sm:$0xff]  ;;  %v5568_v62 = vsel %vm1921_vm8, 1.0, %v7284_v32  ;;  %v1773_v28 = vmul.f32 %v7625_v46, %v7677_v44 }
  0xc3   :  { %v1788_v33 = vadd.f32 %v1772_v53, %v1737_v59  ;;  %vm1372_vm9 = vcmp.gt.f32.partialorder %v1356_v63, 2.0  ;;  %5546 = vst [vmem:[%s13651_s12 + $0x98] sm:$0xff] %v1356_v63  ;;  %v2000_v59 = vmul.f32 6.0, %v5567_v18  ;;  %v1722_v53 = vmul.f32 %v7618_v60, %v7675_v39 }
  0xc4   :  { %v5530_v56 = vsel %vm1372_vm9, 1.0, %v7284_v32  ;;  %v1638_v19 = vadd.f32 %v1622_v21, %v1588_v35  ;;  %v1823_v21 = vmul.f32 %v7644_v31, %v7686_v23  ;;  %v1873_v63 = vmul.f32 %v7658_v45, %v7688_v49 }
  0xc5   :  { %v1838_v15 = vadd.f32 %v1822_v24, %v1788_v33  ;;  %1438 = vst [vmem:[#allocation2 + $0xf9] sm:$0xff] %v5530_v56  ;;  %v810_v33 = vmul.f32 %v7404_v48, %v7343_v1  ;;  %v1969_v18 = vmul.f32 0.8, %v1905_v55  ;;  %v2001_v35 = vmul.f32 6.0, %v5568_v62 }
  0xc6   :  { %v1688_v50 = vadd.f32 %v1672_v29, %v1638_v19  ;;  %v860_v29 = vmul.f32 %v7418_v6, %v7355_v10  ;;  %v910_v55 = vmul.f32 %v7436_v41, %v7362_v0  ;;  %v7724_v56 = vstv %s7662_s23  ;;  %s8604_s23 = sld [smem:[#allocation10 + $0x27]] }
  0xc7   :  { %v1888_v16 = vadd.f32 %v1872_v27, %v1838_v15  ;;  %v7716_v27 = vstv %s13644_s5  ;;  %v826_v48 = vadd.f32 %v810_v33, %v6636_v4  ;;  %13986 = vst [vmem:[#allocation30_spill] sm:$0xff] %v7724_v56  ;;  %v7727_v19 = vstv %s7664_s24  ;;  %s8277_s24 = sld [smem:[#allocation10 + $0xd]] }
  0xc8   :  { %v1738_v15 = vadd.f32 %v1722_v53, %v1688_v50  ;;  %13985 = vst [vmem:[#allocation29_spill] sm:$0xff] %v7716_v27  ;;  %13987 = vst [vmem:[#allocation31_spill] sm:$0xff] %v7727_v19  ;;  %v7730_v6 = vstv %s7668_s25  ;;  %v961_v50 = vmul.f32 %v7503_v47, %v7371_v34  ;;  %v7741_v41 = vstv %s7679_s17  ;;  %s8281_s25 = sld [smem:[#allocation10 + $0xe]]  ;;  %s8508_s5 = sld [smem:[#allocation10 + $0x1d]] }
  0xc9   :  { %v1984_v24 = vadd.f32 %v1968_v3, %v1888_v16  ;;  %13988 = vst [vmem:[#allocation32_spill] sm:$0xff] %v7730_v6  ;;  %v7733_v16 = vstv %s7670_s16  ;;  %v876_v53 = vadd.f32 %v860_v29, %v826_v48  ;;  %13990 = vst [vmem:[#allocation34_spill] sm:$0xff] %v7741_v41  ;;  %v1011_v47 = vmul.f32 %v7519_v11, %v7381_v2  ;;  %s8534_s16 = sld [smem:[#allocation10 + $0x20]]  ;;  %s8627_s17 = sld [smem:[#allocation10 + $0x29]] }
  0xca   :  { %v1789_v62 = vadd.f32 %v1773_v28, %v1738_v15  ;;  %13989 = vst [vmem:[#allocation33_spill] sm:$0xff] %v7733_v16  ;;  %v861_v28 = vmul.f32 %v7461_v26, %v7355_v10  ;;  %v5499_v15 = vld [vmem:[%s13646_s7 + $0xa0] sm:$0xff]  ;;  %v7760_v26 = vstv %s7699_s3  ;;  %v911_v11 = vmul.f32 %v7470_v20, %v7362_v0  ;;  %s8361_s3 = sld [smem:[#allocation10 + $0x15]] }
  0xcb   :  { %v2016_v3 = vsub.f32 %v1984_v24, %v2000_v59  ;;  %v811_v59 = vmul.f32 %v7456_v13, %v7343_v1  ;;  %v926_v29 = vadd.f32 %v910_v55, %v876_v53  ;;  %v7757_v13 = vstv %s7697_s28  ;;  %13992 = vst [vmem:[#allocation36_spill] sm:$0xff] %v7760_v26  ;;  %s8492_s28 = sld [smem:[#allocation10 + $0x1c]] }
  0xcc   :  { %v1839_v33 = vadd.f32 %v1823_v21, %v1789_v62  ;;  %13991 = vst [vmem:[#allocation35_spill] sm:$0xff] %v7757_v13  ;;  %v5448_v21 = vld [vmem:[%s13645_s6 + $0x120] sm:$0xff]  ;;  %v1061_v53 = vmul.f32 %v7524_v8, %v7392_v42  ;;  %v7777_v10 = vstv %s7709_s4  ;;  %vm1261_vm11 = vcmp.gt.f32.partialorder %v5499_v15, 2.0  ;;  %s8630_s4 = sld [smem:[#allocation10 + $0x2a]] }
  0xcd   :  { %2080 = vst [vmem:[%s13652_s13] sm:$0xff] %v2016_v3  ;;  %vm2032_vm10 = vcmp.gt.f32.partialorder %v2016_v3, 6.0  ;;  %v827_v48 = vadd.f32 %v811_v59, %v6636_v4  ;;  %v7769_v3 = vstv %s7705_s26  ;;  %v977_v62 = vadd.f32 %v961_v50, %v926_v29  ;;  %13993 = vst [vmem:[#allocation37_spill] sm:$0xff] %v7777_v10  ;;  %v5482_v59 = vld [vmem:[%s13645_s6 + $0x122] sm:$0xff]  ;;  %s8301_s26 = sld [smem:[#allocation10 + $0x11]] }
  0xce   :  { %v5583_v24 = vsel %vm2032_vm10, 1.0, %v7284_v32  ;;  %v1889_v55 = vadd.f32 %v1873_v63, %v1839_v33  ;;  %v962_v20 = vmul.f32 %v7548_v22, %v7371_v34  ;;  %v7785_v50 = vstv %s7718_s30  ;;  %v5500_v10 = vld [vmem:[%s13646_s7 + $0xa8] sm:$0xff]  ;;  %s8319_s30 = sld [smem:[#allocation10 + $0x13]] }
  0xcf   :  { %2096 = vst [vmem:[%s13649_s10] sm:$0xff] %v5583_v24  ;;  %v5465_v24 = vld [vmem:[%s13645_s6 + $0x121] sm:$0xff]  ;;  %v877_v4 = vadd.f32 %v861_v28, %v827_v48  ;;  %13994 = vst [vmem:[#allocation38_spill] sm:$0xff] %v7785_v50  ;;  %v1027_v33 = vadd.f32 %v1011_v47, %v977_v62  ;;  %v1112_v8 = vmul.f32 %v5448_v21, %v7407_v51  ;;  %v5515_v47 = vsel %vm1261_vm11, 1.0, %v7284_v32 }
  0xd0   :  { %v1985_v63 = vadd.f32 %v1969_v18, %v1889_v55  ;;  %v1162_v29 = vmul.f32 %v5465_v24, %v7412_v43  ;;  %v1012_v1 = vmul.f32 %v7555_v40, %v7381_v2  ;;  %v1473_v28 = vmul.f32 %v7574_v25, %v7563_v36  ;;  %v5466_v55 = vld [vmem:[%s13645_s6 + $0x129] sm:$0xff] }
  0xd1   :  { %v927_v0 = vadd.f32 %v911_v11, %v877_v4  ;;  %v1077_v18 = vadd.f32 %v1061_v53, %v1027_v33  ;;  %v1212_v48 = vmul.f32 %v5482_v59, %v7421_v57  ;;  %v5449_v4 = vld [vmem:[%s13645_s6 + $0x128] sm:$0xff]  ;;  %v1309_v21 = vmul.f32 0.8, %v5499_v15 }
  0xd2   :  { %v2017_v22 = vsub.f32 %v1985_v63, %v2001_v35  ;;  %v1062_v40 = vmul.f32 %v7590_v61, %v7392_v42  ;;  %v1489_v25 = vadd.f32 %v1473_v28, %v7560_v30  ;;  %v5483_v15 = vld [vmem:[%s13645_s6 + $0x12a] sm:$0xff]  ;;  %vm1262_vm13 = vcmp.gt.f32.partialorder %v5500_v10, 2.0 }
  0xd3   :  { %v978_v11 = vadd.f32 %v962_v20, %v927_v0  ;;  %v1128_v35 = vadd.f32 %v1112_v8, %v1077_v18  ;;  %v1523_v0 = vmul.f32 %v7606_v58, %v7566_v37  ;;  %v1341_v62 = vmul.f32 2.0, %v5515_v47 }
  0xd4   :  { %2081 = vst [vmem:[%s13652_s13 + $0x8] sm:$0xff] %v2017_v22  ;;  %vm2033_vm12 = vcmp.gt.f32.partialorder %v2017_v22, 6.0  ;;  %v1113_v24 = vmul.f32 %v5449_v4, %v7407_v51  ;;  %v1163_v63 = vmul.f32 %v5466_v55, %v7412_v43  ;;  %v1573_v58 = vmul.f32 %v7615_v14, %v7580_v52 }
  0xd5   :  { %v5584_v61 = vsel %vm2033_vm12, 1.0, %v7284_v32  ;;  %v1028_v53 = vadd.f32 %v1012_v1, %v978_v11  ;;  %v1178_v20 = vadd.f32 %v1162_v29, %v1128_v35  ;;  %v1539_v33 = vadd.f32 %v1523_v0, %v1489_v25  ;;  %v7837_v25 = vld [vmem:[#allocation2 + $0x48] sm:$0xff] }
  0xd6   :  { %2097 = vst [vmem:[%s13649_s10 + $0x8] sm:$0xff] %v5584_v61  ;;  %v2779_v1 = vld [vmem:[%s13649_s10] sm:$0x7f]  ;;  %v1213_v28 = vmul.f32 %v5483_v15, %v7421_v57  ;;  %v5516_v22 = vsel %vm1262_vm13, 1.0, %v7284_v32  ;;  %v1623_v18 = vmul.f32 %v7622_v38, %v7583_v5  ;;  %v1474_v4 = vmul.f32 %v7638_v9, %v7563_v36  ;;  %v7847_v61 = vld [vmem:[#allocation2 + $0x4a] sm:$0xff] }
  0xd7   :  { %v1078_v8 = vadd.f32 %v1062_v40, %v1028_v53  ;;  %v1228_v47 = vadd.f32 %v1212_v48, %v1178_v20  ;;  %v1589_v29 = vadd.f32 %v1573_v58, %v1539_v33  ;;  %v1310_v14 = vmul.f32 0.8, %v5500_v10  ;;  %v7839_v40 = vld [vmem:[#allocation2 + $0x49] sm:$0xff]  ;;  %v2802_v48 = vld [vmem:[%s13649_s10 + $0x1] sm:$0x7f] }
  0xd8   :  { %v1673_v55 = vmul.f32 %v7641_v54, %v7609_v7  ;;  %v1524_v35 = vmul.f32 %v7653_v12, %v7566_v37  ;;  %v2788_v15 = vmul.f32 %v7724_v56, %v2779_v1  ;;  %v1490_v10 = vadd.f32 %v1474_v4, %v7560_v30 }
  0xd9   :  { %v1129_v11 = vadd.f32 %v1113_v24, %v1078_v8  ;;  %v1325_v0 = vadd.f32 %v1309_v21, %v1228_v47  ;;  %v1639_v9 = vadd.f32 %v1623_v18, %v1589_v29  ;;  %v1342_v24 = vmul.f32 2.0, %v5516_v22  ;;  %v7864_v29 = vld [vmem:[#allocation2 + $0x50] sm:$0xff] }
  0xda   :  { %v1723_v20 = vmul.f32 %v7655_v17, %v7618_v60  ;;  %v1774_v1 = vmul.f32 %v7625_v46, %v7837_v25  ;;  %v1824_v21 = vmul.f32 %v7644_v31, %v7839_v40  ;;  %v2811_v8 = vmul.f32 %v7727_v19, %v2802_v48 }
  0xdb   :  { %v1906_v59 = vld [vmem:[%s13647_s8 + $0x10] sm:$0xff]  ;;  %v1179_v53 = vadd.f32 %v1163_v63, %v1129_v11  ;;  %v1357_v33 = vsub.f32 %v1325_v0, %v1341_v62  ;;  %v1689_v58 = vadd.f32 %v1673_v55, %v1639_v9  ;;  %v1874_v18 = vmul.f32 %v7658_v45, %v7847_v61 }
  0xdc   :  { %vm1922_vm14 = vcmp.gt.f32.partialorder %v1906_v59, 6.0  ;;  %v1540_v47 = vadd.f32 %v1524_v35, %v1490_v10  ;;  %v2795_v62 = vadd.f32 %v2788_v15, %v7716_v27  ;;  %v1970_v11 = vmul.f32 0.8, %v1906_v59  ;;  %v7879_v0 = vld [vmem:[#allocation2 + $0x51] sm:$0xff] }
  0xdd   :  { %v5569_v12 = vsel %vm1922_vm14, 1.0, %v7284_v32  ;;  %v2825_v63 = vld [vmem:[%s13649_s10 + $0x2] sm:$0x7f]  ;;  %v1229_v22 = vadd.f32 %v1213_v28, %v1179_v53  ;;  %5547 = vst [vmem:[%s13651_s12 + $0xa0] sm:$0xff] %v1357_v33  ;;  %v1739_v4 = vadd.f32 %v1723_v20, %v1689_v58  ;;  %vm1373_vm15 = vcmp.gt.f32.partialorder %v1357_v33, 2.0  ;;  %v7881_v9 = vld [vmem:[#allocation2 + $0x52] sm:$0xff] }
  0xde   :  { %v2002_v55 = vmul.f32 6.0, %v5569_v12  ;;  %v2848_v48 = vld [vmem:[%s13649_s10 + $0x3] sm:$0x7f]  ;;  %v1574_v28 = vmul.f32 %v7675_v39, %v7580_v52  ;;  %v1624_v35 = vmul.f32 %v7677_v44, %v7583_v5  ;;  %v1674_v15 = vmul.f32 %v7686_v23, %v7609_v7 }
  0xdf   :  { %v2834_v59 = vmul.f32 %v7730_v6, %v2825_v63  ;;  %v1724_v10 = vmul.f32 %v7688_v49, %v7618_v60  ;;  %v1775_v53 = vmul.f32 %v7625_v46, %v7864_v29  ;;  %v1475_v39 = vmul.f32 %v7622_v38, %v7563_v36  ;;  %v2871_v20 = vld [vmem:[%s13649_s10 + $0x4] sm:$0x7f] }
  0xe0   :  { %v2894_v12 = vld [vmem:[%s13649_s10 + $0x5] sm:$0x7f]  ;;  %v5531_v33 = vsel %vm1373_vm15, 1.0, %v7284_v32  ;;  %v1326_v58 = vadd.f32 %v1310_v14, %v1229_v22  ;;  %v1790_v63 = vadd.f32 %v1774_v1, %v1739_v4  ;;  %v1590_v57 = vadd.f32 %v1574_v28, %v1540_v47  ;;  %v1907_v4 = vld [vmem:[%s13647_s8 + $0x18] sm:$0xff] }
  0xe1   :  { %v2857_v43 = vmul.f32 %v7733_v16, %v2848_v48  ;;  %v2917_v51 = vld [vmem:[%s13649_s10 + $0x6] sm:$0x7f]  ;;  %1439 = vst [vmem:[#allocation2 + $0x109] sm:$0xff] %v5531_v33  ;;  %v1825_v38 = vmul.f32 %v7644_v31, %v7879_v0  ;;  %v1875_v42 = vmul.f32 %v7658_v45, %v7881_v9  ;;  %v1525_v2 = vmul.f32 %v7641_v54, %v7566_v37 }
  0xe2   :  { %v2841_v34 = vadd.f32 %v2834_v59, %v2795_v62  ;;  %v2940_v14 = vld [vmem:[%s13649_s10 + $0x7] sm:$0x7f]  ;;  %v1358_v1 = vsub.f32 %v1326_v58, %v1342_v24  ;;  %v1840_v22 = vadd.f32 %v1824_v21, %v1790_v63  ;;  %v1640_v47 = vadd.f32 %v1624_v35, %v1590_v57 }
  0xe3   :  { %v2880_v48 = vmul.f32 %v7741_v41, %v2871_v20  ;;  %v2903_v28 = vmul.f32 %v7757_v13, %v2894_v12  ;;  %v1491_v33 = vadd.f32 %v1475_v39, %v7560_v30  ;;  %v1575_v54 = vmul.f32 %v7655_v17, %v7580_v52  ;;  %v2963_v24 = vld [vmem:[%s13649_s10 + $0x8] sm:$0x7f]  ;;  %v1908_v39 = vld [vmem:[%s13647_s8 + $0x20] sm:$0xff] }
  0xe4   :  { %v2926_v62 = vmul.f32 %v7760_v26, %v2917_v51  ;;  %v2986_v57 = vld [vmem:[%s13649_s10 + $0x9] sm:$0x7f]  ;;  %vm1374_vm0 = vcmp.gt.f32.partialorder %v1358_v1, 2.0  ;;  %5548 = vst [vmem:[%s13651_s12 + $0xa8] sm:$0xff] %v1358_v1  ;;  %v1890_v21 = vadd.f32 %v1874_v18, %v1840_v22  ;;  %v1690_v35 = vadd.f32 %v1674_v15, %v1640_v47  ;;  %v13995_v26 = vld [vmem:[#allocation37_spill] sm:$0xff] }
  0xe5   :  { %v7929_v59 = vmul.f32 %v7769_v3, %v2940_v14  ;;  %v5532_v51 = vsel %vm1374_vm0, 1.0, %v7284_v32  ;;  %vm1923_vm1 = vcmp.gt.f32.partialorder %v1907_v4, 6.0  ;;  %v1541_v17 = vadd.f32 %v1525_v2, %v1491_v33 }
  0xe6   :  { %v2864_v20 = vadd.f32 %v2857_v43, %v2811_v8  ;;  %v2887_v12 = vadd.f32 %v2880_v48, %v2841_v34  ;;  %1440 = vst [vmem:[#allocation2 + $0x111] sm:$0xff] %v5532_v51  ;;  %v1986_v58 = vadd.f32 %v1970_v11, %v1890_v21  ;;  %v1740_v63 = vadd.f32 %v1724_v10, %v1690_v35  ;;  %v7948_v8 = vld [vmem:[#allocation2 + $0x60] sm:$0xff] }
  0xe7   :  { %v7936_v1 = vmul.f32 %v13995_v26, %v2963_v24  ;;  %v7939_v18 = vmul.f32 %v7785_v50, %v2986_v57  ;;  %v1591_v15 = vadd.f32 %v1575_v54, %v1541_v17  ;;  %v1625_v14 = vmul.f32 %v7837_v25, %v7583_v5  ;;  %v7950_v11 = vld [vmem:[#allocation2 + $0x61] sm:$0xff] }
  0xe8   :  { %v7943_v2 = vsub.f32 %v1986_v58, %v2002_v55  ;;  %v1791_v22 = vadd.f32 %v1775_v53, %v1740_v63  ;;  %v5570_v47 = vsel %vm1923_vm1, 1.0, %v7284_v32  ;;  %vm1924_vm2 = vcmp.gt.f32.partialorder %v1908_v39, 6.0  ;;  %v7964_v24 = vld [vmem:[#allocation2 + $0x62] sm:$0xff] }
  0xe9   :  { %v1641_v34 = vadd.f32 %v1625_v14, %v1591_v15  ;;  %v1675_v43 = vmul.f32 %v7839_v40, %v7609_v7  ;;  %v1476_v10 = vmul.f32 %v7677_v44, %v7563_v36  ;;  %v1526_v48 = vmul.f32 %v7686_v23, %v7566_v37  ;;  %v7981_v63 = vld [vmem:[#allocation2 + $0x68] sm:$0xff] }
  0xea   :  { %v7956_v55 = vadd.f32 %v2903_v28, %v2864_v20  ;;  %v7958_v53 = vadd.f32 %v2926_v62, %v2887_v12  ;;  %2082 = vst [vmem:[%s13652_s13 + $0x10] sm:$0xff] %v7943_v2  ;;  %v1841_v33 = vadd.f32 %v1825_v38, %v1791_v22  ;;  %v1971_v54 = vmul.f32 0.8, %v1907_v4 }
  0xeb   :  { %v1691_v57 = vadd.f32 %v1675_v43, %v1641_v34  ;;  %v1725_v44 = vmul.f32 %v7847_v61, %v7618_v60  ;;  %v5571_v21 = vsel %vm1924_vm2, 1.0, %v7284_v32  ;;  %v1492_v23 = vadd.f32 %v1476_v10, %v7560_v30  ;;  %v7987_v34 = vld [vmem:[#allocation2 + $0x69] sm:$0xff] }
  0xec   :  { %v1891_v28 = vadd.f32 %v1875_v42, %v1841_v33  ;;  %v2003_v62 = vmul.f32 6.0, %v5570_v47  ;;  %v1776_v35 = vmul.f32 %v7625_v46, %v7948_v8  ;;  %v1826_v51 = vmul.f32 %v7644_v31, %v7950_v11 }
  0xed   :  { %v1741_v4 = vadd.f32 %v1725_v44, %v1691_v57  ;;  %v1876_v17 = vmul.f32 %v7658_v45, %v7964_v24  ;;  %v1542_v20 = vadd.f32 %v1526_v48, %v1492_v23  ;;  %v1576_v32 = vmul.f32 %v7688_v49, %v7580_v52 }
  0xee   :  { %v1987_v42 = vadd.f32 %v1971_v54, %v1891_v28  ;;  %v1972_v12 = vmul.f32 0.8, %v1908_v39  ;;  %v2004_v58 = vmul.f32 6.0, %v5571_v21  ;;  %v1477_v15 = vmul.f32 %v7837_v25, %v7563_v36  ;;  %v7993_v39 = vld [vmem:[#allocation2 + $0x6a] sm:$0xff] }
  0xef   :  { %v1792_v14 = vadd.f32 %v1776_v35, %v1741_v4  ;;  %v1592_v22 = vadd.f32 %v1576_v32, %v1542_v20  ;;  %v1626_v47 = vmul.f32 %v7864_v29, %v7583_v5  ;;  %v1676_v49 = vmul.f32 %v7879_v0, %v7609_v7  ;;  %v8011_v21 = vld [vmem:[#allocation2 + $0x8] sm:$0xff] }
  0xf0   :  { %v7989_v43 = vsub.f32 %v1987_v42, %v2003_v62  ;;  %v1493_v10 = vadd.f32 %v1477_v15, %v7560_v30  ;;  %v1527_v25 = vmul.f32 %v7839_v40, %v7566_v37  ;;  %v1726_v54 = vmul.f32 %v7881_v9, %v7618_v60  ;;  %v8020_v42 = vld [vmem:[#allocation2 + $0x78] sm:$0xff] }
  0xf1   :  { %v1909_v38 = vld [vmem:[%s13647_s8 + $0x28] sm:$0xff]  ;;  %v1842_v48 = vadd.f32 %v1826_v51, %v1792_v14  ;;  %v1642_v33 = vadd.f32 %v1626_v47, %v1592_v22  ;;  %v1777_v57 = vmul.f32 %v7625_v46, %v7981_v63  ;;  %v1910_v44 = vld [vmem:[%s13647_s8 + $0x30] sm:$0xff]  ;;  %v1827_v40 = vmul.f32 %v7644_v31, %v7987_v34 }
  0xf2   :  { %vm1925_vm3 = vcmp.gt.f32.partialorder %v1909_v38, 6.0  ;;  %2083 = vst [vmem:[%s13652_s13 + $0x18] sm:$0xff] %v7989_v43  ;;  %v1543_v28 = vadd.f32 %v1527_v25, %v1493_v10  ;;  %v1577_v62 = vmul.f32 %v7847_v61, %v7580_v52  ;;  %v1877_v4 = vmul.f32 %v7658_v45, %v7993_v39 }
  0xf3   :  { %v5572_v23 = vsel %vm1925_vm3, 1.0, %v8011_v21  ;;  %v1892_v35 = vadd.f32 %v1876_v17, %v1842_v48  ;;  %v1692_v51 = vadd.f32 %v1676_v49, %v1642_v33  ;;  %v1627_v20 = vmul.f32 %v7948_v8, %v7583_v5  ;;  %v8026_v49 = vld [vmem:[#allocation2 + $0x79] sm:$0xff] }
  0xf4   :  { %v1593_v32 = vadd.f32 %v1577_v62, %v1543_v28  ;;  %vm1926_vm4 = vcmp.gt.f32.partialorder %v1910_v44, 6.0  ;;  %v1478_v15 = vmul.f32 %v7864_v29, %v7563_v36  ;;  %v1528_v14 = vmul.f32 %v7879_v0, %v7566_v37  ;;  %v8032_v33 = vld [vmem:[#allocation2 + $0x7a] sm:$0xff] }
  0xf5   :  { %v1988_v22 = vadd.f32 %v1972_v12, %v1892_v35  ;;  %v1742_v61 = vadd.f32 %v1726_v54, %v1692_v51  ;;  %v1973_v17 = vmul.f32 0.8, %v1909_v38  ;;  %v2005_v47 = vmul.f32 6.0, %v5572_v23 }
  0xf6   :  { %v1643_v10 = vadd.f32 %v1627_v20, %v1593_v32  ;;  %v1677_v25 = vmul.f32 %v7950_v11, %v7609_v7  ;;  %v1727_v48 = vmul.f32 %v7964_v24, %v7618_v60  ;;  %v1494_v29 = vadd.f32 %v1478_v15, %v7560_v30 }
  0xf7   :  { %v8035_v28 = vsub.f32 %v1988_v22, %v2004_v58  ;;  %v1793_v0 = vadd.f32 %v1777_v57, %v1742_v61  ;;  %v1778_v38 = vmul.f32 %v7625_v46, %v8020_v42  ;;  %v5573_v12 = vsel %vm1926_vm4, 1.0, %v8011_v21  ;;  %v8058_v61 = vld [vmem:[#allocation2 + $0x80] sm:$0xff] }
  0xf8   :  { %v1693_v54 = vadd.f32 %v1677_v25, %v1643_v10  ;;  %v1828_v23 = vmul.f32 %v7644_v31, %v8026_v49  ;;  %v1544_v62 = vadd.f32 %v1528_v14, %v1494_v29  ;;  %v1578_v35 = vmul.f32 %v7881_v9, %v7580_v52  ;;  %v8064_v25 = vld [vmem:[#allocation2 + $0x82] sm:$0xff] }
  0xf9   :  { %2084 = vst [vmem:[%s13652_s13 + $0x20] sm:$0xff] %v8035_v28  ;;  %v1843_v58 = vadd.f32 %v1827_v40, %v1793_v0  ;;  %v1878_v57 = vmul.f32 %v7658_v45, %v8032_v33  ;;  %v1974_v51 = vmul.f32 0.8, %v1910_v44  ;;  %v1479_v32 = vmul.f32 %v7948_v8, %v7563_v36  ;;  %v8062_v44 = vld [vmem:[#allocation2 + $0x81] sm:$0xff] }
  0xfa   :  { %v1743_v15 = vadd.f32 %v1727_v48, %v1693_v54  ;;  %v2006_v14 = vmul.f32 6.0, %v5573_v12  ;;  %v1594_v9 = vadd.f32 %v1578_v35, %v1544_v62  ;;  %v1628_v22 = vmul.f32 %v7981_v63, %v7583_v5 }
  0xfb   :  { %v1893_v40 = vadd.f32 %v1877_v4, %v1843_v58  ;;  %v1678_v10 = vmul.f32 %v7987_v34, %v7609_v7  ;;  %v1495_v29 = vadd.f32 %v1479_v32, %v7560_v30  ;;  %v1529_v8 = vmul.f32 %v7950_v11, %v7566_v37 }
  0xfc   :  { %v1794_v48 = vadd.f32 %v1778_v38, %v1743_v15  ;;  %v1644_v0 = vadd.f32 %v1628_v22, %v1594_v9  ;;  %v1728_v12 = vmul.f32 %v7993_v39, %v7618_v60  ;;  %v1779_v4 = vmul.f32 %v7625_v46, %v8058_v61 }
  0xfd   :  { %v1989_v54 = vadd.f32 %v1973_v17, %v1893_v40  ;;  %v1545_v62 = vadd.f32 %v1529_v8, %v1495_v29  ;;  %v1579_v35 = vmul.f32 %v7964_v24, %v7580_v52  ;;  %v1829_v38 = vmul.f32 %v7644_v31, %v8062_v44  ;;  %v8087_v8 = vld [vmem:[#allocation2 + $0x90] sm:$0xff] }
  0xfe   :  { %v1844_v32 = vadd.f32 %v1828_v23, %v1794_v48  ;;  %v1694_v11 = vadd.f32 %v1678_v10, %v1644_v0  ;;  %v1879_v15 = vmul.f32 %v7658_v45, %v8064_v25  ;;  %v1629_v24 = vmul.f32 %v8020_v42, %v7583_v5 }
  0xff   :  { %v8082_v17 = vsub.f32 %v1989_v54, %v2005_v47  ;;  %v1595_v22 = vadd.f32 %v1579_v35, %v1545_v62  ;;  %v1480_v23 = vmul.f32 %v7981_v63, %v7563_v36  ;;  %v1679_v48 = vmul.f32 %v8026_v49, %v7609_v7  ;;  %v8099_v62 = vld [vmem:[#allocation2 + $0x91] sm:$0xff] }
 0x100   :  { %v1911_v20 = vld [vmem:[%s13647_s8 + $0x38] sm:$0xff]  ;;  %v1912_v58 = vld [vmem:[%s13647_s8 + $0x40] sm:$0xff]  ;;  %v1894_v40 = vadd.f32 %v1878_v57, %v1844_v32  ;;  %v1744_v29 = vadd.f32 %v1728_v12, %v1694_v11  ;;  %v1530_v57 = vmul.f32 %v7987_v34, %v7566_v37  ;;  %v1780_v11 = vmul.f32 %v7625_v46, %v8087_v8 }
 0x101   :  { %vm1927_vm5 = vcmp.gt.f32.partialorder %v1911_v20, 6.0  ;;  %vm1928_vm6 = vcmp.gt.f32.partialorder %v1912_v58, 6.0  ;;  %2085 = vst [vmem:[%s13652_s13 + $0x28] sm:$0xff] %v8082_v17  ;;  %v1975_v47 = vmul.f32 0.8, %v1911_v20  ;;  %v1645_v10 = vadd.f32 %v1629_v24, %v1595_v22  ;;  %v8101_v35 = vld [vmem:[#allocation2 + $0x92] sm:$0xff] }
 0x102   :  { %v5574_v9 = vsel %vm1927_vm5, 1.0, %v8011_v21  ;;  %v1990_v0 = vadd.f32 %v1974_v51, %v1894_v40  ;;  %v1795_v12 = vadd.f32 %v1779_v4, %v1744_v29  ;;  %v1496_v63 = vadd.f32 %v1480_v23, %v7560_v30 }
 0x103   :  { %v2007_v54 = vmul.f32 6.0, %v5574_v9  ;;  %v1695_v32 = vadd.f32 %v1679_v48, %v1645_v10  ;;  %v1729_v20 = vmul.f32 %v8032_v33, %v7618_v60  ;;  %v5575_v22 = vsel %vm1928_vm6, 1.0, %v8011_v21 }
 0x104   :  { %v8110_v34 = vsub.f32 %v1990_v0, %v2006_v14  ;;  %v1845_v51 = vadd.f32 %v1829_v38, %v1795_v12  ;;  %v1546_v4 = vadd.f32 %v1530_v57, %v1496_v63  ;;  %v1580_v9 = vmul.f32 %v7993_v39, %v7580_v52  ;;  %v8129_v12 = vld [vmem:[#allocation2 + $0x98] sm:$0xff] }
 0x105   :  { %v1745_v24 = vadd.f32 %v1729_v20, %v1695_v32  ;;  %v1830_v40 = vmul.f32 %v7644_v31, %v8099_v62  ;;  %v1880_v29 = vmul.f32 %v7658_v45, %v8101_v35  ;;  %v1481_v14 = vmul.f32 %v8020_v42, %v7563_v36  ;;  %v8131_v63 = vld [vmem:[#allocation2 + $0x99] sm:$0xff] }
 0x106   :  { %13996 = vst [vmem:[#allocation37_spill] sm:$0xff] %v8110_v34  ;;  %v1895_v39 = vadd.f32 %v1879_v15, %v1845_v51  ;;  %v1976_v38 = vmul.f32 0.8, %v1912_v58  ;;  %v1596_v10 = vadd.f32 %v1580_v9, %v1546_v4  ;;  %v1630_v48 = vmul.f32 %v8058_v61, %v7583_v5 }
 0x107   :  { %v1796_v57 = vadd.f32 %v1780_v11, %v1745_v24  ;;  %v2008_v0 = vmul.f32 6.0, %v5575_v22  ;;  %v1497_v32 = vadd.f32 %v1481_v14, %v7560_v30  ;;  %v1531_v42 = vmul.f32 %v8026_v49, %v7566_v37  ;;  %v8140_v22 = vld [vmem:[#allocation2 + $0x9a] sm:$0xff] }
 0x108   :  { %v1913_v23 = vld [vmem:[%s13647_s8 + $0x48] sm:$0xff]  ;;  %v1991_v20 = vadd.f32 %v1975_v47, %v1895_v39  ;;  %v1646_v50 = vadd.f32 %v1630_v48, %v1596_v10  ;;  %v1680_v58 = vmul.f32 %v8062_v44, %v7609_v7  ;;  %v1730_v11 = vmul.f32 %v8064_v25, %v7618_v60 }
 0x109   :  { %2086 = vst [vmem:[%s13652_s13 + $0x30] sm:$0xff] %v8110_v34  ;;  %vm1929_vm7 = vcmp.gt.f32.partialorder %v1913_v23, 6.0  ;;  %v1846_v15 = vadd.f32 %v1830_v40, %v1796_v57  ;;  %v1547_v51 = vadd.f32 %v1531_v42, %v1497_v32  ;;  %v1581_v4 = vmul.f32 %v8032_v33, %v7580_v52 }
 0x10a   :  { %v8144_v9 = vsub.f32 %v1991_v20, %v2007_v54  ;;  %v1696_v24 = vadd.f32 %v1680_v58, %v1646_v50  ;;  %v1781_v49 = vmul.f32 %v7625_v46, %v8129_v12  ;;  %v1831_v47 = vmul.f32 %v7644_v31, %v8131_v63 }
 0x10b   :  { %v1896_v14 = vadd.f32 %v1880_v29, %v1846_v15  ;;  %v5576_v39 = vsel %vm1929_vm7, 1.0, %v8011_v21  ;;  %v1597_v10 = vadd.f32 %v1581_v4, %v1547_v51  ;;  %v1631_v33 = vmul.f32 %v8087_v8, %v7583_v5  ;;  %v8168_v51 = vld [vmem:[#allocation2 + $0xa8] sm:$0xff] }
 0x10c   :  { %13997 = vst [vmem:[#allocation39_spill] sm:$0xff] %v8144_v9  ;;  %v1746_v50 = vadd.f32 %v1730_v11, %v1696_v24  ;;  %v1881_v54 = vmul.f32 %v7658_v45, %v8140_v22  ;;  %v1482_v48 = vmul.f32 %v8058_v61, %v7563_v36  ;;  %v1532_v29 = vmul.f32 %v8062_v44, %v7566_v37  ;;  %v8170_v11 = vld [vmem:[#allocation2 + $0xaa] sm:$0xff] }
 0x10d   :  { %v1992_v57 = vadd.f32 %v1976_v38, %v1896_v14  ;;  %v1647_v32 = vadd.f32 %v1631_v33, %v1597_v10  ;;  %v1681_v42 = vmul.f32 %v8099_v62, %v7609_v7  ;;  %v1977_v58 = vmul.f32 0.8, %v1913_v23  ;;  %v8179_v10 = vld [vmem:[#allocation2 + $0xa9] sm:$0xff] }
 0x10e   :  { %v1797_v20 = vadd.f32 %v1781_v49, %v1746_v50  ;;  %v2009_v15 = vmul.f32 6.0, %v5576_v39  ;;  %v1498_v4 = vadd.f32 %v1482_v48, %v7560_v30  ;;  %v1731_v44 = vmul.f32 %v8101_v35, %v7618_v60 }
 0x10f   :  { %v8173_v24 = vsub.f32 %v1992_v57, %v2008_v0  ;;  %v1697_v61 = vadd.f32 %v1681_v42, %v1647_v32  ;;  %v1782_v38 = vmul.f32 %v7625_v46, %v8168_v51  ;;  %v1582_v39 = vmul.f32 %v8064_v25, %v7580_v52 }
 0x110   :  { %v1914_v40 = vld [vmem:[%s13647_s8 + $0x50] sm:$0xff]  ;;  %v1847_v14 = vadd.f32 %v1831_v47, %v1797_v20  ;;  %v1548_v49 = vadd.f32 %v1532_v29, %v1498_v4  ;;  %v1832_v33 = vmul.f32 %v7644_v31, %v8179_v10  ;;  %v1882_v47 = vmul.f32 %v7658_v45, %v8170_v11 }
 0x111   :  { %2087 = vst [vmem:[%s13652_s13 + $0x38] sm:$0xff] %v8144_v9  ;;  %vm1930_vm8 = vcmp.gt.f32.partialorder %v1914_v40, 6.0  ;;  %13998 = vst [vmem:[#allocation40_spill] sm:$0xff] %v8173_v24  ;;  %v1747_v0 = vadd.f32 %v1731_v44, %v1697_v61  ;;  %v1483_v48 = vmul.f32 %v8087_v8, %v7563_v36  ;;  %v1978_v29 = vmul.f32 0.8, %v1914_v40  ;;  %v1765_v4 = vld [vmem:[#allocation2 + $0xb0] sm:$0xff] }
 0x112   :  { %v5577_v23 = vsel %vm1930_vm8, 1.0, %v8011_v21  ;;  %2088 = vst [vmem:[%s13652_s13 + $0x40] sm:$0xff] %v8173_v24  ;;  %v1897_v25 = vadd.f32 %v1881_v54, %v1847_v14  ;;  %v1598_v57 = vadd.f32 %v1582_v39, %v1548_v49  ;;  %v1632_v32 = vmul.f32 %v8129_v12, %v7583_v5  ;;  %v1815_v8 = vld [vmem:[#allocation2 + $0xb1] sm:$0xff] }
 0x113   :  { %v1798_v42 = vadd.f32 %v1782_v38, %v1747_v0  ;;  %v2010_v20 = vmul.f32 6.0, %v5577_v23  ;;  %v1499_v61 = vadd.f32 %v1483_v48, %v7560_v30  ;;  %v1533_v44 = vmul.f32 %v8099_v62, %v7566_v37  ;;  %v8204_v54 = vld [vmem:[#allocation2 + $0xb2] sm:$0xff] }
 0x114   :  { %v1993_v24 = vadd.f32 %v1977_v58, %v1897_v25  ;;  %v1648_v9 = vadd.f32 %v1632_v32, %v1598_v57  ;;  %v1682_v34 = vmul.f32 %v8131_v63, %v7609_v7  ;;  %v1583_v38 = vmul.f32 %v8101_v35, %v7580_v52 }
 0x115   :  { %v1848_v40 = vadd.f32 %v1832_v33, %v1798_v42  ;;  %v1549_v14 = vadd.f32 %v1533_v44, %v1499_v61  ;;  %v1633_v23 = vmul.f32 %v8168_v51, %v7583_v5  ;;  %v1732_v58 = vmul.f32 %v8140_v22, %v7618_v60 }
 0x116   :  { %v8210_v49 = vsub.f32 %v1993_v24, %v2009_v15  ;;  %v1698_v62 = vadd.f32 %v1682_v34, %v1648_v9  ;;  %v1783_v39 = vmul.f32 %v7625_v46, %v1765_v4  ;;  %v1833_v33 = vmul.f32 %v7644_v31, %v1815_v8 }
 0x117   :  { %v1898_v0 = vadd.f32 %v1882_v47, %v1848_v40  ;;  %v1599_v25 = vadd.f32 %v1583_v38, %v1549_v14  ;;  %v1883_v9 = vmul.f32 %v7658_v45, %v8204_v54  ;;  %v1484_v15 = vmul.f32 %v8129_v12, %v7563_v36  ;;  %v1766_v40 = vld [vmem:[#allocation2 + $0xc0] sm:$0xff] }
 0x118   :  { %v1748_v34 = vadd.f32 %v1732_v58, %v1698_v62  ;;  %v1534_v24 = vmul.f32 %v8131_v63, %v7566_v37  ;;  %v1683_v42 = vmul.f32 %v8179_v10, %v7609_v7  ;;  %v1733_v12 = vmul.f32 %v8170_v11, %v7618_v60 }
 0x119   :  { %v1915_v50 = vld [vmem:[%s13647_s8 + $0x58] sm:$0xff]  ;;  %v1916_v35 = vld [vmem:[%s13647_s8 + $0x60] sm:$0xff]  ;;  %v1994_v47 = vadd.f32 %v1978_v29, %v1898_v0  ;;  %v1649_v32 = vadd.f32 %v1633_v23, %v1599_v25  ;;  %v1500_v14 = vadd.f32 %v1484_v15, %v7560_v30  ;;  %v1784_v58 = vmul.f32 %v7625_v46, %v1766_v40 }
 0x11a   :  { %vm1931_vm9 = vcmp.gt.f32.partialorder %v1915_v50, 6.0  ;;  %2089 = vst [vmem:[%s13652_s13 + $0x48] sm:$0xff] %v8210_v49  ;;  %v1979_v57 = vmul.f32 0.8, %v1915_v50  ;;  %v1799_v61 = vadd.f32 %v1783_v39, %v1748_v34  ;;  %vm1932_vm10 = vcmp.gt.f32.partialorder %v1916_v35, 6.0  ;;  %v1816_v29 = vld [vmem:[#allocation2 + $0xc1] sm:$0xff] }
 0x11b   :  { %v5578_v48 = vsel %vm1931_vm9, 1.0, %v8011_v21  ;;  %v2026_v38 = vsub.f32 %v1994_v47, %v2010_v20  ;;  %v1699_v62 = vadd.f32 %v1683_v42, %v1649_v32  ;;  %v1866_v50 = vld [vmem:[#allocation2 + $0xc2] sm:$0xff]  ;;  %v1550_v23 = vadd.f32 %v1534_v24, %v1500_v14 }
 0x11c   :  { %v2011_v44 = vmul.f32 6.0, %v5578_v48  ;;  %v1849_v63 = vadd.f32 %v1833_v33, %v1799_v61  ;;  %v1584_v0 = vmul.f32 %v8140_v22, %v7580_v52  ;;  %v1634_v39 = vmul.f32 %v1765_v4, %v7583_v5  ;;  %v1767_v42 = vld [vmem:[#allocation2 + $0xc8] sm:$0xff] }
 0x11d   :  { %2090 = vst [vmem:[%s13652_s13 + $0x50] sm:$0xff] %v2026_v38  ;;  %v1749_v20 = vadd.f32 %v1733_v12, %v1699_v62  ;;  %v1834_v48 = vmul.f32 %v7644_v31, %v1816_v29  ;;  %v5579_v25 = vsel %vm1932_vm10, 1.0, %v8011_v21  ;;  %v1485_v33 = vmul.f32 %v8168_v51, %v7563_v36  ;;  %v1817_v62 = vld [vmem:[#allocation2 + $0xc9] sm:$0xff] }
 0x11e   :  { %v1899_v34 = vadd.f32 %v1883_v9, %v1849_v63  ;;  %v1600_v15 = vadd.f32 %v1584_v0, %v1550_v23  ;;  %v1684_v24 = vmul.f32 %v1815_v8, %v7609_v7  ;;  %v1535_v4 = vmul.f32 %v8179_v10, %v7566_v37 }
 0x11f   :  { %v1800_v47 = vadd.f32 %v1784_v58, %v1749_v20  ;;  %v1884_v32 = vmul.f32 %v7658_v45, %v1866_v50  ;;  %v1501_v61 = vadd.f32 %v1485_v33, %v7560_v30  ;;  %v1585_v51 = vmul.f32 %v8170_v11, %v7580_v52 }
 0x120   :  { %v1995_v9 = vadd.f32 %v1979_v57, %v1899_v34  ;;  %v1980_v14 = vmul.f32 0.8, %v1916_v35  ;;  %v2012_v38 = vmul.f32 6.0, %v5579_v25  ;;  %v1650_v8 = vadd.f32 %v1634_v39, %v1600_v15 }
 0x121   :  { %v1850_v12 = vadd.f32 %v1834_v48, %v1800_v47  ;;  %v1551_v63 = vadd.f32 %v1535_v4, %v1501_v61  ;;  %v1635_v23 = vmul.f32 %v1766_v40, %v7583_v5  ;;  %v1734_v20 = vmul.f32 %v8204_v54, %v7618_v60  ;;  %v1768_v40 = vld [vmem:[#allocation2 + $0xd8] sm:$0xff] }
 0x122   :  { %v2027_v58 = vsub.f32 %v1995_v9, %v2011_v44  ;;  %v1700_v0 = vadd.f32 %v1684_v24, %v1650_v8  ;;  %v1785_v11 = vmul.f32 %v7625_v46, %v1767_v42  ;;  %v1835_v57 = vmul.f32 %v7644_v31, %v1817_v62  ;;  %v1868_v42 = vld [vmem:[#allocation2 + $0xda] sm:$0xff] }
 0x123   :  { %v1900_v35 = vadd.f32 %v1884_v32, %v1850_v12  ;;  %v1601_v39 = vadd.f32 %v1585_v51, %v1551_v63  ;;  %v1685_v48 = vmul.f32 %v1816_v29, %v7609_v7  ;;  %vm2034_vm13 = vcmp.gt.f32.partialorder %v7943_v2, 6.0  ;;  %v1867_v29 = vld [vmem:[#allocation2 + $0xca] sm:$0xff]  ;;  %v1818_v32 = vld [vmem:[#allocation2 + $0xd9] sm:$0xff] }
 0x124   :  { %v1917_v22 = vld [vmem:[%s13647_s8 + $0x68] sm:$0xff]  ;;  %v1918_v10 = vld [vmem:[%s13647_s8 + $0x70] sm:$0xff]  ;;  %v1750_v54 = vadd.f32 %v1734_v20, %v1700_v0  ;;  %v1735_v34 = vmul.f32 %v1866_v50, %v7618_v60  ;;  %v5585_v15 = vsel %vm2034_vm13, 1.0, %v8011_v21  ;;  %v2956_v24 = vadd.f32 %v7929_v59, %v7956_v55 }
 0x125   :  { %vm1933_vm11 = vcmp.gt.f32.partialorder %v1917_v22, 6.0  ;;  %2091 = vst [vmem:[%s13652_s13 + $0x58] sm:$0xff] %v2027_v58  ;;  %vm1934_vm12 = vcmp.gt.f32.partialorder %v1918_v10, 6.0  ;;  %v1996_v25 = vadd.f32 %v1980_v14, %v1900_v35  ;;  %v1651_v33 = vadd.f32 %v1635_v23, %v1601_v39  ;;  %2098 = vst [vmem:[%s13649_s10 + $0x10] sm:$0xff] %v5585_v15 }
 0x126   :  { %v5580_v44 = vsel %vm1933_vm11, 1.0, %v8011_v21  ;;  %v1801_v4 = vadd.f32 %v1785_v11, %v1750_v54  ;;  %v1786_v47 = vmul.f32 %v7625_v46, %v1768_v40  ;;  %vm2035_vm14 = vcmp.gt.f32.partialorder %v7989_v43, 6.0 }
 0x127   :  { %v2028_v2 = vsub.f32 %v1996_v25, %v2012_v38  ;;  %v1701_v50 = vadd.f32 %v1685_v48, %v1651_v33  ;;  %v5581_v61 = vsel %vm1934_vm12, 1.0, %v8011_v21  ;;  %v5586_v59 = vsel %vm2035_vm14, 1.0, %v8011_v21 }
 0x128   :  { %v1851_v55 = vadd.f32 %v1835_v57, %v1801_v4  ;;  %v1885_v51 = vmul.f32 %v7658_v45, %v1867_v29  ;;  %v1981_v9 = vmul.f32 0.8, %v1917_v22  ;;  %v2013_v14 = vmul.f32 6.0, %v5580_v44  ;;  %2099 = vst [vmem:[%s13649_s10 + $0x18] sm:$0xff] %v5586_v59 }
 0x129   :  { %2092 = vst [vmem:[%s13652_s13 + $0x60] sm:$0xff] %v2028_v2  ;;  %v1751_v43 = vadd.f32 %v1735_v34, %v1701_v50  ;;  %v1836_v38 = vmul.f32 %v7644_v31, %v1818_v32  ;;  %v1886_v8 = vmul.f32 %v7658_v45, %v1868_v42  ;;  %v1982_v62 = vmul.f32 0.8, %v1918_v10 }
 0x12a   :  { %v1901_v22 = vadd.f32 %v1885_v51, %v1851_v55  ;;  %v8310_v12 = vmul.f32 6.0, %v5581_v61  ;;  %v8313_v63 = vstv %s8263_s18  ;;  %vm2036_vm15 = vcmp.gt.f32.partialorder %v8035_v28, 6.0  ;;  %s8467_s18 = sld [smem:[#allocation10 + $0x19]] }
 0x12b   :  { %13999 = vst [vmem:[#allocation41_spill] sm:$0xff] %v8313_v63  ;;  %v1802_v23 = vadd.f32 %v1786_v47, %v1751_v43  ;;  %v8317_v58 = vstv %s8267_s19  ;;  %v5587_v0 = vsel %vm2036_vm15, 1.0, %v8011_v21  ;;  %vm2037_vm0 = vcmp.gt.f32.partialorder %v8082_v17, 6.0  ;;  %s9215_s19 = sld [smem:[#allocation10 + $0x45]] }
 0x12c   :  { %14000 = vst [vmem:[#allocation42_spill] sm:$0xff] %v8317_v58  ;;  %v1997_v10 = vadd.f32 %v1981_v9, %v1901_v22  ;;  %v8324_v20 = vstv %s8269_s0  ;;  %v8327_v11 = vstv %s8277_s24  ;;  %2100 = vst [vmem:[%s13649_s10 + $0x20] sm:$0xff] %v5587_v0  ;;  %v5588_v28 = vsel %vm2037_vm0, 1.0, %v8011_v21  ;;  %v2780_v39 = vld [vmem:[%s13649_s10 + $0x10] sm:$0x7f]  ;;  %s8485_s24 = sld [smem:[#allocation10 + $0x1b]] }
 0x12d   :  { %14001 = vst [vmem:[#allocation43_spill] sm:$0xff] %v8327_v11  ;;  %v2979_v35 = vadd.f32 %v7936_v1, %v7958_v53  ;;  %v3002_v57 = vadd.f32 %v7939_v18, %v2956_v24  ;;  %v1852_v17 = vadd.f32 %v1836_v38, %v1802_v23  ;;  %v2803_v48 = vld [vmem:[%s13649_s10 + $0x11] sm:$0x7f]  ;;  %v8348_v54 = vstv %s8281_s25  ;;  %2101 = vst [vmem:[%s13649_s10 + $0x28] sm:$0xff] %v5588_v28  ;;  %s8574_s25 = sld [smem:[#allocation10 + $0x23]]  ;;  %s8673_s0 = sld [smem:[#allocation10 + $0x31]] }
 0x12e   :  { %v5696_v40 = vld [vmem:[%s13649_s10 + $0x10] sm:$0x7f]  ;;  %14002 = vst [vmem:[#allocation44_spill] sm:$0xff] %v8348_v54  ;;  %v2029_v1 = vsub.f32 %v1997_v10, %v2013_v14  ;;  %v2789_v18 = vmul.f32 %v7724_v56, %v2780_v39  ;;  %v2812_v53 = vmul.f32 %v7727_v19, %v2803_v48  ;;  %v8359_v25 = vstv %s8290_s1  ;;  %s8423_s1 = sld [smem:[#allocation10 + $0x17]] }
 0x12f   :  { %v5704_v44 = vld [vmem:[%s13649_s10 + $0x11] sm:$0x7f]  ;;  %14003 = vst [vmem:[#allocation45_spill] sm:$0xff] %v8359_v25  ;;  %v1902_v29 = vadd.f32 %v1886_v8, %v1852_v17  ;;  %v3019_v33 = vmul.f32 %v5696_v40, %v8313_v63  ;;  %v8375_v47 = vstv %s8295_s27  ;;  %v8390_v59 = vstv %s8301_s26  ;;  %s8447_s26 = sld [smem:[#allocation10 + $0x18]]  ;;  %s8483_s27 = sld [smem:[#allocation10 + $0x1a]] }
 0x130   :  { %v3042_v34 = vmul.f32 %v5704_v44, %v8317_v58  ;;  %v2826_v15 = vld [vmem:[%s13649_s10 + $0x12] sm:$0x7f]  ;;  %14004 = vst [vmem:[#allocation46_spill] sm:$0xff] %v8375_v47  ;;  %2093 = vst [vmem:[%s13652_s13 + $0x68] sm:$0xff] %v2029_v1  ;;  %v2796_v32 = vadd.f32 %v2789_v18, %v7716_v27  ;;  %v8399_v38 = vstv %s8308_s29  ;;  %v8419_v40 = vstv %s8319_s30  ;;  %s8526_s30 = sld [smem:[#allocation10 + $0x1f]] }
 0x131   :  { %v2849_v24 = vld [vmem:[%s13649_s10 + $0x13] sm:$0x7f]  ;;  %v2835_v42 = vmul.f32 %v7730_v6, %v2826_v15  ;;  %14005 = vst [vmem:[#allocation47_spill] sm:$0xff] %v8390_v59  ;;  %v1998_v55 = vadd.f32 %v1982_v62, %v1902_v29  ;;  %v3026_v51 = vadd.f32 %v3019_v33, %v2979_v35  ;;  %14006 = vst [vmem:[#allocation48_spill] sm:$0xff] %v8399_v38  ;;  %s8663_s29 = sld [smem:[#allocation10 + $0x2f]]  ;;  %vm2041_vm4 = vcmp.gt.f32.partialorder %v8210_v49, 6.0 }
 0x132   :  { %v2872_v4 = vld [vmem:[%s13649_s10 + $0x14] sm:$0x7f]  ;;  %v2858_v2 = vmul.f32 %v7733_v16, %v2849_v24  ;;  %v3049_v9 = vadd.f32 %v3042_v34, %v3002_v57  ;;  %v14007_v57 = vld [vmem:[#allocation36_spill] sm:$0xff]  ;;  %v8719_v49 = vstv %s8604_s23  ;;  %v8743_v7 = vstv %s8630_s4  ;;  %s9036_s23 = sld [smem:[#allocation10 + $0x35]]  ;;  %s9152_s4 = sld [smem:[#allocation10 + $0x3f]] }
 0x133   :  { %v2895_v50 = vld [vmem:[%s13649_s10 + $0x15] sm:$0x7f]  ;;  %v2842_v8 = vadd.f32 %v2835_v42, %v2796_v32  ;;  %v2881_v23 = vmul.f32 %v7741_v41, %v2872_v4  ;;  %v2030_v35 = vsub.f32 %v1998_v55, %v8310_v12  ;;  %14008 = vst [vmem:[#allocation36_spill] sm:$0xff] %v8419_v40  ;;  %v2781_v29 = vld [vmem:[%s13649_s10 + $0x20] sm:$0x7f]  ;;  %v8445_v32 = vstv %s8332_s2  ;;  %s8549_s2 = sld [smem:[#allocation10 + $0x22]] }
 0x134   :  { %v2918_v61 = vld [vmem:[%s13649_s10 + $0x16] sm:$0x7f]  ;;  %v2865_v22 = vadd.f32 %v2858_v2, %v2812_v53  ;;  %v2904_v0 = vmul.f32 %v7757_v13, %v2895_v50  ;;  %14009 = vst [vmem:[#allocation49_spill] sm:$0xff] %v8445_v32  ;;  %14033 = vst [vmem:[#allocation65_spill] sm:$0xff] %v8719_v49 }
 0x135   :  { %v2941_v14 = vld [vmem:[%s13649_s10 + $0x17] sm:$0x7f]  ;;  %v2927_v17 = vmul.f32 %v14007_v57, %v2918_v61  ;;  %v2888_v1 = vadd.f32 %v2881_v23, %v2842_v8  ;;  %2094 = vst [vmem:[%s13652_s13 + $0x70] sm:$0xff] %v2030_v35  ;;  %v2790_v8 = vmul.f32 %v7724_v56, %v2781_v29  ;;  %v8465_v23 = vstv %s8361_s3  ;;  %s8602_s3 = sld [smem:[#allocation10 + $0x26]]  ;;  %14036 = vst [vmem:[#allocation68_spill] sm:$0xff] %v8743_v7 }
 0x136   :  { %v5712_v43 = vld [vmem:[%s13649_s10 + $0x12] sm:$0x7f]  ;;  %v2911_v18 = vadd.f32 %v2904_v0, %v2865_v22  ;;  %v2950_v53 = vmul.f32 %v7769_v3, %v2941_v14  ;;  %v2987_v34 = vld [vmem:[%s13649_s10 + $0x19] sm:$0x7f]  ;;  %v2804_v22 = vld [vmem:[%s13649_s10 + $0x21] sm:$0x7f] }
 0x137   :  { %v2964_v62 = vld [vmem:[%s13649_s10 + $0x18] sm:$0x7f]  ;;  %v3065_v39 = vmul.f32 %v5712_v43, %v8324_v20  ;;  %v2934_v42 = vadd.f32 %v2927_v17, %v2888_v1  ;;  %14010 = vst [vmem:[#allocation50_spill] sm:$0xff] %v8465_v23  ;;  %v2827_v17 = vld [vmem:[%s13649_s10 + $0x22] sm:$0x7f] }
 0x138   :  { %v5720_v10 = vld [vmem:[%s13649_s10 + $0x13] sm:$0x7f]  ;;  %v2973_v33 = vmul.f32 %v13995_v26, %v2964_v62  ;;  %v2957_v2 = vadd.f32 %v2950_v53, %v2911_v18  ;;  %v2797_v53 = vadd.f32 %v2790_v8, %v7716_v27 }
 0x139   :  { %v5728_v28 = vld [vmem:[%s13649_s10 + $0x14] sm:$0x7f]  ;;  %v3088_v12 = vmul.f32 %v5720_v10, %v8327_v11  ;;  %v3072_v15 = vadd.f32 %v3065_v39, %v3026_v51  ;;  %v2850_v39 = vld [vmem:[%s13649_s10 + $0x23] sm:$0x7f] }
 0x13a   :  { %v5736_v48 = vld [vmem:[%s13649_s10 + $0x15] sm:$0x7f]  ;;  %v3111_v24 = vmul.f32 %v5728_v28, %v8348_v54  ;;  %v2980_v0 = vadd.f32 %v2973_v33, %v2934_v42  ;;  %v2813_v33 = vmul.f32 %v7727_v19, %v2804_v22  ;;  %v2836_v42 = vmul.f32 %v7730_v6, %v2827_v17  ;;  %v2873_v22 = vld [vmem:[%s13649_s10 + $0x24] sm:$0x7f] }
 0x13b   :  { %v5744_v44 = vld [vmem:[%s13649_s10 + $0x16] sm:$0x7f]  ;;  %v3095_v50 = vadd.f32 %v3088_v12, %v3049_v9  ;;  %v3134_v61 = vmul.f32 %v5736_v48, %v8359_v25  ;;  %v5697_v9 = vld [vmem:[%s13649_s10 + $0x20] sm:$0x7f] }
 0x13c   :  { %v5752_v4 = vld [vmem:[%s13649_s10 + $0x17] sm:$0x7f]  ;;  %v3118_v14 = vadd.f32 %v3111_v24, %v3072_v15  ;;  %v3157_v43 = vmul.f32 %v5744_v44, %v8375_v47  ;;  %v5705_v12 = vld [vmem:[%s13649_s10 + $0x21] sm:$0x7f] }
 0x13d   :  { %v5760_v55 = vld [vmem:[%s13649_s10 + $0x18] sm:$0x7f]  ;;  %v3141_v28 = vadd.f32 %v3134_v61, %v3095_v50  ;;  %v3180_v35 = vmul.f32 %v5752_v4, %v8390_v59  ;;  %v5776_v15 = vld [vmem:[%s13649_s10 + $0x20] sm:$0x7f]  ;;  %v1468_v24 = vld [vmem:[#allocation2 + $0xb0] sm:$0xff]  ;;  %v8503_v61 = vstv %s8421_s15  ;;  %v3043_v8 = vmul.f32 %v5705_v12, %v8317_v58  ;;  %s8655_s15 = sld [smem:[#allocation10 + $0x2e]] }
 0x13e   :  { %v5768_v51 = vld [vmem:[%s13649_s10 + $0x19] sm:$0x7f]  ;;  %v3164_v48 = vadd.f32 %v3157_v43, %v3118_v14  ;;  %v3203_v1 = vmul.f32 %v5760_v55, %v8399_v38  ;;  %v5784_v4 = vld [vmem:[%s13649_s10 + $0x21] sm:$0x7f]  ;;  %v8506_v55 = vstv %s8423_s1  ;;  %s8596_s1 = sld [smem:[#allocation10 + $0x24]] }
 0x13f   :  { %v14011_v62 = vld [vmem:[#allocation38_spill] sm:$0xff]  ;;  %v3226_v18 = vmul.f32 %v5768_v51, %v8419_v40  ;;  %v3187_v29 = vadd.f32 %v3180_v35, %v3141_v28  ;;  %v5713_v50 = vld [vmem:[%s13649_s10 + $0x22] sm:$0x7f]  ;;  %14013 = vst [vmem:[#allocation51_spill] sm:$0xff] %v8506_v55  ;;  %v3250_v28 = vmul.f32 %v5776_v15, %v8445_v32  ;;  %v2843_v35 = vadd.f32 %v2836_v42, %v2797_v53 }
 0x140   :  { %v2996_v10 = vmul.f32 %v14011_v62, %v2987_v34  ;;  %v3020_v34 = vmul.f32 %v5697_v9, %v8313_v63  ;;  %14012 = vst [vmem:[#allocation38_spill] sm:$0xff] %v8503_v61  ;;  %v3210_v51 = vadd.f32 %v3203_v1, %v3164_v48  ;;  %v2896_v9 = vld [vmem:[%s13649_s10 + $0x25] sm:$0x7f]  ;;  %v3273_v1 = vmul.f32 %v5784_v4, %v8465_v23 }
 0x141   :  { %v3233_v14 = vadd.f32 %v3226_v18, %v3187_v29  ;;  %v5721_v17 = vld [vmem:[%s13649_s10 + $0x23] sm:$0x7f]  ;;  %v3066_v12 = vmul.f32 %v5713_v50, %v8324_v20  ;;  %v2882_v29 = vmul.f32 %v7741_v41, %v2873_v22 }
 0x142   :  { %v3003_v44 = vadd.f32 %v2996_v10, %v2957_v2  ;;  %v2859_v2 = vmul.f32 %v7733_v16, %v2850_v39  ;;  %v3027_v43 = vadd.f32 %v3020_v34, %v2980_v0  ;;  %v1518_v10 = vld [vmem:[#allocation2 + $0xb1] sm:$0xff]  ;;  %v8522_v0 = vstv %s8447_s26  ;;  %v5729_v53 = vld [vmem:[%s13649_s10 + $0x24] sm:$0x7f]  ;;  %s8536_s26 = sld [smem:[#allocation10 + $0x21]] }
 0x143   :  { %14014 = vst [vmem:[#allocation52_spill] sm:$0xff] %v8522_v0  ;;  %v1486_v39 = vmul.f32 %v7563_v36, %v1468_v24  ;;  %v2905_v34 = vmul.f32 %v7757_v13, %v2896_v9  ;;  %v5792_v36 = vld [vmem:[%s13649_s10 + $0x22] sm:$0x7f]  ;;  %v8552_v15 = vmul.f32 %v7566_v37, %v1518_v10  ;;  %v3257_v24 = vadd.f32 %v3250_v28, %v3210_v51  ;;  %v2988_v37 = vld [vmem:[%s13649_s10 + $0x29] sm:$0x7f] }
 0x144   :  { %v3050_v48 = vadd.f32 %v3043_v8, %v3003_v44  ;;  %v2866_v18 = vadd.f32 %v2859_v2, %v2813_v33  ;;  %v5800_v44 = vld [vmem:[%s13649_s10 + $0x23] sm:$0x7f]  ;;  %v8547_v33 = vstv %s8467_s18  ;;  %v3280_v4 = vadd.f32 %v3273_v1, %v3233_v14  ;;  %s8598_s18 = sld [smem:[#allocation10 + $0x25]] }
 0x145   :  { %14015 = vst [vmem:[#allocation53_spill] sm:$0xff] %v8547_v33  ;;  %v2919_v42 = vld [vmem:[%s13649_s10 + $0x26] sm:$0x7f]  ;;  %v3073_v8 = vadd.f32 %v3066_v12, %v3027_v43  ;;  %v3089_v22 = vmul.f32 %v5721_v17, %v8327_v11  ;;  %v2889_v9 = vadd.f32 %v2882_v29, %v2843_v35  ;;  %v3112_v51 = vmul.f32 %v5729_v53, %v8348_v54 }
 0x146   :  { %v2942_v2 = vld [vmem:[%s13649_s10 + $0x27] sm:$0x7f]  ;;  %v8572_v10 = vstv %s8483_s27  ;;  %v8577_v28 = vadd.f32 %v1486_v39, %v7560_v30  ;;  %v2912_v43 = vadd.f32 %v2905_v34, %v2866_v18  ;;  %v3296_v1 = vmul.f32 %v5792_v36, %v8503_v61  ;;  %s8665_s27 = sld [smem:[#allocation10 + $0x30]] }
 0x147   :  { %v2965_v50 = vld [vmem:[%s13649_s10 + $0x28] sm:$0x7f]  ;;  %14016 = vst [vmem:[#allocation54_spill] sm:$0xff] %v8572_v10  ;;  %v3096_v17 = vadd.f32 %v3089_v22, %v3050_v48  ;;  %v3319_v12 = vmul.f32 %v5800_v44, %v8506_v55  ;;  %v2928_v39 = vmul.f32 %v14007_v57, %v2919_v42  ;;  %v2951_v48 = vmul.f32 %v7769_v3, %v2942_v2 }
 0x148   :  { %v5737_v14 = vld [vmem:[%s13649_s10 + $0x25] sm:$0x7f]  ;;  %v2974_v18 = vmul.f32 %v13995_v26, %v2965_v50  ;;  %v3119_v34 = vadd.f32 %v3112_v51, %v3073_v8  ;;  %v2997_v44 = vmul.f32 %v14011_v62, %v2988_v37  ;;  %v3303_v30 = vadd.f32 %v3296_v1, %v3257_v24 }
 0x149   :  { %v5745_v35 = vld [vmem:[%s13649_s10 + $0x26] sm:$0x7f]  ;;  %v3135_v22 = vmul.f32 %v5737_v14, %v8359_v25  ;;  %v3326_v42 = vadd.f32 %v3319_v12, %v3280_v4  ;;  %v2935_v2 = vadd.f32 %v2928_v39, %v2889_v9  ;;  %v2958_v4 = vadd.f32 %v2951_v48, %v2912_v43  ;;  %v14018_v43 = vld [vmem:[#allocation37_spill] sm:$0xff] }
 0x14a   :  { %v5808_v53 = vld [vmem:[%s13649_s10 + $0x24] sm:$0x7f]  ;;  %v3158_v50 = vmul.f32 %v5745_v35, %v8375_v47  ;;  %v8625_v12 = vstv %s8485_s24  ;;  %vm2038_vm1 = vcmp.gt.f32.partialorder %v14018_v43, 6.0  ;;  %s8643_s24 = sld [smem:[#allocation10 + $0x2c]]  ;;  %v8694_v43 = vstv %s8549_s2  ;;  %s9082_s2 = sld [smem:[#allocation10 + $0x37]] }
 0x14b   :  { %v5816_v29 = vld [vmem:[%s13649_s10 + $0x25] sm:$0x7f]  ;;  %v3342_v51 = vmul.f32 %v5808_v53, %v8522_v0  ;;  %v3142_v14 = vadd.f32 %v3135_v22, %v3096_v17  ;;  %14017 = vst [vmem:[#allocation55_spill] sm:$0xff] %v8625_v12  ;;  %v8640_v22 = vstv %s8492_s28  ;;  %s8653_s28 = sld [smem:[#allocation10 + $0x2d]]  ;;  %14027 = vst [vmem:[#allocation59_spill] sm:$0xff] %v8694_v43 }
 0x14c   :  { %v5753_v36 = vld [vmem:[%s13649_s10 + $0x27] sm:$0x7f]  ;;  %v3365_v24 = vmul.f32 %v5816_v29, %v8547_v33  ;;  %v3165_v53 = vadd.f32 %v3158_v50, %v3119_v34  ;;  %14019 = vst [vmem:[#allocation37_spill] sm:$0xff] %v8640_v22  ;;  %v8645_v34 = vadd.f32 %v2974_v18, %v2935_v2  ;;  %v8660_v2 = vstv %s8508_s5  ;;  %s9163_s5 = sld [smem:[#allocation10 + $0x40]] }
 0x14d   :  { %v5761_v8 = vld [vmem:[%s13649_s10 + $0x28] sm:$0x7f]  ;;  %v3181_v9 = vmul.f32 %v5753_v36, %v8390_v59  ;;  %v3349_v29 = vadd.f32 %v3342_v51, %v3303_v30  ;;  %v5589_v30 = vsel %vm2038_vm1, 1.0, %v8011_v21  ;;  %v8770_v49 = vstv %s8665_s27  ;;  %s9198_s27 = sld [smem:[#allocation10 + $0x42]] }
 0x14e   :  { %v5769_v37 = vld [vmem:[%s13649_s10 + $0x29] sm:$0x7f]  ;;  %v3372_v39 = vadd.f32 %v3365_v24, %v3326_v42  ;;  %v3204_v17 = vmul.f32 %v5761_v8, %v8399_v38  ;;  %2102 = vst [vmem:[%s13649_s10 + $0x30] sm:$0xff] %v5589_v30  ;;  %v14020_v8 = vld [vmem:[#allocation39_spill] sm:$0xff]  ;;  %v8702_v30 = vstv %s8596_s1  ;;  %14042 = vst [vmem:[#allocation74_spill] sm:$0xff] %v8770_v49  ;;  %v8785_v49 = vstv %s8673_s0  ;;  %s9907_s0 = sld [smem:[#allocation10 + $0x48]] }
 0x14f   :  { %v5824_v35 = vld [vmem:[%s13649_s10 + $0x26] sm:$0x7f]  ;;  %v3227_v48 = vmul.f32 %v5769_v37, %v8419_v40  ;;  %vm2039_vm2 = vcmp.gt.f32.partialorder %v14020_v8, 6.0  ;;  %v8657_v37 = vadd.f32 %v2997_v44, %v2958_v4  ;;  %v3188_v18 = vadd.f32 %v3181_v9, %v3142_v14  ;;  %14021 = vst [vmem:[#allocation39_spill] sm:$0xff] %v8660_v2  ;;  %14029 = vst [vmem:[#allocation61_spill] sm:$0xff] %v8702_v30  ;;  %s9909_s1 = sld [smem:[#allocation10 + $0x49]] }
 0x150   :  { %v5832_v1 = vld [vmem:[%s13649_s10 + $0x27] sm:$0x7f]  ;;  %v3388_v42 = vmul.f32 %v5824_v35, %v8572_v10  ;;  %v5590_v51 = vsel %vm2039_vm2, 1.0, %v8011_v21  ;;  %v8667_v24 = vadd.f32 %v3204_v17, %v3165_v53  ;;  %v8676_v4 = vstv %s8524_s22  ;;  %14043 = vst [vmem:[#allocation75_spill] sm:$0xff] %v8785_v49  ;;  %s9120_s22 = sld [smem:[#allocation10 + $0x39]] }
 0x151   :  { %v5840_v36 = vld [vmem:[%s13649_s10 + $0x28] sm:$0x7f]  ;;  %v3411_v50 = vmul.f32 %v5832_v1, %v8625_v12  ;;  %2103 = vst [vmem:[%s13649_s10 + $0x38] sm:$0xff] %v5590_v51  ;;  %14022 = vst [vmem:[#allocation56_spill] sm:$0xff] %v8676_v4  ;;  %v8679_v14 = vstv %s8526_s30  ;;  %v8682_v9 = vstv %s8534_s16  ;;  %s9076_s16 = sld [smem:[#allocation10 + $0x36]]  ;;  %s9174_s30 = sld [smem:[#allocation10 + $0x41]] }
 0x152   :  { %v3395_v35 = vadd.f32 %v3388_v42, %v3349_v29  ;;  %v3434_v44 = vmul.f32 %v5840_v36, %v8640_v22  ;;  %14023 = vst [vmem:[#allocation57_spill] sm:$0xff] %v8679_v14  ;;  %14024 = vst [vmem:[#allocation58_spill] sm:$0xff] %v8682_v9  ;;  %v14025_v53 = vld [vmem:[#allocation40_spill] sm:$0xff]  ;;  %v8699_v36 = vstv %s8574_s25  ;;  %v8705_v42 = vstv %s8598_s18  ;;  %s9084_s25 = sld [smem:[#allocation10 + $0x38]]  ;;  %s9209_s18 = sld [smem:[#allocation10 + $0x43]] }
 0x153   :  { %v3418_v1 = vadd.f32 %v3411_v50, %v3372_v39  ;;  %vm2040_vm3 = vcmp.gt.f32.partialorder %v14025_v53, 6.0  ;;  %v5848_v29 = vld [vmem:[%s13649_s10 + $0x29] sm:$0x7f]  ;;  %v8691_v39 = vstv %s8536_s26  ;;  %14028 = vst [vmem:[#allocation60_spill] sm:$0xff] %v8699_v36  ;;  %14030 = vst [vmem:[#allocation62_spill] sm:$0xff] %v8705_v42  ;;  %v8722_v51 = vstv %s8615_s21  ;;  %s8730_s26 = sld [smem:[#allocation10 + $0x34]] }
 0x154   :  { %14026 = vst [vmem:[#allocation40_spill] sm:$0xff] %v8691_v39  ;;  %v5591_v17 = vsel %vm2040_vm3, 1.0, %v8011_v21  ;;  %v8710_v50 = vld [vmem:[#allocation2 + $0x8] sm:$0xff]  ;;  %v8716_v21 = vstv %s8602_s3  ;;  %14034 = vst [vmem:[#allocation66_spill] sm:$0xff] %v8722_v51  ;;  %v8725_v53 = vstv %s8627_s17  ;;  %v3441_v45 = vadd.f32 %v3434_v44, %v3395_v35  ;;  %s9139_s3 = sld [smem:[#allocation10 + $0x3c]]  ;;  %s9141_s21 = sld [smem:[#allocation10 + $0x3d]] }
 0x155   :  { %2104 = vst [vmem:[%s13649_s10 + $0x40] sm:$0xff] %v5591_v17  ;;  %14031 = vst [vmem:[#allocation63_spill] sm:$0xff] %v8710_v50  ;;  %v5592_v8 = vsel %vm2041_vm4, 1.0, %v8710_v50  ;;  %v3234_v17 = vadd.f32 %v3227_v48, %v3188_v18  ;;  %v3457_v31 = vmul.f32 %v5848_v29, %v8660_v2  ;;  %v2782_v46 = vld [vmem:[%s13649_s10 + $0x30] sm:$0x7f]  ;;  %v8750_v35 = vstv %s8632_s20  ;;  %s9213_s17 = sld [smem:[#allocation10 + $0x44]] }
 0x156   :  { %14032 = vst [vmem:[#allocation64_spill] sm:$0xff] %v8716_v21  ;;  %14035 = vst [vmem:[#allocation67_spill] sm:$0xff] %v8725_v53  ;;  %v2805_v60 = vld [vmem:[%s13649_s10 + $0x31] sm:$0x7f]  ;;  %v2791_v48 = vmul.f32 %v7724_v56, %v2782_v46  ;;  %v8753_v44 = vstv %s8643_s24  ;;  %v8756_v29 = vstv %s8653_s28  ;;  %v8764_v46 = vstv %s8655_s15  ;;  %s10168_s24 = sld [smem:[#allocation8 + $0x3]]  ;;  %s10180_s15 = sld [smem:[#allocation8 + $0x5]] }
 0x157   :  { %2105 = vst [vmem:[%s13649_s10 + $0x48] sm:$0xff] %v5592_v8  ;;  %v5698_v8 = vld [vmem:[%s13649_s10 + $0x30] sm:$0x7f]  ;;  %14037 = vst [vmem:[#allocation69_spill] sm:$0xff] %v8750_v35  ;;  %v8758_v53 = vadd.f32 %v3457_v31, %v3418_v1  ;;  %v8767_v51 = vstv %s8663_s29  ;;  %v1618_v35 = vld [vmem:[#allocation2 + $0xc8] sm:$0xff]  ;;  %s12687_s28 = sld [smem:[#allocation10 + $0x56]] }
 0x158   :  { %v5706_v18 = vld [vmem:[%s13649_s10 + $0x31] sm:$0x7f]  ;;  %14038 = vst [vmem:[#allocation70_spill] sm:$0xff] %v8753_v44  ;;  %14039 = vst [vmem:[#allocation71_spill] sm:$0xff] %v8756_v29  ;;  %v2798_v21 = vadd.f32 %v2791_v48, %v7716_v27  ;;  %v2814_v44 = vmul.f32 %v7727_v19, %v2805_v60  ;;  %v3021_v29 = vmul.f32 %v5698_v8, %v8313_v63  ;;  %v8792_v8 = vstv %s8685_s11  ;;  %s9128_s11 = sld [smem:[#allocation10 + $0x3a]]  ;;  %s12738_s29 = sld [smem:[#allocation10 + $0x5c]] }
 0x159   :  { %v1568_v50 = vld [vmem:[#allocation2 + $0xb2] sm:$0xff]  ;;  %14040 = vst [vmem:[#allocation72_spill] sm:$0xff] %v8764_v46  ;;  %14041 = vst [vmem:[#allocation73_spill] sm:$0xff] %v8767_v51  ;;  %v3044_v48 = vmul.f32 %v5706_v18, %v8317_v58  ;;  %v8796_v46 = vadd.f32 %v8552_v15, %v8577_v28  ;;  %v8814_v15 = vmul.f32 %v7583_v5, %v1618_v35 }
 0x15a   :  { %v2828_v7 = vld [vmem:[%s13649_s10 + $0x32] sm:$0x7f]  ;;  %14044 = vst [vmem:[#allocation76_spill] sm:$0xff] %v8792_v8  ;;  %v8799_v63 = vmul.f32 %v7580_v52, %v1568_v50  ;;  %v3028_v19 = vadd.f32 %v3021_v29, %v8645_v34  ;;  %v8826_v29 = vstv %s8713_s9  ;;  %s9150_s9 = sld [smem:[#allocation10 + $0x3e]] }
 0x15b   :  { %v5777_v31 = vld [vmem:[%s13649_s10 + $0x30] sm:$0x7f]  ;;  %14045 = vst [vmem:[#allocation77_spill] sm:$0xff] %v8796_v46  ;;  %v2837_v49 = vmul.f32 %v7730_v6, %v2828_v7  ;;  %14047 = vst [vmem:[#allocation79_spill] sm:$0xff] %v8814_v15  ;;  %v3051_v28 = vadd.f32 %v3044_v48, %v8657_v37 }
 0x15c   :  { %v5785_v1 = vld [vmem:[%s13649_s10 + $0x31] sm:$0x7f]  ;;  %14046 = vst [vmem:[#allocation78_spill] sm:$0xff] %v8799_v63  ;;  %v3251_v34 = vmul.f32 %v5777_v31, %v8445_v32  ;;  %14048 = vst [vmem:[#allocation80_spill] sm:$0xff] %v8826_v29  ;;  %v8836_v31 = vstv %s8730_s26 }
 0x15d   :  { %v2851_v51 = vld [vmem:[%s13649_s10 + $0x33] sm:$0x7f]  ;;  %v3274_v7 = vmul.f32 %v5785_v1, %v8465_v23  ;;  %v2844_v63 = vadd.f32 %v2837_v49, %v2798_v21  ;;  %14049 = vst [vmem:[#allocation81_spill] sm:$0xff] %v8836_v31 }
 0x15e   :  { %v5856_v60 = vld [vmem:[%s13649_s10 + $0x30] sm:$0x7f]  ;;  %v2860_v58 = vmul.f32 %v7733_v16, %v2851_v51  ;;  %v3258_v1 = vadd.f32 %v3251_v34, %v8667_v24 }
 0x15f   :  { %v5864_v18 = vld [vmem:[%s13649_s10 + $0x31] sm:$0x7f]  ;;  %v3481_v48 = vmul.f32 %v5856_v60, %v8676_v4 }
 0x160   :  { %v5714_v8 = vld [vmem:[%s13649_s10 + $0x32] sm:$0x7f]  ;;  %v2867_v46 = vadd.f32 %v2860_v58, %v2814_v44  ;;  %v3504_v29 = vmul.f32 %v5864_v18, %v8679_v14  ;;  %v3281_v44 = vadd.f32 %v3274_v7, %v3234_v17 }
 0x161   :  { %v5722_v52 = vld [vmem:[%s13649_s10 + $0x33] sm:$0x7f]  ;;  %v3067_v5 = vmul.f32 %v5714_v8, %v8324_v20 }
 0x162   :  { %v2874_v50 = vld [vmem:[%s13649_s10 + $0x34] sm:$0x7f]  ;;  %v3090_v58 = vmul.f32 %v5722_v52, %v8327_v11  ;;  %v3488_v52 = vadd.f32 %v3481_v48, %v3441_v45 }
 0x163   :  { %v2897_v51 = vld [vmem:[%s13649_s10 + $0x35] sm:$0x7f]  ;;  %v2883_v8 = vmul.f32 %v7741_v41, %v2874_v50  ;;  %v3074_v18 = vadd.f32 %v3067_v5, %v3028_v19 }
 0x164   :  { %v5730_v37 = vld [vmem:[%s13649_s10 + $0x34] sm:$0x7f]  ;;  %v2906_v31 = vmul.f32 %v7757_v13, %v2897_v51  ;;  %v3097_v34 = vadd.f32 %v3090_v58, %v3051_v28 }
 0x165   :  { %v5738_v35 = vld [vmem:[%s13649_s10 + $0x35] sm:$0x7f]  ;;  %v3113_v15 = vmul.f32 %v5730_v37, %v8348_v54  ;;  %v2890_v50 = vadd.f32 %v2883_v8, %v2844_v63 }
 0x166   :  { %v5793_v21 = vld [vmem:[%s13649_s10 + $0x32] sm:$0x7f]  ;;  %v3136_v11 = vmul.f32 %v5738_v35, %v8359_v25  ;;  %v2913_v51 = vadd.f32 %v2906_v31, %v2867_v46 }
 0x167   :  { %v5801_v49 = vld [vmem:[%s13649_s10 + $0x33] sm:$0x7f]  ;;  %v3297_v5 = vmul.f32 %v5793_v21, %v8503_v61  ;;  %v3120_v46 = vadd.f32 %v3113_v15, %v3074_v18 }
 0x168   :  { %v2920_v24 = vld [vmem:[%s13649_s10 + $0x36] sm:$0x7f]  ;;  %v3320_v37 = vmul.f32 %v5801_v49, %v8506_v55  ;;  %v3143_v31 = vadd.f32 %v3136_v11, %v3097_v34  ;;  %v3511_v11 = vadd.f32 %v3504_v29, %v8758_v53 }
 0x169   :  { %v2943_v60 = vld [vmem:[%s13649_s10 + $0x37] sm:$0x7f]  ;;  %v2929_v35 = vmul.f32 %v14007_v57, %v2920_v24  ;;  %v3304_v48 = vadd.f32 %v3297_v5, %v3258_v1 }
 0x16a   :  { %v5809_v17 = vld [vmem:[%s13649_s10 + $0x34] sm:$0x7f]  ;;  %v2952_v63 = vmul.f32 %v7769_v3, %v2943_v60  ;;  %v3327_v58 = vadd.f32 %v3320_v37, %v3281_v44 }
 0x16b   :  { %v5817_v7 = vld [vmem:[%s13649_s10 + $0x35] sm:$0x7f]  ;;  %v3343_v8 = vmul.f32 %v5809_v17, %v8522_v0  ;;  %v2936_v34 = vadd.f32 %v2929_v35, %v2890_v50 }
 0x16c   :  { %v2966_v19 = vld [vmem:[%s13649_s10 + $0x38] sm:$0x7f]  ;;  %v3366_v25 = vmul.f32 %v5817_v7, %v8547_v33  ;;  %v2959_v53 = vadd.f32 %v2952_v63, %v2913_v51  ;;  %v2783_v51 = vld [vmem:[%s13649_s10 + $0x40] sm:$0x7f] }
 0x16d   :  { %v5746_v45 = vld [vmem:[%s13649_s10 + $0x36] sm:$0x7f]  ;;  %v2975_v15 = vmul.f32 %v13995_v26, %v2966_v19  ;;  %v3350_v17 = vadd.f32 %v3343_v8, %v3304_v48 }
 0x16e   :  { %v5754_v28 = vld [vmem:[%s13649_s10 + $0x37] sm:$0x7f]  ;;  %v3159_v44 = vmul.f32 %v5746_v45, %v8375_v47  ;;  %v3373_v7 = vadd.f32 %v3366_v25, %v3327_v58 }
 0x16f   :  { %v5825_v54 = vld [vmem:[%s13649_s10 + $0x36] sm:$0x7f]  ;;  %v3182_v24 = vmul.f32 %v5754_v28, %v8390_v59 }
 0x170   :  { %v5872_v21 = vld [vmem:[%s13649_s10 + $0x32] sm:$0x7f]  ;;  %v2989_v1 = vld [vmem:[%s13649_s10 + $0x39] sm:$0x7f]  ;;  %v3166_v19 = vadd.f32 %v3159_v44, %v3120_v46  ;;  %v3389_v45 = vmul.f32 %v5825_v54, %v8572_v10 }
 0x171   :  { %v5880_v49 = vld [vmem:[%s13649_s10 + $0x33] sm:$0x7f]  ;;  %v3527_v28 = vmul.f32 %v5872_v21, %v8682_v9  ;;  %v2998_v25 = vmul.f32 %v14011_v62, %v2989_v1  ;;  %v3189_v35 = vadd.f32 %v3182_v24, %v3143_v31 }
 0x172   :  { %v5762_v60 = vld [vmem:[%s13649_s10 + $0x38] sm:$0x7f]  ;;  %v3550_v5 = vmul.f32 %v5880_v49, %v8691_v39  ;;  %v3396_v58 = vadd.f32 %v3389_v45, %v3350_v17 }
 0x173   :  { %v5833_v18 = vld [vmem:[%s13649_s10 + $0x37] sm:$0x7f]  ;;  %v3205_v54 = vmul.f32 %v5762_v60, %v8399_v38  ;;  %v3534_v21 = vadd.f32 %v3527_v28, %v3488_v52  ;;  %v2792_v52 = vmul.f32 %v7724_v56, %v2783_v51  ;;  %v2806_v28 = vld [vmem:[%s13649_s10 + $0x41] sm:$0x7f] }
 0x174   :  { %v5770_v29 = vld [vmem:[%s13649_s10 + $0x39] sm:$0x7f]  ;;  %v3412_v63 = vmul.f32 %v5833_v18, %v8625_v12  ;;  %v3557_v49 = vadd.f32 %v3550_v5, %v3511_v11  ;;  %v2982_v11 = vadd.f32 %v2975_v15, %v2936_v34  ;;  %v5699_v5 = vld [vmem:[%s13649_s10 + $0x40] sm:$0x7f] }
 0x175   :  { %v5888_v37 = vld [vmem:[%s13649_s10 + $0x34] sm:$0x7f]  ;;  %v3228_v48 = vmul.f32 %v5770_v29, %v8419_v40  ;;  %v3005_v29 = vadd.f32 %v2998_v25, %v2959_v53  ;;  %v3212_v17 = vadd.f32 %v3205_v54, %v3166_v19  ;;  %v5707_v53 = vld [vmem:[%s13649_s10 + $0x41] sm:$0x7f] }
 0x176   :  { %v5896_v50 = vld [vmem:[%s13649_s10 + $0x35] sm:$0x7f]  ;;  %v3419_v44 = vadd.f32 %v3412_v63, %v3373_v7  ;;  %v3573_v31 = vmul.f32 %v5888_v37, %v8694_v43  ;;  %v5778_v19 = vld [vmem:[%s13649_s10 + $0x40] sm:$0x7f]  ;;  %v14050_v63 = vld [vmem:[#allocation64_spill] sm:$0xff] }
 0x177   :  { %v5841_v46 = vld [vmem:[%s13649_s10 + $0x38] sm:$0x7f]  ;;  %v3596_v1 = vmul.f32 %v5896_v50, %v8699_v36  ;;  %v3235_v37 = vadd.f32 %v3228_v48, %v3189_v35  ;;  %v5786_v51 = vld [vmem:[%s13649_s10 + $0x41] sm:$0x7f] }
 0x178   :  { %v5849_v8 = vld [vmem:[%s13649_s10 + $0x39] sm:$0x7f]  ;;  %v3435_v7 = vmul.f32 %v5841_v46, %v8640_v22  ;;  %v3580_v15 = vadd.f32 %v3573_v31, %v3534_v21  ;;  %v2829_v48 = vld [vmem:[%s13649_s10 + $0x42] sm:$0x7f] }
 0x179   :  { %v5904_v24 = vld [vmem:[%s13649_s10 + $0x36] sm:$0x7f]  ;;  %v3458_v50 = vmul.f32 %v5849_v8, %v8660_v2  ;;  %v3603_v34 = vadd.f32 %v3596_v1, %v3557_v49  ;;  %v2852_v8 = vld [vmem:[%s13649_s10 + $0x43] sm:$0x7f]  ;;  %v2799_v1 = vadd.f32 %v2792_v52, %v7716_v27 }
 0x17a   :  { %v5912_v60 = vld [vmem:[%s13649_s10 + $0x37] sm:$0x7f]  ;;  %v3442_v25 = vadd.f32 %v3435_v7, %v3396_v58  ;;  %v3619_v54 = vmul.f32 %v5904_v24, %v8702_v30  ;;  %v14052_v58 = vld [vmem:[#allocation31_spill] sm:$0xff]  ;;  %v3275_v30 = vmul.f32 %v5786_v51, %v8465_v23 }
 0x17b   :  { %v5920_v18 = vld [vmem:[%s13649_s10 + $0x38] sm:$0x7f]  ;;  %v3642_v35 = vmul.f32 %v5912_v60, %v8705_v42  ;;  %v3465_v21 = vadd.f32 %v3458_v50, %v3419_v44  ;;  %v14051_v49 = vld [vmem:[#allocation65_spill] sm:$0xff]  ;;  %v2815_v7 = vmul.f32 %v14052_v58, %v2806_v28  ;;  %v5857_v24 = vld [vmem:[%s13649_s10 + $0x40] sm:$0x7f]  ;;  %v3252_v42 = vmul.f32 %v5778_v19, %v8445_v32 }
 0x17c   :  { %v5928_v45 = vld [vmem:[%s13649_s10 + $0x39] sm:$0x7f]  ;;  %v3665_v46 = vmul.f32 %v5920_v18, %v14050_v63  ;;  %v14053_v60 = vld [vmem:[#allocation41_spill] sm:$0xff]  ;;  %v5865_v44 = vld [vmem:[%s13649_s10 + $0x41] sm:$0x7f]  ;;  %v2838_v50 = vmul.f32 %v7730_v6, %v2829_v48 }
 0x17d   :  { %v3688_v31 = vmul.f32 %v5928_v45, %v14051_v49  ;;  %v3022_v18 = vmul.f32 %v5699_v5, %v14053_v60  ;;  %v14054_v56 = vld [vmem:[#allocation42_spill] sm:$0xff]  ;;  %v2875_v52 = vld [vmem:[%s13649_s10 + $0x44] sm:$0x7f]  ;;  %v3626_v45 = vadd.f32 %v3619_v54, %v3580_v15  ;;  %v3649_v28 = vadd.f32 %v3642_v35, %v3603_v34 }
 0x17e   :  { %v3045_v63 = vmul.f32 %v5707_v53, %v14054_v56  ;;  %v2861_v5 = vmul.f32 %v7733_v16, %v2852_v8  ;;  %v2898_v53 = vld [vmem:[%s13649_s10 + $0x45] sm:$0x7f]  ;;  %v3259_v15 = vadd.f32 %v3252_v42, %v3212_v17  ;;  %v3482_v34 = vmul.f32 %v5857_v24, %v8676_v4 }
 0x17f   :  { %v5715_v19 = vld [vmem:[%s13649_s10 + $0x42] sm:$0x7f]  ;;  %v3029_v23 = vadd.f32 %v3022_v18, %v2982_v11  ;;  %v3282_v54 = vadd.f32 %v3275_v30, %v3235_v37  ;;  %v2845_v8 = vadd.f32 %v2838_v50, %v2799_v1  ;;  %v2884_v6 = vmul.f32 %v7741_v41, %v2875_v52 }
 0x180   :  { %v5723_v51 = vld [vmem:[%s13649_s10 + $0x43] sm:$0x7f]  ;;  %v3052_v32 = vadd.f32 %v3045_v63, %v3005_v29  ;;  %v2868_v16 = vadd.f32 %v2861_v5, %v2815_v7  ;;  %v3505_v56 = vmul.f32 %v5865_v44, %v8679_v14  ;;  %v2907_v11 = vmul.f32 %v7757_v13, %v2898_v53  ;;  %v14056_v5 = vld [vmem:[#allocation66_spill] sm:$0xff] }
 0x181   :  { %v5936_v35 = vld [vmem:[%s13649_s10 + $0x40] sm:$0x7f]  ;;  %v2944_v42 = vld [vmem:[%s13649_s10 + $0x47] sm:$0x7f]  ;;  %v3068_v29 = vmul.f32 %v5715_v19, %v8324_v20  ;;  %v3672_v1 = vadd.f32 %v3665_v46, %v3626_v45  ;;  %v3695_v7 = vadd.f32 %v3688_v31, %v3649_v28  ;;  %v9015_v24 = vadd.f32 %v3482_v34, %v3442_v25 }
 0x182   :  { %v5944_v48 = vld [vmem:[%s13649_s10 + $0x41] sm:$0x7f]  ;;  %v2891_v18 = vadd.f32 %v2884_v6, %v2845_v8  ;;  %v3712_v53 = vmul.f32 %v5936_v35, %v14056_v5  ;;  %v2914_v19 = vadd.f32 %v2907_v11, %v2868_v16  ;;  %v3512_v25 = vadd.f32 %v3505_v56, %v3465_v21  ;;  %v2990_v34 = vld [vmem:[%s13649_s10 + $0x49] sm:$0x7f] }
 0x183   :  { %v2921_v30 = vld [vmem:[%s13649_s10 + $0x46] sm:$0x7f]  ;;  %v3075_v46 = vadd.f32 %v3068_v29, %v3029_v23  ;;  %v2953_v16 = vmul.f32 %v7769_v3, %v2944_v42 }
 0x184   :  { %v14055_v17 = vld [vmem:[#allocation43_spill] sm:$0xff]  ;;  %v2930_v28 = vmul.f32 %v14007_v57, %v2921_v30  ;;  %v14058_v8 = vld [vmem:[#allocation44_spill] sm:$0xff]  ;;  %v9051_v30 = vadd.f32 %v3712_v53, %v3672_v1  ;;  %v9067_v1 = vld [vmem:[%s13652_s13 + $0x50] sm:$0xff] }
 0x185   :  { %v3091_v37 = vmul.f32 %v5723_v51, %v14055_v17  ;;  %v5731_v63 = vld [vmem:[%s13649_s10 + $0x44] sm:$0x7f]  ;;  %vm2042_vm5 = vcmp.gt.f32.partialorder %v9067_v1, 6.0 }
 0x186   :  { %v5739_v44 = vld [vmem:[%s13649_s10 + $0x45] sm:$0x7f]  ;;  %v3114_v17 = vmul.f32 %v5731_v63, %v14058_v8  ;;  %v2937_v29 = vadd.f32 %v2930_v28, %v2891_v18  ;;  %v2999_v28 = vmul.f32 %v14011_v62, %v2990_v34 }
 0x187   :  { %v5794_v52 = vld [vmem:[%s13649_s10 + $0x42] sm:$0x7f]  ;;  %v3098_v31 = vadd.f32 %v3091_v37, %v3052_v32  ;;  %v14059_v32 = vld [vmem:[#allocation45_spill] sm:$0xff] }
 0x188   :  { %v5802_v50 = vld [vmem:[%s13649_s10 + $0x43] sm:$0x7f]  ;;  %v3137_v56 = vmul.f32 %v5739_v44, %v14059_v32  ;;  %v3298_v35 = vmul.f32 %v5794_v52, %v8503_v61  ;;  %v3121_v37 = vadd.f32 %v3114_v17, %v3075_v46  ;;  %v2960_v17 = vadd.f32 %v2953_v16, %v2914_v19 }
 0x189   :  { %v14057_v45 = vld [vmem:[#allocation67_spill] sm:$0xff]  ;;  %v2967_v51 = vld [vmem:[%s13649_s10 + $0x48] sm:$0x7f] }
 0x18a   :  { %v3735_v6 = vmul.f32 %v5944_v48, %v14057_v45  ;;  %v5747_v23 = vld [vmem:[%s13649_s10 + $0x46] sm:$0x7f]  ;;  %v3321_v48 = vmul.f32 %v5802_v50, %v8506_v55  ;;  %v3305_v18 = vadd.f32 %v3298_v35, %v3259_v15 }
 0x18b   :  { %v5755_v21 = vld [vmem:[%s13649_s10 + $0x47] sm:$0x7f]  ;;  %v3160_v55 = vmul.f32 %v5747_v23, %v8375_v47 }
 0x18c   :  { %v5810_v11 = vld [vmem:[%s13649_s10 + $0x44] sm:$0x7f]  ;;  %v9053_v42 = vadd.f32 %v3735_v6, %v3695_v7  ;;  %v3144_v7 = vadd.f32 %v3137_v56, %v3098_v31  ;;  %v3328_v50 = vadd.f32 %v3321_v48, %v3282_v54  ;;  %v2976_v6 = vmul.f32 %v13995_v26, %v2967_v51 }
 0x18d   :  { %v5763_v63 = vld [vmem:[%s13649_s10 + $0x48] sm:$0x7f]  ;;  %v3344_v19 = vmul.f32 %v5810_v11, %v8522_v0  ;;  %v3183_v15 = vmul.f32 %v5755_v21, %v8390_v59  ;;  %v3167_v23 = vadd.f32 %v3160_v55, %v3121_v37  ;;  %v9112_v55 = vadd.f32 %v2999_v28, %v2960_v17 }
 0x18e   :  { %v5771_v44 = vld [vmem:[%s13649_s10 + $0x49] sm:$0x7f]  ;;  %v5873_v53 = vld [vmem:[%s13649_s10 + $0x42] sm:$0x7f]  ;;  %v3206_v54 = vmul.f32 %v5763_v63, %v8399_v38 }
 0x18f   :  { %v5818_v52 = vld [vmem:[%s13649_s10 + $0x45] sm:$0x7f]  ;;  %v3229_v31 = vmul.f32 %v5771_v44, %v8419_v40  ;;  %v3351_v21 = vadd.f32 %v3344_v19, %v3305_v18  ;;  %v3528_v48 = vmul.f32 %v5873_v53, %v8682_v9  ;;  %v3190_v37 = vadd.f32 %v3183_v15, %v3144_v7 }
 0x190   :  { %v5881_v46 = vld [vmem:[%s13649_s10 + $0x43] sm:$0x7f]  ;;  %v3367_v16 = vmul.f32 %v5818_v52, %v8547_v33  ;;  %v9110_v52 = vadd.f32 %v2976_v6, %v2937_v29 }
 0x191   :  { %v5826_v51 = vld [vmem:[%s13649_s10 + $0x46] sm:$0x7f]  ;;  %v3551_v11 = vmul.f32 %v5881_v46, %v8691_v39  ;;  %v3535_v29 = vadd.f32 %v3528_v48, %v9015_v24 }
 0x192   :  { %v5834_v34 = vld [vmem:[%s13649_s10 + $0x47] sm:$0x7f]  ;;  %v3374_v18 = vadd.f32 %v3367_v16, %v3328_v50  ;;  %v3390_v19 = vmul.f32 %v5826_v51, %v8572_v10  ;;  %v14061_v16 = vld [vmem:[#allocation69_spill] sm:$0xff] }
 0x193   :  { %v5842_v56 = vld [vmem:[%s13649_s10 + $0x48] sm:$0x7f]  ;;  %v3413_v33 = vmul.f32 %v5834_v34, %v8625_v12  ;;  %v3558_v17 = vadd.f32 %v3551_v11, %v3512_v25  ;;  %v9143_v25 = vadd.f32 %v3206_v54, %v3167_v23 }
 0x194   :  { %v5850_v35 = vld [vmem:[%s13649_s10 + $0x49] sm:$0x7f]  ;;  %v5952_v63 = vld [vmem:[%s13649_s10 + $0x42] sm:$0x7f]  ;;  %v3436_v50 = vmul.f32 %v5842_v56, %v8640_v22  ;;  %v3397_v34 = vadd.f32 %v3390_v19, %v3351_v21 }
 0x195   :  { %v5960_v44 = vld [vmem:[%s13649_s10 + $0x43] sm:$0x7f]  ;;  %v3459_v6 = vmul.f32 %v5850_v35, %v8660_v2  ;;  %v3420_v11 = vadd.f32 %v3413_v33, %v3374_v18 }
 0x196   :  { %v5889_v53 = vld [vmem:[%s13649_s10 + $0x44] sm:$0x7f]  ;;  %v3781_v51 = vmul.f32 %v5960_v44, %v14061_v16  ;;  %v14062_v44 = vld [vmem:[#allocation70_spill] sm:$0xff] }
 0x197   :  { %v5897_v46 = vld [vmem:[%s13649_s10 + $0x45] sm:$0x7f]  ;;  %v3574_v48 = vmul.f32 %v5889_v53, %v8694_v43 }
 0x198   :  { %v5968_v7 = vld [vmem:[%s13649_s10 + $0x44] sm:$0x7f]  ;;  %v3597_v56 = vmul.f32 %v5897_v46, %v8699_v36  ;;  %v3788_v21 = vadd.f32 %v3781_v51, %v9053_v42  ;;  %v9165_v46 = vadd.f32 %v3229_v31, %v3190_v37  ;;  %v14064_v42 = vld [vmem:[#allocation61_spill] sm:$0xff]  ;;  %v6438_v51 = vld [vmem:[%s13652_s13 + $0x58] sm:$0xff] }
 0x199   :  { %v14060_v28 = vld [vmem:[#allocation68_spill] sm:$0xff]  ;;  %v3804_v53 = vmul.f32 %v5968_v7, %v14062_v44  ;;  %v3581_v19 = vadd.f32 %v3574_v48, %v3535_v29  ;;  %v14063_v16 = vld [vmem:[#allocation71_spill] sm:$0xff]  ;;  %vm2043_vm6 = vcmp.gt.f32.partialorder %v6438_v51, 6.0  ;;  %v9202_v51 = vadd.f32 %v3459_v6, %v3420_v11 }
 0x19a   :  { %v3758_v15 = vmul.f32 %v5952_v63, %v14060_v28  ;;  %v5976_v24 = vld [vmem:[%s13649_s10 + $0x45] sm:$0x7f]  ;;  %v3604_v33 = vadd.f32 %v3597_v56, %v3558_v17 }
 0x19b   :  { %v5905_v35 = vld [vmem:[%s13649_s10 + $0x46] sm:$0x7f]  ;;  %v3827_v36 = vmul.f32 %v5976_v24, %v14063_v16  ;;  %v14066_v24 = vld [vmem:[#allocation62_spill] sm:$0xff] }
 0x19c   :  { %v5913_v63 = vld [vmem:[%s13649_s10 + $0x47] sm:$0x7f]  ;;  %v3765_v23 = vadd.f32 %v3758_v15, %v9051_v30  ;;  %v3620_v7 = vmul.f32 %v5905_v35, %v14064_v42  ;;  %v9200_v42 = vadd.f32 %v3436_v50, %v3397_v34  ;;  %v14070_v34 = vld [vmem:[#allocation74_spill] sm:$0xff] }
 0x19d   :  { %v5921_v54 = vld [vmem:[%s13649_s10 + $0x48] sm:$0x7f]  ;;  %v14065_v29 = vld [vmem:[#allocation63_spill] sm:$0xff]  ;;  %v3643_v48 = vmul.f32 %v5913_v63, %v14066_v24 }
 0x19e   :  { %v5929_v18 = vld [vmem:[%s13649_s10 + $0x49] sm:$0x7f]  ;;  %v3811_v15 = vadd.f32 %v3804_v53, %v3765_v23  ;;  %v5593_v17 = vsel %vm2042_vm5, 1.0, %v14065_v29  ;;  %v3834_v23 = vadd.f32 %v3827_v36, %v3788_v21  ;;  %v5594_v1 = vsel %vm2043_vm6, 1.0, %v14065_v29 }
 0x19f   :  { %v5984_v30 = vld [vmem:[%s13649_s10 + $0x46] sm:$0x7f]  ;;  %2106 = vst [vmem:[%s13649_s10 + $0x50] sm:$0xff] %v5593_v17  ;;  %v3689_v63 = vmul.f32 %v5929_v18, %v14051_v49  ;;  %2107 = vst [vmem:[%s13649_s10 + $0x58] sm:$0xff] %v5594_v1  ;;  %v3627_v21 = vadd.f32 %v3620_v7, %v3581_v19  ;;  %v3650_v17 = vadd.f32 %v3643_v48, %v3604_v33  ;;  %v9219_v1 = vstv %s9036_s23  ;;  %s10178_s23 = sld [smem:[#allocation8 + $0x4]] }
 0x1a0   :  { %v5992_v31 = vld [vmem:[%s13649_s10 + $0x47] sm:$0x7f]  ;;  %14072 = vst [vmem:[#allocation63_spill] sm:$0xff] %v9219_v1  ;;  %v9225_v7 = vstv %s9076_s16  ;;  %v9235_v48 = vstv %s9084_s25  ;;  %s10115_s16 = sld [smem:[#allocation8 + $0x1]]  ;;  %s12619_s25 = sld [smem:[#allocation10 + $0x4f]] }
 0x1a1   :  { %v6000_v37 = vld [vmem:[%s13649_s10 + $0x48] sm:$0x7f]  ;;  %v14071_v18 = vld [vmem:[#allocation75_spill] sm:$0xff]  ;;  %14073 = vst [vmem:[#allocation82_spill] sm:$0xff] %v9225_v7  ;;  %14075 = vst [vmem:[#allocation84_spill] sm:$0xff] %v9235_v48  ;;  %v9286_v48 = vstv %s9198_s27  ;;  %s9917_s27 = sld [smem:[#allocation10 + $0x4b]] }
 0x1a2   :  { %v14067_v56 = vld [vmem:[#allocation64_spill] sm:$0xff]  ;;  %v3896_v6 = vmul.f32 %v6000_v37, %v14070_v34  ;;  %v6439_v19 = vld [vmem:[%s13652_s13 + $0x60] sm:$0xff]  ;;  %v9232_v37 = vstv %s9082_s2  ;;  %14086 = vst [vmem:[#allocation94_spill] sm:$0xff] %v9286_v48  ;;  %v14088_v48 = vld [vmem:[#allocation77_spill] sm:$0xff]  ;;  %s12606_s2 = sld [smem:[#allocation10 + $0x4d]] }
 0x1a3   :  { %v3666_v35 = vmul.f32 %v5921_v54, %v14067_v56  ;;  %v6008_v53 = vld [vmem:[%s13649_s10 + $0x49] sm:$0x7f]  ;;  %v14069_v56 = vld [vmem:[#allocation73_spill] sm:$0xff]  ;;  %vm2044_vm7 = vcmp.gt.f32.partialorder %v6439_v19, 6.0  ;;  %14074 = vst [vmem:[#allocation83_spill] sm:$0xff] %v9232_v37  ;;  %v9251_v19 = vstv %s9139_s3  ;;  %s12638_s3 = sld [smem:[#allocation10 + $0x52]] }
 0x1a4   :  { %v14068_v36 = vld [vmem:[#allocation72_spill] sm:$0xff]  ;;  %v3873_v50 = vmul.f32 %v5992_v31, %v14069_v56  ;;  %v5595_v31 = vsel %vm2044_vm7, 1.0, %v14065_v29  ;;  %14079 = vst [vmem:[#allocation88_spill] sm:$0xff] %v9251_v19  ;;  %v9271_v19 = vstv %s9163_s5  ;;  %v14089_v56 = vld [vmem:[#allocation78_spill] sm:$0xff] }
 0x1a5   :  { %v3850_v54 = vmul.f32 %v5984_v30, %v14068_v36  ;;  %v3919_v30 = vmul.f32 %v6008_v53, %v14071_v18  ;;  %v9238_v53 = vstv %s9120_s22  ;;  %2108 = vst [vmem:[%s13649_s10 + $0x60] sm:$0xff] %v5595_v31  ;;  %v1668_v18 = vld [vmem:[#allocation2 + $0xc9] sm:$0xff]  ;;  %v9259_v34 = vadd.f32 %v3666_v35, %v3627_v21  ;;  %14083 = vst [vmem:[#allocation92_spill] sm:$0xff] %v9271_v19  ;;  %v1819_v19 = vld [vmem:[#allocation2 + $0xe1] sm:$0xff]  ;;  %s10126_s22 = sld [smem:[#allocation8 + $0x2]] }
 0x1a6   :  { %v3880_v33 = vadd.f32 %v3873_v50, %v3834_v23  ;;  %14076 = vst [vmem:[#allocation85_spill] sm:$0xff] %v9238_v53  ;;  %v9248_v50 = vstv %s9130_s14  ;;  %v9265_v31 = vstv %s9150_s9  ;;  %v9273_v53 = vadd.f32 %v3689_v63, %v3650_v17  ;;  %v2807_v21 = vld [vmem:[%s13649_s10 + $0x51] sm:$0x7f]  ;;  %v14092_v37 = vld [vmem:[#allocation24_spill] sm:$0xff]  ;;  %s9897_s9 = sld [smem:[#allocation10 + $0x46]]  ;;  %s12721_s14 = sld [smem:[#allocation10 + $0x5b]] }
 0x1a7   :  { %v3857_v11 = vadd.f32 %v3850_v54, %v3811_v15  ;;  %v6440_v15 = vld [vmem:[%s13652_s13 + $0x68] sm:$0xff]  ;;  %v9245_v54 = vstv %s9128_s11  ;;  %14078 = vst [vmem:[#allocation87_spill] sm:$0xff] %v9248_v50  ;;  %14081 = vst [vmem:[#allocation90_spill] sm:$0xff] %v9265_v31  ;;  %v9268_v50 = vstv %s9152_s4  ;;  %v5700_v31 = vld [vmem:[%s13649_s10 + $0x50] sm:$0x7f]  ;;  %v9316_v7 = vmul.f32 %v14092_v37, %v1668_v18  ;;  %s9899_s4 = sld [smem:[#allocation10 + $0x47]] }
 0x1a8   :  { %vm2045_vm8 = vcmp.gt.f32.partialorder %v6440_v15, 6.0  ;;  %14077 = vst [vmem:[#allocation86_spill] sm:$0xff] %v9245_v54  ;;  %v9254_v15 = vstv %s9141_s21  ;;  %14082 = vst [vmem:[#allocation91_spill] sm:$0xff] %v9268_v50  ;;  %v1718_v54 = vld [vmem:[#allocation2 + $0xca] sm:$0xff]  ;;  %v9283_v50 = vstv %s9174_s30  ;;  %v9290_v63 = vadd.f32 %v3919_v30, %v3880_v33  ;;  %v2853_v18 = vld [vmem:[%s13649_s10 + $0x53] sm:$0x7f] }
 0x1a9   :  { %v5596_v23 = vsel %vm2045_vm8, 1.0, %v14065_v29  ;;  %14080 = vst [vmem:[#allocation89_spill] sm:$0xff] %v9254_v15  ;;  %v2784_v29 = vld [vmem:[%s13649_s10 + $0x50] sm:$0x7f]  ;;  %v1769_v15 = vld [vmem:[#allocation2 + $0xe0] sm:$0xff]  ;;  %14085 = vst [vmem:[#allocation93_spill] sm:$0xff] %v9283_v50  ;;  %v9288_v49 = vadd.f32 %v3896_v6, %v3857_v11  ;;  %v9302_v50 = vstv %s9209_s18  ;;  %v1602_v6 = vadd.f32 %v14089_v56, %v14088_v48 }
 0x1aa   :  { %2109 = vst [vmem:[%s13649_s10 + $0x68] sm:$0xff] %v5596_v23  ;;  %v14084_v23 = vld [vmem:[#allocation30_spill] sm:$0xff]  ;;  %v5708_v17 = vld [vmem:[%s13649_s10 + $0x51] sm:$0x7f]  ;;  %14087 = vst [vmem:[#allocation95_spill] sm:$0xff] %v9302_v50  ;;  %v9310_v30 = vstv %s9213_s17  ;;  %v9313_v33 = vstv %s9215_s19  ;;  %v2816_v50 = vmul.f32 %v14052_v58, %v2807_v21  ;;  %v3023_v56 = vmul.f32 %v5700_v31, %v14053_v60  ;;  %s9915_s30 = sld [smem:[#allocation10 + $0x4a]] }
 0x1ab   :  { %v2793_v35 = vmul.f32 %v14084_v23, %v2784_v29  ;;  %v5779_v29 = vld [vmem:[%s13649_s10 + $0x50] sm:$0x7f]  ;;  %14090 = vst [vmem:[#allocation77_spill] sm:$0xff] %v9310_v30  ;;  %14091 = vst [vmem:[#allocation78_spill] sm:$0xff] %v9313_v33  ;;  %v14100_v31 = vld [vmem:[#allocation50_spill] sm:$0xff]  ;;  %s10237_s11 = sld [smem:[#allocation8 + $0x6]] }
 0x1ac   :  { %v5787_v23 = vld [vmem:[%s13649_s10 + $0x51] sm:$0x7f]  ;;  %14093 = vst [vmem:[#allocation24_spill] sm:$0xff] %v9316_v7  ;;  %v3030_v60 = vadd.f32 %v3023_v56, %v9110_v52  ;;  %s12655_s18 = sld [smem:[#allocation10 + $0x54]]  ;;  %s12762_s19 = sld [smem:[#allocation10 + $0x5f]] }
 0x1ad   :  { %v5858_v11 = vld [vmem:[%s13649_s10 + $0x50] sm:$0x7f]  ;;  %v2800_v1 = vadd.f32 %v2793_v35, %v7716_v27  ;;  %v14101_v27 = vld [vmem:[#allocation27_spill] sm:$0xff] }
 0x1ae   :  { %v14094_v36 = vld [vmem:[#allocation25_spill] sm:$0xff]  ;;  %v9343_v58 = vmul.f32 %v14101_v27, %v1819_v19  ;;  %v14105_v27 = vld [vmem:[#allocation79_spill] sm:$0xff] }
 0x1af   :  { %v9319_v24 = vmul.f32 %v14094_v36, %v1718_v54  ;;  %v5866_v48 = vld [vmem:[%s13649_s10 + $0x51] sm:$0x7f]  ;;  %v14096_v36 = vld [vmem:[#allocation26_spill] sm:$0xff]  ;;  %v9358_v19 = vadd.f32 %v14105_v27, %v1602_v6  ;;  %v14108_v27 = vld [vmem:[#allocation76_spill] sm:$0xff] }
 0x1b0   :  { %v2830_v33 = vld [vmem:[%s13649_s10 + $0x52] sm:$0x7f]  ;;  %v9334_v37 = vmul.f32 %v14096_v36, %v1769_v15  ;;  %14102 = vst [vmem:[#allocation27_spill] sm:$0xff] %v9343_v58  ;;  %v14103_v36 = vld [vmem:[#allocation32_spill] sm:$0xff]  ;;  %v3483_v58 = vmul.f32 %v5858_v11, %v8676_v4 }
 0x1b1   :  { %14095 = vst [vmem:[#allocation25_spill] sm:$0xff] %v9319_v24  ;;  %v14098_v54 = vld [vmem:[#allocation42_spill] sm:$0xff]  ;;  %v14099_v21 = vld [vmem:[#allocation49_spill] sm:$0xff]  ;;  %v3276_v24 = vmul.f32 %v5787_v23, %v14100_v31  ;;  %14106 = vst [vmem:[#allocation79_spill] sm:$0xff] %v9358_v19 }
 0x1b2   :  { %14097 = vst [vmem:[#allocation26_spill] sm:$0xff] %v9334_v37  ;;  %v3046_v35 = vmul.f32 %v5708_v17, %v14098_v54  ;;  %v3253_v30 = vmul.f32 %v5779_v29, %v14099_v21  ;;  %v2876_v7 = vld [vmem:[%s13649_s10 + $0x54] sm:$0x7f]  ;;  %v2839_v37 = vmul.f32 %v14103_v36, %v2830_v33  ;;  %v3506_v33 = vmul.f32 %v5866_v48, %v8679_v14 }
 0x1b3   :  { %v5937_v15 = vld [vmem:[%s13649_s10 + $0x50] sm:$0x7f]  ;;  %v3283_v36 = vadd.f32 %v3276_v24, %v9165_v46  ;;  %v2885_v11 = vmul.f32 %v7741_v41, %v2876_v7  ;;  %v9379_v48 = vadd.f32 %v3483_v58, %v9200_v42 }
 0x1b4   :  { %v14104_v17 = vld [vmem:[#allocation33_spill] sm:$0xff]  ;;  %v3053_v52 = vadd.f32 %v3046_v35, %v9112_v55  ;;  %v3260_v56 = vadd.f32 %v3253_v30, %v9143_v25  ;;  %v2846_v6 = vadd.f32 %v2839_v37, %v2800_v1  ;;  %v3713_v35 = vmul.f32 %v5937_v15, %v14056_v5 }
 0x1b5   :  { %v2862_v54 = vmul.f32 %v14104_v17, %v2853_v18  ;;  %v2899_v23 = vld [vmem:[%s13649_s10 + $0x55] sm:$0x7f] }
 0x1b6   :  { %v5716_v29 = vld [vmem:[%s13649_s10 + $0x52] sm:$0x7f]  ;;  %v2908_v24 = vmul.f32 %v7757_v13, %v2899_v23  ;;  %v2892_v42 = vadd.f32 %v2885_v11, %v2846_v6  ;;  %v14109_v11 = vld [vmem:[#allocation80_spill] sm:$0xff] }
 0x1b7   :  { %v5945_v18 = vld [vmem:[%s13649_s10 + $0x51] sm:$0x7f]  ;;  %v2869_v25 = vadd.f32 %v2862_v54, %v2816_v50  ;;  %v3069_v7 = vmul.f32 %v5716_v29, %v8324_v20  ;;  %v9391_v50 = vadd.f32 %v3506_v33, %v9202_v51  ;;  %v14107_v54 = vld [vmem:[#allocation43_spill] sm:$0xff] }
 0x1b8   :  { %v5724_v17 = vld [vmem:[%s13649_s10 + $0x53] sm:$0x7f]  ;;  %v3736_v58 = vmul.f32 %v5945_v18, %v14057_v45 }
 0x1b9   :  { %v6016_v55 = vld [vmem:[%s13649_s10 + $0x50] sm:$0x7f]  ;;  %v2945_v37 = vld [vmem:[%s13649_s10 + $0x57] sm:$0x7f]  ;;  %v3092_v15 = vmul.f32 %v5724_v17, %v14107_v54  ;;  %v2915_v33 = vadd.f32 %v2908_v24, %v2869_v25  ;;  %v3076_v19 = vadd.f32 %v3069_v7, %v3030_v60  ;;  %v9410_v17 = vadd.f32 %v3713_v35, %v9259_v34 }
 0x1ba   :  { %v5732_v30 = vld [vmem:[%s13649_s10 + $0x54] sm:$0x7f]  ;;  %v3943_v51 = vmul.f32 %v6016_v55, %v14108_v27  ;;  %v2954_v60 = vmul.f32 %v7769_v3, %v2945_v37  ;;  %v9430_v24 = vadd.f32 %v3736_v58, %v9273_v53 }
 0x1bb   :  { %v6024_v46 = vld [vmem:[%s13649_s10 + $0x51] sm:$0x7f]  ;;  %v3115_v18 = vmul.f32 %v5732_v30, %v14058_v8  ;;  %v3099_v41 = vadd.f32 %v3092_v15, %v3053_v52  ;;  %v2968_v25 = vld [vmem:[%s13649_s10 + $0x58] sm:$0x7f] }
 0x1bc   :  { %v2922_v1 = vld [vmem:[%s13649_s10 + $0x56] sm:$0x7f]  ;;  %v3966_v13 = vmul.f32 %v6024_v46, %v14109_v11 }
 0x1bd   :  { %v5740_v23 = vld [vmem:[%s13649_s10 + $0x55] sm:$0x7f]  ;;  %v2931_v54 = vmul.f32 %v14007_v57, %v2922_v1  ;;  %v3122_v30 = vadd.f32 %v3115_v18, %v3076_v19  ;;  %v9433_v1 = vadd.f32 %v3943_v51, %v9288_v49  ;;  %v14110_v49 = vld [vmem:[#allocation51_spill] sm:$0xff] }
 0x1be   :  { %v5795_v29 = vld [vmem:[%s13649_s10 + $0x52] sm:$0x7f]  ;;  %v2991_v34 = vld [vmem:[%s13649_s10 + $0x59] sm:$0x7f]  ;;  %v3138_v35 = vmul.f32 %v5740_v23, %v14059_v32  ;;  %v2961_v23 = vadd.f32 %v2954_v60, %v2915_v33  ;;  %v9453_v51 = vadd.f32 %v3966_v13, %v9290_v63 }
 0x1bf   :  { %v5748_v6 = vld [vmem:[%s13649_s10 + $0x56] sm:$0x7f]  ;;  %v3299_v46 = vmul.f32 %v5795_v29, %v8503_v61  ;;  %v2938_v7 = vadd.f32 %v2931_v54, %v2892_v42  ;;  %v3000_v33 = vmul.f32 %v14011_v62, %v2991_v34 }
 0x1c0   :  { %v5803_v55 = vld [vmem:[%s13649_s10 + $0x53] sm:$0x7f]  ;;  %v3161_v37 = vmul.f32 %v5748_v6, %v8375_v47  ;;  %v3145_v18 = vadd.f32 %v3138_v35, %v3099_v41  ;;  %v2977_v41 = vmul.f32 %v13995_v26, %v2968_v25 }
 0x1c1   :  { %v5756_v52 = vld [vmem:[%s13649_s10 + $0x57] sm:$0x7f]  ;;  %v3306_v58 = vadd.f32 %v3299_v46, %v3260_v56  ;;  %v3322_v29 = vmul.f32 %v5803_v55, %v14110_v49 }
 0x1c2   :  { %v5764_v19 = vld [vmem:[%s13649_s10 + $0x58] sm:$0x7f]  ;;  %v3184_v6 = vmul.f32 %v5756_v52, %v8390_v59  ;;  %v3168_v55 = vadd.f32 %v3161_v37, %v3122_v30  ;;  %v9469_v25 = vadd.f32 %v2977_v41, %v2938_v7  ;;  %v9483_v7 = vadd.f32 %v3000_v33, %v2961_v23 }
 0x1c3   :  { %v5811_v15 = vld [vmem:[%s13649_s10 + $0x54] sm:$0x7f]  ;;  %v3207_v60 = vmul.f32 %v5764_v19, %v8399_v38  ;;  %v3329_v35 = vadd.f32 %v3322_v29, %v3283_v36 }
 0x1c4   :  { %v5772_v53 = vld [vmem:[%s13649_s10 + $0x59] sm:$0x7f]  ;;  %v5874_v42 = vld [vmem:[%s13649_s10 + $0x52] sm:$0x7f]  ;;  %v3345_v46 = vmul.f32 %v5811_v15, %v8522_v0  ;;  %v3191_v15 = vadd.f32 %v3184_v6, %v3145_v18 }
 0x1c5   :  { %v5882_v54 = vld [vmem:[%s13649_s10 + $0x53] sm:$0x7f]  ;;  %v3230_v34 = vmul.f32 %v5772_v53, %v8419_v40  ;;  %v3529_v52 = vmul.f32 %v5874_v42, %v8682_v9  ;;  %v9502_v6 = vadd.f32 %v3207_v60, %v3168_v55 }
 0x1c6   :  { %v5819_v56 = vld [vmem:[%s13649_s10 + $0x55] sm:$0x7f]  ;;  %v3552_v37 = vmul.f32 %v5882_v54, %v8691_v39  ;;  %v3352_v53 = vadd.f32 %v3345_v46, %v3306_v58 }
 0x1c7   :  { %v5827_v13 = vld [vmem:[%s13649_s10 + $0x56] sm:$0x7f]  ;;  %v3536_v18 = vadd.f32 %v3529_v52, %v9379_v48 }
 0x1c8   :  { %v5835_v63 = vld [vmem:[%s13649_s10 + $0x57] sm:$0x7f]  ;;  %v3391_v39 = vmul.f32 %v5827_v13, %v8572_v10  ;;  %v3559_v58 = vadd.f32 %v3552_v37, %v9391_v50  ;;  %v14112_v50 = vld [vmem:[#allocation60_spill] sm:$0xff] }
 0x1c9   :  { %v5843_v30 = vld [vmem:[%s13649_s10 + $0x58] sm:$0x7f]  ;;  %v14111_v29 = vld [vmem:[#allocation53_spill] sm:$0xff]  ;;  %v3414_v23 = vmul.f32 %v5835_v63, %v8625_v12 }
 0x1ca   :  { %v5851_v36 = vld [vmem:[%s13649_s10 + $0x59] sm:$0x7f]  ;;  %v5953_v19 = vld [vmem:[%s13649_s10 + $0x52] sm:$0x7f]  ;;  %v3368_v41 = vmul.f32 %v5819_v56, %v14111_v29  ;;  %v3437_v46 = vmul.f32 %v5843_v30, %v8640_v22  ;;  %v3398_v30 = vadd.f32 %v3391_v39, %v3352_v53  ;;  %v14118_v22 = vld [vmem:[#allocation72_spill] sm:$0xff] }
 0x1cb   :  { %v5890_v40 = vld [vmem:[%s13649_s10 + $0x54] sm:$0x7f]  ;;  %v3759_v38 = vmul.f32 %v5953_v19, %v14060_v28  ;;  %v3460_v63 = vmul.f32 %v5851_v36, %v8660_v2 }
 0x1cc   :  { %v5898_v42 = vld [vmem:[%s13649_s10 + $0x55] sm:$0x7f]  ;;  %v3375_v56 = vadd.f32 %v3368_v41, %v3329_v35  ;;  %v3575_v48 = vmul.f32 %v5890_v40, %v8694_v43  ;;  %v9519_v35 = vadd.f32 %v3230_v34, %v3191_v15 }
 0x1cd   :  { %v5961_v54 = vld [vmem:[%s13649_s10 + $0x53] sm:$0x7f]  ;;  %v3598_v52 = vmul.f32 %v5898_v42, %v14112_v50  ;;  %v3766_v19 = vadd.f32 %v3759_v38, %v9410_v17 }
 0x1ce   :  { %v5969_v33 = vld [vmem:[%s13649_s10 + $0x54] sm:$0x7f]  ;;  %v3421_v17 = vadd.f32 %v3414_v23, %v3375_v56 }
 0x1cf   :  { %v5977_v13 = vld [vmem:[%s13649_s10 + $0x55] sm:$0x7f]  ;;  %v3805_v41 = vmul.f32 %v5969_v33, %v14062_v44  ;;  %v3605_v34 = vadd.f32 %v3598_v52, %v3559_v58  ;;  %v14115_v58 = vld [vmem:[#allocation63_spill] sm:$0xff] }
 0x1d0   :  { %v14113_v37 = vld [vmem:[#allocation69_spill] sm:$0xff]  ;;  %v3828_v15 = vmul.f32 %v5977_v13, %v14063_v16  ;;  %v5922_v33 = vld [vmem:[%s13649_s10 + $0x58] sm:$0x7f] }
 0x1d1   :  { %v3782_v12 = vmul.f32 %v5961_v54, %v14113_v37  ;;  %v6032_v55 = vld [vmem:[%s13649_s10 + $0x52] sm:$0x7f]  ;;  %v3582_v54 = vadd.f32 %v3575_v48, %v3536_v18  ;;  %v3812_v44 = vadd.f32 %v3805_v41, %v3766_v19  ;;  %v5930_v56 = vld [vmem:[%s13649_s10 + $0x59] sm:$0x7f] }
 0x1d2   :  { %v6040_v60 = vld [vmem:[%s13649_s10 + $0x53] sm:$0x7f] }
 0x1d3   :  { %v5906_v36 = vld [vmem:[%s13649_s10 + $0x56] sm:$0x7f]  ;;  %v3789_v39 = vadd.f32 %v3782_v12, %v9430_v24  ;;  %v4012_v13 = vmul.f32 %v6040_v60, %v14115_v58 }
 0x1d4   :  { %v5914_v40 = vld [vmem:[%s13649_s10 + $0x57] sm:$0x7f] }
 0x1d5   :  { %v5985_v42 = vld [vmem:[%s13649_s10 + $0x56] sm:$0x7f]  ;;  %v3835_v2 = vadd.f32 %v3828_v15, %v3789_v39  ;;  %v4019_v41 = vadd.f32 %v4012_v13, %v9453_v51  ;;  %v14121_v39 = vld [vmem:[#allocation64_spill] sm:$0xff] }
 0x1d6   :  { %v6048_v53 = vld [vmem:[%s13649_s10 + $0x54] sm:$0x7f]  ;;  %v3851_v23 = vmul.f32 %v5985_v42, %v14118_v22  ;;  %v3667_v15 = vmul.f32 %v5922_v33, %v14121_v39 }
 0x1d7   :  { %v6056_v38 = vld [vmem:[%s13649_s10 + $0x55] sm:$0x7f] }
 0x1d8   :  { %v5993_v12 = vld [vmem:[%s13649_s10 + $0x57] sm:$0x7f]  ;;  %v3858_v13 = vadd.f32 %v3851_v23, %v3812_v44  ;;  %v5701_v44 = vld [vmem:[%s13649_s10 + $0x60] sm:$0x7f] }
 0x1d9   :  { %v14114_v24 = vld [vmem:[#allocation81_spill] sm:$0xff]  ;;  %v14117_v16 = vld [vmem:[#allocation62_spill] sm:$0xff] }
 0x1da   :  { %v3989_v18 = vmul.f32 %v6032_v55, %v14114_v24  ;;  %v14116_v48 = vld [vmem:[#allocation61_spill] sm:$0xff]  ;;  %v3644_v37 = vmul.f32 %v5914_v40, %v14117_v16  ;;  %v14119_v28 = vld [vmem:[#allocation82_spill] sm:$0xff]  ;;  %v14120_v55 = vld [vmem:[#allocation83_spill] sm:$0xff] }
 0x1db   :  { %v3621_v52 = vmul.f32 %v5906_v36, %v14116_v48  ;;  %v4035_v50 = vmul.f32 %v6048_v53, %v14119_v28  ;;  %v4058_v24 = vmul.f32 %v6056_v38, %v14120_v55  ;;  %v6064_v60 = vld [vmem:[%s13649_s10 + $0x56] sm:$0x7f]  ;;  %v2785_v38 = vld [vmem:[%s13649_s10 + $0x60] sm:$0x7f] }
 0x1dc   :  { %v3996_v19 = vadd.f32 %v3989_v18, %v9433_v1  ;;  %v6072_v36 = vld [vmem:[%s13649_s10 + $0x57] sm:$0x7f]  ;;  %v3651_v42 = vadd.f32 %v3644_v37, %v3605_v34  ;;  %v3444_v18 = vadd.f32 %v3437_v46, %v3398_v30  ;;  %v3467_v46 = vadd.f32 %v3460_v63, %v3421_v17 }
 0x1dd   :  { %v3628_v40 = vadd.f32 %v3621_v52, %v3582_v54  ;;  %v14122_v22 = vld [vmem:[#allocation73_spill] sm:$0xff]  ;;  %v6001_v51 = vld [vmem:[%s13649_s10 + $0x58] sm:$0x7f]  ;;  %v4065_v37 = vadd.f32 %v4058_v24, %v4019_v41  ;;  %v5709_v41 = vld [vmem:[%s13649_s10 + $0x61] sm:$0x7f] }
 0x1de   :  { %v3874_v1 = vmul.f32 %v5993_v12, %v14122_v22  ;;  %v6009_v53 = vld [vmem:[%s13649_s10 + $0x59] sm:$0x7f]  ;;  %v4042_v54 = vadd.f32 %v4035_v50, %v3996_v19  ;;  %v14123_v34 = vld [vmem:[#allocation65_spill] sm:$0xff]  ;;  %v14124_v12 = vld [vmem:[#allocation84_spill] sm:$0xff] }
 0x1df   :  { %v3690_v33 = vmul.f32 %v5930_v56, %v14123_v34  ;;  %v4081_v55 = vmul.f32 %v6064_v60, %v14124_v12  ;;  %v14125_v28 = vld [vmem:[#allocation85_spill] sm:$0xff]  ;;  %v6080_v58 = vld [vmem:[%s13649_s10 + $0x58] sm:$0x7f]  ;;  %v2808_v19 = vld [vmem:[%s13649_s10 + $0x61] sm:$0x7f] }
 0x1e0   :  { %v3881_v52 = vadd.f32 %v3874_v1, %v3835_v2  ;;  %v4104_v22 = vmul.f32 %v6072_v36, %v14125_v28  ;;  %v6088_v39 = vld [vmem:[%s13649_s10 + $0x59] sm:$0x7f]  ;;  %v14127_v2 = vld [vmem:[#allocation75_spill] sm:$0xff]  ;;  %v3674_v36 = vadd.f32 %v3667_v15, %v3628_v40 }
 0x1e1   :  { %v14126_v50 = vld [vmem:[#allocation74_spill] sm:$0xff]  ;;  %v3920_v24 = vmul.f32 %v6009_v53, %v14127_v2  ;;  %v5780_v60 = vld [vmem:[%s13649_s10 + $0x60] sm:$0x7f]  ;;  %v3697_v63 = vadd.f32 %v3690_v33, %v3651_v42  ;;  %v4088_v17 = vadd.f32 %v4081_v55, %v4042_v54 }
 0x1e2   :  { %v3897_v30 = vmul.f32 %v6001_v51, %v14126_v50  ;;  %v14128_v23 = vld [vmem:[#allocation30_spill] sm:$0xff]  ;;  %v4111_v1 = vadd.f32 %v4104_v22, %v4065_v37  ;;  %v5788_v51 = vld [vmem:[%s13649_s10 + $0x61] sm:$0x7f]  ;;  %v14131_v50 = vld [vmem:[#allocation41_spill] sm:$0xff]  ;;  %v3254_v15 = vmul.f32 %v5780_v60, %v14099_v21 }
 0x1e3   :  { %v2794_v56 = vmul.f32 %v14128_v23, %v2785_v38  ;;  %v5859_v53 = vld [vmem:[%s13649_s10 + $0x60] sm:$0x7f]  ;;  %v14129_v23 = vld [vmem:[#allocation86_spill] sm:$0xff]  ;;  %v3024_v34 = vmul.f32 %v5701_v44, %v14131_v50  ;;  %v3927_v16 = vadd.f32 %v3920_v24, %v3881_v52  ;;  %v3277_v52 = vmul.f32 %v5788_v51, %v14100_v31 }
 0x1e4   :  { %v3904_v38 = vadd.f32 %v3897_v30, %v3858_v13  ;;  %v4127_v28 = vmul.f32 %v6080_v58, %v14129_v23  ;;  %v14130_v12 = vld [vmem:[#allocation87_spill] sm:$0xff]  ;;  %v14133_v55 = vld [vmem:[#allocation42_spill] sm:$0xff]  ;;  %v3484_v44 = vmul.f32 %v5859_v53, %v8676_v4 }
 0x1e5   :  { %v4150_v2 = vmul.f32 %v6088_v39, %v14130_v12  ;;  %v14132_v40 = vld [vmem:[#allocation31_spill] sm:$0xff]  ;;  %v3047_v22 = vmul.f32 %v5709_v41, %v14133_v55  ;;  %v14134_v39 = vld [vmem:[#allocation29_spill] sm:$0xff]  ;;  %v3031_v33 = vadd.f32 %v3024_v34, %v9469_v25  ;;  %v3261_v34 = vadd.f32 %v3254_v15, %v9502_v6 }
 0x1e6   :  { %v2817_v42 = vmul.f32 %v14132_v40, %v2808_v19  ;;  %v5867_v54 = vld [vmem:[%s13649_s10 + $0x61] sm:$0x7f]  ;;  %v2801_v37 = vadd.f32 %v2794_v56, %v14134_v39  ;;  %v4134_v41 = vadd.f32 %v4127_v28, %v4088_v17  ;;  %v3284_v53 = vadd.f32 %v3277_v52, %v9519_v35 }
 0x1e7   :  { %v5938_v13 = vld [vmem:[%s13649_s10 + $0x60] sm:$0x7f]  ;;  %v4157_v56 = vadd.f32 %v4150_v2, %v4111_v1  ;;  %v3054_v25 = vadd.f32 %v3047_v22, %v9483_v7  ;;  %v9642_v40 = vadd.f32 %v3484_v44, %v3444_v18  ;;  %v3507_v39 = vmul.f32 %v5867_v54, %v8679_v14  ;;  %v14135_v7 = vld [vmem:[#allocation32_spill] sm:$0xff]  ;;  %v14136_v18 = vld [vmem:[#allocation33_spill] sm:$0xff] }
 0x1e8   :  { %v2831_v58 = vld [vmem:[%s13649_s10 + $0x62] sm:$0x7f]  ;;  %v3714_v17 = vmul.f32 %v5938_v13, %v14056_v5 }
 0x1e9   :  { %v5946_v30 = vld [vmem:[%s13649_s10 + $0x61] sm:$0x7f]  ;;  %v2840_v6 = vmul.f32 %v14135_v7, %v2831_v58  ;;  %v9662_v58 = vadd.f32 %v3507_v39, %v3467_v46  ;;  %v14137_v44 = vld [vmem:[#allocation88_spill] sm:$0xff] }
 0x1ea   :  { %v6017_v24 = vld [vmem:[%s13649_s10 + $0x60] sm:$0x7f]  ;;  %v3737_v1 = vmul.f32 %v5946_v30, %v14057_v45 }
 0x1eb   :  { %v2854_v19 = vld [vmem:[%s13649_s10 + $0x63] sm:$0x7f]  ;;  %v3944_v35 = vmul.f32 %v6017_v24, %v14108_v27  ;;  %v2847_v7 = vadd.f32 %v2840_v6, %v2801_v37  ;;  %v9669_v24 = vadd.f32 %v3714_v17, %v3674_v36  ;;  %v14139_v37 = vld [vmem:[#allocation34_spill] sm:$0xff] }
 0x1ec   :  { %v6025_v60 = vld [vmem:[%s13649_s10 + $0x61] sm:$0x7f]  ;;  %v2863_v22 = vmul.f32 %v14136_v18, %v2854_v19  ;;  %v14138_v19 = vld [vmem:[#allocation89_spill] sm:$0xff]  ;;  %v9676_v39 = vadd.f32 %v3737_v1, %v3697_v63 }
 0x1ed   :  { %v6096_v51 = vld [vmem:[%s13649_s10 + $0x60] sm:$0x7f]  ;;  %v3967_v52 = vmul.f32 %v6025_v60, %v14109_v11  ;;  %v9678_v60 = vadd.f32 %v3944_v35, %v3904_v38  ;;  %v2946_v35 = vld [vmem:[%s13649_s10 + $0x67] sm:$0x7f] }
 0x1ee   :  { %v6104_v28 = vld [vmem:[%s13649_s10 + $0x61] sm:$0x7f]  ;;  %v4174_v13 = vmul.f32 %v6096_v51, %v14137_v44  ;;  %v2870_v27 = vadd.f32 %v2863_v22, %v2817_v42 }
 0x1ef   :  { %v5717_v2 = vld [vmem:[%s13649_s10 + $0x62] sm:$0x7f]  ;;  %v4197_v18 = vmul.f32 %v6104_v28, %v14138_v19  ;;  %v9691_v63 = vadd.f32 %v3967_v52, %v3927_v16 }
 0x1f0   :  { %v2877_v15 = vld [vmem:[%s13649_s10 + $0x64] sm:$0x7f]  ;;  %v3070_v45 = vmul.f32 %v5717_v2, %v8324_v20  ;;  %v9693_v38 = vadd.f32 %v4174_v13, %v4134_v41 }
 0x1f1   :  { %v5725_v54 = vld [vmem:[%s13649_s10 + $0x63] sm:$0x7f]  ;;  %v2886_v51 = vmul.f32 %v14139_v37, %v2877_v15 }
 0x1f2   :  { %v2900_v30 = vld [vmem:[%s13649_s10 + $0x65] sm:$0x7f]  ;;  %v3077_v22 = vadd.f32 %v3070_v45, %v3031_v33 }
 0x1f3   :  { %v5796_v46 = vld [vmem:[%s13649_s10 + $0x62] sm:$0x7f]  ;;  %v2893_v16 = vadd.f32 %v2886_v51, %v2847_v7  ;;  %v2992_v37 = vld [vmem:[%s13649_s10 + $0x69] sm:$0x7f] }
 0x1f4   :  { %v14140_v6 = vld [vmem:[#allocation43_spill] sm:$0xff]  ;;  %v2969_v41 = vld [vmem:[%s13649_s10 + $0x68] sm:$0x7f]  ;;  %v3300_v13 = vmul.f32 %v5796_v46, %v8503_v61 }
 0x1f5   :  { %v3093_v44 = vmul.f32 %v5725_v54, %v14140_v6  ;;  %v5733_v36 = vld [vmem:[%s13649_s10 + $0x64] sm:$0x7f]  ;;  %v9705_v54 = vadd.f32 %v4197_v18, %v4157_v56 }
 0x1f6   :  { %v5741_v42 = vld [vmem:[%s13649_s10 + $0x65] sm:$0x7f]  ;;  %v3116_v45 = vmul.f32 %v5733_v36, %v14058_v8  ;;  %v3307_v46 = vadd.f32 %v3300_v13, %v3261_v34 }
 0x1f7   :  { %v5804_v28 = vld [vmem:[%s13649_s10 + $0x63] sm:$0x7f]  ;;  %v3100_v52 = vadd.f32 %v3093_v44, %v3054_v25  ;;  %v3139_v33 = vmul.f32 %v5741_v42, %v14059_v32  ;;  %v2955_v44 = vmul.f32 %v7769_v3, %v2946_v35  ;;  %v2978_v42 = vmul.f32 %v13995_v26, %v2969_v41 }
 0x1f8   :  { %v14141_v2 = vld [vmem:[#allocation35_spill] sm:$0xff]  ;;  %v3323_v7 = vmul.f32 %v5804_v28, %v14110_v49  ;;  %v3123_v28 = vadd.f32 %v3116_v45, %v3077_v22  ;;  %v14207_v49 = vld [vmem:[#allocation22_spill] sm:$0xff] }
 0x1f9   :  { %v2909_v17 = vmul.f32 %v14141_v2, %v2900_v30  ;;  %v2923_v1 = vld [vmem:[%s13649_s10 + $0x66] sm:$0x7f]  ;;  %v3146_v2 = vadd.f32 %v3139_v33, %v3100_v52 }
 0x1fa   :  { %v5812_v15 = vld [vmem:[%s13649_s10 + $0x64] sm:$0x7f]  ;;  %v3330_v3 = vadd.f32 %v3323_v7, %v3284_v53 }
 0x1fb   :  { %v2916_v30 = vadd.f32 %v2909_v17, %v2870_v27  ;;  %v5749_v56 = vld [vmem:[%s13649_s10 + $0x66] sm:$0x7f]  ;;  %v2932_v27 = vmul.f32 %v14007_v57, %v2923_v1  ;;  %v3346_v51 = vmul.f32 %v5812_v15, %v8522_v0  ;;  %v3001_v1 = vmul.f32 %v14011_v62, %v2992_v37  ;;  %v14202_v0 = vld [vmem:[#allocation18_spill] sm:$0xff] }
 0x1fc   :  { %v5820_v25 = vld [vmem:[%s13649_s10 + $0x65] sm:$0x7f]  ;;  %v3162_v35 = vmul.f32 %v5749_v56, %v8375_v47 }
 0x1fd   :  { %v5757_v18 = vld [vmem:[%s13649_s10 + $0x67] sm:$0x7f]  ;;  %v3353_v26 = vadd.f32 %v3346_v51, %v3307_v46  ;;  %v3369_v22 = vmul.f32 %v5820_v25, %v14111_v29  ;;  %v2939_v53 = vadd.f32 %v2932_v27, %v2893_v16  ;;  %v2962_v41 = vadd.f32 %v2955_v44, %v2916_v30 }
 0x1fe   :  { %v5875_v36 = vld [vmem:[%s13649_s10 + $0x62] sm:$0x7f]  ;;  %v3185_v52 = vmul.f32 %v5757_v18, %v8390_v59  ;;  %v5773_v56 = vld [vmem:[%s13649_s10 + $0x69] sm:$0x7f]  ;;  %v3169_v44 = vadd.f32 %v3162_v35, %v3123_v28 }
 0x1ff   :  { %v5765_v57 = vld [vmem:[%s13649_s10 + $0x68] sm:$0x7f]  ;;  %v3530_v13 = vmul.f32 %v5875_v36, %v8682_v9  ;;  %v3376_v16 = vadd.f32 %v3369_v22, %v3330_v3  ;;  %v14144_v46 = vld [vmem:[#allocation55_spill] sm:$0xff]  ;;  %v9779_v35 = vadd.f32 %v2978_v42, %v2939_v53 }
 0x200   :  { %v5828_v17 = vld [vmem:[%s13649_s10 + $0x66] sm:$0x7f]  ;;  %v3192_v18 = vadd.f32 %v3185_v52, %v3146_v2 }
 0x201   :  { %v5883_v34 = vld [vmem:[%s13649_s10 + $0x63] sm:$0x7f]  ;;  %v3392_v30 = vmul.f32 %v5828_v17, %v8572_v10 }
 0x202   :  { %v5836_v15 = vld [vmem:[%s13649_s10 + $0x67] sm:$0x7f] }
 0x203   :  { %v5891_v45 = vld [vmem:[%s13649_s10 + $0x64] sm:$0x7f]  ;;  %v3415_v51 = vmul.f32 %v5836_v15, %v14144_v46  ;;  %v9781_v15 = vadd.f32 %v3001_v1, %v2962_v41  ;;  %v14160_v46 = vld [vmem:[#allocation74_spill] sm:$0xff] }
 0x204   :  { %v5899_v62 = vld [vmem:[%s13649_s10 + $0x65] sm:$0x7f] }
 0x205   :  { %v14142_v37 = vld [vmem:[#allocation48_spill] sm:$0xff]  ;;  %v14203_v9 = vld [vmem:[#allocation19_spill] sm:$0xff] }
 0x206   :  { %v3208_v33 = vmul.f32 %v5765_v57, %v14142_v37  ;;  %v14143_v7 = vld [vmem:[#allocation40_spill] sm:$0xff]  ;;  %v3537_v57 = vadd.f32 %v3530_v13, %v9642_v40  ;;  %v3399_v37 = vadd.f32 %v3392_v30, %v3353_v26  ;;  %v14148_v30 = vld [vmem:[#allocation37_spill] sm:$0xff] }
 0x207   :  { %v3553_v25 = vmul.f32 %v5883_v34, %v14143_v7  ;;  %v5954_v27 = vld [vmem:[%s13649_s10 + $0x62] sm:$0x7f]  ;;  %v5852_v3 = vld [vmem:[%s13649_s10 + $0x69] sm:$0x7f]  ;;  %v3576_v34 = vmul.f32 %v5891_v45, %v8694_v43 }
 0x208   :  { %v5844_v36 = vld [vmem:[%s13649_s10 + $0x68] sm:$0x7f] }
 0x209   :  { %v3560_v17 = vadd.f32 %v3553_v25, %v9662_v58  ;;  %v14145_v22 = vld [vmem:[#allocation60_spill] sm:$0xff]  ;;  %v3438_v25 = vmul.f32 %v5844_v36, %v14148_v30  ;;  %v14150_v36 = vld [vmem:[#allocation69_spill] sm:$0xff]  ;;  %v14151_v30 = vld [vmem:[#allocation62_spill] sm:$0xff] }
 0x20a   :  { %v3599_v28 = vmul.f32 %v5899_v62, %v14145_v22  ;;  %v5962_v2 = vld [vmem:[%s13649_s10 + $0x63] sm:$0x7f]  ;;  %v3422_v62 = vadd.f32 %v3415_v51, %v3376_v16  ;;  %v3583_v22 = vadd.f32 %v3576_v34, %v3537_v57 }
 0x20b   :  { %v14146_v40 = vld [vmem:[#allocation36_spill] sm:$0xff]  ;;  %v3783_v57 = vmul.f32 %v5962_v2, %v14150_v36  ;;  %v14156_v36 = vld [vmem:[#allocation65_spill] sm:$0xff] }
 0x20c   :  { %v3231_v26 = vmul.f32 %v5773_v56, %v14146_v40  ;;  %v5907_v52 = vld [vmem:[%s13649_s10 + $0x66] sm:$0x7f]  ;;  %v3606_v42 = vadd.f32 %v3599_v28, %v3560_v17  ;;  %v9801_v56 = vadd.f32 %v3208_v33, %v3169_v44  ;;  %v9811_v28 = vadd.f32 %v3438_v25, %v3399_v37  ;;  %v14197_v40 = vld [vmem:[#allocation17_spill] sm:$0xff] }
 0x20d   :  { %v5915_v58 = vld [vmem:[%s13649_s10 + $0x67] sm:$0x7f]  ;;  %v3790_v2 = vadd.f32 %v3783_v57, %v9676_v39 }
 0x20e   :  { %v14147_v13 = vld [vmem:[#allocation68_spill] sm:$0xff]  ;;  %v9809_v34 = vadd.f32 %v3231_v26, %v3192_v18  ;;  %v3645_v43 = vmul.f32 %v5915_v58, %v14151_v30  ;;  %v14153_v18 = vld [vmem:[#allocation70_spill] sm:$0xff]  ;;  %v14155_v57 = vld [vmem:[#allocation63_spill] sm:$0xff] }
 0x20f   :  { %v3760_v45 = vmul.f32 %v5954_v27, %v14147_v13  ;;  %v5923_v1 = vld [vmem:[%s13649_s10 + $0x68] sm:$0x7f]  ;;  %v14149_v27 = vld [vmem:[#allocation39_spill] sm:$0xff]  ;;  %v3622_v13 = vmul.f32 %v5907_v52, %v14116_v48 }
 0x210   :  { %v5970_v53 = vld [vmem:[%s13649_s10 + $0x64] sm:$0x7f]  ;;  %v3461_v16 = vmul.f32 %v5852_v3, %v14149_v27  ;;  %v3652_v39 = vadd.f32 %v3645_v43, %v3606_v42 }
 0x211   :  { %v6033_v41 = vld [vmem:[%s13649_s10 + $0x62] sm:$0x7f]  ;;  %v3767_v51 = vadd.f32 %v3760_v45, %v9669_v24  ;;  %v5931_v33 = vld [vmem:[%s13649_s10 + $0x69] sm:$0x7f]  ;;  %v3806_v26 = vmul.f32 %v5970_v53, %v14153_v18  ;;  %v14154_v45 = vld [vmem:[#allocation81_spill] sm:$0xff] }
 0x212   :  { %v6041_v17 = vld [vmem:[%s13649_s10 + $0x63] sm:$0x7f]  ;;  %v3990_v25 = vmul.f32 %v6033_v41, %v14154_v45  ;;  %v9834_v30 = vadd.f32 %v3461_v16, %v3422_v62  ;;  %v3691_v41 = vmul.f32 %v5931_v33, %v14156_v36  ;;  %v14159_v45 = vld [vmem:[#allocation73_spill] sm:$0xff] }
 0x213   :  { %v5978_v24 = vld [vmem:[%s13649_s10 + $0x65] sm:$0x7f]  ;;  %v3813_v62 = vadd.f32 %v3806_v26, %v3767_v51 }
 0x214   :  { %v14152_v44 = vld [vmem:[#allocation64_spill] sm:$0xff]  ;;  %v14157_v16 = vld [vmem:[#allocation71_spill] sm:$0xff]  ;;  %v3997_v43 = vadd.f32 %v3990_v25, %v9678_v60  ;;  %v14162_v25 = vld [vmem:[#allocation82_spill] sm:$0xff] }
 0x215   :  { %v3668_v3 = vmul.f32 %v5923_v1, %v14152_v44  ;;  %v5986_v37 = vld [vmem:[%s13649_s10 + $0x66] sm:$0x7f]  ;;  %v3629_v1 = vadd.f32 %v3622_v13, %v3583_v22  ;;  %v4013_v44 = vmul.f32 %v6041_v17, %v14155_v57  ;;  %v3829_v22 = vmul.f32 %v5978_v24, %v14157_v16 }
 0x216   :  { %v5994_v52 = vld [vmem:[%s13649_s10 + $0x67] sm:$0x7f] }
 0x217   :  { %v6002_v58 = vld [vmem:[%s13649_s10 + $0x68] sm:$0x7f]  ;;  %v3875_v27 = vmul.f32 %v5994_v52, %v14159_v45  ;;  %v4020_v51 = vadd.f32 %v4013_v44, %v9691_v63  ;;  %v3836_v33 = vadd.f32 %v3829_v22, %v3790_v2  ;;  %v14161_v24 = vld [vmem:[#allocation75_spill] sm:$0xff]  ;;  %v9871_v63 = vadd.f32 %v3668_v3, %v3629_v1 }
 0x218   :  { %v6010_v53 = vld [vmem:[%s13649_s10 + $0x69] sm:$0x7f]  ;;  %v6112_v18 = vld [vmem:[%s13649_s10 + $0x62] sm:$0x7f]  ;;  %v3898_v10 = vmul.f32 %v6002_v58, %v14160_v46  ;;  %v9873_v44 = vadd.f32 %v3691_v41, %v3652_v39  ;;  %v1919_v41 = vld [vmem:[%s13647_s8 + $0x78] sm:$0xff] }
 0x219   :  { %v6049_v48 = vld [vmem:[%s13649_s10 + $0x64] sm:$0x7f]  ;;  %v3921_v26 = vmul.f32 %v6010_v53, %v14161_v24  ;;  %vm1935_vm9 = vcmp.gt.f32.partialorder %v1919_v41, 6.0 }
 0x21a   :  { %v6057_v13 = vld [vmem:[%s13649_s10 + $0x65] sm:$0x7f]  ;;  %v4036_v36 = vmul.f32 %v6049_v48, %v14162_v25 }
 0x21b   :  { %v6120_v42 = vld [vmem:[%s13649_s10 + $0x63] sm:$0x7f] }
 0x21c   :  { %v14158_v17 = vld [vmem:[#allocation72_spill] sm:$0xff]  ;;  %v14164_v58 = vld [vmem:[#allocation83_spill] sm:$0xff]  ;;  %v4043_v46 = vadd.f32 %v4036_v36, %v3997_v43 }
 0x21d   :  { %v3852_v57 = vmul.f32 %v5986_v37, %v14158_v17  ;;  %v6128_v60 = vld [vmem:[%s13649_s10 + $0x64] sm:$0x7f]  ;;  %v14163_v37 = vld [vmem:[#allocation90_spill] sm:$0xff]  ;;  %v4059_v2 = vmul.f32 %v6057_v13, %v14164_v58 }
 0x21e   :  { %v6065_v16 = vld [vmem:[%s13649_s10 + $0x66] sm:$0x7f]  ;;  %v4220_v17 = vmul.f32 %v6112_v18, %v14163_v37 }
 0x21f   :  { %v6136_v52 = vld [vmem:[%s13649_s10 + $0x65] sm:$0x7f]  ;;  %v3859_v24 = vadd.f32 %v3852_v57, %v3813_v62  ;;  %v4066_v13 = vadd.f32 %v4059_v2, %v4020_v51 }
 0x220   :  { %v6073_v48 = vld [vmem:[%s13649_s10 + $0x67] sm:$0x7f]  ;;  %v4227_v37 = vadd.f32 %v4220_v17, %v9693_v38  ;;  %v14168_v38 = vld [vmem:[#allocation93_spill] sm:$0xff]  ;;  %v3882_v17 = vadd.f32 %v3875_v27, %v3836_v33 }
 0x221   :  { %v14165_v53 = vld [vmem:[#allocation91_spill] sm:$0xff]  ;;  %v6081_v18 = vld [vmem:[%s13649_s10 + $0x68] sm:$0x7f]  ;;  %v4289_v43 = vmul.f32 %v6136_v52, %v14168_v38 }
 0x222   :  { %v4243_v22 = vmul.f32 %v6120_v42, %v14165_v53  ;;  %v14166_v3 = vld [vmem:[#allocation92_spill] sm:$0xff]  ;;  %v14170_v51 = vld [vmem:[#allocation79_spill] sm:$0xff] }
 0x223   :  { %v4266_v1 = vmul.f32 %v6128_v60, %v14166_v3  ;;  %v6144_v39 = vld [vmem:[%s13649_s10 + $0x66] sm:$0x7f]  ;;  %v14169_v60 = vld [vmem:[#allocation85_spill] sm:$0xff] }
 0x224   :  { %v14167_v42 = vld [vmem:[#allocation84_spill] sm:$0xff]  ;;  %v4250_v62 = vadd.f32 %v4243_v22, %v9705_v54  ;;  %v4105_v3 = vmul.f32 %v6073_v48, %v14169_v60  ;;  %v4128_v54 = vmul.f32 %v6081_v18, %v14129_v23  ;;  %v14172_v22 = vld [vmem:[#allocation94_spill] sm:$0xff] }
 0x225   :  { %v4082_v57 = vmul.f32 %v6065_v16, %v14167_v42  ;;  %v6089_v36 = vld [vmem:[%s13649_s10 + $0x69] sm:$0x7f]  ;;  %v4273_v53 = vadd.f32 %v4266_v1, %v4227_v37  ;;  %v4312_v38 = vmul.f32 %v6144_v39, %v14172_v22  ;;  %v14174_v1 = vld [vmem:[#allocation25_spill] sm:$0xff] }
 0x226   :  { %v6152_v16 = vld [vmem:[%s13649_s10 + $0x67] sm:$0x7f]  ;;  %v4296_v52 = vadd.f32 %v4289_v43, %v4250_v62  ;;  %v4151_v37 = vmul.f32 %v6089_v36, %v14130_v12  ;;  %v6441_v62 = vld [vmem:[%s13652_s13 + $0x70] sm:$0xff]  ;;  %v4112_v43 = vadd.f32 %v4105_v3, %v4066_v13  ;;  %v9937_v12 = vadd.f32 %v3898_v10, %v3859_v24  ;;  %v14179_v10 = vld [vmem:[#allocation78_spill] sm:$0xff] }
 0x227   :  { %v14171_v2 = vld [vmem:[#allocation24_spill] sm:$0xff]  ;;  %v4089_v33 = vadd.f32 %v4082_v57, %v4043_v46  ;;  %vm2046_vm10 = vcmp.gt.f32.partialorder %v6441_v62, 6.0  ;;  %v14175_v46 = vld [vmem:[#allocation95_spill] sm:$0xff]  ;;  %v9947_v3 = vadd.f32 %v3921_v26, %v3882_v17  ;;  %v5501_v26 = vld [vmem:[%s13646_s7 + $0xb0] sm:$0xff] }
 0x228   :  { %v1702_v42 = vadd.f32 %v14171_v2, %v14170_v51  ;;  %v9913_v27 = vld [vmem:[#allocation2 + $0xe2] sm:$0xff]  ;;  %v4319_v51 = vadd.f32 %v4312_v38, %v4273_v53  ;;  %v4335_v57 = vmul.f32 %v6152_v16, %v14175_v46  ;;  %v14178_v38 = vld [vmem:[#allocation77_spill] sm:$0xff]  ;;  %v14181_v46 = vld [vmem:[#allocation14_spill] sm:$0xff]  ;;  %v9961_v17 = vadd.f32 %v4151_v37, %v4112_v43 }
 0x229   :  { %14173 = vst [vmem:[#allocation30_spill] sm:$0xff] %v9913_v27  ;;  %v6160_v48 = vld [vmem:[%s13649_s10 + $0x68] sm:$0x7f]  ;;  %v14180_v62 = vld [vmem:[#allocation27_spill] sm:$0xff]  ;;  %v9980_v37 = vstv %s9899_s4  ;;  %v14185_v43 = vld [vmem:[#allocation13_spill] sm:$0xff]  ;;  %vm1263_vm11 = vcmp.gt.f32.partialorder %v5501_v26, 2.0 }
 0x22a   :  { %v6168_v18 = vld [vmem:[%s13649_s10 + $0x69] sm:$0x7f]  ;;  %v1752_v39 = vadd.f32 %v14174_v1, %v1702_v42  ;;  %v14176_v42 = vld [vmem:[#allocation26_spill] sm:$0xff]  ;;  %v4342_v13 = vadd.f32 %v4335_v57, %v4296_v52  ;;  %v4358_v16 = vmul.f32 %v6160_v48, %v14178_v38  ;;  %14184 = vst [vmem:[#allocation42_spill] sm:$0xff] %v9980_v37  ;;  %v14186_v57 = vld [vmem:[#allocation15_spill] sm:$0xff]  ;;  %v10018_v38 = vstv %s9915_s30  ;;  %s12610_s30 = sld [smem:[#allocation10 + $0x4e]] }
 0x22b   :  { %v9931_v36 = vld [vmem:[#allocation2 + $0x8] sm:$0xff]  ;;  %v4381_v24 = vmul.f32 %v6168_v18, %v14179_v10  ;;  %v9966_v18 = vstv %s9897_s9  ;;  %14194 = vst [vmem:[#allocation24_spill] sm:$0xff] %v10018_v38 }
 0x22c   :  { %v5597_v2 = vsel %vm2046_vm10, 1.0, %v9931_v36  ;;  %v5349_v22 = vld [vmem:[%s13645_s6 + $0x108] sm:$0xff]  ;;  %v1803_v1 = vadd.f32 %v14176_v42, %v1752_v39  ;;  %v5582_v53 = vsel %vm1935_vm9, 1.0, %v9931_v36  ;;  %v9954_v39 = vadd.f32 %v4128_v54, %v4089_v33  ;;  %14182 = vst [vmem:[#allocation41_spill] sm:$0xff] %v9966_v18 }
 0x22d   :  { %v14177_v23 = vld [vmem:[#allocation28_spill] sm:$0xff]  ;;  %2110 = vst [vmem:[%s13649_s10 + $0x70] sm:$0xff] %v5597_v2  ;;  %v812_v58 = vmul.f32 %v5349_v22, %v14181_v46  ;;  %v9963_v52 = vadd.f32 %v4358_v16, %v4319_v51  ;;  %v2015_v48 = vmul.f32 6.0, %v5582_v53  ;;  %v5350_v22 = vld [vmem:[%s13645_s6 + $0x110] sm:$0xff]  ;;  %v9999_v16 = vadd.f32 %v4381_v24, %v4342_v13 }
 0x22e   :  { %v1887_v60 = vmul.f32 %v14177_v23, %v9913_v27  ;;  %v5365_v23 = vld [vmem:[%s13645_s6 + $0x109] sm:$0xff]  ;;  %v1853_v42 = vadd.f32 %v14180_v62, %v1803_v1  ;;  %v1983_v27 = vmul.f32 0.8, %v1919_v41  ;;  %v9974_v41 = vld [vmem:[%s13645_s6 + $0x120] sm:$0xff]  ;;  %v10021_v13 = vstv %s9917_s27  ;;  %s12790_s27 = sld [smem:[#allocation10 + $0x61]] }
 0x22f   :  { %v5382_v54 = vld [vmem:[%s13645_s6 + $0x10a] sm:$0xff]  ;;  %14183 = vst [vmem:[#allocation31_spill] sm:$0xff] %v9974_v41  ;;  %v828_v51 = vadd.f32 %v812_v58, %v14185_v43  ;;  %v862_v2 = vmul.f32 %v5365_v23, %v14186_v57  ;;  %v9987_v1 = vld [vmem:[%s13645_s6 + $0x121] sm:$0xff]  ;;  %v10002_v58 = vstv %s9907_s0  ;;  %v10005_v23 = vstv %s9909_s1  ;;  %14195 = vst [vmem:[#allocation25_spill] sm:$0xff] %v10021_v13  ;;  %s10106_s1 = sld [smem:[#allocation8]] }
 0x230   :  { %v1903_v33 = vadd.f32 %v1887_v60, %v1853_v42  ;;  %14187 = vst [vmem:[#allocation29_spill] sm:$0xff] %v9987_v1  ;;  %v9992_v53 = vld [vmem:[%s13645_s6 + $0x122] sm:$0xff]  ;;  %v9997_v60 = vld [vmem:[%s13645_s6 + $0x138] sm:$0xff]  ;;  %14190 = vst [vmem:[#allocation34_spill] sm:$0xff] %v10002_v58  ;;  %v813_v24 = vmul.f32 %v5350_v22, %v14181_v46  ;;  %v963_v29 = vmul.f32 %v9974_v41, %v14197_v40  ;;  %s10508_s0 = sld [smem:[#allocation8 + $0x8]] }
 0x231   :  { %14188 = vst [vmem:[#allocation32_spill] sm:$0xff] %v9992_v53  ;;  %14189 = vst [vmem:[#allocation33_spill] sm:$0xff] %v9997_v60  ;;  %v10010_v62 = vld [vmem:[%s13645_s6 + $0x139] sm:$0xff]  ;;  %v14196_v25 = vld [vmem:[#allocation16_spill] sm:$0xff]  ;;  %v1013_v7 = vmul.f32 %v9987_v1, %v14202_v0  ;;  %v10066_v59 = vmul.f32 %v9992_v53, %v14203_v9 }
 0x232   :  { %14191 = vst [vmem:[#allocation43_spill] sm:$0xff] %v10005_v23  ;;  %14192 = vst [vmem:[#allocation35_spill] sm:$0xff] %v10010_v62  ;;  %v10015_v42 = vld [vmem:[%s13645_s6 + $0x13a] sm:$0xff]  ;;  %v1999_v10 = vadd.f32 %v1983_v27, %v1903_v33  ;;  %v5366_v23 = vld [vmem:[%s13645_s6 + $0x111] sm:$0xff]  ;;  %v912_v45 = vmul.f32 %v5382_v54, %v14196_v25  ;;  %v10034_v27 = vsel %vm1263_vm11, 1.0, %v9931_v36 }
 0x233   :  { %14193 = vst [vmem:[#allocation79_spill] sm:$0xff] %v10015_v42  ;;  %v5383_v58 = vld [vmem:[%s13645_s6 + $0x112] sm:$0xff]  ;;  %v10036_v33 = vmul.f32 0.8, %v5501_v26  ;;  %v10041_v22 = vld [vmem:[%s13645_s6 + $0x128] sm:$0xff]  ;;  %v10087_v61 = vmul.f32 %v10015_v42, %v14207_v49  ;;  %v863_v32 = vmul.f32 %v5366_v23, %v14186_v57 }
 0x234   :  { %14199 = vst [vmem:[#allocation28_spill] sm:$0xff] %v10041_v22  ;;  %v10046_v13 = vld [vmem:[%s13645_s6 + $0x129] sm:$0xff]  ;;  %v2031_v38 = vsub.f32 %v1999_v10, %v2015_v48  ;;  %v5710_v41 = vld [vmem:[%s13649_s10 + $0x71] sm:$0x7f] }
 0x235   :  { %14198 = vst [vmem:[#allocation26_spill] sm:$0xff] %v10036_v33  ;;  %14200 = vst [vmem:[#allocation27_spill] sm:$0xff] %v10046_v13  ;;  %v10051_v54 = vld [vmem:[%s13645_s6 + $0x12a] sm:$0xff]  ;;  %v878_v33 = vadd.f32 %v862_v2, %v828_v51  ;;  %v10104_v42 = vmul.f32 %v10046_v13, %v14202_v0  ;;  %v3048_v57 = vmul.f32 %v5710_v41, %v14133_v55 }
 0x236   :  { %14201 = vst [vmem:[#allocation96_spill] sm:$0xff] %v10051_v54  ;;  %v5702_v26 = vld [vmem:[%s13649_s10 + $0x70] sm:$0x7f]  ;;  %v14204_v51 = vld [vmem:[#allocation20_spill] sm:$0xff]  ;;  %14208 = vst [vmem:[#allocation98_spill] sm:$0xff] %v10087_v61  ;;  %vm2047_vm12 = vcmp.gt.f32.partialorder %v2031_v38, 6.0 }
 0x237   :  { %v5781_v46 = vld [vmem:[%s13649_s10 + $0x70] sm:$0x7f]  ;;  %v10079_v2 = vmul.f32 %v9997_v60, %v14204_v51  ;;  %2095 = vst [vmem:[%s13652_s13 + $0x78] sm:$0xff] %v2031_v38  ;;  %v829_v60 = vadd.f32 %v813_v24, %v14185_v43  ;;  %v3025_v23 = vmul.f32 %v5702_v26, %v14131_v50  ;;  %v10113_v24 = vmul.f32 %v10051_v54, %v14203_v9 }
 0x238   :  { %v5789_v10 = vld [vmem:[%s13649_s10 + $0x71] sm:$0x7f]  ;;  %v3255_v61 = vmul.f32 %v5781_v46, %v14099_v21  ;;  %v928_v46 = vadd.f32 %v912_v45, %v878_v33  ;;  %v10132_v26 = vadd.f32 %v3048_v57, %v9781_v15 }
 0x239   :  { %v5860_v48 = vld [vmem:[%s13649_s10 + $0x70] sm:$0x7f]  ;;  %14205 = vst [vmem:[#allocation97_spill] sm:$0xff] %v10079_v2  ;;  %v913_v2 = vmul.f32 %v5383_v58, %v14196_v25  ;;  %v3278_v58 = vmul.f32 %v5789_v10, %v14100_v31  ;;  %v10129_v41 = vadd.f32 %v3025_v23, %v9779_v35 }
 0x23a   :  { %v5868_v47 = vld [vmem:[%s13649_s10 + $0x71] sm:$0x7f]  ;;  %v10135_v10 = vadd.f32 %v3255_v61, %v9801_v56  ;;  %v979_v38 = vadd.f32 %v963_v29, %v928_v46  ;;  %v10194_v46 = vld [vmem:[%s13645_s6 + $0x140] sm:$0xff] }
 0x23b   :  { %v14206_v1 = vld [vmem:[#allocation21_spill] sm:$0xff]  ;;  %v3508_v13 = vmul.f32 %v5868_v47, %v8679_v14  ;;  %v10148_v15 = vadd.f32 %v3278_v58, %v9809_v34  ;;  %v14209_v34 = vld [vmem:[#allocation67_spill] sm:$0xff]  ;;  %v14210_v58 = vld [vmem:[#allocation76_spill] sm:$0xff]  ;;  %14212 = vst [vmem:[#allocation99_spill] sm:$0xff] %v10194_v46 }
 0x23c   :  { %v10083_v53 = vmul.f32 %v10010_v62, %v14206_v1  ;;  %v5939_v8 = vld [vmem:[%s13649_s10 + $0x70] sm:$0x7f]  ;;  %v10100_v62 = vmul.f32 %v10041_v22, %v14197_v40  ;;  %v3485_v22 = vmul.f32 %v5860_v48, %v8676_v4  ;;  %v1029_v29 = vadd.f32 %v1013_v7, %v979_v38  ;;  %v14226_v4 = vld [vmem:[#allocation44_spill] sm:$0xff] }
 0x23d   :  { %v5947_v50 = vld [vmem:[%s13649_s10 + $0x71] sm:$0x7f]  ;;  %v3715_v47 = vmul.f32 %v5939_v8, %v14056_v5  ;;  %v10154_v8 = vadd.f32 %v3508_v13, %v9834_v30  ;;  %v14211_v13 = vld [vmem:[#allocation88_spill] sm:$0xff]  ;;  %v10247_v38 = vstv %s10126_s22  ;;  %s12740_s22 = sld [smem:[#allocation10 + $0x5d]] }
 0x23e   :  { %v6018_v55 = vld [vmem:[%s13649_s10 + $0x70] sm:$0x7f]  ;;  %v10151_v61 = vadd.f32 %v3485_v22, %v9811_v28  ;;  %v3738_v23 = vmul.f32 %v5947_v50, %v14209_v34  ;;  %v5598_v22 = vsel %vm2047_vm12, 1.0, %v9931_v36  ;;  %v5502_v50 = vld [vmem:[%s13646_s7 + $0xb8] sm:$0xff] }
 0x23f   :  { %v6026_v48 = vld [vmem:[%s13649_s10 + $0x71] sm:$0x7f]  ;;  %v10163_v33 = vadd.f32 %v3715_v47, %v9871_v63  ;;  %v3945_v28 = vmul.f32 %v6018_v55, %v14210_v58  ;;  %2111 = vst [vmem:[%s13649_s10 + $0x78] sm:$0xff] %v5598_v22  ;;  %v879_v63 = vadd.f32 %v863_v32, %v829_v60  ;;  %v2115_v55 = vld [vmem:[#allocation2 + $0xc0] sm:$0xff]  ;;  %vm1264_vm13 = vcmp.gt.f32.partialorder %v5502_v50, 2.0 }
 0x240   :  { %v6097_v45 = vld [vmem:[%s13649_s10 + $0x70] sm:$0x7f]  ;;  %v3968_v30 = vmul.f32 %v6026_v48, %v14109_v11  ;;  %v10183_v47 = vadd.f32 %v3738_v23, %v9873_v44  ;;  %v1079_v23 = vadd.f32 %v10066_v59, %v1029_v29  ;;  %v10244_v59 = vmul.f32 0.8, %v5502_v50  ;;  %v10279_v11 = vld [vmem:[#allocation2 + $0xda] sm:$0xff] }
 0x241   :  { %v6105_v35 = vld [vmem:[%s13649_s10 + $0x71] sm:$0x7f]  ;;  %v4175_v5 = vmul.f32 %v6097_v45, %v14211_v13  ;;  %v10189_v32 = vadd.f32 %v3945_v28, %v9937_v12  ;;  %v929_v60 = vadd.f32 %v913_v2, %v879_v63  ;;  %v10197_v13 = vstv %s10106_s1  ;;  %v10208_v12 = vld [vmem:[%s13645_s6 + $0x141] sm:$0xff]  ;;  %14223 = vst [vmem:[#allocation108_spill] sm:$0xff] %v10279_v11  ;;  %s12707_s1 = sld [smem:[#allocation10 + $0x59]] }
 0x242   :  { %v6176_v56 = vld [vmem:[%s13649_s10 + $0x70] sm:$0x7f]  ;;  %v4198_v48 = vmul.f32 %v6105_v35, %v14138_v19  ;;  %14213 = vst [vmem:[#allocation100_spill] sm:$0xff] %v10197_v13  ;;  %v10200_v44 = vadd.f32 %v3968_v30, %v9947_v3  ;;  %14214 = vst [vmem:[#allocation101_spill] sm:$0xff] %v10208_v12  ;;  %v2133_v7 = vmul.f32 %v10197_v13, %v2115_v55  ;;  %v10230_v28 = vmul.f32 2.0, %v10034_v27  ;;  %v2215_v27 = vld [vmem:[#allocation2 + $0xc2] sm:$0xff] }
 0x243   :  { %v6184_v57 = vld [vmem:[%s13649_s10 + $0x71] sm:$0x7f]  ;;  %v4405_v45 = vmul.f32 %v6176_v56, %v9966_v18  ;;  %v10203_v35 = vadd.f32 %v4175_v5, %v9954_v39  ;;  %v10223_v5 = vld [vmem:[%s13645_s6 + $0x142] sm:$0xff]  ;;  %v5518_v30 = vsel %vm1264_vm13, 1.0, %v9931_v36  ;;  %v10274_v18 = vld [vmem:[#allocation2 + $0xd9] sm:$0xff]  ;;  %v10277_v19 = vstv %s10178_s23  ;;  %s12771_s23 = sld [smem:[#allocation10 + $0x60]] }
 0x244   :  { %v4428_v22 = vmul.f32 %v6184_v57, %v9980_v37  ;;  %v10212_v2 = vadd.f32 %v4198_v48, %v9961_v17  ;;  %14217 = vst [vmem:[#allocation104_spill] sm:$0xff] %v10223_v5  ;;  %v2165_v39 = vld [vmem:[#allocation2 + $0xc1] sm:$0xff]  ;;  %v10226_v57 = vstv %s10115_s16  ;;  %v980_v17 = vadd.f32 %v10100_v62, %v929_v60  ;;  %v10249_v62 = vld [vmem:[#allocation2 + $0xd8] sm:$0xff]  ;;  %14222 = vst [vmem:[#allocation107_spill] sm:$0xff] %v10277_v19  ;;  %s12719_s16 = sld [smem:[#allocation10 + $0x5a]] }
 0x245   :  { %v10215_v56 = vadd.f32 %v4405_v45, %v9963_v52  ;;  %14218 = vst [vmem:[#allocation105_spill] sm:$0xff] %v10226_v57  ;;  %v10235_v52 = vmul.f32 %v10194_v46, %v14204_v51  ;;  %14219 = vst [vmem:[#allocation106_spill] sm:$0xff] %v10249_v62  ;;  %v10262_v50 = vmul.f32 %v10223_v5, %v14207_v49  ;;  %v14220_v45 = vld [vmem:[#allocation23_spill] sm:$0xff]  ;;  %v10267_v60 = vstv %s10168_s24  ;;  %v14227_v21 = vld [vmem:[#allocation45_spill] sm:$0xff]  ;;  %s12760_s24 = sld [smem:[#allocation10 + $0x5e]] }
 0x246   :  { %v10218_v3 = vadd.f32 %v4428_v22, %v9999_v16  ;;  %v10241_v16 = vmul.f32 %v10208_v12, %v14206_v1  ;;  %v5718_v63 = vld [vmem:[%s13649_s10 + $0x72] sm:$0x7f]  ;;  %v2149_v22 = vadd.f32 %v2133_v7, %v14220_v45  ;;  %v2183_v29 = vmul.f32 %v10226_v57, %v2165_v39  ;;  %14221 = vst [vmem:[#allocation23_spill] sm:$0xff] %v10274_v18 }
 0x247   :  { %14215 = vst [vmem:[#allocation102_spill] sm:$0xff] %v10215_v56  ;;  %v5726_v55 = vld [vmem:[%s13649_s10 + $0x73] sm:$0x7f]  ;;  %v10282_v58 = vstv %s10180_s15 }
 0x248   :  { %14216 = vst [vmem:[#allocation103_spill] sm:$0xff] %v10218_v3  ;;  %v5734_v48 = vld [vmem:[%s13649_s10 + $0x74] sm:$0x7f]  ;;  %v3071_v3 = vmul.f32 %v5718_v63, %v8324_v20  ;;  %v3094_v56 = vmul.f32 %v5726_v55, %v14140_v6  ;;  %14224 = vst [vmem:[#allocation109_spill] sm:$0xff] %v10282_v58  ;;  %v1030_v6 = vadd.f32 %v10104_v42, %v980_v17  ;;  %v10289_v63 = vmul.f32 2.0, %v5518_v30 }
 0x249   :  { %v5742_v37 = vld [vmem:[%s13649_s10 + $0x75] sm:$0x7f]  ;;  %v10292_v55 = vmul.f32 %v10247_v38, %v2215_v27  ;;  %v3117_v31 = vmul.f32 %v5734_v48, %v14226_v4  ;;  %v10310_v4 = vadd.f32 %v2183_v29, %v2149_v22  ;;  %v14229_v27 = vld [vmem:[#allocation51_spill] sm:$0xff] }
 0x24a   :  { %v5797_v7 = vld [vmem:[%s13649_s10 + $0x72] sm:$0x7f]  ;;  %v3078_v34 = vadd.f32 %v3071_v3, %v10129_v41  ;;  %v3101_v14 = vadd.f32 %v3094_v56, %v10132_v26  ;;  %v3140_v5 = vmul.f32 %v5742_v37, %v14227_v21  ;;  %v10314_v21 = vmul.f32 %v10267_v60, %v10249_v62 }
 0x24b   :  { %v14225_v39 = vld [vmem:[#allocation97_spill] sm:$0xff]  ;;  %v10318_v37 = vmul.f32 %v10277_v19, %v10274_v18  ;;  %v10322_v26 = vmul.f32 %v10282_v58, %v10279_v11  ;;  %v14228_v17 = vld [vmem:[#allocation38_spill] sm:$0xff] }
 0x24c   :  { %v1130_v20 = vadd.f32 %v14225_v39, %v1079_v23  ;;  %v5750_v12 = vld [vmem:[%s13649_s10 + $0x76] sm:$0x7f]  ;;  %v3124_v56 = vadd.f32 %v3117_v31, %v3078_v34  ;;  %v3147_v3 = vadd.f32 %v3140_v5, %v3101_v14  ;;  %v3301_v30 = vmul.f32 %v5797_v7, %v14228_v17  ;;  %v14231_v31 = vld [vmem:[#allocation47_spill] sm:$0xff]  ;;  %v6443_v7 = vld [vmem:[#allocation2 + $0xc8] sm:$0xff] }
 0x24d   :  { %v5758_v42 = vld [vmem:[%s13649_s10 + $0x77] sm:$0x7f]  ;;  %v10341_v5 = vstv %s10237_s11  ;;  %s10479_s11 = sld [smem:[#allocation8 + $0x7]] }
 0x24e   :  { %v5805_v23 = vld [vmem:[%s13649_s10 + $0x73] sm:$0x7f]  ;;  %v3186_v14 = vmul.f32 %v5758_v42, %v14231_v31  ;;  %14232 = vst [vmem:[#allocation97_spill] sm:$0xff] %v10341_v5  ;;  %v3308_v17 = vadd.f32 %v3301_v30, %v10135_v10 }
 0x24f   :  { %v5813_v41 = vld [vmem:[%s13649_s10 + $0x74] sm:$0x7f]  ;;  %v3324_v48 = vmul.f32 %v5805_v23, %v14229_v27  ;;  %v10344_v23 = vmul.f32 %v6443_v7, %v10197_v13  ;;  %v14234_v7 = vld [vmem:[#allocation40_spill] sm:$0xff] }
 0x250   :  { %v5821_v22 = vld [vmem:[%s13649_s10 + $0x75] sm:$0x7f]  ;;  %v14235_v13 = vld [vmem:[#allocation52_spill] sm:$0xff] }
 0x251   :  { %v5876_v29 = vld [vmem:[%s13649_s10 + $0x72] sm:$0x7f]  ;;  %v5774_v27 = vld [vmem:[%s13649_s10 + $0x79] sm:$0x7f]  ;;  %v3347_v46 = vmul.f32 %v5813_v41, %v14235_v13 }
 0x252   :  { %v5884_v39 = vld [vmem:[%s13649_s10 + $0x73] sm:$0x7f] }
 0x253   :  { %v14230_v11 = vld [vmem:[#allocation46_spill] sm:$0xff]  ;;  %v3554_v62 = vmul.f32 %v5884_v39, %v14234_v7  ;;  %v14236_v1 = vld [vmem:[#allocation53_spill] sm:$0xff]  ;;  %v3354_v54 = vadd.f32 %v3347_v46, %v3308_v17  ;;  %v14245_v17 = vld [vmem:[#allocation68_spill] sm:$0xff] }
 0x254   :  { %v3163_v18 = vmul.f32 %v5750_v12, %v14230_v11  ;;  %v5766_v34 = vld [vmem:[%s13649_s10 + $0x78] sm:$0x7f]  ;;  %v3331_v11 = vadd.f32 %v3324_v48, %v10148_v15  ;;  %v3370_v51 = vmul.f32 %v5821_v22, %v14236_v1  ;;  %v10371_v48 = vadd.f32 %v10083_v53, %v1130_v20 }
 0x255   :  { %v5829_v12 = vld [vmem:[%s13649_s10 + $0x76] sm:$0x7f]  ;;  %v3193_v22 = vadd.f32 %v3186_v14, %v3147_v3  ;;  %v3561_v13 = vadd.f32 %v3554_v62, %v10154_v8  ;;  %v14240_v14 = vld [vmem:[#allocation55_spill] sm:$0xff]  ;;  %v14242_v62 = vld [vmem:[#allocation60_spill] sm:$0xff] }
 0x256   :  { %v5837_v42 = vld [vmem:[%s13649_s10 + $0x77] sm:$0x7f]  ;;  %v3170_v41 = vadd.f32 %v3163_v18, %v3124_v56  ;;  %v14238_v18 = vld [vmem:[#allocation36_spill] sm:$0xff] }
 0x257   :  { %v14233_v31 = vld [vmem:[#allocation58_spill] sm:$0xff] }
 0x258   :  { %v3531_v49 = vmul.f32 %v5876_v29, %v14233_v31  ;;  %v5845_v10 = vld [vmem:[%s13649_s10 + $0x78] sm:$0x7f]  ;;  %v10374_v29 = vadd.f32 %v10113_v24, %v1030_v6  ;;  %v14237_v24 = vld [vmem:[#allocation48_spill] sm:$0xff]  ;;  %v3232_v6 = vmul.f32 %v5774_v27, %v14238_v18  ;;  %v3416_v31 = vmul.f32 %v5837_v42, %v14240_v14  ;;  %v14244_v18 = vld [vmem:[#allocation39_spill] sm:$0xff] }
 0x259   :  { %v5892_v15 = vld [vmem:[%s13649_s10 + $0x74] sm:$0x7f]  ;;  %v3209_v20 = vmul.f32 %v5766_v34, %v14237_v24 }
 0x25a   :  { %v5900_v30 = vld [vmem:[%s13649_s10 + $0x75] sm:$0x7f]  ;;  %v3538_v1 = vadd.f32 %v3531_v49, %v10151_v61  ;;  %v3377_v49 = vadd.f32 %v3370_v51, %v3331_v11  ;;  %v14241_v61 = vld [vmem:[#allocation59_spill] sm:$0xff]  ;;  %v10411_v14 = vadd.f32 %v3232_v6, %v3193_v22 }
 0x25b   :  { %v5853_v39 = vld [vmem:[%s13649_s10 + $0x79] sm:$0x7f]  ;;  %v5955_v7 = vld [vmem:[%s13649_s10 + $0x72] sm:$0x7f]  ;;  %v3577_v8 = vmul.f32 %v5892_v15, %v14241_v61  ;;  %v3600_v9 = vmul.f32 %v5900_v30, %v14242_v62  ;;  %v10409_v30 = vadd.f32 %v3209_v20, %v3170_v41 }
 0x25c   :  { %v5963_v53 = vld [vmem:[%s13649_s10 + $0x73] sm:$0x7f]  ;;  %v3761_v11 = vmul.f32 %v5955_v7, %v14245_v17 }
 0x25d   :  { %v14239_v56 = vld [vmem:[#allocation54_spill] sm:$0xff]  ;;  %v14243_v24 = vld [vmem:[#allocation37_spill] sm:$0xff] }
 0x25e   :  { %v3393_v3 = vmul.f32 %v5829_v12, %v14239_v56  ;;  %v5971_v0 = vld [vmem:[%s13649_s10 + $0x74] sm:$0x7f]  ;;  %v3439_v27 = vmul.f32 %v5845_v10, %v14243_v24  ;;  %v3462_v12 = vmul.f32 %v5853_v39, %v14244_v18  ;;  %v3584_v56 = vadd.f32 %v3577_v8, %v3538_v1  ;;  %v14248_v1 = vld [vmem:[#allocation71_spill] sm:$0xff] }
 0x25f   :  { %v5979_v34 = vld [vmem:[%s13649_s10 + $0x75] sm:$0x7f]  ;;  %v3607_v10 = vadd.f32 %v3600_v9, %v3561_v13  ;;  %v3423_v8 = vadd.f32 %v3416_v31, %v3377_v49 }
 0x260   :  { %v5908_v51 = vld [vmem:[%s13649_s10 + $0x76] sm:$0x7f]  ;;  %v3830_v9 = vmul.f32 %v5979_v34, %v14248_v1  ;;  %v3400_v6 = vadd.f32 %v3393_v3, %v3354_v54  ;;  %v14252_v3 = vld [vmem:[#allocation63_spill] sm:$0xff]  ;;  %v14254_v1 = vld [vmem:[#allocation72_spill] sm:$0xff] }
 0x261   :  { %v5916_v46 = vld [vmem:[%s13649_s10 + $0x77] sm:$0x7f] }
 0x262   :  { %v14246_v42 = vld [vmem:[#allocation69_spill] sm:$0xff]  ;;  %v5924_v7 = vld [vmem:[%s13649_s10 + $0x78] sm:$0x7f] }
 0x263   :  { %v3784_v15 = vmul.f32 %v5963_v53, %v14246_v42  ;;  %v6034_v39 = vld [vmem:[%s13649_s10 + $0x72] sm:$0x7f]  ;;  %v3768_v53 = vadd.f32 %v3761_v11, %v10163_v33 }
 0x264   :  { %v6042_v18 = vld [vmem:[%s13649_s10 + $0x73] sm:$0x7f] }
 0x265   :  { %v3791_v41 = vadd.f32 %v3784_v15, %v10183_v47  ;;  %v14247_v22 = vld [vmem:[#allocation70_spill] sm:$0xff]  ;;  %v14249_v24 = vld [vmem:[#allocation61_spill] sm:$0xff]  ;;  %v4014_v49 = vmul.f32 %v6042_v18, %v14252_v3 }
 0x266   :  { %v3807_v20 = vmul.f32 %v5971_v0, %v14247_v22  ;;  %v5987_v13 = vld [vmem:[%s13649_s10 + $0x76] sm:$0x7f]  ;;  %v3623_v42 = vmul.f32 %v5908_v51, %v14249_v24 }
 0x267   :  { %v14250_v17 = vld [vmem:[#allocation62_spill] sm:$0xff]  ;;  %v3837_v11 = vadd.f32 %v3830_v9, %v3791_v41  ;;  %v14251_v54 = vld [vmem:[#allocation81_spill] sm:$0xff]  ;;  %v3853_v22 = vmul.f32 %v5987_v13, %v14254_v1  ;;  %v4021_v18 = vadd.f32 %v4014_v49, %v10200_v44  ;;  %v14305_v1 = vld [vmem:[#allocation100_spill] sm:$0xff] }
 0x268   :  { %v3646_v62 = vmul.f32 %v5916_v46, %v14250_v17  ;;  %v5995_v33 = vld [vmem:[%s13649_s10 + $0x77] sm:$0x7f]  ;;  %v3814_v34 = vadd.f32 %v3807_v20, %v3768_v53  ;;  %v3991_v31 = vmul.f32 %v6034_v39, %v14251_v54  ;;  %v3630_v46 = vadd.f32 %v3623_v42, %v3584_v56  ;;  %v14253_v17 = vld [vmem:[#allocation64_spill] sm:$0xff] }
 0x269   :  { %v6050_v0 = vld [vmem:[%s13649_s10 + $0x74] sm:$0x7f]  ;;  %v3669_v24 = vmul.f32 %v5924_v7, %v14253_v17  ;;  %v10460_v42 = vadd.f32 %v3439_v27, %v3400_v6  ;;  %v14260_v17 = vld [vmem:[#allocation84_spill] sm:$0xff] }
 0x26a   :  { %v5932_v47 = vld [vmem:[%s13649_s10 + $0x79] sm:$0x7f]  ;;  %v3653_v15 = vadd.f32 %v3646_v62, %v3607_v10  ;;  %v6113_v61 = vld [vmem:[%s13649_s10 + $0x72] sm:$0x7f]  ;;  %v3998_v39 = vadd.f32 %v3991_v31, %v10189_v32  ;;  %v10462_v10 = vadd.f32 %v3462_v12, %v3423_v8  ;;  %v3860_v31 = vadd.f32 %v3853_v22, %v3814_v34  ;;  %v14261_v34 = vld [vmem:[#allocation91_spill] sm:$0xff] }
 0x26b   :  { %v6058_v51 = vld [vmem:[%s13649_s10 + $0x75] sm:$0x7f] }
 0x26c   :  { %v14255_v53 = vld [vmem:[#allocation73_spill] sm:$0xff]  ;;  %v14256_v20 = vld [vmem:[#allocation82_spill] sm:$0xff] }
 0x26d   :  { %v3876_v41 = vmul.f32 %v5995_v33, %v14255_v53  ;;  %v4037_v9 = vmul.f32 %v6050_v0, %v14256_v20  ;;  %v6066_v56 = vld [vmem:[%s13649_s10 + $0x76] sm:$0x7f]  ;;  %v14258_v33 = vld [vmem:[#allocation83_spill] sm:$0xff] }
 0x26e   :  { %v6121_v62 = vld [vmem:[%s13649_s10 + $0x73] sm:$0x7f]  ;;  %v4060_v0 = vmul.f32 %v6058_v51, %v14258_v33  ;;  %v4083_v51 = vmul.f32 %v6066_v56, %v14260_v17  ;;  %v14266_v17 = vld [vmem:[#allocation87_spill] sm:$0xff] }
 0x26f   :  { %v14257_v7 = vld [vmem:[#allocation65_spill] sm:$0xff]  ;;  %v6003_v32 = vld [vmem:[%s13649_s10 + $0x78] sm:$0x7f]  ;;  %v3883_v49 = vadd.f32 %v3876_v41, %v3837_v11  ;;  %v4044_v20 = vadd.f32 %v4037_v9, %v3998_v39  ;;  %v4244_v11 = vmul.f32 %v6121_v62, %v14261_v34 }
 0x270   :  { %v3692_v13 = vmul.f32 %v5932_v47, %v14257_v7  ;;  %v6011_v44 = vld [vmem:[%s13649_s10 + $0x79] sm:$0x7f]  ;;  %v10481_v47 = vadd.f32 %v3669_v24, %v3630_v46  ;;  %v4067_v7 = vadd.f32 %v4060_v0, %v4021_v18 }
 0x271   :  { %v6074_v27 = vld [vmem:[%s13649_s10 + $0x77] sm:$0x7f] }
 0x272   :  { %v6082_v12 = vld [vmem:[%s13649_s10 + $0x78] sm:$0x7f]  ;;  %v10491_v39 = vadd.f32 %v3692_v13, %v3653_v15  ;;  %v4090_v15 = vadd.f32 %v4083_v51, %v4044_v20  ;;  %v14264_v13 = vld [vmem:[#allocation85_spill] sm:$0xff] }
 0x273   :  { %v14259_v6 = vld [vmem:[#allocation90_spill] sm:$0xff]  ;;  %v4106_v0 = vmul.f32 %v6074_v27, %v14264_v13 }
 0x274   :  { %v4221_v8 = vmul.f32 %v6113_v61, %v14259_v6  ;;  %v6090_v22 = vld [vmem:[%s13649_s10 + $0x79] sm:$0x7f]  ;;  %v14263_v6 = vld [vmem:[#allocation75_spill] sm:$0xff] }
 0x275   :  { %v6129_v41 = vld [vmem:[%s13649_s10 + $0x74] sm:$0x7f]  ;;  %v3922_v24 = vmul.f32 %v6011_v44, %v14263_v6  ;;  %v4251_v44 = vadd.f32 %v4244_v11, %v10212_v2  ;;  %v4152_v33 = vmul.f32 %v6090_v22, %v14266_v17  ;;  %v14267_v6 = vld [vmem:[#allocation92_spill] sm:$0xff] }
 0x276   :  { %v14262_v61 = vld [vmem:[#allocation74_spill] sm:$0xff]  ;;  %v4228_v46 = vadd.f32 %v4221_v8, %v10203_v35  ;;  %v14268_v2 = vld [vmem:[#allocation93_spill] sm:$0xff] }
 0x277   :  { %v3899_v9 = vmul.f32 %v6003_v32, %v14262_v61  ;;  %v6137_v18 = vld [vmem:[%s13649_s10 + $0x75] sm:$0x7f]  ;;  %v10512_v8 = vadd.f32 %v3922_v24, %v3883_v49  ;;  %v4267_v61 = vmul.f32 %v6129_v41, %v14267_v6 }
 0x278   :  { %v6145_v56 = vld [vmem:[%s13649_s10 + $0x76] sm:$0x7f]  ;;  %v4290_v51 = vmul.f32 %v6137_v18, %v14268_v2  ;;  %v2249_v18 = vadd.f32 %v10292_v55, %v10310_v4  ;;  %v10553_v55 = vstv %s10479_s11 }
 0x279   :  { %v6153_v62 = vld [vmem:[%s13649_s10 + $0x77] sm:$0x7f]  ;;  %v10510_v35 = vadd.f32 %v3899_v9, %v3860_v31  ;;  %v14270_v9 = vld [vmem:[#allocation95_spill] sm:$0xff]  ;;  %v4274_v24 = vadd.f32 %v4267_v61, %v4228_v46  ;;  %14275 = vst [vmem:[#allocation44_spill] sm:$0xff] %v10553_v55 }
 0x27a   :  { %v14265_v32 = vld [vmem:[#allocation86_spill] sm:$0xff]  ;;  %v4336_v49 = vmul.f32 %v6153_v62, %v14270_v9  ;;  %v4297_v61 = vadd.f32 %v4290_v51, %v4251_v44  ;;  %v14272_v46 = vld [vmem:[#allocation77_spill] sm:$0xff]  ;;  %v10578_v51 = vstv %s10508_s0  ;;  %s12604_s0 = sld [smem:[#allocation10 + $0x4c]] }
 0x27b   :  { %v4129_v34 = vmul.f32 %v6082_v12, %v14265_v32  ;;  %v6161_v20 = vld [vmem:[%s13649_s10 + $0x78] sm:$0x7f]  ;;  %v4113_v12 = vadd.f32 %v4106_v0, %v4067_v7  ;;  %v1131_v7 = vadd.f32 %v10235_v52, %v10374_v29  ;;  %v2299_v52 = vadd.f32 %v10314_v21, %v2249_v18  ;;  %14280 = vst [vmem:[#allocation47_spill] sm:$0xff] %v10578_v51 }
 0x27c   :  { %v6169_v27 = vld [vmem:[%s13649_s10 + $0x79] sm:$0x7f]  ;;  %v6192_v22 = vld [vmem:[%s13649_s10 + $0x72] sm:$0x7f]  ;;  %v10540_v62 = vmul.f32 %v6161_v20, %v14272_v46 }
 0x27d   :  { %v14269_v11 = vld [vmem:[#allocation94_spill] sm:$0xff]  ;;  %v10555_v4 = vadd.f32 %v4152_v33, %v4113_v12  ;;  %v2349_v33 = vadd.f32 %v10318_v37, %v2299_v52  ;;  %v14289_v46 = vld [vmem:[#allocation33_spill] sm:$0xff] }
 0x27e   :  { %v4313_v31 = vmul.f32 %v6145_v56, %v14269_v11  ;;  %v6200_v41 = vld [vmem:[%s13649_s10 + $0x73] sm:$0x7f]  ;;  %v10537_v56 = vadd.f32 %v4129_v34, %v4090_v15  ;;  %v14278_v15 = vld [vmem:[#allocation43_spill] sm:$0xff]  ;;  %v965_v13 = vmul.f32 %v14289_v46, %v14197_v40 }
 0x27f   :  { %v14271_v6 = vld [vmem:[#allocation98_spill] sm:$0xff]  ;;  %v10545_v11 = vld [vmem:[#allocation2 + $0xf0] sm:$0xff]  ;;  %v10561_v44 = vmul.f32 %v6200_v41, %v14278_v15  ;;  %v2399_v37 = vadd.f32 %v10322_v26, %v2349_v33 }
 0x280   :  { %v1230_v17 = vadd.f32 %v14271_v6, %v10371_v48  ;;  %v14273_v0 = vld [vmem:[#allocation78_spill] sm:$0xff]  ;;  %v1181_v48 = vadd.f32 %v10241_v16, %v1131_v7  ;;  %v2150_v16 = vadd.f32 %v10344_v23, %v14220_v45  ;;  %v6445_v23 = vld [vmem:[#allocation2 + $0xca] sm:$0xff] }
 0x281   :  { %v10543_v9 = vmul.f32 %v6169_v27, %v14273_v0  ;;  %v14274_v2 = vld [vmem:[#allocation26_spill] sm:$0xff]  ;;  %14279 = vst [vmem:[#allocation46_spill] sm:$0xff] %v10561_v44  ;;  %v2434_v27 = vmul.f32 %v10341_v5, %v10545_v11 }
 0x282   :  { %v1327_v32 = vadd.f32 %v14274_v2, %v1230_v17  ;;  %v10550_v29 = vld [vmem:[#allocation2 + $0xf1] sm:$0xff]  ;;  %v5607_v17 = vld [vmem:[%s13647_s8 + $0x80] sm:$0xff]  ;;  %v1231_v20 = vadd.f32 %v10262_v50, %v1181_v48 }
 0x283   :  { %v14276_v6 = vld [vmem:[#allocation34_spill] sm:$0xff]  ;;  %v2484_v12 = vmul.f32 %v10553_v55, %v10550_v29  ;;  %vm2583_vm15 = vcmp.gt.f32.partialorder %v5607_v17, 6.0  ;;  %v6446_v48 = vld [vmem:[#allocation2 + $0xe0] sm:$0xff]  ;;  %v2450_v44 = vadd.f32 %v2434_v27, %v2399_v37  ;;  %v2631_v33 = vmul.f32 0.8, %v5607_v17 }
 0x284   :  { %v10558_v34 = vmul.f32 %v6192_v22, %v14276_v6  ;;  %v1359_v21 = vsub.f32 %v1327_v32, %v10230_v28  ;;  %v10575_v2 = vld [vmem:[#allocation2 + $0xf2] sm:$0xff]  ;;  %v6444_v22 = vld [vmem:[#allocation2 + $0xc9] sm:$0xff]  ;;  %v2234_v28 = vmul.f32 %v6445_v23, %v10247_v38  ;;  %v1328_v50 = vadd.f32 %v10244_v59, %v1231_v20  ;;  %v10625_v15 = vld [vmem:[#allocation2 + $0xfa] sm:$0xff] }
 0x285   :  { %v2184_v41 = vmul.f32 %v6444_v22, %v10226_v57  ;;  %v10587_v32 = vadd.f32 %v4313_v31, %v4274_v24  ;;  %v2284_v52 = vmul.f32 %v6446_v48, %v10267_v60  ;;  %v10591_v22 = vadd.f32 %v4336_v49, %v4297_v61  ;;  %v6208_v26 = vld [vmem:[%s13649_s10 + $0x74] sm:$0x7f]  ;;  %v14282_v49 = vld [vmem:[#allocation31_spill] sm:$0xff] }
 0x286   :  { %14277 = vst [vmem:[#allocation45_spill] sm:$0xff] %v10558_v34  ;;  %vm1375_vm14 = vcmp.gt.f32.partialorder %v1359_v21, 2.0  ;;  %5549 = vst [vmem:[%s13651_s12 + $0xb0] sm:$0xff] %v1359_v21  ;;  %v1360_v23 = vsub.f32 %v1328_v50, %v10289_v63  ;;  %v2534_v59 = vmul.f32 %v10578_v51, %v10575_v2  ;;  %v5623_v31 = vsel %vm2583_vm15, 1.0, %v9931_v36  ;;  %v14281_v20 = vld [vmem:[#allocation14_spill] sm:$0xff]  ;;  %v14284_v50 = vld [vmem:[#allocation29_spill] sm:$0xff] }
 0x287   :  { %v5533_v7 = vsel %vm1375_vm14, 1.0, %v9931_v36  ;;  %v2200_v18 = vadd.f32 %v2184_v41, %v2150_v16  ;;  %v6447_v16 = vld [vmem:[#allocation2 + $0xe1] sm:$0xff]  ;;  %v814_v61 = vmul.f32 %v14282_v49, %v14281_v20  ;;  %v2500_v63 = vadd.f32 %v2484_v12, %v2450_v44  ;;  %v10606_v27 = vld [vmem:[#allocation2 + $0xf8] sm:$0xff] }
 0x288   :  { %1441 = vst [vmem:[#allocation2 + $0x121] sm:$0xff] %v5533_v7  ;;  %v2334_v21 = vmul.f32 %v6447_v16, %v10277_v19  ;;  %vm1376_vm0 = vcmp.gt.f32.partialorder %v1360_v23, 2.0  ;;  %5550 = vst [vmem:[%s13651_s12 + $0xb8] sm:$0xff] %v1360_v23  ;;  %v14283_v41 = vld [vmem:[#allocation15_spill] sm:$0xff]  ;;  %v14285_v48 = vld [vmem:[#allocation30_spill] sm:$0xff]  ;;  %v2663_v34 = vmul.f32 6.0, %v5623_v31  ;;  %v2435_v6 = vmul.f32 %v10341_v5, %v10606_v27 }
 0x289   :  { %v2250_v24 = vadd.f32 %v2234_v28, %v2200_v18  ;;  %v864_v37 = vmul.f32 %v14284_v50, %v14283_v41  ;;  %v6216_v28 = vld [vmem:[%s13649_s10 + $0x75] sm:$0x7f]  ;;  %v5534_v7 = vsel %vm1376_vm0, 1.0, %v9931_v36  ;;  %v2384_v16 = vmul.f32 %v10282_v58, %v14285_v48  ;;  %v5608_v44 = vld [vmem:[%s13647_s8 + $0x88] sm:$0xff] }
 0x28a   :  { %v10616_v49 = vld [vmem:[#allocation2 + $0xf9] sm:$0xff]  ;;  %v830_v17 = vadd.f32 %v814_v61, %v14185_v43  ;;  %v14286_v12 = vld [vmem:[#allocation24_spill] sm:$0xff]  ;;  %1442 = vst [vmem:[#allocation2 + $0x129] sm:$0xff] %v5534_v7  ;;  %v2550_v50 = vadd.f32 %v2534_v59, %v2500_v63  ;;  %v14290_v61 = vld [vmem:[#allocation25_spill] sm:$0xff]  ;;  %vm2584_vm1 = vcmp.gt.f32.partialorder %v5608_v44, 6.0  ;;  %v2535_v63 = vmul.f32 %v10578_v51, %v10625_v15 }
 0x28b   :  { %v2300_v18 = vadd.f32 %v2284_v52, %v2250_v24  ;;  %v10623_v23 = vmul.f32 %v6208_v26, %v14286_v12  ;;  %v14288_v52 = vld [vmem:[#allocation32_spill] sm:$0xff]  ;;  %v10634_v53 = vmul.f32 %v6216_v28, %v14290_v61  ;;  %v2485_v59 = vmul.f32 %v10553_v55, %v10616_v49  ;;  %v14292_v7 = vld [vmem:[#allocation18_spill] sm:$0xff] }
 0x28c   :  { %v914_v24 = vmul.f32 %v14288_v52, %v14196_v25  ;;  %v880_v0 = vadd.f32 %v864_v37, %v830_v17  ;;  %v2647_v26 = vadd.f32 %v2631_v33, %v2550_v50  ;;  %v2632_v28 = vmul.f32 0.8, %v5608_v44  ;;  %v10648_v33 = vld [vmem:[%s13645_s6 + $0x150] sm:$0xff]  ;;  %v14296_v50 = vld [vmem:[#allocation27_spill] sm:$0xff] }
 0x28d   :  { %14287 = vst [vmem:[#allocation48_spill] sm:$0xff] %v10623_v23  ;;  %v2350_v48 = vadd.f32 %v2334_v21, %v2300_v18  ;;  %14291 = vst [vmem:[#allocation36_spill] sm:$0xff] %v10634_v53  ;;  %v14293_v18 = vld [vmem:[#allocation35_spill] sm:$0xff] }
 0x28e   :  { %v930_v21 = vadd.f32 %v914_v24, %v880_v0  ;;  %v1015_v52 = vmul.f32 %v14293_v18, %v14292_v7  ;;  %v2679_v37 = vsub.f32 %v2647_v26, %v2663_v34  ;;  %14294 = vst [vmem:[#allocation98_spill] sm:$0xff] %v10648_v33  ;;  %v865_v0 = vmul.f32 %v14296_v50, %v14283_v41  ;;  %v14297_v53 = vld [vmem:[#allocation19_spill] sm:$0xff]  ;;  %v10660_v34 = vld [vmem:[%s13645_s6 + $0x151] sm:$0xff] }
 0x28f   :  { %v2400_v31 = vadd.f32 %v2384_v16, %v2350_v48  ;;  %v5503_v46 = vld [vmem:[%s13646_s7 + $0xc0] sm:$0xff]  ;;  %v14295_v16 = vld [vmem:[#allocation28_spill] sm:$0xff]  ;;  %v5624_v48 = vsel %vm2584_vm1, 1.0, %v9931_v36  ;;  %14299 = vst [vmem:[#allocation26_spill] sm:$0xff] %v10660_v34 }
 0x290   :  { %v815_v17 = vmul.f32 %v14295_v16, %v14281_v20  ;;  %v981_v18 = vadd.f32 %v965_v13, %v930_v21  ;;  %v14298_v23 = vld [vmem:[#allocation79_spill] sm:$0xff]  ;;  %5655 = vst [vmem:[%s13652_s13 + $0x80] sm:$0xff] %v2679_v37  ;;  %vm2695_vm2 = vcmp.gt.f32.partialorder %v2679_v37, 6.0  ;;  %vm1265_vm3 = vcmp.gt.f32.partialorder %v5503_v46, 2.0  ;;  %v5504_v13 = vld [vmem:[%s13646_s7 + $0xc8] sm:$0xff]  ;;  %v14302_v37 = vld [vmem:[#allocation21_spill] sm:$0xff] }
 0x291   :  { %v2451_v24 = vadd.f32 %v2435_v6, %v2400_v31  ;;  %v1065_v61 = vmul.f32 %v14298_v23, %v14297_v53  ;;  %v14300_v6 = vld [vmem:[#allocation96_spill] sm:$0xff]  ;;  %v5639_v31 = vsel %vm2695_vm2, 1.0, %v9931_v36  ;;  %v2664_v12 = vmul.f32 6.0, %v5624_v48 }
 0x292   :  { %v831_v44 = vadd.f32 %v815_v17, %v14185_v43  ;;  %v915_v26 = vmul.f32 %v14300_v6, %v14196_v25  ;;  %v1031_v21 = vadd.f32 %v1015_v52, %v981_v18  ;;  %v14301_v16 = vld [vmem:[#allocation20_spill] sm:$0xff]  ;;  %5671 = vst [vmem:[%s13649_s10 + $0x80] sm:$0xff] %v5639_v31  ;;  %v1166_v17 = vmul.f32 %v10660_v34, %v14302_v37  ;;  %v10682_v6 = vld [vmem:[%s13645_s6 + $0x152] sm:$0xff] }
 0x293   :  { %v2501_v23 = vadd.f32 %v2485_v59, %v2451_v24  ;;  %v1116_v50 = vmul.f32 %v10648_v33, %v14301_v16  ;;  %14303 = vst [vmem:[#allocation31_spill] sm:$0xff] %v10682_v6  ;;  %v14304_v24 = vld [vmem:[#allocation99_spill] sm:$0xff]  ;;  %v5519_v48 = vsel %vm1265_vm3, 1.0, %v9931_v36  ;;  %vm1266_vm4 = vcmp.gt.f32.partialorder %v5504_v13, 2.0 }
 0x294   :  { %v881_v59 = vadd.f32 %v865_v0, %v831_v44  ;;  %v966_v52 = vmul.f32 %v14304_v24, %v14197_v40  ;;  %v1081_v3 = vadd.f32 %v1065_v61, %v1031_v21  ;;  %v10690_v31 = vadd.f32 %v10540_v62, %v10587_v32  ;;  %v14306_v0 = vld [vmem:[#allocation106_spill] sm:$0xff] }
 0x295   :  { %v2551_v18 = vadd.f32 %v2535_v63, %v2501_v23  ;;  %v10694_v34 = vadd.f32 %v10543_v9, %v10591_v22  ;;  %v2135_v44 = vmul.f32 %v14306_v0, %v14305_v1  ;;  %v14307_v63 = vld [vmem:[#allocation22_spill] sm:$0xff]  ;;  %v14308_v23 = vld [vmem:[#allocation101_spill] sm:$0xff]  ;;  %v1313_v32 = vmul.f32 0.8, %v5503_v46  ;;  %v14312_v0 = vld [vmem:[#allocation23_spill] sm:$0xff] }
 0x296   :  { %v931_v54 = vadd.f32 %v915_v26, %v881_v59  ;;  %v1132_v24 = vadd.f32 %v1116_v50, %v1081_v3  ;;  %v1216_v61 = vmul.f32 %v10682_v6, %v14307_v63  ;;  %v1016_v21 = vmul.f32 %v14308_v23, %v14292_v7  ;;  %v10705_v62 = vld [vmem:[%s13645_s6 + $0x158] sm:$0xff]  ;;  %v10721_v6 = vld [vmem:[#allocation2 + $0x108] sm:$0xff] }
 0x297   :  { %v2648_v33 = vadd.f32 %v2632_v28, %v2551_v18  ;;  %14309 = vst [vmem:[#allocation29_spill] sm:$0xff] %v10705_v62  ;;  %v10710_v9 = vld [vmem:[%s13645_s6 + $0x159] sm:$0xff]  ;;  %v1345_v22 = vmul.f32 2.0, %v5519_v48  ;;  %v5520_v26 = vsel %vm1266_vm4, 1.0, %v9931_v36  ;;  %v2151_v18 = vadd.f32 %v2135_v44, %v14220_v45  ;;  %14313 = vst [vmem:[#allocation33_spill] sm:$0xff] %v10721_v6  ;;  %v14314_v7 = vld [vmem:[#allocation104_spill] sm:$0xff] }
 0x298   :  { %14310 = vst [vmem:[#allocation30_spill] sm:$0xff] %v10710_v9  ;;  %v10715_v3 = vld [vmem:[%s13645_s6 + $0x15a] sm:$0xff]  ;;  %v982_v28 = vadd.f32 %v966_v52, %v931_v54  ;;  %v1182_v59 = vadd.f32 %v1166_v17, %v1132_v24  ;;  %v2185_v23 = vmul.f32 %v14312_v0, %v10226_v57  ;;  %v1066_v40 = vmul.f32 %v14314_v7, %v14297_v53  ;;  %v10735_v46 = vld [vmem:[#allocation2 + $0x109] sm:$0xff] }
 0x299   :  { %14311 = vst [vmem:[#allocation32_spill] sm:$0xff] %v10715_v3  ;;  %v2680_v50 = vsub.f32 %v2648_v33, %v2664_v12  ;;  %v1117_v25 = vmul.f32 %v10705_v62, %v14301_v16  ;;  %v10729_v54 = vmul.f32 %v10710_v9, %v14302_v37  ;;  %v10733_v12 = vmul.f32 %v10715_v3, %v14307_v63  ;;  %v2118_v33 = vld [vmem:[#allocation2 + $0xe0] sm:$0xff]  ;;  %v10744_v24 = vld [vmem:[#allocation2 + $0x10a] sm:$0xff] }
 0x29a   :  { %14315 = vst [vmem:[#allocation35_spill] sm:$0xff] %v10735_v46  ;;  %v2168_v17 = vld [vmem:[#allocation2 + $0xe1] sm:$0xff]  ;;  %v1232_v7 = vadd.f32 %v1216_v61, %v1182_v59  ;;  %v1032_v52 = vadd.f32 %v1016_v21, %v982_v28  ;;  %v10740_v48 = vmul.f32 0.8, %v5504_v13  ;;  %v10742_v44 = vmul.f32 2.0, %v5520_v26  ;;  %14316 = vst [vmem:[#allocation28_spill] sm:$0xff] %v10744_v24 }
 0x29b   :  { %5656 = vst [vmem:[%s13652_s13 + $0x88] sm:$0xff] %v2680_v50  ;;  %v2218_v3 = vld [vmem:[#allocation2 + $0xe2] sm:$0xff]  ;;  %v2285_v26 = vmul.f32 %v10545_v11, %v10267_v60  ;;  %v10766_v59 = vmul.f32 %v10550_v29, %v10277_v19  ;;  %v10770_v63 = vmul.f32 %v10575_v2, %v10282_v58  ;;  %v2201_v16 = vadd.f32 %v2185_v23, %v2151_v18  ;;  %v14323_v23 = vld [vmem:[#allocation50_spill] sm:$0xff] }
 0x29c   :  { %v5782_v9 = vld [vmem:[%s13649_s10 + $0x80] sm:$0x7f]  ;;  %v14317_v21 = vld [vmem:[#allocation108_spill] sm:$0xff]  ;;  %v10783_v29 = vmul.f32 %v10341_v5, %v10721_v6  ;;  %v10787_v2 = vmul.f32 %v10553_v55, %v10735_v46  ;;  %v10791_v53 = vmul.f32 %v10578_v51, %v10744_v24  ;;  %v2136_v43 = vmul.f32 %v14305_v1, %v2118_v33 }
 0x29d   :  { %v5790_v61 = vld [vmem:[%s13649_s10 + $0x81] sm:$0x7f]  ;;  %v2235_v28 = vmul.f32 %v14317_v21, %v10247_v38  ;;  %14318 = vst [vmem:[#allocation27_spill] sm:$0xff] %v10770_v63  ;;  %v1329_v21 = vadd.f32 %v1313_v32, %v1232_v7  ;;  %v2186_v41 = vmul.f32 %v10226_v57, %v2168_v17  ;;  %v14322_v32 = vld [vmem:[#allocation49_spill] sm:$0xff]  ;;  %v1082_v46 = vadd.f32 %v1066_v40, %v1032_v52  ;;  %v14326_v63 = vld [vmem:[#allocation66_spill] sm:$0xff] }
 0x29e   :  { %v5861_v13 = vld [vmem:[%s13649_s10 + $0x80] sm:$0x7f]  ;;  %14319 = vst [vmem:[#allocation79_spill] sm:$0xff] %v10783_v29  ;;  %14320 = vst [vmem:[#allocation96_spill] sm:$0xff] %v10787_v2  ;;  %v3256_v18 = vmul.f32 %v5782_v9, %v14322_v32  ;;  %v3279_v7 = vmul.f32 %v5790_v61, %v14323_v23  ;;  %v2236_v2 = vmul.f32 %v10247_v38, %v2218_v3  ;;  %v14324_v29 = vld [vmem:[#allocation56_spill] sm:$0xff]  ;;  %vm2696_vm6 = vcmp.gt.f32.partialorder %v2680_v50, 6.0 }
 0x29f   :  { %v5869_v62 = vld [vmem:[%s13649_s10 + $0x81] sm:$0x7f]  ;;  %14321 = vst [vmem:[#allocation99_spill] sm:$0xff] %v10791_v53  ;;  %v3486_v24 = vmul.f32 %v5861_v13, %v14324_v29  ;;  %v14325_v53 = vld [vmem:[#allocation57_spill] sm:$0xff]  ;;  %v1361_v3 = vsub.f32 %v1329_v21, %v1345_v22  ;;  %v5640_v13 = vsel %vm2696_vm6, 1.0, %v9931_v36  ;;  %v14330_v21 = vld [vmem:[#allocation88_spill] sm:$0xff] }
 0x2a0   :  { %v5940_v37 = vld [vmem:[%s13649_s10 + $0x80] sm:$0x7f]  ;;  %v3509_v51 = vmul.f32 %v5869_v62, %v14325_v53  ;;  %v10807_v17 = vadd.f32 %v3256_v18, %v10409_v30  ;;  %v10810_v9 = vadd.f32 %v3279_v7, %v10411_v14  ;;  %5672 = vst [vmem:[%s13649_s10 + $0x88] sm:$0xff] %v5640_v13  ;;  %v14331_v18 = vld [vmem:[#allocation89_spill] sm:$0xff] }
 0x2a1   :  { %v5948_v11 = vld [vmem:[%s13649_s10 + $0x81] sm:$0x7f]  ;;  %v3716_v55 = vmul.f32 %v5940_v37, %v14326_v63  ;;  %v10816_v52 = vadd.f32 %v3486_v24, %v10460_v42  ;;  %v14328_v37 = vld [vmem:[#allocation76_spill] sm:$0xff]  ;;  %vm1377_vm7 = vcmp.gt.f32.partialorder %v1361_v3, 2.0  ;;  %5551 = vst [vmem:[%s13651_s12 + $0xc0] sm:$0xff] %v1361_v3 }
 0x2a2   :  { %v10749_v0 = vld [vmem:[%s13647_s8 + $0x90] sm:$0xff]  ;;  %v6019_v6 = vld [vmem:[%s13649_s10 + $0x80] sm:$0x7f]  ;;  %v10819_v62 = vadd.f32 %v3509_v51, %v10462_v10  ;;  %v1133_v51 = vadd.f32 %v1117_v25, %v1082_v46  ;;  %v5535_v24 = vsel %vm1377_vm7, 1.0, %v9931_v36  ;;  %v5610_v25 = vld [vmem:[%s13647_s8 + $0x98] sm:$0xff] }
 0x2a3   :  { %vm2585_vm5 = vcmp.gt.f32.partialorder %v10749_v0, 6.0  ;;  %v14327_v33 = vld [vmem:[#allocation67_spill] sm:$0xff]  ;;  %v3946_v61 = vmul.f32 %v6019_v6, %v14328_v37  ;;  %v10830_v22 = vadd.f32 %v3716_v55, %v10481_v47  ;;  %v2251_v47 = vadd.f32 %v2235_v28, %v2201_v16  ;;  %v14329_v6 = vld [vmem:[#allocation80_spill] sm:$0xff]  ;;  %1443 = vst [vmem:[#allocation2 + $0x139] sm:$0xff] %v5535_v24  ;;  %v14333_v16 = vld [vmem:[#allocation42_spill] sm:$0xff] }
 0x2a4   :  { %v3739_v1 = vmul.f32 %v5948_v11, %v14327_v33  ;;  %v6027_v40 = vld [vmem:[%s13649_s10 + $0x81] sm:$0x7f]  ;;  %v2152_v11 = vadd.f32 %v2136_v43, %v14220_v45  ;;  %v1183_v7 = vadd.f32 %v10729_v54, %v1133_v51  ;;  %v5625_v43 = vsel %vm2585_vm5, 1.0, %v9931_v36 }
 0x2a5   :  { %v6098_v30 = vld [vmem:[%s13649_s10 + $0x80] sm:$0x7f]  ;;  %v3969_v50 = vmul.f32 %v6027_v40, %v14329_v6  ;;  %v2301_v13 = vadd.f32 %v2285_v26, %v2251_v47  ;;  %v10862_v40 = vadd.f32 %v3946_v61, %v10510_v35  ;;  %vm2586_vm8 = vcmp.gt.f32.partialorder %v5610_v25, 6.0  ;;  %v5353_v35 = vld [vmem:[%s13645_s6 + $0x138] sm:$0xff] }
 0x2a6   :  { %v6106_v14 = vld [vmem:[%s13649_s10 + $0x81] sm:$0x7f]  ;;  %v10845_v55 = vadd.f32 %v3739_v1, %v10491_v39  ;;  %v4176_v32 = vmul.f32 %v6098_v30, %v14330_v21  ;;  %v14332_v1 = vld [vmem:[#allocation41_spill] sm:$0xff]  ;;  %v2202_v28 = vadd.f32 %v2186_v41, %v2152_v11  ;;  %v1233_v26 = vadd.f32 %v10733_v12, %v1183_v7  ;;  %v5369_v61 = vld [vmem:[%s13645_s6 + $0x139] sm:$0xff] }
 0x2a7   :  { %v6177_v42 = vld [vmem:[%s13649_s10 + $0x80] sm:$0x7f]  ;;  %v4199_v23 = vmul.f32 %v6106_v14, %v14331_v18  ;;  %v10865_v3 = vadd.f32 %v3969_v50, %v10512_v8  ;;  %v10880_v41 = vld [vmem:[#allocation2 + $0x110] sm:$0xff]  ;;  %v10890_v12 = vmul.f32 6.0, %v5625_v43  ;;  %v10911_v51 = vmul.f32 0.8, %v5610_v25 }
 0x2a8   :  { %v6185_v10 = vld [vmem:[%s13649_s10 + $0x81] sm:$0x7f]  ;;  %v4406_v39 = vmul.f32 %v6177_v42, %v14332_v1  ;;  %v10868_v54 = vadd.f32 %v4176_v32, %v10537_v56  ;;  %14336 = vst [vmem:[#allocation23_spill] sm:$0xff] %v10880_v41  ;;  %v1330_v8 = vadd.f32 %v10740_v48, %v1233_v26  ;;  %v2351_v56 = vadd.f32 %v10766_v59, %v2301_v13  ;;  %v14339_v47 = vld [vmem:[#allocation38_spill] sm:$0xff]  ;;  %v10917_v11 = vld [vmem:[#allocation2 + $0x8] sm:$0xff] }
 0x2a9   :  { %v4429_v46 = vmul.f32 %v6185_v10, %v14333_v16  ;;  %v10872_v30 = vadd.f32 %v4199_v23, %v10555_v4  ;;  %v10888_v4 = vmul.f32 0.8, %v10749_v0  ;;  %v5798_v42 = vld [vmem:[%s13649_s10 + $0x82] sm:$0x7f]  ;;  %v2252_v0 = vadd.f32 %v2236_v2, %v2202_v28  ;;  %v14348_v21 = vld [vmem:[#allocation53_spill] sm:$0xff] }
 0x2aa   :  { %v10875_v14 = vadd.f32 %v4406_v39, %v10690_v31  ;;  %v10892_v31 = vld [vmem:[#allocation2 + $0x111] sm:$0xff]  ;;  %v5806_v48 = vld [vmem:[%s13649_s10 + $0x83] sm:$0x7f]  ;;  %v2286_v59 = vmul.f32 %v10606_v27, %v10267_v60  ;;  %v10909_v10 = vmul.f32 %v10616_v49, %v10277_v19  ;;  %v3302_v50 = vmul.f32 %v5798_v42, %v14339_v47  ;;  %v5386_v27 = vld [vmem:[%s13645_s6 + $0x13a] sm:$0xff] }
 0x2ab   :  { %v10878_v36 = vadd.f32 %v4429_v46, %v10694_v34  ;;  %14337 = vst [vmem:[#allocation104_spill] sm:$0xff] %v10892_v31  ;;  %v10894_v34 = vld [vmem:[#allocation2 + $0x112] sm:$0xff]  ;;  %v10915_v24 = vsub.f32 %v1330_v8, %v10742_v44  ;;  %v10921_v32 = vsel %vm2586_vm8, 1.0, %v10917_v11  ;;  %v816_v2 = vmul.f32 %v5353_v35, %v14281_v20  ;;  %v14340_v49 = vld [vmem:[#allocation51_spill] sm:$0xff]  ;;  %v14341_v46 = vld [vmem:[#allocation44_spill] sm:$0xff] }
 0x2ac   :  { %14334 = vst [vmem:[#allocation106_spill] sm:$0xff] %v10875_v14  ;;  %14338 = vst [vmem:[#allocation108_spill] sm:$0xff] %v10894_v34  ;;  %v3325_v23 = vmul.f32 %v5806_v48, %v14340_v49  ;;  %v5814_v7 = vld [vmem:[%s13649_s10 + $0x84] sm:$0x7f]  ;;  %v10939_v25 = vmul.f32 %v10625_v15, %v10282_v58  ;;  %v10943_v39 = vmul.f32 %v10341_v5, %v10880_v41 }
 0x2ad   :  { %14335 = vst [vmem:[#allocation101_spill] sm:$0xff] %v10878_v36  ;;  %v5822_v44 = vld [vmem:[%s13649_s10 + $0x85] sm:$0x7f]  ;;  %v10947_v43 = vmul.f32 %v14341_v46, %v10892_v31  ;;  %v3309_v28 = vadd.f32 %v3302_v50, %v10807_v17  ;;  %5552 = vst [vmem:[%s13651_s12 + $0xc8] sm:$0xff] %v10915_v24  ;;  %v14345_v36 = vld [vmem:[#allocation58_spill] sm:$0xff]  ;;  %v10974_v16 = vadd.f32 %v2286_v59, %v2252_v0  ;;  %vm1378_vm9 = vcmp.gt.f32.partialorder %v10915_v24, 2.0 }
 0x2ae   :  { %v5877_v13 = vld [vmem:[%s13649_s10 + $0x82] sm:$0x7f]  ;;  %v3332_v49 = vadd.f32 %v3325_v23, %v10810_v9  ;;  %v3371_v6 = vmul.f32 %v5822_v44, %v14348_v21  ;;  %v14349_v23 = vld [vmem:[#allocation13_spill] sm:$0xff] }
 0x2af   :  { %v5885_v26 = vld [vmem:[%s13649_s10 + $0x83] sm:$0x7f]  ;;  %v3532_v14 = vmul.f32 %v5877_v13, %v14345_v36  ;;  %v10988_v13 = vadd.f32 %v816_v2, %v14349_v23  ;;  %v14366_v46 = vld [vmem:[#allocation81_spill] sm:$0xff] }
 0x2b0   :  { %v5893_v35 = vld [vmem:[%s13649_s10 + $0x84] sm:$0x7f] }
 0x2b1   :  { %v5901_v15 = vld [vmem:[%s13649_s10 + $0x85] sm:$0x7f]  ;;  %v3539_v21 = vadd.f32 %v3532_v14, %v10816_v52 }
 0x2b2   :  { %v14342_v8 = vld [vmem:[#allocation27_spill] sm:$0xff]  ;;  %v14346_v31 = vld [vmem:[#allocation40_spill] sm:$0xff] }
 0x2b3   :  { %v2401_v42 = vadd.f32 %v14342_v8, %v2351_v56  ;;  %v14343_v17 = vld [vmem:[#allocation47_spill] sm:$0xff]  ;;  %v3555_v41 = vmul.f32 %v5885_v26, %v14346_v31  ;;  %v14347_v1 = vld [vmem:[#allocation52_spill] sm:$0xff] }
 0x2b4   :  { %v10966_v48 = vmul.f32 %v14343_v17, %v10894_v34  ;;  %v14344_v47 = vld [vmem:[#allocation15_spill] sm:$0xff]  ;;  %v3348_v18 = vmul.f32 %v5814_v7, %v14347_v1  ;;  %v14350_v0 = vld [vmem:[#allocation16_spill] sm:$0xff] }
 0x2b5   :  { %v10969_v50 = vmul.f32 %v5369_v61, %v14344_v47  ;;  %v5830_v56 = vld [vmem:[%s13649_s10 + $0x86] sm:$0x7f]  ;;  %v10991_v59 = vmul.f32 %v5386_v27, %v14350_v0  ;;  %v3562_v1 = vadd.f32 %v3555_v41, %v10819_v62 }
 0x2b6   :  { %v5956_v61 = vld [vmem:[%s13649_s10 + $0x82] sm:$0x7f]  ;;  %v3355_v31 = vadd.f32 %v3348_v18, %v3309_v28  ;;  %v3378_v18 = vadd.f32 %v3371_v6, %v3332_v49  ;;  %v14357_v28 = vld [vmem:[#allocation54_spill] sm:$0xff] }
 0x2b7   :  { %v5964_v9 = vld [vmem:[%s13649_s10 + $0x83] sm:$0x7f]  ;;  %v3394_v37 = vmul.f32 %v5830_v56, %v14357_v28  ;;  %v14364_v28 = vld [vmem:[#allocation62_spill] sm:$0xff] }
 0x2b8   :  { %v14351_v7 = vld [vmem:[#allocation59_spill] sm:$0xff]  ;;  %v14352_v26 = vld [vmem:[#allocation60_spill] sm:$0xff] }
 0x2b9   :  { %v3578_v44 = vmul.f32 %v5893_v35, %v14351_v7  ;;  %v3601_v8 = vmul.f32 %v5901_v15, %v14352_v26  ;;  %v5972_v34 = vld [vmem:[%s13649_s10 + $0x84] sm:$0x7f]  ;;  %v14354_v35 = vld [vmem:[#allocation69_spill] sm:$0xff]  ;;  %v14356_v7 = vld [vmem:[#allocation98_spill] sm:$0xff] }
 0x2ba   :  { %v5980_v2 = vld [vmem:[%s13649_s10 + $0x85] sm:$0x7f]  ;;  %v3785_v15 = vmul.f32 %v5964_v9, %v14354_v35  ;;  %v14355_v26 = vld [vmem:[#allocation17_spill] sm:$0xff] }
 0x2bb   :  { %v5838_v27 = vld [vmem:[%s13649_s10 + $0x87] sm:$0x7f]  ;;  %v11016_v36 = vmul.f32 %v14356_v7, %v14355_v26  ;;  %v3585_v33 = vadd.f32 %v3578_v44, %v3539_v21  ;;  %v3608_v63 = vadd.f32 %v3601_v8, %v3562_v1  ;;  %v14361_v1 = vld [vmem:[#allocation37_spill] sm:$0xff] }
 0x2bc   :  { %v5846_v52 = vld [vmem:[%s13649_s10 + $0x88] sm:$0x7f]  ;;  %v3792_v17 = vadd.f32 %v3785_v15, %v10845_v55  ;;  %v14359_v9 = vld [vmem:[#allocation71_spill] sm:$0xff]  ;;  %v14362_v7 = vld [vmem:[#allocation61_spill] sm:$0xff]  ;;  %v3401_v15 = vadd.f32 %v3394_v37, %v3355_v31 }
 0x2bd   :  { %v5909_v62 = vld [vmem:[%s13649_s10 + $0x86] sm:$0x7f]  ;;  %v3831_v35 = vmul.f32 %v5980_v2, %v14359_v9  ;;  %v3440_v55 = vmul.f32 %v5846_v52, %v14361_v1 }
 0x2be   :  { %v14353_v14 = vld [vmem:[#allocation68_spill] sm:$0xff]  ;;  %v14360_v21 = vld [vmem:[#allocation55_spill] sm:$0xff]  ;;  %v3624_v44 = vmul.f32 %v5909_v62, %v14362_v7 }
 0x2bf   :  { %v3762_v41 = vmul.f32 %v5956_v61, %v14353_v14  ;;  %v5917_v53 = vld [vmem:[%s13649_s10 + $0x87] sm:$0x7f]  ;;  %v14358_v61 = vld [vmem:[#allocation70_spill] sm:$0xff] }
 0x2c0   :  { %v3808_v14 = vmul.f32 %v5972_v34, %v14358_v61  ;;  %v5988_v6 = vld [vmem:[%s13649_s10 + $0x86] sm:$0x7f]  ;;  %v3647_v9 = vmul.f32 %v5917_v53, %v14364_v28  ;;  %v3631_v28 = vadd.f32 %v3624_v44, %v3585_v33  ;;  %v14371_v44 = vld [vmem:[#allocation65_spill] sm:$0xff] }
 0x2c1   :  { %v3769_v29 = vadd.f32 %v3762_v41, %v10830_v22  ;;  %v6035_v49 = vld [vmem:[%s13649_s10 + $0x82] sm:$0x7f]  ;;  %v3417_v22 = vmul.f32 %v5838_v27, %v14360_v21  ;;  %v5854_v34 = vld [vmem:[%s13649_s10 + $0x89] sm:$0x7f]  ;;  %v3838_v21 = vadd.f32 %v3831_v35, %v3792_v17  ;;  %v14369_v17 = vld [vmem:[#allocation73_spill] sm:$0xff] }
 0x2c2   :  { %v6043_v56 = vld [vmem:[%s13649_s10 + $0x83] sm:$0x7f]  ;;  %v3992_v5 = vmul.f32 %v6035_v49, %v14366_v46 }
 0x2c3   :  { %v5996_v8 = vld [vmem:[%s13649_s10 + $0x87] sm:$0x7f]  ;;  %v3815_v52 = vadd.f32 %v3808_v14, %v3769_v29  ;;  %v3424_v1 = vadd.f32 %v3417_v22, %v3378_v18  ;;  %v3654_v29 = vadd.f32 %v3647_v9, %v3608_v63 }
 0x2c4   :  { %v14363_v2 = vld [vmem:[#allocation79_spill] sm:$0xff]  ;;  %v5925_v27 = vld [vmem:[%s13649_s10 + $0x88] sm:$0x7f]  ;;  %v3877_v14 = vmul.f32 %v5996_v8, %v14369_v17  ;;  %v3999_v33 = vadd.f32 %v3992_v5, %v10862_v40  ;;  %v14372_v17 = vld [vmem:[#allocation82_spill] sm:$0xff] }
 0x2c5   :  { %v11045_v41 = vadd.f32 %v14363_v2, %v2401_v42  ;;  %v5933_v62 = vld [vmem:[%s13649_s10 + $0x89] sm:$0x7f]  ;;  %v14367_v42 = vld [vmem:[#allocation63_spill] sm:$0xff] }
 0x2c6   :  { %v14365_v7 = vld [vmem:[#allocation72_spill] sm:$0xff]  ;;  %v4015_v2 = vmul.f32 %v6043_v56, %v14367_v42  ;;  %v14368_v37 = vld [vmem:[#allocation39_spill] sm:$0xff]  ;;  %v3693_v8 = vmul.f32 %v5933_v62, %v14371_v44 }
 0x2c7   :  { %v3854_v61 = vmul.f32 %v5988_v6, %v14365_v7  ;;  %v6051_v53 = vld [vmem:[%s13649_s10 + $0x84] sm:$0x7f]  ;;  %v3463_v31 = vmul.f32 %v5854_v34, %v14368_v37  ;;  %v11077_v34 = vadd.f32 %v3440_v55, %v3401_v15  ;;  %v3884_v37 = vadd.f32 %v3877_v14, %v3838_v21 }
 0x2c8   :  { %v6004_v35 = vld [vmem:[%s13649_s10 + $0x88] sm:$0x7f]  ;;  %v4022_v63 = vadd.f32 %v4015_v2, %v10865_v3  ;;  %v4038_v7 = vmul.f32 %v6051_v53, %v14372_v17  ;;  %v14373_v3 = vld [vmem:[#allocation74_spill] sm:$0xff]  ;;  %v14375_v15 = vld [vmem:[#allocation83_spill] sm:$0xff] }
 0x2c9   :  { %v6012_v18 = vld [vmem:[%s13649_s10 + $0x89] sm:$0x7f]  ;;  %v3861_v22 = vadd.f32 %v3854_v61, %v3815_v52  ;;  %v6114_v5 = vld [vmem:[%s13649_s10 + $0x82] sm:$0x7f]  ;;  %v11087_v40 = vadd.f32 %v3463_v31, %v3424_v1  ;;  %v3900_v61 = vmul.f32 %v6004_v35, %v14373_v3  ;;  %v11103_v31 = vadd.f32 %v3693_v8, %v3654_v29  ;;  %v14377_v29 = vld [vmem:[#allocation85_spill] sm:$0xff] }
 0x2ca   :  { %v6059_v6 = vld [vmem:[%s13649_s10 + $0x85] sm:$0x7f]  ;;  %v4045_v14 = vadd.f32 %v4038_v7, %v3999_v33  ;;  %v14378_v7 = vld [vmem:[#allocation90_spill] sm:$0xff] }
 0x2cb   :  { %v14370_v49 = vld [vmem:[#allocation64_spill] sm:$0xff]  ;;  %v14374_v52 = vld [vmem:[#allocation75_spill] sm:$0xff]  ;;  %v4061_v2 = vmul.f32 %v6059_v6, %v14375_v15  ;;  %v11115_v44 = vadd.f32 %v3900_v61, %v3861_v22  ;;  %v4222_v33 = vmul.f32 %v6114_v5, %v14378_v7 }
 0x2cc   :  { %v3670_v56 = vmul.f32 %v5925_v27, %v14370_v49  ;;  %v6067_v9 = vld [vmem:[%s13649_s10 + $0x86] sm:$0x7f]  ;;  %v3923_v55 = vmul.f32 %v6012_v18, %v14374_v52 }
 0x2cd   :  { %v6075_v27 = vld [vmem:[%s13649_s10 + $0x87] sm:$0x7f]  ;;  %v4229_v22 = vadd.f32 %v4222_v33, %v10868_v54 }
 0x2ce   :  { %v6083_v21 = vld [vmem:[%s13649_s10 + $0x88] sm:$0x7f]  ;;  %v11101_v1 = vadd.f32 %v3670_v56, %v3631_v28  ;;  %v4068_v28 = vadd.f32 %v4061_v2, %v4022_v63  ;;  %v4107_v56 = vmul.f32 %v6075_v27, %v14377_v29  ;;  %v11122_v8 = vadd.f32 %v3923_v55, %v3884_v37  ;;  %v14380_v15 = vld [vmem:[#allocation87_spill] sm:$0xff]  ;;  %v14383_v2 = vld [vmem:[#allocation93_spill] sm:$0xff] }
 0x2cf   :  { %v6091_v62 = vld [vmem:[%s13649_s10 + $0x89] sm:$0x7f]  ;;  %v14381_v42 = vld [vmem:[#allocation91_spill] sm:$0xff]  ;;  %v14384_v29 = vld [vmem:[#allocation94_spill] sm:$0xff] }
 0x2d0   :  { %v6122_v53 = vld [vmem:[%s13649_s10 + $0x83] sm:$0x7f]  ;;  %v4153_v17 = vmul.f32 %v6091_v62, %v14380_v15 }
 0x2d1   :  { %v14376_v35 = vld [vmem:[#allocation84_spill] sm:$0xff]  ;;  %v4245_v46 = vmul.f32 %v6122_v53, %v14381_v42 }
 0x2d2   :  { %v4084_v18 = vmul.f32 %v6067_v9, %v14376_v35  ;;  %v6130_v6 = vld [vmem:[%s13649_s10 + $0x84] sm:$0x7f]  ;;  %v14379_v35 = vld [vmem:[#allocation86_spill] sm:$0xff] }
 0x2d3   :  { %v6138_v52 = vld [vmem:[%s13649_s10 + $0x85] sm:$0x7f]  ;;  %v4130_v49 = vmul.f32 %v6083_v21, %v14379_v35  ;;  %v4252_v33 = vadd.f32 %v4245_v46, %v10872_v30  ;;  %v882_v30 = vadd.f32 %v10969_v50, %v10988_v13  ;;  %v14394_v50 = vld [vmem:[#allocation18_spill] sm:$0xff] }
 0x2d4   :  { %v6146_v3 = vld [vmem:[%s13649_s10 + $0x86] sm:$0x7f]  ;;  %v4291_v27 = vmul.f32 %v6138_v52, %v14383_v2  ;;  %v4091_v55 = vadd.f32 %v4084_v18, %v4045_v14  ;;  %v5536_v14 = vsel %vm1378_vm9, 1.0, %v10917_v11  ;;  %v2352_v18 = vadd.f32 %v10909_v10, %v10974_v16  ;;  %v14395_v13 = vld [vmem:[#allocation26_spill] sm:$0xff] }
 0x2d5   :  { %v6154_v9 = vld [vmem:[%s13649_s10 + $0x87] sm:$0x7f]  ;;  %v4314_v5 = vmul.f32 %v6146_v3, %v14384_v29  ;;  %v14388_v29 = vld [vmem:[#allocation78_spill] sm:$0xff]  ;;  %1444 = vst [vmem:[#allocation2 + $0x141] sm:$0xff] %v5536_v14 }
 0x2d6   :  { %v14382_v61 = vld [vmem:[#allocation92_spill] sm:$0xff]  ;;  %v14385_v21 = vld [vmem:[#allocation95_spill] sm:$0xff] }
 0x2d7   :  { %v4268_v63 = vmul.f32 %v6130_v6, %v14382_v61  ;;  %v6162_v7 = vld [vmem:[%s13649_s10 + $0x88] sm:$0x7f]  ;;  %v4337_v62 = vmul.f32 %v6154_v9, %v14385_v21  ;;  %v4114_v6 = vadd.f32 %v4107_v56, %v4068_v28  ;;  %v14387_v9 = vld [vmem:[#allocation77_spill] sm:$0xff]  ;;  %v14389_v61 = vld [vmem:[#allocation99_spill] sm:$0xff] }
 0x2d8   :  { %v6170_v37 = vld [vmem:[%s13649_s10 + $0x89] sm:$0x7f]  ;;  %v6193_v54 = vld [vmem:[%s13649_s10 + $0x82] sm:$0x7f]  ;;  %v4360_v21 = vmul.f32 %v6162_v7, %v14387_v9  ;;  %v14390_v28 = vld [vmem:[#allocation34_spill] sm:$0xff]  ;;  %v2402_v7 = vadd.f32 %v10939_v25, %v2352_v18 }
 0x2d9   :  { %v6201_v52 = vld [vmem:[%s13649_s10 + $0x83] sm:$0x7f]  ;;  %v11153_v2 = vmul.f32 %v6170_v37, %v14388_v29  ;;  %v4275_v46 = vadd.f32 %v4268_v63, %v4229_v22  ;;  %v11162_v56 = vmul.f32 %v6193_v54, %v14390_v28  ;;  %v1017_v22 = vmul.f32 %v14395_v13, %v14394_v50 }
 0x2da   :  { %v14386_v3 = vld [vmem:[#allocation96_spill] sm:$0xff]  ;;  %v14392_v16 = vld [vmem:[#allocation43_spill] sm:$0xff]  ;;  %v11185_v54 = vadd.f32 %v4153_v17, %v4114_v6  ;;  %v5505_v17 = vld [vmem:[%s13646_s7 + $0xd0] sm:$0xff] }
 0x2db   :  { %v2502_v53 = vadd.f32 %v14386_v3, %v11045_v41  ;;  %v6209_v24 = vld [vmem:[%s13649_s10 + $0x84] sm:$0x7f]  ;;  %14391 = vst [vmem:[#allocation49_spill] sm:$0xff] %v11162_v56  ;;  %v11165_v10 = vmul.f32 %v6201_v52, %v14392_v16  ;;  %v11171_v3 = vadd.f32 %v4130_v49, %v4091_v55  ;;  %v4298_v49 = vadd.f32 %v4291_v27, %v4252_v33 }
 0x2dc   :  { %v5354_v37 = vld [vmem:[%s13645_s6 + $0x140] sm:$0xff]  ;;  %v11180_v63 = vld [vmem:[%s13645_s6 + $0x168] sm:$0xff]  ;;  %v4321_v6 = vadd.f32 %v4314_v5, %v4275_v46  ;;  %vm1267_vm11 = vcmp.gt.f32.partialorder %v5505_v17, 2.0 }
 0x2dd   :  { %v2552_v41 = vadd.f32 %v14389_v61, %v2502_v53  ;;  %14393 = vst [vmem:[#allocation50_spill] sm:$0xff] %v11165_v10  ;;  %v932_v53 = vadd.f32 %v10991_v59, %v882_v30  ;;  %14396 = vst [vmem:[#allocation38_spill] sm:$0xff] %v11180_v63  ;;  %v5370_v25 = vld [vmem:[%s13645_s6 + $0x141] sm:$0xff]  ;;  %v817_v27 = vmul.f32 %v5354_v37, %v14281_v20  ;;  %v5506_v37 = vld [vmem:[%s13646_s7 + $0xd8] sm:$0xff] }
 0x2de   :  { %v14397_v55 = vld [vmem:[#allocation24_spill] sm:$0xff]  ;;  %v14400_v30 = vld [vmem:[#allocation31_spill] sm:$0xff]  ;;  %vm1268_vm12 = vcmp.gt.f32.partialorder %v5506_v37, 2.0 }
 0x2df   :  { %v2649_v61 = vadd.f32 %v10888_v4, %v2552_v41  ;;  %v11188_v52 = vmul.f32 %v6209_v24, %v14397_v55  ;;  %v2453_v4 = vadd.f32 %v10943_v39, %v2402_v7  ;;  %v5387_v59 = vld [vmem:[%s13645_s6 + $0x142] sm:$0xff]  ;;  %v983_v18 = vadd.f32 %v11016_v36, %v932_v53  ;;  %v14425_v55 = vld [vmem:[#allocation57_spill] sm:$0xff] }
 0x2e0   :  { %v14399_v41 = vld [vmem:[#allocation19_spill] sm:$0xff]  ;;  %v14401_v33 = vld [vmem:[#allocation20_spill] sm:$0xff]  ;;  %v867_v36 = vmul.f32 %v5370_v25, %v14344_v47  ;;  %v833_v5 = vadd.f32 %v817_v27, %v14349_v23  ;;  %v917_v46 = vmul.f32 %v5387_v59, %v14350_v0  ;;  %v2666_v53 = vmul.f32 6.0, %v10921_v32  ;;  %v14426_v47 = vld [vmem:[#allocation66_spill] sm:$0xff] }
 0x2e1   :  { %14398 = vst [vmem:[#allocation51_spill] sm:$0xff] %v11188_v52  ;;  %v2681_v14 = vsub.f32 %v2649_v61, %v10890_v12  ;;  %v1067_v13 = vmul.f32 %v14400_v30, %v14399_v41  ;;  %v2503_v39 = vadd.f32 %v10947_v43, %v2453_v4  ;;  %v1118_v24 = vmul.f32 %v11180_v63, %v14401_v33  ;;  %v11208_v12 = vld [vmem:[%s13645_s6 + $0x169] sm:$0xff]  ;;  %v14406_v52 = vld [vmem:[#allocation22_spill] sm:$0xff] }
 0x2e2   :  { %14402 = vst [vmem:[#allocation27_spill] sm:$0xff] %v11208_v12  ;;  %v1033_v7 = vadd.f32 %v1017_v22, %v983_v18  ;;  %v11217_v43 = vld [vmem:[%s13645_s6 + $0x16a] sm:$0xff]  ;;  %v883_v30 = vadd.f32 %v867_v36, %v833_v5  ;;  %v4344_v27 = vadd.f32 %v4337_v62, %v4298_v49  ;;  %v5521_v63 = vsel %vm1267_vm11, 1.0, %v10917_v11 }
 0x2e3   :  { %5657 = vst [vmem:[%s13652_s13 + $0x90] sm:$0xff] %v2681_v14  ;;  %vm2697_vm10 = vcmp.gt.f32.partialorder %v2681_v14, 6.0  ;;  %14403 = vst [vmem:[#allocation52_spill] sm:$0xff] %v11217_v43  ;;  %v2553_v61 = vadd.f32 %v10966_v48, %v2503_v39  ;;  %v2119_v22 = vld [vmem:[#allocation2 + $0xf0] sm:$0xff]  ;;  %v6217_v4 = vld [vmem:[%s13649_s10 + $0x85] sm:$0x7f]  ;;  %v1218_v10 = vmul.f32 %v11217_v43, %v14406_v52 }
 0x2e4   :  { %v5641_v25 = vsel %vm2697_vm10, 1.0, %v10917_v11  ;;  %v1083_v59 = vadd.f32 %v1067_v13, %v1033_v7  ;;  %v14404_v14 = vld [vmem:[#allocation21_spill] sm:$0xff]  ;;  %v933_v0 = vadd.f32 %v917_v46, %v883_v30  ;;  %v11242_v7 = vadd.f32 %v4360_v21, %v4321_v6  ;;  %v11276_v30 = vld [vmem:[#allocation2 + $0x120] sm:$0xff]  ;;  %v14424_v23 = vld [vmem:[#allocation56_spill] sm:$0xff] }
 0x2e5   :  { %5673 = vst [vmem:[%s13649_s10 + $0x90] sm:$0xff] %v5641_v25  ;;  %v1168_v18 = vmul.f32 %v11208_v12, %v14404_v14  ;;  %v14405_v48 = vld [vmem:[#allocation29_spill] sm:$0xff]  ;;  %v2650_v39 = vadd.f32 %v10911_v51, %v2553_v61  ;;  %v14407_v25 = vld [vmem:[#allocation100_spill] sm:$0xff]  ;;  %v14410_v61 = vld [vmem:[#allocation30_spill] sm:$0xff]  ;;  %v5522_v6 = vsel %vm1268_vm12, 1.0, %v10917_v11 }
 0x2e6   :  { %v968_v32 = vmul.f32 %v14405_v48, %v14355_v26  ;;  %v1134_v56 = vadd.f32 %v1118_v24, %v1083_v59  ;;  %v2137_v13 = vmul.f32 %v14407_v25, %v2119_v22  ;;  %v14408_v12 = vld [vmem:[#allocation25_spill] sm:$0xff]  ;;  %v1315_v48 = vmul.f32 0.8, %v5505_v17  ;;  %14415 = vst [vmem:[#allocation37_spill] sm:$0xff] %v11276_v30 }
 0x2e7   :  { %v11245_v36 = vmul.f32 %v6217_v4, %v14408_v12  ;;  %v2682_v5 = vsub.f32 %v2650_v39, %v2666_v53  ;;  %v2169_v62 = vld [vmem:[#allocation2 + $0xf1] sm:$0xff]  ;;  %v1018_v43 = vmul.f32 %v14410_v61, %v14394_v50  ;;  %v11261_v17 = vadd.f32 %v11153_v2, %v4344_v27 }
 0x2e8   :  { %v1184_v49 = vadd.f32 %v1168_v18, %v1134_v56  ;;  %v984_v51 = vadd.f32 %v968_v32, %v933_v0  ;;  %v11252_v24 = vld [vmem:[%s13645_s6 + $0x170] sm:$0xff]  ;;  %v1347_v0 = vmul.f32 2.0, %v5521_v63  ;;  %v14413_v56 = vld [vmem:[#allocation32_spill] sm:$0xff]  ;;  %v2153_v2 = vadd.f32 %v2137_v13, %v14220_v45  ;;  %v2120_v32 = vld [vmem:[#allocation2 + $0xf8] sm:$0xff] }
 0x2e9   :  { %14409 = vst [vmem:[#allocation53_spill] sm:$0xff] %v11245_v36  ;;  %14411 = vst [vmem:[#allocation98_spill] sm:$0xff] %v11252_v24  ;;  %v11257_v21 = vld [vmem:[%s13645_s6 + $0x171] sm:$0xff]  ;;  %vm2698_vm13 = vcmp.gt.f32.partialorder %v2682_v5, 6.0  ;;  %v1068_v46 = vmul.f32 %v14413_v56, %v14399_v41  ;;  %v2187_v18 = vmul.f32 %v10226_v57, %v2169_v62  ;;  %v1119_v63 = vmul.f32 %v11252_v24, %v14401_v33  ;;  %v11291_v13 = vld [vmem:[#allocation2 + $0x121] sm:$0xff] }
 0x2ea   :  { %14412 = vst [vmem:[#allocation54_spill] sm:$0xff] %v11257_v21  ;;  %5658 = vst [vmem:[%s13652_s13 + $0x98] sm:$0xff] %v2682_v5  ;;  %v11271_v53 = vld [vmem:[%s13645_s6 + $0x172] sm:$0xff]  ;;  %v5642_v4 = vsel %vm2698_vm13, 1.0, %v10917_v11  ;;  %v1234_v59 = vadd.f32 %v1218_v10, %v1184_v49  ;;  %v11285_v27 = vmul.f32 %v11257_v21, %v14404_v14  ;;  %v11287_v39 = vmul.f32 0.8, %v5506_v37 }
 0x2eb   :  { %14414 = vst [vmem:[#allocation55_spill] sm:$0xff] %v11271_v53  ;;  %v2219_v22 = vld [vmem:[#allocation2 + $0xf2] sm:$0xff]  ;;  %5674 = vst [vmem:[%s13649_s10 + $0x98] sm:$0xff] %v5642_v4  ;;  %v11289_v10 = vmul.f32 2.0, %v5522_v6  ;;  %v11293_v5 = vld [vmem:[#allocation2 + $0x122] sm:$0xff]  ;;  %v1034_v6 = vadd.f32 %v1018_v43, %v984_v51  ;;  %v11306_v4 = vmul.f32 %v11271_v53, %v14406_v52  ;;  %v2203_v41 = vadd.f32 %v2187_v18, %v2153_v2 }
 0x2ec   :  { %14416 = vst [vmem:[#allocation79_spill] sm:$0xff] %v11291_v13  ;;  %14417 = vst [vmem:[#allocation39_spill] sm:$0xff] %v11293_v5  ;;  %v2170_v62 = vld [vmem:[#allocation2 + $0xf9] sm:$0xff]  ;;  %v5862_v49 = vld [vmem:[%s13649_s10 + $0x90] sm:$0x7f]  ;;  %v1331_v56 = vadd.f32 %v1315_v48, %v1234_v59  ;;  %v2237_v36 = vmul.f32 %v10247_v38, %v2219_v22 }
 0x2ed   :  { %v5870_v61 = vld [vmem:[%s13649_s10 + $0x91] sm:$0x7f]  ;;  %v14419_v43 = vld [vmem:[#allocation35_spill] sm:$0xff]  ;;  %v14420_v51 = vld [vmem:[#allocation28_spill] sm:$0xff]  ;;  %v3487_v12 = vmul.f32 %v5862_v49, %v14424_v23  ;;  %v1084_v49 = vadd.f32 %v1068_v46, %v1034_v6 }
 0x2ee   :  { %v5941_v37 = vld [vmem:[%s13649_s10 + $0x90] sm:$0x7f]  ;;  %v11321_v48 = vmul.f32 %v14419_v43, %v10277_v19  ;;  %v11325_v59 = vmul.f32 %v14420_v51, %v10282_v58  ;;  %v14423_v43 = vld [vmem:[#allocation47_spill] sm:$0xff]  ;;  %v2138_v51 = vmul.f32 %v14407_v25, %v2120_v32  ;;  %v14428_v32 = vld [vmem:[#allocation76_spill] sm:$0xff] }
 0x2ef   :  { %v5949_v21 = vld [vmem:[%s13649_s10 + $0x91] sm:$0x7f]  ;;  %v11340_v26 = vmul.f32 %v14423_v43, %v11293_v5  ;;  %v3717_v20 = vmul.f32 %v5941_v37, %v14426_v47  ;;  %v14427_v5 = vld [vmem:[#allocation67_spill] sm:$0xff] }
 0x2f0   :  { %v6020_v14 = vld [vmem:[%s13649_s10 + $0x90] sm:$0x7f]  ;;  %v3740_v43 = vmul.f32 %v5949_v21, %v14427_v5  ;;  %v14430_v5 = vld [vmem:[#allocation88_spill] sm:$0xff] }
 0x2f1   :  { %v14418_v24 = vld [vmem:[#allocation33_spill] sm:$0xff]  ;;  %v3947_v25 = vmul.f32 %v6020_v14, %v14428_v32  ;;  %v3724_v47 = vadd.f32 %v3717_v20, %v11101_v1 }
 0x2f2   :  { %v11317_v33 = vmul.f32 %v14418_v24, %v10267_v60  ;;  %v14421_v22 = vld [vmem:[#allocation97_spill] sm:$0xff]  ;;  %v14422_v24 = vld [vmem:[#allocation44_spill] sm:$0xff]  ;;  %v3747_v14 = vadd.f32 %v3740_v43, %v11103_v31  ;;  %v14433_v31 = vld [vmem:[#allocation58_spill] sm:$0xff] }
 0x2f3   :  { %v11329_v53 = vmul.f32 %v14421_v22, %v11276_v30  ;;  %v6028_v52 = vld [vmem:[%s13649_s10 + $0x91] sm:$0x7f]  ;;  %v11336_v50 = vmul.f32 %v14422_v24, %v11291_v13  ;;  %v3510_v30 = vmul.f32 %v5870_v61, %v14425_v55  ;;  %v11353_v13 = vmul.f32 %v10226_v57, %v2170_v62  ;;  %v14429_v24 = vld [vmem:[#allocation80_spill] sm:$0xff] }
 0x2f4   :  { %v6099_v2 = vld [vmem:[%s13649_s10 + $0x90] sm:$0x7f]  ;;  %v11360_v55 = vsub.f32 %v1331_v56, %v1347_v0  ;;  %v3494_v61 = vadd.f32 %v3487_v12, %v11077_v34  ;;  %v3970_v62 = vmul.f32 %v6028_v52, %v14429_v24  ;;  %v3954_v32 = vadd.f32 %v3947_v25, %v11115_v44  ;;  %v14434_v12 = vld [vmem:[#allocation40_spill] sm:$0xff]  ;;  %v6013_v24 = vld [vmem:[%s13649_s10 + $0x99] sm:$0x7f] }
 0x2f5   :  { %v6107_v18 = vld [vmem:[%s13649_s10 + $0x91] sm:$0x7f]  ;;  %v3517_v37 = vadd.f32 %v3510_v30, %v11087_v40  ;;  %v4177_v0 = vmul.f32 %v6099_v2, %v14430_v5 }
 0x2f6   :  { %v6178_v23 = vld [vmem:[%s13649_s10 + $0x90] sm:$0x7f]  ;;  %5553 = vst [vmem:[%s13651_s12 + $0xd0] sm:$0xff] %v11360_v55  ;;  %v3977_v40 = vadd.f32 %v3970_v62, %v11122_v8  ;;  %v14435_v8 = vld [vmem:[#allocation42_spill] sm:$0xff]  ;;  %v1135_v62 = vadd.f32 %v1119_v63, %v1084_v49  ;;  %v14438_v49 = vld [vmem:[#allocation60_spill] sm:$0xff]  ;;  %vm1379_vm15 = vcmp.gt.f32.partialorder %v11360_v55, 2.0 }
 0x2f7   :  { %v6186_v21 = vld [vmem:[%s13649_s10 + $0x91] sm:$0x7f]  ;;  %v11394_v43 = vadd.f32 %v4177_v0, %v11171_v3  ;;  %v2253_v0 = vadd.f32 %v2237_v36, %v2203_v41  ;;  %v14442_v36 = vld [vmem:[#allocation70_spill] sm:$0xff] }
 0x2f8   :  { %v14431_v56 = vld [vmem:[#allocation89_spill] sm:$0xff] }
 0x2f9   :  { %v4200_v46 = vmul.f32 %v6107_v18, %v14431_v56  ;;  %v5878_v34 = vld [vmem:[%s13649_s10 + $0x92] sm:$0x7f]  ;;  %v4430_v18 = vmul.f32 %v6186_v21, %v14435_v8 }
 0x2fa   :  { %v5886_v20 = vld [vmem:[%s13649_s10 + $0x93] sm:$0x7f]  ;;  %v3533_v52 = vmul.f32 %v5878_v34, %v14433_v31 }
 0x2fb   :  { %v14432_v44 = vld [vmem:[#allocation41_spill] sm:$0xff]  ;;  %v3556_v25 = vmul.f32 %v5886_v20, %v14434_v12  ;;  %v11397_v2 = vadd.f32 %v4200_v46, %v11185_v54  ;;  %v14437_v46 = vld [vmem:[#allocation59_spill] sm:$0xff]  ;;  %v5926_v8 = vld [vmem:[%s13649_s10 + $0x98] sm:$0x7f] }
 0x2fc   :  { %v4407_v1 = vmul.f32 %v6178_v23, %v14432_v44  ;;  %v5894_v30 = vld [vmem:[%s13649_s10 + $0x94] sm:$0x7f]  ;;  %v3540_v20 = vadd.f32 %v3533_v52, %v3494_v61 }
 0x2fd   :  { %v5902_v6 = vld [vmem:[%s13649_s10 + $0x95] sm:$0x7f]  ;;  %v3563_v31 = vadd.f32 %v3556_v25, %v3517_v37  ;;  %v3579_v63 = vmul.f32 %v5894_v30, %v14437_v46  ;;  %v14439_v37 = vld [vmem:[#allocation68_spill] sm:$0xff]  ;;  %v14443_v46 = vld [vmem:[#allocation71_spill] sm:$0xff] }
 0x2fe   :  { %v5957_v23 = vld [vmem:[%s13649_s10 + $0x92] sm:$0x7f]  ;;  %v11404_v34 = vadd.f32 %v4407_v1, %v11242_v7  ;;  %v3602_v7 = vmul.f32 %v5902_v6, %v14438_v49  ;;  %v2220_v25 = vld [vmem:[#allocation2 + $0xfa] sm:$0xff] }
 0x2ff   :  { %v5965_v3 = vld [vmem:[%s13649_s10 + $0x93] sm:$0x7f]  ;;  %v3763_v1 = vmul.f32 %v5957_v23, %v14439_v37 }
 0x300   :  { %14436 = vst [vmem:[#allocation96_spill] sm:$0xff] %v11404_v34  ;;  %v5973_v54 = vld [vmem:[%s13649_s10 + $0x94] sm:$0x7f]  ;;  %v11423_v34 = vadd.f32 %v4430_v18, %v11261_v17  ;;  %v3586_v17 = vadd.f32 %v3579_v63, %v3540_v20  ;;  %v3609_v18 = vadd.f32 %v3602_v7, %v3563_v31  ;;  %v1185_v63 = vadd.f32 %v11285_v27, %v1135_v62 }
 0x301   :  { %v5981_v21 = vld [vmem:[%s13649_s10 + $0x95] sm:$0x7f]  ;;  %v3809_v30 = vmul.f32 %v5973_v54, %v14442_v36  ;;  %v11455_v7 = vmul.f32 %v10247_v38, %v2220_v25 }
 0x302   :  { %v5910_v61 = vld [vmem:[%s13649_s10 + $0x96] sm:$0x7f]  ;;  %14441 = vst [vmem:[#allocation99_spill] sm:$0xff] %v11423_v34  ;;  %v3832_v6 = vmul.f32 %v5981_v21, %v14443_v46  ;;  %v3770_v34 = vadd.f32 %v3763_v1, %v3724_v47  ;;  %v14445_v47 = vld [vmem:[#allocation63_spill] sm:$0xff] }
 0x303   :  { %v14440_v52 = vld [vmem:[#allocation69_spill] sm:$0xff]  ;;  %v14447_v36 = vld [vmem:[#allocation62_spill] sm:$0xff] }
 0x304   :  { %v3786_v12 = vmul.f32 %v5965_v3, %v14440_v52  ;;  %v5918_v41 = vld [vmem:[%s13649_s10 + $0x97] sm:$0x7f]  ;;  %v11437_v3 = vadd.f32 %v2138_v51, %v14220_v45  ;;  %v3816_v44 = vadd.f32 %v3809_v30, %v3770_v34 }
 0x305   :  { %v6036_v49 = vld [vmem:[%s13649_s10 + $0x92] sm:$0x7f]  ;;  %v3648_v37 = vmul.f32 %v5918_v41, %v14447_v36  ;;  %v5934_v27 = vld [vmem:[%s13649_s10 + $0x99] sm:$0x7f] }
 0x306   :  { %v6044_v23 = vld [vmem:[%s13649_s10 + $0x93] sm:$0x7f]  ;;  %v3793_v52 = vadd.f32 %v3786_v12, %v3747_v14 }
 0x307   :  { %v6052_v54 = vld [vmem:[%s13649_s10 + $0x94] sm:$0x7f]  ;;  %v4016_v14 = vmul.f32 %v6044_v23, %v14445_v47  ;;  %v14449_v23 = vld [vmem:[#allocation83_spill] sm:$0xff] }
 0x308   :  { %v6060_v21 = vld [vmem:[%s13649_s10 + $0x95] sm:$0x7f]  ;;  %v3839_v56 = vadd.f32 %v3832_v6, %v3793_v52  ;;  %v3655_v6 = vadd.f32 %v3648_v37, %v3609_v18  ;;  %v2303_v18 = vadd.f32 %v11317_v33, %v2253_v0  ;;  %v14457_v0 = vld [vmem:[#allocation84_spill] sm:$0xff] }
 0x309   :  { %v5989_v46 = vld [vmem:[%s13649_s10 + $0x96] sm:$0x7f]  ;;  %v4023_v25 = vadd.f32 %v4016_v14, %v3977_v40  ;;  %v4062_v34 = vmul.f32 %v6060_v21, %v14449_v23 }
 0x30a   :  { %v5997_v51 = vld [vmem:[%s13649_s10 + $0x97] sm:$0x7f] }
 0x30b   :  { %v14444_v20 = vld [vmem:[#allocation81_spill] sm:$0xff]  ;;  %v6005_v62 = vld [vmem:[%s13649_s10 + $0x98] sm:$0x7f]  ;;  %v4069_v37 = vadd.f32 %v4062_v34, %v4023_v25 }
 0x30c   :  { %v3993_v31 = vmul.f32 %v6036_v49, %v14444_v20  ;;  %v14446_v1 = vld [vmem:[#allocation61_spill] sm:$0xff]  ;;  %v11465_v49 = vld [vmem:[%s13647_s8 + $0xa0] sm:$0xff]  ;;  %v14448_v41 = vld [vmem:[#allocation82_spill] sm:$0xff] }
 0x30d   :  { %v3625_v12 = vmul.f32 %v5910_v61, %v14446_v1  ;;  %v4039_v36 = vmul.f32 %v6052_v54, %v14448_v41  ;;  %v6115_v52 = vld [vmem:[%s13649_s10 + $0x92] sm:$0x7f]  ;;  %v14450_v1 = vld [vmem:[#allocation72_spill] sm:$0xff]  ;;  %vm2587_vm14 = vcmp.gt.f32.partialorder %v11465_v49, 6.0 }
 0x30e   :  { %v4000_v61 = vadd.f32 %v3993_v31, %v3954_v32  ;;  %v3855_v47 = vmul.f32 %v5989_v46, %v14450_v1  ;;  %v14451_v20 = vld [vmem:[#allocation73_spill] sm:$0xff]  ;;  %v14452_v54 = vld [vmem:[#allocation64_spill] sm:$0xff]  ;;  %v6084_v23 = vld [vmem:[%s13649_s10 + $0x98] sm:$0x7f] }
 0x30f   :  { %v3632_v30 = vadd.f32 %v3625_v12, %v3586_v17  ;;  %v3878_v5 = vmul.f32 %v5997_v51, %v14451_v20  ;;  %v6068_v32 = vld [vmem:[%s13649_s10 + $0x96] sm:$0x7f]  ;;  %v3671_v21 = vmul.f32 %v5926_v8, %v14452_v54  ;;  %v14456_v54 = vld [vmem:[#allocation75_spill] sm:$0xff] }
 0x310   :  { %v6076_v40 = vld [vmem:[%s13649_s10 + $0x97] sm:$0x7f]  ;;  %v4046_v17 = vadd.f32 %v4039_v36, %v4000_v61  ;;  %v3862_v14 = vadd.f32 %v3855_v47, %v3816_v44  ;;  %v3924_v33 = vmul.f32 %v6013_v24, %v14456_v54  ;;  %v4131_v54 = vmul.f32 %v6084_v23, %v14379_v35 }
 0x311   :  { %v6123_v46 = vld [vmem:[%s13649_s10 + $0x93] sm:$0x7f]  ;;  %v3885_v12 = vadd.f32 %v3878_v5, %v3839_v56  ;;  %v11510_v47 = vadd.f32 %v3671_v21, %v3632_v30 }
 0x312   :  { %v14453_v51 = vld [vmem:[#allocation65_spill] sm:$0xff]  ;;  %v6092_v8 = vld [vmem:[%s13649_s10 + $0x99] sm:$0x7f] }
 0x313   :  { %v3694_v31 = vmul.f32 %v5934_v27, %v14453_v51  ;;  %v14454_v61 = vld [vmem:[#allocation90_spill] sm:$0xff]  ;;  %v4085_v27 = vmul.f32 %v6068_v32, %v14457_v0  ;;  %v14458_v44 = vld [vmem:[#allocation85_spill] sm:$0xff]  ;;  %v4154_v30 = vmul.f32 %v6092_v8, %v14380_v15  ;;  %v11529_v21 = vadd.f32 %v3924_v33, %v3885_v12 }
 0x314   :  { %v4223_v25 = vmul.f32 %v6115_v52, %v14454_v61  ;;  %v14455_v36 = vld [vmem:[#allocation74_spill] sm:$0xff]  ;;  %v4108_v5 = vmul.f32 %v6076_v40, %v14458_v44  ;;  %v4246_v61 = vmul.f32 %v6123_v46, %v14381_v42  ;;  %v2353_v33 = vadd.f32 %v11321_v48, %v2303_v18 }
 0x315   :  { %v3901_v34 = vmul.f32 %v6005_v62, %v14455_v36  ;;  %v6131_v56 = vld [vmem:[%s13649_s10 + $0x94] sm:$0x7f]  ;;  %v11512_v51 = vadd.f32 %v3694_v31, %v3655_v6  ;;  %v4092_v32 = vadd.f32 %v4085_v27, %v4046_v17  ;;  %v14459_v31 = vld [vmem:[#allocation92_spill] sm:$0xff] }
 0x316   :  { %v4230_v52 = vadd.f32 %v4223_v25, %v11394_v43  ;;  %v6139_v24 = vld [vmem:[%s13649_s10 + $0x95] sm:$0x7f]  ;;  %v4115_v40 = vadd.f32 %v4108_v5, %v4069_v37  ;;  %v4253_v46 = vadd.f32 %v4246_v61, %v11397_v2  ;;  %v4269_v25 = vmul.f32 %v6131_v56, %v14459_v31  ;;  %v14462_v2 = vld [vmem:[#allocation95_spill] sm:$0xff] }
 0x317   :  { %v6147_v62 = vld [vmem:[%s13649_s10 + $0x96] sm:$0x7f]  ;;  %v11527_v6 = vadd.f32 %v3901_v34, %v3862_v14  ;;  %v1235_v14 = vadd.f32 %v11306_v4, %v1185_v63  ;;  %v5537_v34 = vsel %vm1379_vm15, 1.0, %v10917_v11  ;;  %v11546_v27 = vadd.f32 %v4131_v54, %v4092_v32  ;;  %v14463_v32 = vld [vmem:[#allocation23_spill] sm:$0xff] }
 0x318   :  { %v6155_v43 = vld [vmem:[%s13649_s10 + $0x97] sm:$0x7f]  ;;  %v4276_v12 = vadd.f32 %v4269_v25, %v4230_v52  ;;  %v11548_v5 = vadd.f32 %v4154_v30, %v4115_v40  ;;  %1445 = vst [vmem:[#allocation2 + $0x151] sm:$0xff] %v5537_v34  ;;  %v2204_v63 = vadd.f32 %v11353_v13, %v11437_v3  ;;  %v2403_v54 = vadd.f32 %v11325_v59, %v2353_v33 }
 0x319   :  { %v14460_v36 = vld [vmem:[#allocation93_spill] sm:$0xff]  ;;  %v14461_v17 = vld [vmem:[#allocation94_spill] sm:$0xff]  ;;  %v4338_v61 = vmul.f32 %v6155_v43, %v14462_v2  ;;  %v1332_v4 = vadd.f32 %v11287_v39, %v1235_v14  ;;  %v2288_v40 = vmul.f32 %v14463_v32, %v10267_v60  ;;  %v14464_v39 = vld [vmem:[#allocation104_spill] sm:$0xff]  ;;  %v2635_v33 = vmul.f32 0.8, %v11465_v49 }
 0x31a   :  { %v4292_v44 = vmul.f32 %v6139_v24, %v14460_v36  ;;  %v4315_v37 = vmul.f32 %v6147_v62, %v14461_v17  ;;  %v6163_v23 = vld [vmem:[%s13649_s10 + $0x98] sm:$0x7f]  ;;  %v2254_v62 = vadd.f32 %v11455_v7, %v2204_v63  ;;  %v2338_v30 = vmul.f32 %v14464_v39, %v10277_v19  ;;  %v11570_v43 = vld [vmem:[#allocation2 + $0x128] sm:$0xff]  ;;  %v5355_v7 = vld [vmem:[%s13645_s6 + $0x150] sm:$0xff] }
 0x31b   :  { %v6171_v8 = vld [vmem:[%s13649_s10 + $0x99] sm:$0x7f]  ;;  %v6194_v56 = vld [vmem:[%s13649_s10 + $0x92] sm:$0x7f]  ;;  %v4361_v48 = vmul.f32 %v6163_v23, %v14387_v9  ;;  %v1364_v24 = vsub.f32 %v1332_v4, %v11289_v10  ;;  %v2454_v59 = vadd.f32 %v11329_v53, %v2403_v54  ;;  %v5612_v10 = vld [vmem:[%s13647_s8 + $0xa8] sm:$0xff] }
 0x31c   :  { %v6202_v55 = vld [vmem:[%s13649_s10 + $0x93] sm:$0x7f]  ;;  %v4299_v52 = vadd.f32 %v4292_v44, %v4253_v46  ;;  %v11561_v18 = vmul.f32 %v6171_v8, %v14388_v29  ;;  %v4322_v13 = vadd.f32 %v4315_v37, %v4276_v12  ;;  %v11573_v3 = vmul.f32 %v6194_v56, %v14390_v28  ;;  %v14467_v8 = vld [vmem:[#allocation108_spill] sm:$0xff] }
 0x31d   :  { %v11576_v44 = vmul.f32 %v6202_v55, %v14392_v16  ;;  %v5371_v46 = vld [vmem:[%s13645_s6 + $0x151] sm:$0xff]  ;;  %vm1380_vm0 = vcmp.gt.f32.partialorder %v1364_v24, 2.0  ;;  %5554 = vst [vmem:[%s13651_s12 + $0xd8] sm:$0xff] %v1364_v24  ;;  %v5627_v37 = vsel %vm2587_vm14, 1.0, %v10917_v11  ;;  %v2304_v23 = vadd.f32 %v2288_v40, %v2254_v62  ;;  %v11607_v55 = vld [vmem:[#allocation2 + $0x129] sm:$0xff]  ;;  %v14470_v62 = vld [vmem:[#allocation15_spill] sm:$0xff] }
 0x31e   :  { %14465 = vst [vmem:[#allocation26_spill] sm:$0xff] %v11573_v3  ;;  %v6210_v25 = vld [vmem:[%s13649_s10 + $0x94] sm:$0x7f]  ;;  %v2388_v14 = vmul.f32 %v14467_v8, %v10282_v58  ;;  %v5538_v12 = vsel %vm1380_vm0, 1.0, %v10917_v11  ;;  %v2504_v34 = vadd.f32 %v11336_v50, %v2454_v59  ;;  %v2439_v56 = vmul.f32 %v14421_v22, %v11570_v43  ;;  %14468 = vst [vmem:[#allocation29_spill] sm:$0xff] %v11607_v55  ;;  %v14471_v40 = vld [vmem:[#allocation24_spill] sm:$0xff] }
 0x31f   :  { %14466 = vst [vmem:[#allocation31_spill] sm:$0xff] %v11576_v44  ;;  %v6218_v53 = vld [vmem:[%s13649_s10 + $0x95] sm:$0x7f]  ;;  %1446 = vst [vmem:[#allocation2 + $0x159] sm:$0xff] %v5538_v12  ;;  %v2354_v63 = vadd.f32 %v2338_v30, %v2304_v23  ;;  %vm2588_vm1 = vcmp.gt.f32.partialorder %v5612_v10, 6.0  ;;  %v868_v32 = vmul.f32 %v5371_v46, %v14470_v62  ;;  %v11615_v50 = vmul.f32 %v6210_v25, %v14471_v40  ;;  %v11621_v44 = vld [vmem:[#allocation2 + $0x12a] sm:$0xff] }
 0x320   :  { %v5388_v4 = vld [vmem:[%s13645_s6 + $0x152] sm:$0xff]  ;;  %v2554_v59 = vadd.f32 %v11340_v26, %v2504_v34  ;;  %v2667_v8 = vmul.f32 6.0, %v5627_v37  ;;  %14475 = vst [vmem:[#allocation33_spill] sm:$0xff] %v11621_v44  ;;  %v14476_v12 = vld [vmem:[#allocation44_spill] sm:$0xff]  ;;  %v4345_v26 = vadd.f32 %v4338_v61, %v4299_v52  ;;  %v5389_v61 = vld [vmem:[%s13645_s6 + $0x15a] sm:$0xff] }
 0x321   :  { %v14469_v54 = vld [vmem:[#allocation14_spill] sm:$0xff]  ;;  %14472 = vst [vmem:[#allocation30_spill] sm:$0xff] %v11615_v50  ;;  %v14473_v49 = vld [vmem:[#allocation25_spill] sm:$0xff]  ;;  %v2404_v3 = vadd.f32 %v2388_v14, %v2354_v63  ;;  %v2489_v30 = vmul.f32 %v14476_v12, %v11607_v55  ;;  %v5628_v14 = vsel %vm2588_vm1, 1.0, %v10917_v11  ;;  %v14479_v63 = vld [vmem:[#allocation47_spill] sm:$0xff] }
 0x322   :  { %v818_v24 = vmul.f32 %v5355_v7, %v14469_v54  ;;  %v11618_v39 = vmul.f32 %v6218_v53, %v14473_v49  ;;  %v14477_v23 = vld [vmem:[#allocation13_spill] sm:$0xff]  ;;  %v14478_v7 = vld [vmem:[#allocation16_spill] sm:$0xff]  ;;  %v5356_v46 = vld [vmem:[%s13645_s6 + $0x158] sm:$0xff]  ;;  %v11633_v53 = vadd.f32 %v4361_v48, %v4322_v13  ;;  %v2651_v37 = vadd.f32 %v2635_v33, %v2554_v59 }
 0x323   :  { %v918_v28 = vmul.f32 %v5388_v4, %v14478_v7  ;;  %v5372_v25 = vld [vmem:[%s13645_s6 + $0x159] sm:$0xff]  ;;  %v2455_v34 = vadd.f32 %v2439_v56, %v2404_v3  ;;  %v2636_v48 = vmul.f32 0.8, %v5612_v10  ;;  %v819_v13 = vmul.f32 %v5356_v46, %v14469_v54  ;;  %v14493_v54 = vld [vmem:[#allocation100_spill] sm:$0xff] }
 0x324   :  { %14474 = vst [vmem:[#allocation32_spill] sm:$0xff] %v11618_v39  ;;  %v834_v16 = vadd.f32 %v818_v24, %v14477_v23  ;;  %v2539_v24 = vmul.f32 %v14479_v63, %v11621_v44  ;;  %v14480_v39 = vld [vmem:[#allocation17_spill] sm:$0xff]  ;;  %v14481_v50 = vld [vmem:[#allocation38_spill] sm:$0xff]  ;;  %v5507_v40 = vld [vmem:[%s13646_s7 + $0xe0] sm:$0xff]  ;;  %v2683_v52 = vsub.f32 %v2651_v37, %v2667_v8  ;;  %v869_v3 = vmul.f32 %v5372_v25, %v14470_v62 }
 0x325   :  { %v969_v49 = vmul.f32 %v14481_v50, %v14480_v39  ;;  %v2505_v33 = vadd.f32 %v2489_v30, %v2455_v34  ;;  %v2668_v56 = vmul.f32 6.0, %v5628_v14  ;;  %v14483_v59 = vld [vmem:[#allocation27_spill] sm:$0xff]  ;;  %vm1269_vm3 = vcmp.gt.f32.partialorder %v5507_v40, 2.0  ;;  %v14486_v14 = vld [vmem:[#allocation52_spill] sm:$0xff]  ;;  %v14494_v9 = vld [vmem:[#allocation22_spill] sm:$0xff] }
 0x326   :  { %v884_v4 = vadd.f32 %v868_v32, %v834_v16  ;;  %v14482_v32 = vld [vmem:[#allocation18_spill] sm:$0xff]  ;;  %v11654_v44 = vld [vmem:[%s13645_s6 + $0x180] sm:$0xff]  ;;  %5659 = vst [vmem:[%s13652_s13 + $0xa0] sm:$0xff] %v2683_v52  ;;  %vm2699_vm2 = vcmp.gt.f32.partialorder %v2683_v52, 6.0  ;;  %v835_v10 = vadd.f32 %v819_v13, %v14477_v23  ;;  %v919_v8 = vmul.f32 %v5389_v61, %v14478_v7  ;;  %v2121_v52 = vld [vmem:[#allocation2 + $0x108] sm:$0xff] }
 0x327   :  { %v1019_v50 = vmul.f32 %v14483_v59, %v14482_v32  ;;  %14484 = vst [vmem:[#allocation35_spill] sm:$0xff] %v11654_v44  ;;  %v2555_v30 = vadd.f32 %v2539_v24, %v2505_v33  ;;  %v5643_v46 = vsel %vm2699_vm2, 1.0, %v10917_v11  ;;  %v14485_v37 = vld [vmem:[#allocation19_spill] sm:$0xff]  ;;  %v11673_v13 = vadd.f32 %v11561_v18, %v4345_v26  ;;  %v14488_v24 = vld [vmem:[#allocation20_spill] sm:$0xff]  ;;  %v14491_v26 = vld [vmem:[#allocation21_spill] sm:$0xff] }
 0x328   :  { %v934_v16 = vadd.f32 %v918_v28, %v884_v4  ;;  %v5508_v28 = vld [vmem:[%s13646_s7 + $0xe8] sm:$0xff]  ;;  %v1069_v34 = vmul.f32 %v14486_v14, %v14485_v37  ;;  %5675 = vst [vmem:[%s13649_s10 + $0xa0] sm:$0xff] %v5643_v46  ;;  %v1120_v61 = vmul.f32 %v11654_v44, %v14488_v24  ;;  %v885_v33 = vadd.f32 %v869_v3, %v835_v10  ;;  %v14492_v44 = vld [vmem:[#allocation54_spill] sm:$0xff] }
 0x329   :  { %v11670_v4 = vld [vmem:[%s13645_s6 + $0x181] sm:$0xff]  ;;  %v2652_v7 = vadd.f32 %v2636_v48, %v2555_v30  ;;  %v5523_v18 = vsel %vm1269_vm3, 1.0, %v10917_v11  ;;  %vm1270_vm4 = vcmp.gt.f32.partialorder %v5508_v28, 2.0  ;;  %v1020_v62 = vmul.f32 %v14492_v44, %v14482_v32  ;;  %v2171_v29 = vld [vmem:[#allocation2 + $0x109] sm:$0xff]  ;;  %v11729_v44 = vld [vmem:[#allocation2 + $0x138] sm:$0xff] }
 0x32a   :  { %v985_v25 = vadd.f32 %v969_v49, %v934_v16  ;;  %14487 = vst [vmem:[#allocation28_spill] sm:$0xff] %v11670_v4  ;;  %v11683_v49 = vld [vmem:[%s13645_s6 + $0x182] sm:$0xff]  ;;  %v14490_v16 = vld [vmem:[#allocation98_spill] sm:$0xff]  ;;  %v1170_v46 = vmul.f32 %v11670_v4, %v14491_v26  ;;  %v935_v59 = vadd.f32 %v919_v8, %v885_v33  ;;  %v2139_v55 = vmul.f32 %v14493_v54, %v2121_v52 }
 0x32b   :  { %14489 = vst [vmem:[#allocation56_spill] sm:$0xff] %v11683_v49  ;;  %v970_v14 = vmul.f32 %v14490_v16, %v14480_v39  ;;  %v2684_v3 = vsub.f32 %v2652_v7, %v2668_v56  ;;  %v1220_v48 = vmul.f32 %v11683_v49, %v14494_v9  ;;  %v11699_v30 = vld [vmem:[%s13645_s6 + $0x188] sm:$0xff]  ;;  %v14497_v7 = vld [vmem:[#allocation55_spill] sm:$0xff]  ;;  %v5524_v56 = vsel %vm1270_vm4, 1.0, %v10917_v11  ;;  %14499 = vst [vmem:[#allocation59_spill] sm:$0xff] %v11729_v44 }
 0x32c   :  { %v1035_v23 = vadd.f32 %v1019_v50, %v985_v25  ;;  %v1317_v50 = vmul.f32 0.8, %v5507_v40  ;;  %14495 = vst [vmem:[#allocation57_spill] sm:$0xff] %v11699_v30  ;;  %v11704_v8 = vld [vmem:[%s13645_s6 + $0x189] sm:$0xff]  ;;  %v11706_v25 = vmul.f32 2.0, %v5523_v18  ;;  %v2155_v33 = vadd.f32 %v2139_v55, %v14220_v45  ;;  %v11731_v16 = vld [vmem:[#allocation2 + $0x139] sm:$0xff] }
 0x32d   :  { %14496 = vst [vmem:[#allocation58_spill] sm:$0xff] %v11704_v8  ;;  %v986_v52 = vadd.f32 %v970_v14, %v935_v59  ;;  %v11713_v40 = vld [vmem:[%s13645_s6 + $0x18a] sm:$0xff]  ;;  %5660 = vst [vmem:[%s13652_s13 + $0xa8] sm:$0xff] %v2684_v3  ;;  %vm2700_vm5 = vcmp.gt.f32.partialorder %v2684_v3, 6.0  ;;  %v2189_v59 = vmul.f32 %v10226_v57, %v2171_v29  ;;  %v1121_v49 = vmul.f32 %v11699_v30, %v14488_v24  ;;  %v11744_v3 = vld [vmem:[#allocation2 + $0x13a] sm:$0xff] }
 0x32e   :  { %v1085_v10 = vadd.f32 %v1069_v34, %v1035_v23  ;;  %v1070_v23 = vmul.f32 %v14497_v7, %v14485_v37  ;;  %14498 = vst [vmem:[#allocation40_spill] sm:$0xff] %v11713_v40  ;;  %v2221_v14 = vld [vmem:[#allocation2 + $0x10a] sm:$0xff]  ;;  %v5644_v18 = vsel %vm2700_vm5, 1.0, %v10917_v11  ;;  %v11727_v37 = vmul.f32 %v11704_v8, %v14491_v26  ;;  %14500 = vst [vmem:[#allocation60_spill] sm:$0xff] %v11731_v16  ;;  %v14504_v26 = vld [vmem:[#allocation39_spill] sm:$0xff] }
 0x32f   :  { %v1036_v7 = vadd.f32 %v1020_v62, %v986_v52  ;;  %5676 = vst [vmem:[%s13649_s10 + $0xa8] sm:$0xff] %v5644_v18  ;;  %v11738_v11 = vmul.f32 %v11713_v40, %v14494_v9  ;;  %v11740_v55 = vmul.f32 0.8, %v5508_v28  ;;  %v11742_v62 = vmul.f32 2.0, %v5524_v56  ;;  %14501 = vst [vmem:[#allocation61_spill] sm:$0xff] %v11744_v3  ;;  %v2222_v52 = vld [vmem:[#allocation2 + $0x112] sm:$0xff] }
 0x330   :  { %v1136_v34 = vadd.f32 %v1120_v61, %v1085_v10  ;;  %v2122_v61 = vld [vmem:[#allocation2 + $0x110] sm:$0xff]  ;;  %v5942_v8 = vld [vmem:[%s13649_s10 + $0xa0] sm:$0x7f]  ;;  %v2239_v28 = vmul.f32 %v10247_v38, %v2221_v14  ;;  %v11766_v30 = vmul.f32 %v14504_v26, %v10282_v58  ;;  %v2205_v32 = vadd.f32 %v2189_v59, %v2155_v33  ;;  %v14506_v59 = vld [vmem:[#allocation66_spill] sm:$0xff] }
 0x331   :  { %v2172_v10 = vld [vmem:[#allocation2 + $0x111] sm:$0xff]  ;;  %v14503_v40 = vld [vmem:[#allocation79_spill] sm:$0xff]  ;;  %v11783_v26 = vmul.f32 %v14476_v12, %v11731_v16  ;;  %v1086_v58 = vadd.f32 %v1070_v23, %v1036_v7  ;;  %v14508_v16 = vld [vmem:[#allocation76_spill] sm:$0xff]  ;;  %v11803_v7 = vmul.f32 %v10247_v38, %v2222_v52 }
 0x332   :  { %v1186_v29 = vadd.f32 %v1170_v46, %v1136_v34  ;;  %v5950_v46 = vld [vmem:[%s13649_s10 + $0xa1] sm:$0x7f]  ;;  %v14502_v56 = vld [vmem:[#allocation37_spill] sm:$0xff]  ;;  %v11762_v9 = vmul.f32 %v14503_v40, %v10277_v19  ;;  %v11779_v40 = vmul.f32 %v14421_v22, %v11729_v44  ;;  %v11790_v19 = vmul.f32 %v14479_v63, %v11744_v3  ;;  %v14509_v23 = vld [vmem:[#allocation80_spill] sm:$0xff] }
 0x333   :  { %v6021_v34 = vld [vmem:[%s13649_s10 + $0xa0] sm:$0x7f]  ;;  %v11758_v18 = vmul.f32 %v14502_v56, %v10267_v60  ;;  %14505 = vst [vmem:[#allocation62_spill] sm:$0xff] %v11783_v26  ;;  %v11794_v33 = vmul.f32 %v10226_v57, %v2172_v10  ;;  %v14510_v63 = vld [vmem:[#allocation88_spill] sm:$0xff]  ;;  %v14512_v52 = vld [vmem:[#allocation41_spill] sm:$0xff] }
 0x334   :  { %v6029_v24 = vld [vmem:[%s13649_s10 + $0xa1] sm:$0x7f]  ;;  %v1236_v4 = vadd.f32 %v1220_v48, %v1186_v29  ;;  %v2140_v48 = vmul.f32 %v14493_v54, %v2122_v61  ;;  %v3718_v29 = vmul.f32 %v5942_v8, %v14506_v59  ;;  %v3948_v12 = vmul.f32 %v6021_v34, %v14508_v16  ;;  %v14511_v54 = vld [vmem:[#allocation89_spill] sm:$0xff] }
 0x335   :  { %v6100_v14 = vld [vmem:[%s13649_s10 + $0xa0] sm:$0x7f]  ;;  %v3971_v3 = vmul.f32 %v6029_v24, %v14509_v23  ;;  %v14513_v23 = vld [vmem:[#allocation42_spill] sm:$0xff] }
 0x336   :  { %v6108_v56 = vld [vmem:[%s13649_s10 + $0xa1] sm:$0x7f]  ;;  %v4178_v61 = vmul.f32 %v6100_v14, %v14510_v63  ;;  %v1333_v57 = vadd.f32 %v1317_v50, %v1236_v4  ;;  %v3725_v8 = vadd.f32 %v3718_v29, %v11510_v47  ;;  %v3955_v34 = vadd.f32 %v3948_v12, %v11527_v6  ;;  %v14515_v12 = vld [vmem:[#allocation69_spill] sm:$0xff] }
 0x337   :  { %v6179_v39 = vld [vmem:[%s13649_s10 + $0xa0] sm:$0x7f]  ;;  %v4201_v10 = vmul.f32 %v6108_v56, %v14511_v54  ;;  %v3978_v24 = vadd.f32 %v3971_v3, %v11529_v21  ;;  %v14514_v21 = vld [vmem:[#allocation68_spill] sm:$0xff] }
 0x338   :  { %v14507_v44 = vld [vmem:[#allocation67_spill] sm:$0xff]  ;;  %v4408_v59 = vmul.f32 %v6179_v39, %v14512_v52  ;;  %v11829_v47 = vsub.f32 %v1333_v57, %v11706_v25  ;;  %v4185_v6 = vadd.f32 %v4178_v61, %v11546_v27  ;;  %v14518_v25 = vld [vmem:[#allocation70_spill] sm:$0xff] }
 0x339   :  { %v3741_v22 = vmul.f32 %v5950_v46, %v14507_v44  ;;  %v6187_v26 = vld [vmem:[%s13649_s10 + $0xa1] sm:$0x7f]  ;;  %v11811_v44 = vld [vmem:[%s13647_s8 + $0xb0] sm:$0xff]  ;;  %v4208_v29 = vadd.f32 %v4201_v10, %v11548_v5  ;;  %v2255_v5 = vadd.f32 %v2239_v28, %v2205_v32 }
 0x33a   :  { %v4431_v14 = vmul.f32 %v6187_v26, %v14513_v23  ;;  %v5958_v4 = vld [vmem:[%s13649_s10 + $0xa2] sm:$0x7f]  ;;  %v11838_v56 = vmul.f32 0.8, %v11811_v44  ;;  %v11842_v23 = vadd.f32 %v4408_v59, %v11633_v53  ;;  %5555 = vst [vmem:[%s13651_s12 + $0xe0] sm:$0xff] %v11829_v47  ;;  %vm2589_vm6 = vcmp.gt.f32.partialorder %v11811_v44, 6.0 }
 0x33b   :  { %v3748_v46 = vadd.f32 %v3741_v22, %v11512_v51  ;;  %v5966_v50 = vld [vmem:[%s13649_s10 + $0xa3] sm:$0x7f]  ;;  %v1137_v51 = vadd.f32 %v1121_v49, %v1086_v58  ;;  %v3764_v39 = vmul.f32 %v5958_v4, %v14514_v21  ;;  %v14520_v21 = vld [vmem:[#allocation81_spill] sm:$0xff]  ;;  %vm1381_vm7 = vcmp.gt.f32.partialorder %v11829_v47, 2.0 }
 0x33c   :  { %v5974_v22 = vld [vmem:[%s13649_s10 + $0xa4] sm:$0x7f]  ;;  %v3787_v26 = vmul.f32 %v5966_v50, %v14515_v12  ;;  %14516 = vst [vmem:[#allocation72_spill] sm:$0xff] %v11842_v23  ;;  %v11845_v58 = vadd.f32 %v4431_v14, %v11673_v13 }
 0x33d   :  { %v5982_v3 = vld [vmem:[%s13649_s10 + $0xa5] sm:$0x7f]  ;;  %v3771_v53 = vadd.f32 %v3764_v39, %v3725_v8  ;;  %v3810_v61 = vmul.f32 %v5974_v22, %v14518_v25  ;;  %v2156_v22 = vadd.f32 %v2140_v48, %v14220_v45 }
 0x33e   :  { %14517 = vst [vmem:[#allocation73_spill] sm:$0xff] %v11845_v58  ;;  %v5990_v57 = vld [vmem:[%s13649_s10 + $0xa6] sm:$0x7f]  ;;  %v3794_v13 = vadd.f32 %v3787_v26, %v3748_v46  ;;  %v1187_v46 = vadd.f32 %v11727_v37, %v1137_v51 }
 0x33f   :  { %v5998_v27 = vld [vmem:[%s13649_s10 + $0xa7] sm:$0x7f]  ;;  %v3817_v39 = vadd.f32 %v3810_v61, %v3771_v53  ;;  %v3856_v26 = vmul.f32 %v5990_v57, %v14450_v1  ;;  %v2290_v61 = vmul.f32 %v11570_v43, %v10267_v60  ;;  %v2206_v23 = vadd.f32 %v11794_v33, %v2156_v22 }
 0x340   :  { %v6037_v49 = vld [vmem:[%s13649_s10 + $0xa2] sm:$0x7f]  ;;  %v6172_v33 = vld [vmem:[%s13649_s10 + $0xa9] sm:$0x7f] }
 0x341   :  { %v14519_v10 = vld [vmem:[#allocation71_spill] sm:$0xff]  ;;  %v3994_v32 = vmul.f32 %v6037_v49, %v14520_v21  ;;  %v6006_v57 = vld [vmem:[%s13649_s10 + $0xa8] sm:$0x7f] }
 0x342   :  { %v3833_v59 = vmul.f32 %v5982_v3, %v14519_v10  ;;  %v6045_v14 = vld [vmem:[%s13649_s10 + $0xa3] sm:$0x7f]  ;;  %v3879_v3 = vmul.f32 %v5998_v27, %v14451_v20 }
 0x343   :  { %v6053_v4 = vld [vmem:[%s13649_s10 + $0xa4] sm:$0x7f]  ;;  %v4001_v10 = vadd.f32 %v3994_v32, %v3955_v34 }
 0x344   :  { %v6061_v50 = vld [vmem:[%s13649_s10 + $0xa5] sm:$0x7f]  ;;  %v3840_v12 = vadd.f32 %v3833_v59, %v3794_v13  ;;  %v4040_v37 = vmul.f32 %v6053_v4, %v14448_v41  ;;  %v2305_v13 = vadd.f32 %v11758_v18, %v2255_v5  ;;  %v3863_v59 = vadd.f32 %v3856_v26, %v3817_v39  ;;  %v14524_v18 = vld [vmem:[#allocation85_spill] sm:$0xff] }
 0x345   :  { %v14521_v28 = vld [vmem:[#allocation63_spill] sm:$0xff]  ;;  %v6014_v34 = vld [vmem:[%s13649_s10 + $0xa9] sm:$0x7f] }
 0x346   :  { %v4017_v8 = vmul.f32 %v6045_v14, %v14521_v28  ;;  %v6116_v25 = vld [vmem:[%s13649_s10 + $0xa2] sm:$0x7f]  ;;  %v3886_v4 = vadd.f32 %v3879_v3, %v3840_v12  ;;  %v6093_v12 = vld [vmem:[%s13649_s10 + $0xa9] sm:$0x7f] }
 0x347   :  { %v6124_v49 = vld [vmem:[%s13649_s10 + $0xa3] sm:$0x7f] }
 0x348   :  { %v4024_v14 = vadd.f32 %v4017_v8, %v3978_v24  ;;  %v14522_v51 = vld [vmem:[#allocation83_spill] sm:$0xff]  ;;  %v14523_v24 = vld [vmem:[#allocation90_spill] sm:$0xff]  ;;  %v4247_v53 = vmul.f32 %v6124_v49, %v14381_v42  ;;  %v6085_v39 = vld [vmem:[%s13649_s10 + $0xa8] sm:$0x7f] }
 0x349   :  { %v4063_v48 = vmul.f32 %v6061_v50, %v14522_v51  ;;  %v6069_v1 = vld [vmem:[%s13649_s10 + $0xa6] sm:$0x7f]  ;;  %v4224_v27 = vmul.f32 %v6116_v25, %v14523_v24  ;;  %v4047_v50 = vadd.f32 %v4040_v37, %v4001_v10  ;;  %v14525_v49 = vld [vmem:[#allocation74_spill] sm:$0xff] }
 0x34a   :  { %v6077_v20 = vld [vmem:[%s13649_s10 + $0xa7] sm:$0x7f]  ;;  %v4086_v25 = vmul.f32 %v6069_v1, %v14457_v0  ;;  %v4254_v3 = vadd.f32 %v4247_v53, %v4208_v29  ;;  %v3902_v10 = vmul.f32 %v6006_v57, %v14525_v49  ;;  %v4132_v53 = vmul.f32 %v6085_v39, %v14379_v35 }
 0x34b   :  { %v4070_v32 = vadd.f32 %v4063_v48, %v4024_v14  ;;  %v6132_v8 = vld [vmem:[%s13649_s10 + $0xa4] sm:$0x7f]  ;;  %v4109_v5 = vmul.f32 %v6077_v20, %v14524_v18  ;;  %v4231_v26 = vadd.f32 %v4224_v27, %v4185_v6  ;;  %v1237_v20 = vadd.f32 %v11738_v11, %v1187_v46 }
 0x34c   :  { %v6140_v58 = vld [vmem:[%s13649_s10 + $0xa5] sm:$0x7f]  ;;  %v4093_v18 = vadd.f32 %v4086_v25, %v4047_v50  ;;  %v4270_v6 = vmul.f32 %v6132_v8, %v14459_v31  ;;  %v4155_v11 = vmul.f32 %v6093_v12, %v14380_v15 }
 0x34d   :  { %v14526_v14 = vld [vmem:[#allocation75_spill] sm:$0xff]  ;;  %v4116_v0 = vadd.f32 %v4109_v5, %v4070_v32  ;;  %v4293_v29 = vmul.f32 %v6140_v58, %v14460_v36  ;;  %v6164_v57 = vld [vmem:[%s13649_s10 + $0xa8] sm:$0x7f]  ;;  %v14527_v32 = vld [vmem:[#allocation77_spill] sm:$0xff]  ;;  %v1334_v25 = vadd.f32 %v11740_v55, %v1237_v20  ;;  %v2355_v5 = vadd.f32 %v11762_v9, %v2305_v13 }
 0x34e   :  { %v3925_v37 = vmul.f32 %v6014_v34, %v14526_v14  ;;  %v6148_v48 = vld [vmem:[%s13649_s10 + $0xa6] sm:$0x7f]  ;;  %v11932_v34 = vadd.f32 %v3902_v10, %v3863_v59  ;;  %v4277_v46 = vadd.f32 %v4270_v6, %v4231_v26  ;;  %v4362_v8 = vmul.f32 %v6164_v57, %v14527_v32  ;;  %v14528_v26 = vld [vmem:[#allocation78_spill] sm:$0xff]  ;;  %v14531_v13 = vld [vmem:[#allocation29_spill] sm:$0xff] }
 0x34f   :  { %v6156_v1 = vld [vmem:[%s13649_s10 + $0xa7] sm:$0x7f]  ;;  %v4300_v22 = vadd.f32 %v4293_v29, %v4254_v3  ;;  %v4316_v58 = vmul.f32 %v6148_v48, %v14461_v17  ;;  %v11953_v39 = vadd.f32 %v4132_v53, %v4093_v18  ;;  %v11955_v12 = vadd.f32 %v4155_v11, %v4116_v0  ;;  %v14537_v53 = vld [vmem:[#allocation33_spill] sm:$0xff] }
 0x350   :  { %v11934_v27 = vadd.f32 %v3925_v37, %v3886_v4  ;;  %v4339_v50 = vmul.f32 %v6156_v1, %v14462_v2  ;;  %v6195_v59 = vld [vmem:[%s13649_s10 + $0xa2] sm:$0x7f]  ;;  %v4385_v3 = vmul.f32 %v6172_v33, %v14528_v26  ;;  %v1366_v55 = vsub.f32 %v1334_v25, %v11742_v62  ;;  %v14532_v1 = vld [vmem:[#allocation34_spill] sm:$0xff] }
 0x351   :  { %v6203_v4 = vld [vmem:[%s13649_s10 + $0xa3] sm:$0x7f]  ;;  %v2405_v9 = vadd.f32 %v11766_v30, %v2355_v5  ;;  %v2256_v0 = vadd.f32 %v11803_v7, %v2206_v23  ;;  %v4323_v37 = vadd.f32 %v4316_v58, %v4277_v46  ;;  %v11973_v20 = vmul.f32 %v6195_v59, %v14532_v1  ;;  %v14536_v23 = vld [vmem:[#allocation109_spill] sm:$0xff]  ;;  %v5614_v33 = vld [vmem:[%s13647_s8 + $0xb8] sm:$0xff] }
 0x352   :  { %v11958_v49 = vld [vmem:[#allocation2 + $0x8] sm:$0xff]  ;;  %v14530_v47 = vld [vmem:[#allocation107_spill] sm:$0xff]  ;;  %v4346_v48 = vadd.f32 %v4339_v50, %v4300_v22  ;;  %vm1382_vm8 = vcmp.gt.f32.partialorder %v1366_v55, 2.0  ;;  %5556 = vst [vmem:[%s13651_s12 + $0xe8] sm:$0xff] %v1366_v55  ;;  %v2390_v11 = vmul.f32 %v14537_v53, %v14536_v23  ;;  %v14543_v25 = vld [vmem:[#allocation62_spill] sm:$0xff]  ;;  %vm2590_vm9 = vcmp.gt.f32.partialorder %v5614_v33, 6.0 }
 0x353   :  { %v11961_v10 = vsel %vm1381_vm7, 1.0, %v11958_v49  ;;  %v6211_v14 = vld [vmem:[%s13649_s10 + $0xa4] sm:$0x7f]  ;;  %v2340_v18 = vmul.f32 %v14531_v13, %v14530_v47  ;;  %14533 = vst [vmem:[#allocation65_spill] sm:$0xff] %v11973_v20  ;;  %v2456_v30 = vadd.f32 %v11779_v40, %v2405_v9  ;;  %v2306_v7 = vadd.f32 %v2290_v61, %v2256_v0  ;;  %v14541_v40 = vld [vmem:[#allocation14_spill] sm:$0xff]  ;;  %v14547_v20 = vld [vmem:[#allocation25_spill] sm:$0xff] }
 0x354   :  { %14529 = vst [vmem:[#allocation64_spill] sm:$0xff] %v11961_v10  ;;  %1447 = vst [vmem:[#allocation2 + $0x169] sm:$0xff] %v11961_v10  ;;  %v14534_v6 = vld [vmem:[#allocation43_spill] sm:$0xff]  ;;  %v14538_v46 = vld [vmem:[#allocation24_spill] sm:$0xff]  ;;  %v11996_v58 = vsel %vm1382_vm8, 1.0, %v11958_v49  ;;  %v5629_v50 = vsel %vm2589_vm6, 1.0, %v11958_v49  ;;  %v12022_v32 = vadd.f32 %v4362_v8, %v4323_v37 }
 0x355   :  { %v11976_v29 = vmul.f32 %v6203_v4, %v14534_v6  ;;  %v11978_v57 = vld [vmem:[#allocation2 + $0x140] sm:$0xff]  ;;  %v11993_v22 = vmul.f32 %v6211_v14, %v14538_v46  ;;  %14540 = vst [vmem:[#allocation108_spill] sm:$0xff] %v11996_v58  ;;  %v14542_v61 = vld [vmem:[#allocation38_spill] sm:$0xff]  ;;  %1448 = vst [vmem:[#allocation2 + $0x171] sm:$0xff] %v11996_v58  ;;  %v2506_v5 = vadd.f32 %v14543_v25, %v2456_v30 }
 0x356   :  { %v6219_v62 = vld [vmem:[%s13649_s10 + $0xa5] sm:$0x7f]  ;;  %v820_v4 = vmul.f32 %v14542_v61, %v14541_v40  ;;  %v2356_v55 = vadd.f32 %v2340_v18, %v2306_v7  ;;  %v14544_v14 = vld [vmem:[#allocation97_spill] sm:$0xff]  ;;  %v2669_v18 = vmul.f32 6.0, %v5629_v50  ;;  %v14556_v37 = vld [vmem:[#allocation18_spill] sm:$0xff] }
 0x357   :  { %14535 = vst [vmem:[#allocation23_spill] sm:$0xff] %v11976_v29  ;;  %14539 = vst [vmem:[#allocation104_spill] sm:$0xff] %v11993_v22  ;;  %v12001_v59 = vld [vmem:[#allocation2 + $0x141] sm:$0xff]  ;;  %v2441_v9 = vmul.f32 %v14544_v14, %v11978_v57  ;;  %v12012_v10 = vmul.f32 %v6219_v62, %v14547_v20  ;;  %v14549_v46 = vld [vmem:[#allocation13_spill] sm:$0xff]  ;;  %v2556_v30 = vadd.f32 %v11790_v19, %v2506_v5  ;;  %v5630_v19 = vsel %vm2590_vm9, 1.0, %v11958_v49 }
 0x358   :  { %v14545_v0 = vld [vmem:[#allocation15_spill] sm:$0xff]  ;;  %v836_v6 = vadd.f32 %v820_v4, %v14549_v46  ;;  %v14550_v61 = vld [vmem:[#allocation16_spill] sm:$0xff]  ;;  %v2406_v7 = vadd.f32 %v2390_v11, %v2356_v55 }
 0x359   :  { %v14546_v22 = vld [vmem:[#allocation27_spill] sm:$0xff]  ;;  %14548 = vst [vmem:[#allocation66_spill] sm:$0xff] %v12012_v10  ;;  %v14551_v1 = vld [vmem:[#allocation52_spill] sm:$0xff]  ;;  %v14553_v10 = vld [vmem:[#allocation17_spill] sm:$0xff]  ;;  %v2653_v4 = vadd.f32 %v11838_v56, %v2556_v30 }
 0x35a   :  { %v870_v29 = vmul.f32 %v14546_v22, %v14545_v0  ;;  %v12014_v44 = vld [vmem:[#allocation2 + $0x142] sm:$0xff]  ;;  %v920_v58 = vmul.f32 %v14551_v1, %v14550_v61  ;;  %v12024_v22 = vadd.f32 %v4385_v3, %v4346_v48  ;;  %v2457_v17 = vadd.f32 %v2441_v9, %v2406_v7  ;;  %v5509_v11 = vld [vmem:[%s13646_s7 + $0xf0] sm:$0xff]  ;;  %v14558_v56 = vld [vmem:[#allocation98_spill] sm:$0xff] }
 0x35b   :  { %v14552_v25 = vld [vmem:[#allocation44_spill] sm:$0xff]  ;;  %v14554_v20 = vld [vmem:[#allocation35_spill] sm:$0xff]  ;;  %v2685_v5 = vsub.f32 %v2653_v4, %v2669_v18  ;;  %v2638_v9 = vmul.f32 0.8, %v5614_v33  ;;  %vm1271_vm10 = vcmp.gt.f32.partialorder %v5509_v11, 2.0 }
 0x35c   :  { %v2491_v26 = vmul.f32 %v14552_v25, %v12001_v59  ;;  %v886_v62 = vadd.f32 %v870_v29, %v836_v6  ;;  %v971_v2 = vmul.f32 %v14554_v20, %v14553_v10  ;;  %v14555_v1 = vld [vmem:[#allocation47_spill] sm:$0xff]  ;;  %v14557_v3 = vld [vmem:[#allocation28_spill] sm:$0xff]  ;;  %v5458_v20 = vld [vmem:[%s13645_s6 + $0x198] sm:$0xff]  ;;  %v821_v6 = vmul.f32 %v14558_v56, %v14541_v40 }
 0x35d   :  { %v2541_v36 = vmul.f32 %v14555_v1, %v12014_v44  ;;  %v1021_v48 = vmul.f32 %v14557_v3, %v14556_v37  ;;  %v14559_v29 = vld [vmem:[#allocation54_spill] sm:$0xff]  ;;  %v14560_v30 = vld [vmem:[#allocation19_spill] sm:$0xff]  ;;  %v14561_v7 = vld [vmem:[#allocation56_spill] sm:$0xff]  ;;  %5661 = vst [vmem:[%s13652_s13 + $0xb0] sm:$0xff] %v2685_v5  ;;  %vm2701_vm11 = vcmp.gt.f32.partialorder %v2685_v5, 6.0 }
 0x35e   :  { %v936_v8 = vadd.f32 %v920_v58, %v886_v62  ;;  %v871_v50 = vmul.f32 %v14559_v29, %v14545_v0  ;;  %v2507_v55 = vadd.f32 %v2491_v26, %v2457_v17  ;;  %v1071_v15 = vmul.f32 %v14561_v7, %v14560_v30  ;;  %v5475_v62 = vld [vmem:[%s13645_s6 + $0x199] sm:$0xff]  ;;  %v14563_v33 = vld [vmem:[#allocation20_spill] sm:$0xff]  ;;  %v14569_v7 = vld [vmem:[#allocation105_spill] sm:$0xff] }
 0x35f   :  { %v837_v3 = vadd.f32 %v821_v6, %v14549_v46  ;;  %v14562_v31 = vld [vmem:[#allocation55_spill] sm:$0xff]  ;;  %v2670_v26 = vmul.f32 6.0, %v5630_v19  ;;  %v1122_v0 = vmul.f32 %v5458_v20, %v14563_v33  ;;  %v14565_v19 = vld [vmem:[#allocation21_spill] sm:$0xff]  ;;  %v14566_v56 = vld [vmem:[#allocation100_spill] sm:$0xff] }
 0x360   :  { %v987_v58 = vadd.f32 %v971_v2, %v936_v8  ;;  %v921_v40 = vmul.f32 %v14562_v31, %v14550_v61  ;;  %v2557_v17 = vadd.f32 %v2541_v36, %v2507_v55  ;;  %v5645_v2 = vsel %vm2701_vm11, 1.0, %v11958_v49  ;;  %v5492_v4 = vld [vmem:[%s13645_s6 + $0x19a] sm:$0xff]  ;;  %v14564_v8 = vld [vmem:[#allocation57_spill] sm:$0xff]  ;;  %v14572_v51 = vld [vmem:[#allocation40_spill] sm:$0xff] }
 0x361   :  { %v887_v46 = vadd.f32 %v871_v50, %v837_v3  ;;  %v972_v31 = vmul.f32 %v14564_v8, %v14553_v10  ;;  %v5510_v61 = vld [vmem:[%s13646_s7 + $0xf8] sm:$0xff]  ;;  %5677 = vst [vmem:[%s13649_s10 + $0xb0] sm:$0xff] %v5645_v2  ;;  %v1172_v20 = vmul.f32 %v5475_v62, %v14565_v19  ;;  %v14567_v6 = vld [vmem:[#allocation37_spill] sm:$0xff]  ;;  %v1072_v41 = vmul.f32 %v14572_v51, %v14560_v30  ;;  %s12621_s7 = sld [smem:[#allocation10 + $0x50]] }
 0x362   :  { %v1037_v18 = vadd.f32 %v1021_v48, %v987_v58  ;;  %v2654_v36 = vadd.f32 %v2638_v9, %v2557_v17  ;;  %v5525_v48 = vsel %vm1271_vm10, 1.0, %v11958_v49  ;;  %v2141_v29 = vmul.f32 %v14567_v6, %v14566_v56  ;;  %v14568_v10 = vld [vmem:[#allocation58_spill] sm:$0xff]  ;;  %v14570_v58 = vld [vmem:[#allocation79_spill] sm:$0xff]  ;;  %v12098_v6 = vld [vmem:[#allocation2 + $0x150] sm:$0xff] }
 0x363   :  { %v937_v5 = vadd.f32 %v921_v40, %v887_v46  ;;  %v1022_v55 = vmul.f32 %v14568_v10, %v14556_v37  ;;  %v2191_v9 = vmul.f32 %v14570_v58, %v14569_v7  ;;  %v14571_v17 = vld [vmem:[#allocation22_spill] sm:$0xff]  ;;  %vm1272_vm12 = vcmp.gt.f32.partialorder %v5510_v61, 2.0  ;;  %v5476_v37 = vld [vmem:[%s13645_s6 + $0x1a1] sm:$0xff]  ;;  %14574 = vst [vmem:[#allocation67_spill] sm:$0xff] %v12098_v6 }
 0x364   :  { %v1087_v50 = vadd.f32 %v1071_v15, %v1037_v18  ;;  %v2686_v3 = vsub.f32 %v2654_v36, %v2670_v26  ;;  %v1222_v8 = vmul.f32 %v5492_v4, %v14571_v17  ;;  %v2157_v62 = vadd.f32 %v2141_v29, %v14220_v45  ;;  %v5459_v15 = vld [vmem:[%s13645_s6 + $0x1a0] sm:$0xff] }
 0x365   :  { %v988_v35 = vadd.f32 %v972_v31, %v937_v5  ;;  %v5493_v40 = vld [vmem:[%s13645_s6 + $0x1a2] sm:$0xff]  ;;  %v1319_v51 = vmul.f32 0.8, %v5509_v11  ;;  %v1351_v30 = vmul.f32 2.0, %v5525_v48  ;;  %v5526_v36 = vsel %vm1272_vm12, 1.0, %v11958_v49  ;;  %s12653_s6 = sld [smem:[#allocation10 + $0x53]] }
 0x366   :  { %v1138_v2 = vadd.f32 %v1122_v0, %v1087_v50  ;;  %v14573_v26 = vld [vmem:[#allocation39_spill] sm:$0xff]  ;;  %5662 = vst [vmem:[%s13652_s13 + $0xb8] sm:$0xff] %v2686_v3  ;;  %vm2702_vm13 = vcmp.gt.f32.partialorder %v2686_v3, 6.0  ;;  %v2207_v0 = vadd.f32 %v2191_v9, %v2157_v62  ;;  %v1123_v29 = vmul.f32 %v5459_v15, %v14563_v33 }
 0x367   :  { %v2241_v18 = vmul.f32 %v14573_v26, %v10247_v38  ;;  %v5646_v4 = vsel %vm2702_vm13, 1.0, %v11958_v49  ;;  %v1038_v31 = vadd.f32 %v1022_v55, %v988_v35  ;;  %v1173_v50 = vmul.f32 %v5476_v37, %v14565_v19  ;;  %v12112_v35 = vld [vmem:[#allocation2 + $0x152] sm:$0xff]  ;;  %v14577_v58 = vld [vmem:[#allocation59_spill] sm:$0xff] }
 0x368   :  { %v1188_v46 = vadd.f32 %v1172_v20, %v1138_v2  ;;  %5678 = vst [vmem:[%s13649_s10 + $0xb8] sm:$0xff] %v5646_v4  ;;  %v12106_v11 = vmul.f32 %v5493_v40, %v14571_v17  ;;  %v12108_v48 = vmul.f32 0.8, %v5510_v61  ;;  %v12110_v20 = vld [vmem:[#allocation2 + $0x151] sm:$0xff]  ;;  %14576 = vst [vmem:[#allocation68_spill] sm:$0xff] %v12112_v35  ;;  %v2291_v9 = vmul.f32 %v14577_v58, %v10267_v60  ;;  %v14578_v2 = vld [vmem:[#allocation60_spill] sm:$0xff] }
 0x369   :  { %14575 = vst [vmem:[#allocation76_spill] sm:$0xff] %v12110_v20  ;;  %v6022_v10 = vld [vmem:[%s13649_s10 + $0xb0] sm:$0x7f]  ;;  %v1088_v55 = vadd.f32 %v1072_v41, %v1038_v31  ;;  %v2257_v61 = vadd.f32 %v2241_v18, %v2207_v0  ;;  %v12131_v62 = vmul.f32 2.0, %v5526_v36  ;;  %v2341_v15 = vmul.f32 %v14578_v2, %v14530_v47  ;;  %v14580_v4 = vld [vmem:[#allocation80_spill] sm:$0xff] }
 0x36a   :  { %v6030_v33 = vld [vmem:[%s13649_s10 + $0xb1] sm:$0x7f]  ;;  %v1238_v19 = vadd.f32 %v1222_v8, %v1188_v46  ;;  %v12141_v37 = vmul.f32 %v14544_v14, %v12098_v6  ;;  %v12145_v26 = vmul.f32 %v14552_v25, %v12110_v20  ;;  %v12149_v18 = vmul.f32 %v14555_v1, %v12112_v35 }
 0x36b   :  { %v6101_v3 = vld [vmem:[%s13649_s10 + $0xb0] sm:$0x7f]  ;;  %v3949_v0 = vmul.f32 %v6022_v10, %v14508_v16  ;;  %v3972_v46 = vmul.f32 %v6030_v33, %v14580_v4  ;;  %v1139_v36 = vadd.f32 %v1123_v29, %v1088_v55  ;;  %v2307_v16 = vadd.f32 %v2291_v9, %v2257_v61 }
 0x36c   :  { %v6109_v17 = vld [vmem:[%s13649_s10 + $0xb1] sm:$0x7f]  ;;  %v1335_v40 = vadd.f32 %v1319_v51, %v1238_v19  ;;  %v2142_v19 = vmul.f32 %v11570_v43, %v14566_v56  ;;  %v4179_v35 = vmul.f32 %v6101_v3, %v14510_v63  ;;  %v12171_v1 = vmul.f32 %v14531_v13, %v14569_v7  ;;  %v14581_v3 = vld [vmem:[#allocation42_spill] sm:$0xff] }
 0x36d   :  { %v5615_v5 = vld [vmem:[%s13647_s8 + $0xc0] sm:$0xff]  ;;  %v14579_v8 = vld [vmem:[#allocation61_spill] sm:$0xff]  ;;  %v4202_v20 = vmul.f32 %v6109_v17, %v14511_v54  ;;  %v3956_v10 = vadd.f32 %v3949_v0, %v11932_v34  ;;  %v3979_v33 = vadd.f32 %v3972_v46, %v11934_v27  ;;  %v2242_v46 = vmul.f32 %v14537_v53, %v10247_v38 }
 0x36e   :  { %v12137_v41 = vmul.f32 %v14579_v8, %v14536_v23  ;;  %vm2591_vm14 = vcmp.gt.f32.partialorder %v5615_v5, 6.0  ;;  %v6180_v31 = vld [vmem:[%s13649_s10 + $0xb0] sm:$0x7f]  ;;  %v12163_v6 = vsub.f32 %v1335_v40, %v1351_v30  ;;  %v12167_v4 = vmul.f32 0.8, %v5615_v5 }
 0x36f   :  { %v6188_v51 = vld [vmem:[%s13649_s10 + $0xb1] sm:$0x7f]  ;;  %v4186_v29 = vadd.f32 %v4179_v35, %v11953_v39  ;;  %v4209_v43 = vadd.f32 %v4202_v20, %v11955_v12  ;;  %v4409_v55 = vmul.f32 %v6180_v31, %v14512_v52  ;;  %v1189_v20 = vadd.f32 %v1173_v50, %v1139_v36  ;;  %v14589_v52 = vld [vmem:[#allocation92_spill] sm:$0xff] }
 0x370   :  { %v4432_v30 = vmul.f32 %v6188_v51, %v14581_v3  ;;  %v6038_v34 = vld [vmem:[%s13649_s10 + $0xb2] sm:$0x7f]  ;;  %5557 = vst [vmem:[%s13651_s12 + $0xf0] sm:$0xff] %v12163_v6  ;;  %v12194_v35 = vsel %vm2591_vm14, 1.0, %v11958_v49  ;;  %v2357_v5 = vadd.f32 %v2341_v15, %v2307_v16  ;;  %v2158_v17 = vadd.f32 %v2142_v19, %v14220_v45  ;;  %v6094_v51 = vld [vmem:[%s13649_s10 + $0xb9] sm:$0x7f] }
 0x371   :  { %v6046_v27 = vld [vmem:[%s13649_s10 + $0xb3] sm:$0x7f]  ;;  %v3995_v39 = vmul.f32 %v6038_v34, %v14520_v21  ;;  %v12197_v61 = vadd.f32 %v4409_v55, %v12022_v32  ;;  %v12222_v31 = vmul.f32 %v11978_v57, %v10267_v60  ;;  %v12237_v16 = vmul.f32 %v12001_v59, %v14530_v47 }
 0x372   :  { %v4018_v12 = vmul.f32 %v6046_v27, %v14521_v28  ;;  %v6054_v13 = vld [vmem:[%s13649_s10 + $0xb4] sm:$0x7f]  ;;  %v12200_v9 = vadd.f32 %v4432_v30, %v12024_v22  ;;  %v14585_v30 = vld [vmem:[#allocation83_spill] sm:$0xff]  ;;  %v14586_v27 = vld [vmem:[#allocation84_spill] sm:$0xff]  ;;  %vm1383_vm15 = vcmp.gt.f32.partialorder %v12163_v6, 2.0 }
 0x373   :  { %14582 = vst [vmem:[#allocation69_spill] sm:$0xff] %v12197_v61  ;;  %v6062_v21 = vld [vmem:[%s13649_s10 + $0xb5] sm:$0x7f]  ;;  %v4002_v32 = vadd.f32 %v3995_v39, %v3956_v10  ;;  %v12241_v10 = vmul.f32 %v12014_v44, %v14536_v23 }
 0x374   :  { %14583 = vst [vmem:[#allocation70_spill] sm:$0xff] %v12200_v9  ;;  %v6070_v28 = vld [vmem:[%s13649_s10 + $0xb6] sm:$0x7f]  ;;  %v4025_v40 = vadd.f32 %v4018_v12, %v3979_v33  ;;  %v4064_v34 = vmul.f32 %v6062_v21, %v14585_v30  ;;  %v1239_v9 = vadd.f32 %v12106_v11, %v1189_v20  ;;  %v2407_v30 = vadd.f32 %v12137_v41, %v2357_v5  ;;  %v14590_v20 = vld [vmem:[#allocation87_spill] sm:$0xff] }
 0x375   :  { %v6117_v50 = vld [vmem:[%s13649_s10 + $0xb2] sm:$0x7f]  ;;  %v4087_v39 = vmul.f32 %v6070_v28, %v14586_v27  ;;  %v6173_v11 = vld [vmem:[%s13649_s10 + $0xb9] sm:$0x7f] }
 0x376   :  { %v6078_v22 = vld [vmem:[%s13649_s10 + $0xb7] sm:$0x7f]  ;;  %v4225_v36 = vmul.f32 %v6117_v50, %v14523_v24 }
 0x377   :  { %v6125_v0 = vld [vmem:[%s13649_s10 + $0xb3] sm:$0x7f] }
 0x378   :  { %v6086_v15 = vld [vmem:[%s13649_s10 + $0xb8] sm:$0x7f]  ;;  %v4248_v19 = vmul.f32 %v6125_v0, %v14381_v42  ;;  %v14587_v61 = vld [vmem:[#allocation85_spill] sm:$0xff]  ;;  %v4071_v42 = vadd.f32 %v4064_v34, %v4025_v40 }
 0x379   :  { %v6133_v53 = vld [vmem:[%s13649_s10 + $0xb4] sm:$0x7f] }
 0x37a   :  { %v14584_v33 = vld [vmem:[#allocation82_spill] sm:$0xff]  ;;  %v4255_v21 = vadd.f32 %v4248_v19, %v4209_v43  ;;  %v4271_v54 = vmul.f32 %v6133_v53, %v14589_v52  ;;  %v14593_v19 = vld [vmem:[#allocation95_spill] sm:$0xff] }
 0x37b   :  { %v4041_v55 = vmul.f32 %v6054_v13, %v14584_v33  ;;  %v6141_v12 = vld [vmem:[%s13649_s10 + $0xb5] sm:$0x7f]  ;;  %v4110_v13 = vmul.f32 %v6078_v22, %v14587_v61  ;;  %v4232_v33 = vadd.f32 %v4225_v36, %v4186_v29  ;;  %v4156_v61 = vmul.f32 %v6094_v51, %v14590_v20  ;;  %v14601_v20 = vld [vmem:[#allocation24_spill] sm:$0xff] }
 0x37c   :  { %v6149_v50 = vld [vmem:[%s13649_s10 + $0xb6] sm:$0x7f]  ;;  %v1336_v51 = vadd.f32 %v12108_v48, %v1239_v9  ;;  %v2208_v48 = vadd.f32 %v12171_v1, %v2158_v17  ;;  %v5616_v17 = vld [vmem:[%s13647_s8 + $0xc8] sm:$0xff] }
 0x37d   :  { %v6157_v0 = vld [vmem:[%s13649_s10 + $0xb7] sm:$0x7f]  ;;  %v4048_v27 = vadd.f32 %v4041_v55, %v4002_v32  ;;  %v4278_v5 = vadd.f32 %v4271_v54, %v4232_v33  ;;  %v4117_v33 = vadd.f32 %v4110_v13, %v4071_v42  ;;  %vm2592_vm1 = vcmp.gt.f32.partialorder %v5616_v17, 6.0 }
 0x37e   :  { %v6165_v28 = vld [vmem:[%s13649_s10 + $0xb8] sm:$0x7f]  ;;  %v14591_v29 = vld [vmem:[#allocation93_spill] sm:$0xff]  ;;  %v4340_v63 = vmul.f32 %v6157_v0, %v14593_v19  ;;  %v1368_v6 = vsub.f32 %v1336_v51, %v12131_v62  ;;  %v2258_v1 = vadd.f32 %v2242_v46, %v2208_v48 }
 0x37f   :  { %v14588_v24 = vld [vmem:[#allocation86_spill] sm:$0xff]  ;;  %v4294_v43 = vmul.f32 %v6141_v12, %v14591_v29  ;;  %v12287_v12 = vsel %vm1383_vm15, 1.0, %v11958_v49  ;;  %v4094_v0 = vadd.f32 %v4087_v39, %v4048_v27  ;;  %v14603_v39 = vld [vmem:[#allocation25_spill] sm:$0xff]  ;;  %v2671_v27 = vmul.f32 6.0, %v12194_v35 }
 0x380   :  { %v4133_v3 = vmul.f32 %v6086_v15, %v14588_v24  ;;  %v14592_v22 = vld [vmem:[#allocation94_spill] sm:$0xff]  ;;  %v14594_v24 = vld [vmem:[#allocation77_spill] sm:$0xff]  ;;  %14596 = vst [vmem:[#allocation71_spill] sm:$0xff] %v12287_v12  ;;  %1449 = vst [vmem:[#allocation2 + $0x181] sm:$0xff] %v12287_v12  ;;  %vm1384_vm0 = vcmp.gt.f32.partialorder %v1368_v6, 2.0  ;;  %v2308_v46 = vadd.f32 %v12222_v31, %v2258_v1 }
 0x381   :  { %v4317_v36 = vmul.f32 %v6149_v50, %v14592_v22  ;;  %v6196_v41 = vld [vmem:[%s13649_s10 + $0xb2] sm:$0x7f]  ;;  %v4363_v32 = vmul.f32 %v6165_v28, %v14594_v24  ;;  %v4301_v53 = vadd.f32 %v4294_v43, %v4255_v21  ;;  %v2458_v50 = vadd.f32 %v12141_v37, %v2407_v30  ;;  %v14599_v28 = vld [vmem:[#allocation43_spill] sm:$0xff]  ;;  %5558 = vst [vmem:[%s13651_s12 + $0xf8] sm:$0xff] %v1368_v6  ;;  %s12677_s12 = sld [smem:[#allocation10 + $0x55]] }
 0x382   :  { %v6204_v40 = vld [vmem:[%s13649_s10 + $0xb3] sm:$0x7f]  ;;  %v12315_v30 = vsel %vm1384_vm0, 1.0, %v11958_v49  ;;  %v2358_v31 = vadd.f32 %v12237_v16, %v2308_v46  ;;  %v14606_v16 = vld [vmem:[#allocation67_spill] sm:$0xff]  ;;  %v2194_v6 = vmul.f32 %v12001_v59, %v14569_v7  ;;  %v14609_v46 = vld [vmem:[#allocation68_spill] sm:$0xff]  ;;  %v2244_v59 = vmul.f32 %v12014_v44, %v10247_v38 }
 0x383   :  { %v6212_v15 = vld [vmem:[%s13649_s10 + $0xb4] sm:$0x7f]  ;;  %v4324_v37 = vadd.f32 %v4317_v36, %v4278_v5  ;;  %v4347_v13 = vadd.f32 %v4340_v63, %v4301_v53  ;;  %v12319_v36 = vadd.f32 %v4133_v3, %v4094_v0  ;;  %1450 = vst [vmem:[#allocation2 + $0x189] sm:$0xff] %v12315_v30  ;;  %v2143_v63 = vmul.f32 %v14577_v58, %v14566_v56 }
 0x384   :  { %v14595_v55 = vld [vmem:[#allocation78_spill] sm:$0xff]  ;;  %v12300_v43 = vmul.f32 %v6212_v15, %v14601_v20  ;;  %v12331_v15 = vadd.f32 %v4156_v61, %v4117_v33  ;;  %v2243_v58 = vmul.f32 %v14579_v8, %v10247_v38  ;;  %v2293_v0 = vmul.f32 %v14606_v16, %v10267_v60 }
 0x385   :  { %v4386_v34 = vmul.f32 %v6173_v11, %v14595_v55  ;;  %v6220_v54 = vld [vmem:[%s13649_s10 + $0xb5] sm:$0x7f]  ;;  %v12297_v11 = vmul.f32 %v6204_v40, %v14599_v28  ;;  %v2508_v55 = vadd.f32 %v12145_v26, %v2458_v50  ;;  %v2193_v40 = vmul.f32 %v14578_v2, %v14569_v7 }
 0x386   :  { %v14597_v9 = vld [vmem:[#allocation34_spill] sm:$0xff]  ;;  %14602 = vst [vmem:[#allocation74_spill] sm:$0xff] %v12300_v43  ;;  %v12304_v42 = vmul.f32 %v6220_v54, %v14603_v39  ;;  %v12336_v35 = vadd.f32 %v4363_v32, %v4324_v37  ;;  %v2159_v51 = vadd.f32 %v2143_v63, %v14220_v45  ;;  %v2408_v54 = vadd.f32 %v12241_v10, %v2358_v31 }
 0x387   :  { %v12294_v21 = vmul.f32 %v6196_v41, %v14597_v9  ;;  %14600 = vst [vmem:[#allocation63_spill] sm:$0xff] %v12297_v11  ;;  %v12309_v62 = vld [vmem:[#allocation2 + $0x158] sm:$0xff]  ;;  %v2558_v26 = vadd.f32 %v12149_v18, %v2508_v55  ;;  %v12342_v53 = vadd.f32 %v4386_v34, %v4347_v13  ;;  %v5632_v32 = vsel %vm2592_vm1, 1.0, %v11958_v49  ;;  %v12355_v34 = vld [vmem:[#allocation2 + $0x168] sm:$0xff] }
 0x388   :  { %14604 = vst [vmem:[#allocation75_spill] sm:$0xff] %v12304_v42  ;;  %v12323_v41 = vld [vmem:[#allocation2 + $0x159] sm:$0xff]  ;;  %v2443_v3 = vmul.f32 %v14544_v14, %v12309_v62  ;;  %v2209_v50 = vadd.f32 %v2193_v40, %v2159_v51  ;;  %v2640_v8 = vmul.f32 0.8, %v5616_v17  ;;  %v2144_v10 = vmul.f32 %v11978_v57, %v14566_v56  ;;  %v14607_v13 = vld [vmem:[#allocation76_spill] sm:$0xff] }
 0x389   :  { %14598 = vst [vmem:[#allocation81_spill] sm:$0xff] %v12294_v21  ;;  %v12325_v5 = vld [vmem:[#allocation2 + $0x15a] sm:$0xff]  ;;  %v2655_v18 = vadd.f32 %v12167_v4, %v2558_v26  ;;  %v2493_v61 = vmul.f32 %v14552_v25, %v12323_v41  ;;  %v2343_v17 = vmul.f32 %v14607_v13, %v14530_v47  ;;  %v12367_v26 = vld [vmem:[#allocation2 + $0x16a] sm:$0xff]  ;;  %v2393_v57 = vmul.f32 %v14609_v46, %v14536_v23  ;;  %v12403_v43 = vld [vmem:[#allocation2 + $0x172] sm:$0xff] }
 0x38a   :  { %v14605_v4 = vld [vmem:[#allocation47_spill] sm:$0xff]  ;;  %v2459_v48 = vadd.f32 %v2443_v3, %v2408_v54  ;;  %v2259_v1 = vadd.f32 %v2243_v58, %v2209_v50  ;;  %14608 = vst [vmem:[#allocation107_spill] sm:$0xff] %v12367_v26  ;;  %v2160_v63 = vadd.f32 %v2144_v10, %v14220_v45  ;;  %v2444_v31 = vmul.f32 %v14544_v14, %v12355_v34  ;;  %v14610_v51 = vld [vmem:[#allocation64_spill] sm:$0xff] }
 0x38b   :  { %v2687_v2 = vsub.f32 %v2655_v18, %v2671_v27  ;;  %v2543_v55 = vmul.f32 %v14605_v4, %v12325_v5  ;;  %v2672_v27 = vmul.f32 6.0, %v5632_v32  ;;  %v2494_v58 = vmul.f32 %v14610_v51, %v14552_v25 }
 0x38c   :  { %v2509_v18 = vadd.f32 %v2493_v61, %v2459_v48  ;;  %v2309_v3 = vadd.f32 %v2293_v0, %v2259_v1  ;;  %v2210_v54 = vadd.f32 %v2194_v6, %v2160_v63  ;;  %v2294_v44 = vmul.f32 %v12309_v62, %v10267_v60  ;;  %v12395_v63 = vld [vmem:[#allocation2 + $0x170] sm:$0xff] }
 0x38d   :  { %5663 = vst [vmem:[%s13652_s13 + $0xc0] sm:$0xff] %v2687_v2  ;;  %vm2703_vm2 = vcmp.gt.f32.partialorder %v2687_v2, 6.0  ;;  %v2544_v2 = vmul.f32 %v14605_v4, %v12367_v26  ;;  %v2145_v61 = vmul.f32 %v14606_v16, %v14566_v56  ;;  %v2344_v48 = vmul.f32 %v12323_v41, %v14530_v47 }
 0x38e   :  { %v5647_v37 = vsel %vm2703_vm2, 1.0, %v11958_v49  ;;  %v2559_v32 = vadd.f32 %v2543_v55, %v2509_v18  ;;  %v2359_v50 = vadd.f32 %v2343_v17, %v2309_v3  ;;  %v2260_v10 = vadd.f32 %v2244_v59, %v2210_v54 }
 0x38f   :  { %5679 = vst [vmem:[%s13649_s10 + $0xc0] sm:$0xff] %v5647_v37  ;;  %v2195_v37 = vmul.f32 %v14607_v13, %v14569_v7  ;;  %v2161_v55 = vadd.f32 %v2145_v61, %v14220_v45  ;;  %v2245_v17 = vmul.f32 %v14609_v46, %v10247_v38  ;;  %v2394_v59 = vmul.f32 %v12325_v5, %v14536_v23  ;;  %v12416_v61 = vld [vmem:[#allocation2 + $0x180] sm:$0xff] }
 0x390   :  { %v2656_v1 = vadd.f32 %v2640_v8, %v2559_v32  ;;  %v2409_v6 = vadd.f32 %v2393_v57, %v2359_v50  ;;  %v2310_v16 = vadd.f32 %v2294_v44, %v2260_v10  ;;  %v2295_v13 = vmul.f32 %v12355_v34, %v10267_v60  ;;  %14612 = vst [vmem:[#allocation29_spill] sm:$0xff] %v12416_v61 }
 0x391   :  { %v2211_v8 = vadd.f32 %v2195_v37, %v2161_v55  ;;  %v2445_v46 = vmul.f32 %v14544_v14, %v12395_v63  ;;  %v2345_v50 = vmul.f32 %v14610_v51, %v14530_v47  ;;  %v2545_v37 = vmul.f32 %v14605_v4, %v12403_v43 }
 0x392   :  { %v2688_v54 = vsub.f32 %v2656_v1, %v2672_v27  ;;  %v2460_v42 = vadd.f32 %v2444_v31, %v2409_v6  ;;  %v2360_v32 = vadd.f32 %v2344_v48, %v2310_v16  ;;  %v2446_v16 = vmul.f32 %v14544_v14, %v12416_v61 }
 0x393   :  { %v2261_v31 = vadd.f32 %v2245_v17, %v2211_v8  ;;  %v14613_v8 = vld [vmem:[#allocation88_spill] sm:$0xff] }
 0x394   :  { %v5617_v33 = vld [vmem:[%s13647_s8 + $0xd0] sm:$0xff]  ;;  %v5618_v40 = vld [vmem:[%s13647_s8 + $0xd8] sm:$0xff]  ;;  %vm2704_vm5 = vcmp.gt.f32.partialorder %v2688_v54, 6.0  ;;  %v2510_v27 = vadd.f32 %v2494_v58, %v2460_v42  ;;  %v2410_v55 = vadd.f32 %v2394_v59, %v2360_v32 }
 0x395   :  { %vm2593_vm3 = vcmp.gt.f32.partialorder %v5617_v33, 6.0  ;;  %vm2594_vm4 = vcmp.gt.f32.partialorder %v5618_v40, 6.0  ;;  %v2641_v18 = vmul.f32 0.8, %v5617_v33  ;;  %v14611_v33 = vld [vmem:[#allocation108_spill] sm:$0xff]  ;;  %5664 = vst [vmem:[%s13652_s13 + $0xc8] sm:$0xff] %v2688_v54  ;;  %v2311_v17 = vadd.f32 %v2295_v13, %v2261_v31 }
 0x396   :  { %v5633_v0 = vsel %vm2593_vm3, 1.0, %v11958_v49  ;;  %v5634_v3 = vsel %vm2594_vm4, 1.0, %v11958_v49  ;;  %v2495_v44 = vmul.f32 %v14611_v33, %v14552_v25  ;;  %v6102_v10 = vld [vmem:[%s13649_s10 + $0xc0] sm:$0x7f]  ;;  %v5648_v48 = vsel %vm2704_vm5, 1.0, %v11958_v49 }
 0x397   :  { %v2673_v57 = vmul.f32 6.0, %v5633_v0  ;;  %v2642_v42 = vmul.f32 0.8, %v5618_v40  ;;  %v12427_v58 = vmul.f32 6.0, %v5634_v3  ;;  %v6110_v51 = vld [vmem:[%s13649_s10 + $0xc1] sm:$0x7f]  ;;  %v2560_v6 = vadd.f32 %v2544_v2, %v2510_v27 }
 0x398   :  { %v6181_v1 = vld [vmem:[%s13649_s10 + $0xc0] sm:$0x7f]  ;;  %5680 = vst [vmem:[%s13649_s10 + $0xc8] sm:$0xff] %v5648_v48  ;;  %v2395_v40 = vmul.f32 %v12367_v26, %v14536_v23  ;;  %v2496_v3 = vmul.f32 %v12287_v12, %v14552_v25  ;;  %v2146_v54 = vmul.f32 %v12309_v62, %v14566_v56  ;;  %v4180_v11 = vmul.f32 %v6102_v10, %v14613_v8  ;;  %v14614_v27 = vld [vmem:[#allocation89_spill] sm:$0xff] }
 0x399   :  { %v6189_v2 = vld [vmem:[%s13649_s10 + $0xc1] sm:$0x7f]  ;;  %v2657_v59 = vadd.f32 %v2641_v18, %v2560_v6  ;;  %v2461_v13 = vadd.f32 %v2445_v46, %v2410_v55  ;;  %v2361_v32 = vadd.f32 %v2345_v50, %v2311_v17  ;;  %v4203_v31 = vmul.f32 %v6110_v51, %v14614_v27  ;;  %v14615_v48 = vld [vmem:[#allocation41_spill] sm:$0xff]  ;;  %v14616_v46 = vld [vmem:[#allocation42_spill] sm:$0xff] }
 0x39a   :  { %v4410_v21 = vmul.f32 %v6181_v1, %v14615_v48  ;;  %v2162_v61 = vadd.f32 %v2146_v54, %v14220_v45  ;;  %v2196_v12 = vmul.f32 %v12323_v41, %v14569_v7  ;;  %v12455_v10 = vld [vmem:[#allocation2 + $0x182] sm:$0xff]  ;;  %v4187_v18 = vadd.f32 %v4180_v11, %v12319_v36 }
 0x39b   :  { %v2689_v39 = vsub.f32 %v2657_v59, %v2673_v57  ;;  %v2511_v62 = vadd.f32 %v2495_v44, %v2461_v13  ;;  %v2411_v26 = vadd.f32 %v2395_v40, %v2361_v32  ;;  %v4433_v50 = vmul.f32 %v6189_v2, %v14616_v46  ;;  %v12469_v44 = vld [vmem:[#allocation2 + $0x188] sm:$0xff] }
 0x39c   :  { %v5619_v0 = vld [vmem:[%s13647_s8 + $0xe0] sm:$0xff]  ;;  %v2212_v6 = vadd.f32 %v2196_v12, %v2162_v61  ;;  %v2246_v51 = vmul.f32 %v12325_v5, %v10247_v38  ;;  %v4210_v1 = vadd.f32 %v4203_v31, %v12331_v15  ;;  %v12464_v55 = vadd.f32 %v4410_v21, %v12336_v35  ;;  %v2179_v11 = vld [vmem:[#allocation2 + $0x169] sm:$0xff]  ;;  %v14617_v31 = vld [vmem:[#allocation90_spill] sm:$0xff] }
 0x39d   :  { %vm2595_vm6 = vcmp.gt.f32.partialorder %v5619_v0, 6.0  ;;  %5665 = vst [vmem:[%s13652_s13 + $0xd0] sm:$0xff] %v2689_v39  ;;  %v2561_v41 = vadd.f32 %v2545_v37, %v2511_v62  ;;  %v2462_v57 = vadd.f32 %v2446_v16, %v2411_v26  ;;  %v12472_v36 = vadd.f32 %v4433_v50, %v12342_v53  ;;  %v12479_v35 = vld [vmem:[#allocation2 + $0x18a] sm:$0xff] }
 0x39e   :  { %v5635_v8 = vsel %vm2595_vm6, 1.0, %v11958_v49  ;;  %v2546_v21 = vmul.f32 %v14605_v4, %v12455_v10  ;;  %v2643_v5 = vmul.f32 0.8, %v5619_v0  ;;  %v2296_v17 = vmul.f32 %v12395_v63, %v10267_v60 }
 0x39f   :  { %v6118_v12 = vld [vmem:[%s13649_s10 + $0xc2] sm:$0x7f]  ;;  %v2675_v15 = vmul.f32 6.0, %v5635_v8  ;;  %v2658_v37 = vadd.f32 %v2642_v42, %v2561_v41  ;;  %v2346_v0 = vmul.f32 %v14611_v33, %v14530_v47  ;;  %v2396_v40 = vmul.f32 %v12403_v43, %v14536_v23  ;;  %v6174_v41 = vld [vmem:[%s13649_s10 + $0xc9] sm:$0x7f] }
 0x3a0   :  { %v6126_v26 = vld [vmem:[%s13649_s10 + $0xc3] sm:$0x7f]  ;;  %vm2705_vm7 = vcmp.gt.f32.partialorder %v2689_v39, 6.0  ;;  %v2512_v2 = vadd.f32 %v2496_v3, %v2462_v57  ;;  %v2262_v42 = vadd.f32 %v2246_v51, %v2212_v6  ;;  %v2447_v59 = vmul.f32 %v14544_v14, %v12469_v44  ;;  %v14619_v39 = vld [vmem:[#allocation78_spill] sm:$0xff] }
 0x3a1   :  { %v6134_v53 = vld [vmem:[%s13649_s10 + $0xc4] sm:$0x7f]  ;;  %v2497_v33 = vmul.f32 %v12315_v30, %v14552_v25  ;;  %v12508_v13 = vmul.f32 %v14605_v4, %v12479_v35  ;;  %v2147_v32 = vmul.f32 %v12355_v34, %v14566_v56  ;;  %v2197_v27 = vmul.f32 %v14569_v7, %v2179_v11 }
 0x3a2   :  { %v6142_v61 = vld [vmem:[%s13649_s10 + $0xc5] sm:$0x7f]  ;;  %v4226_v62 = vmul.f32 %v6118_v12, %v14617_v31  ;;  %v4272_v50 = vmul.f32 %v6134_v53, %v14589_v52  ;;  %v5649_v12 = vsel %vm2705_vm7, 1.0, %v11958_v49 }
 0x3a3   :  { %v6150_v16 = vld [vmem:[%s13649_s10 + $0xc6] sm:$0x7f]  ;;  %v4295_v6 = vmul.f32 %v6142_v61, %v14591_v29  ;;  %v2690_v29 = vsub.f32 %v2658_v37, %v12427_v58  ;;  %5681 = vst [vmem:[%s13649_s10 + $0xd0] sm:$0xff] %v5649_v12  ;;  %v14624_v12 = vld [vmem:[#allocation29_spill] sm:$0xff] }
 0x3a4   :  { %v6158_v54 = vld [vmem:[%s13649_s10 + $0xc7] sm:$0x7f]  ;;  %v4318_v57 = vmul.f32 %v6150_v16, %v14592_v22  ;;  %v2562_v22 = vadd.f32 %v2546_v21, %v2512_v2 }
 0x3a5   :  { %v14618_v8 = vld [vmem:[#allocation91_spill] sm:$0xff]  ;;  %v6166_v51 = vld [vmem:[%s13649_s10 + $0xc8] sm:$0x7f]  ;;  %v4341_v11 = vmul.f32 %v6158_v54, %v14593_v19  ;;  %v2312_v19 = vadd.f32 %v2296_v17, %v2262_v42  ;;  %vm2706_vm8 = vcmp.gt.f32.partialorder %v2690_v29, 6.0  ;;  %v2163_v42 = vadd.f32 %v2147_v32, %v14220_v45 }
 0x3a6   :  { %v4249_v3 = vmul.f32 %v6126_v26, %v14618_v8  ;;  %v6197_v34 = vld [vmem:[%s13649_s10 + $0xc2] sm:$0x7f]  ;;  %v4233_v26 = vadd.f32 %v4226_v62, %v4187_v18  ;;  %v12544_v58 = vmul.f32 %v6166_v51, %v14594_v24  ;;  %v12547_v18 = vmul.f32 %v6174_v41, %v14619_v39  ;;  %v14622_v41 = vld [vmem:[#allocation25_spill] sm:$0xff] }
 0x3a7   :  { %v6205_v52 = vld [vmem:[%s13649_s10 + $0xc3] sm:$0x7f]  ;;  %v5650_v24 = vsel %vm2706_vm8, 1.0, %v11958_v49  ;;  %v2659_v17 = vadd.f32 %v2643_v5, %v2562_v22  ;;  %v2362_v54 = vadd.f32 %v2346_v0, %v2312_v19  ;;  %v2397_v39 = vmul.f32 %v12455_v10, %v14536_v23 }
 0x3a8   :  { %v4256_v53 = vadd.f32 %v4249_v3, %v4210_v1  ;;  %v6213_v61 = vld [vmem:[%s13649_s10 + $0xc4] sm:$0x7f]  ;;  %v12550_v1 = vmul.f32 %v6197_v34, %v14597_v9  ;;  %v12556_v21 = vmul.f32 %v6205_v52, %v14599_v28  ;;  %5682 = vst [vmem:[%s13649_s10 + $0xd8] sm:$0xff] %v5650_v24  ;;  %v4279_v3 = vadd.f32 %v4272_v50, %v4233_v26  ;;  %v2180_v50 = vld [vmem:[#allocation2 + $0x171] sm:$0xff]  ;;  %v2530_v24 = vld [vmem:[#allocation2 + $0x19a] sm:$0xff] }
 0x3a9   :  { %v5620_v16 = vld [vmem:[%s13647_s8 + $0xe8] sm:$0xff]  ;;  %v12563_v2 = vmul.f32 %v6213_v61, %v14601_v20  ;;  %v14621_v31 = vld [vmem:[#allocation107_spill] sm:$0xff]  ;;  %v2691_v0 = vsub.f32 %v2659_v17, %v2675_v15  ;;  %v2412_v51 = vadd.f32 %v2396_v40, %v2362_v54  ;;  %v2297_v61 = vmul.f32 %v14624_v12, %v10267_v60 }
 0x3aa   :  { %5666 = vst [vmem:[%s13652_s13 + $0xd8] sm:$0xff] %v2690_v29  ;;  %v6221_v37 = vld [vmem:[%s13649_s10 + $0xc5] sm:$0x7f]  ;;  %vm2596_vm9 = vcmp.gt.f32.partialorder %v5620_v16, 6.0  ;;  %v2247_v62 = vmul.f32 %v14621_v31, %v10247_v38  ;;  %v4302_v5 = vadd.f32 %v4295_v6, %v4256_v53  ;;  %v2644_v52 = vmul.f32 0.8, %v5620_v16 }
 0x3ab   :  { %14620 = vst [vmem:[#allocation109_spill] sm:$0xff] %v12563_v2  ;;  %v12575_v34 = vmul.f32 %v6221_v37, %v14622_v41  ;;  %v2213_v29 = vadd.f32 %v2197_v27, %v2163_v42  ;;  %v2463_v32 = vadd.f32 %v2447_v59, %v2412_v51  ;;  %v5636_v22 = vsel %vm2596_vm9, 1.0, %v11958_v49  ;;  %v14625_v6 = vld [vmem:[#allocation71_spill] sm:$0xff]  ;;  %v2430_v27 = vld [vmem:[#allocation2 + $0x198] sm:$0xff] }
 0x3ac   :  { %vm2707_vm10 = vcmp.gt.f32.partialorder %v2691_v0, 6.0  ;;  %v2347_v26 = vmul.f32 %v14625_v6, %v14530_v47  ;;  %v2148_v53 = vmul.f32 %v12395_v63, %v14566_v56  ;;  %v12588_v19 = vadd.f32 %v4318_v57, %v4279_v3  ;;  %v2480_v37 = vld [vmem:[#allocation2 + $0x199] sm:$0xff]  ;;  %v2481_v3 = vld [vmem:[#allocation2 + $0x1a1] sm:$0xff] }
 0x3ad   :  { %14623 = vst [vmem:[#allocation33_spill] sm:$0xff] %v12575_v34  ;;  %v5651_v15 = vsel %vm2707_vm10, 1.0, %v11958_v49  ;;  %v2263_v40 = vadd.f32 %v2247_v62, %v2213_v29  ;;  %v12590_v16 = vadd.f32 %v4341_v11, %v4302_v5  ;;  %v2513_v59 = vadd.f32 %v2497_v33, %v2463_v32  ;;  %v14654_v34 = vld [vmem:[#allocation23_spill] sm:$0xff] }
 0x3ae   :  { %5683 = vst [vmem:[%s13649_s10 + $0xe0] sm:$0xff] %v5651_v15  ;;  %v2164_v42 = vadd.f32 %v2148_v53, %v14220_v45  ;;  %v2198_v56 = vmul.f32 %v14569_v7, %v2180_v50  ;;  %v2676_v57 = vmul.f32 6.0, %v5636_v22  ;;  %v2448_v33 = vmul.f32 %v14544_v14, %v2430_v27  ;;  %v2531_v7 = vld [vmem:[#allocation2 + $0x1a2] sm:$0xff]  ;;  %v14629_v15 = vld [vmem:[#allocation46_spill] sm:$0xff] }
 0x3af   :  { %v2313_v17 = vadd.f32 %v2297_v61, %v2263_v40  ;;  %v2563_v63 = vadd.f32 %v12508_v13, %v2513_v59  ;;  %v2248_v11 = vmul.f32 %v12403_v43, %v10247_v38  ;;  %v2498_v31 = vmul.f32 %v14552_v25, %v2480_v37  ;;  %v14628_v50 = vld [vmem:[#allocation103_spill] sm:$0xff]  ;;  %v14630_v53 = vld [vmem:[#allocation48_spill] sm:$0xff] }
 0x3b0   :  { %v2548_v62 = vmul.f32 %v14605_v4, %v2530_v24  ;;  %v2298_v38 = vmul.f32 %v12469_v44, %v10267_v60  ;;  %v2348_v51 = vmul.f32 %v12315_v30, %v14530_v47  ;;  %v2449_v29 = vmul.f32 %v11958_v49, %v14544_v14  ;;  %v6224_v60 = vld [vmem:[%s13649_s10 + $0x76] sm:$0x7f]  ;;  %v14631_v24 = vld [vmem:[#allocation36_spill] sm:$0xff] }
 0x3b1   :  { %v5621_v8 = vld [vmem:[%s13647_s8 + $0xf0] sm:$0xff]  ;;  %v2363_v10 = vadd.f32 %v2347_v26, %v2313_v17  ;;  %v2660_v13 = vadd.f32 %v2644_v52, %v2563_v63  ;;  %v2398_v52 = vmul.f32 %v12479_v35, %v14536_v23  ;;  %v2499_v61 = vmul.f32 %v14552_v25, %v2481_v3  ;;  %v14626_v30 = vld [vmem:[#allocation102_spill] sm:$0xff] }
 0x3b2   :  { %5667 = vst [vmem:[%s13652_s13 + $0xe0] sm:$0xff] %v2691_v0  ;;  %vm2597_vm11 = vcmp.gt.f32.partialorder %v5621_v8, 6.0  ;;  %v2645_v45 = vmul.f32 0.8, %v5621_v8  ;;  %v2214_v0 = vadd.f32 %v2198_v56, %v2164_v42  ;;  %v12634_v32 = vmul.f32 %v14605_v4, %v2531_v7  ;;  %v6232_v47 = vld [vmem:[%s13649_s10 + $0x77] sm:$0x7f] }
 0x3b3   :  { %v5637_v54 = vsel %vm2597_vm11, 1.0, %v11958_v49  ;;  %v2413_v8 = vadd.f32 %v2397_v39, %v2363_v10  ;;  %v2692_v44 = vsub.f32 %v2660_v13, %v2676_v57  ;;  %v14627_v35 = vld [vmem:[#allocation45_spill] sm:$0xff]  ;;  %v4481_v40 = vadd.f32 %v14629_v15, %v14628_v50  ;;  %v6240_v39 = vld [vmem:[%s13649_s10 + $0x78] sm:$0x7f]  ;;  %v6264_v7 = vld [vmem:[%s13649_s10 + $0x81] sm:$0x7f] }
 0x3b4   :  { %v12612_v5 = vmul.f32 6.0, %v5637_v54  ;;  %v2264_v12 = vadd.f32 %v2248_v11, %v2214_v0  ;;  %v4458_v22 = vadd.f32 %v14627_v35, %v14626_v30  ;;  %v12669_v54 = vstv %s12604_s0  ;;  %v6248_v42 = vld [vmem:[%s13649_s10 + $0x79] sm:$0x7f]  ;;  %v6256_v11 = vld [vmem:[%s13649_s10 + $0x80] sm:$0x7f]  ;;  %s12699_s0 = sld [smem:[#allocation10 + $0x57]] }
 0x3b5   :  { %v2464_v23 = vadd.f32 %v2448_v33, %v2413_v8  ;;  %vm2708_vm13 = vcmp.gt.f32.partialorder %v2692_v44, 6.0  ;;  %v4527_v17 = vadd.f32 %v14631_v24, %v4481_v40  ;;  %v4543_v63 = vmul.f32 %v6224_v60, %v12669_v54  ;;  %v6272_v8 = vld [vmem:[%s13649_s10 + $0x82] sm:$0x7f] }
 0x3b6   :  { %v2314_v25 = vadd.f32 %v2298_v38, %v2264_v12  ;;  %v5652_v6 = vsel %vm2708_vm13, 1.0, %v11958_v49  ;;  %v4504_v59 = vadd.f32 %v14630_v53, %v4458_v22  ;;  %v12682_v33 = vstv %s12610_s30  ;;  %v6288_v30 = vld [vmem:[%s13649_s10 + $0x84] sm:$0x7f] }
 0x3b7   :  { %v2514_v26 = vadd.f32 %v2498_v31, %v2464_v23  ;;  %5684 = vst [vmem:[%s13649_s10 + $0xe8] sm:$0xff] %v5652_v6  ;;  %v4589_v31 = vmul.f32 %v6240_v39, %v12682_v33  ;;  %v12691_v3 = vstv %s12619_s25  ;;  %v6304_v40 = vld [vmem:[%s13649_s10 + $0x86] sm:$0x7f] }
 0x3b8   :  { %v2364_v37 = vadd.f32 %v2348_v51, %v2314_v25  ;;  %v4550_v0 = vadd.f32 %v4543_v63, %v4504_v59  ;;  %v12730_v25 = vstv %s12653_s6  ;;  %v6312_v6 = vld [vmem:[%s13649_s10 + $0x87] sm:$0x7f] }
 0x3b9   :  { %v5622_v43 = vld [vmem:[%s13647_s8 + $0xf8] sm:$0xff]  ;;  %s12636_s8 = sld [smem:[#allocation10 + $0x51]]  ;;  %v2564_v56 = vadd.f32 %v2548_v62, %v2514_v26  ;;  %v12694_v62 = vstv %s12621_s7  ;;  %v12753_v53 = vld [vmem:[#allocation2 + $0x8] sm:$0xff]  ;;  %s12797_s7 = sld [smem:[#allocation10 + $0x62]] }
 0x3ba   :  { %vm2598_vm12 = vcmp.gt.f32.partialorder %v5622_v43, 6.0  ;;  %v12643_v14 = vmul.f32 0.8, %v5622_v43  ;;  %5668 = vst [vmem:[%s13652_s13 + $0xe8] sm:$0xff] %v2692_v44  ;;  %v2414_v10 = vadd.f32 %v2398_v52, %v2364_v37  ;;  %v4612_v43 = vmul.f32 %v6248_v42, %v12691_v3 }
 0x3bb   :  { %v5638_v4 = vsel %vm2598_vm12, 1.0, %v11958_v49  ;;  %v12672_v49 = vstv %s12606_s2  ;;  %s12701_s2 = sld [smem:[#allocation10 + $0x58]]  ;;  %v2661_v13 = vadd.f32 %v2645_v45, %v2564_v56  ;;  %v4635_v52 = vmul.f32 %v6256_v11, %v12694_v62  ;;  %v6280_v45 = vld [vmem:[%s13649_s10 + $0x83] sm:$0x7f] }
 0x3bc   :  { %v12658_v27 = vmul.f32 6.0, %v5638_v4  ;;  %v4566_v57 = vmul.f32 %v6232_v47, %v12672_v49  ;;  %v2465_v51 = vadd.f32 %v2449_v29, %v2414_v10  ;;  %v12714_v44 = vstv %s12638_s3  ;;  %v6320_v11 = vld [vmem:[%s13649_s10 + $0x88] sm:$0x7f] }
 0x3bd   :  { %v2693_v12 = vsub.f32 %v2661_v13, %v12612_v5  ;;  %v4596_v47 = vadd.f32 %v4589_v31, %v4550_v0  ;;  %v4681_v22 = vmul.f32 %v6272_v8, %v12714_v44  ;;  %v12733_v4 = vstv %s12655_s18  ;;  %v6296_v5 = vld [vmem:[%s13649_s10 + $0x85] sm:$0x7f]  ;;  %v6336_v13 = vld [vmem:[%s13649_s10 + $0x90] sm:$0x7f] }
 0x3be   :  { %v4573_v38 = vadd.f32 %v4566_v57, %v4527_v17  ;;  %v2515_v35 = vadd.f32 %v2499_v61, %v2465_v51  ;;  %v4704_v15 = vmul.f32 %v6280_v45, %v12730_v25  ;;  %v4727_v39 = vmul.f32 %v6288_v30, %v12733_v4  ;;  %v6328_v31 = vld [vmem:[%s13649_s10 + $0x89] sm:$0x7f]  ;;  %v6344_v8 = vld [vmem:[%s13649_s10 + $0x91] sm:$0x7f] }
 0x3bf   :  { %v12711_v60 = vstv %s12636_s8  ;;  %5669 = vst [vmem:[%s13652_s13 + $0xf0] sm:$0xff] %v2693_v12  ;;  %vm2709_vm14 = vcmp.gt.f32.partialorder %v2693_v12, 6.0  ;;  %v4642_v61 = vadd.f32 %v4635_v52, %v4596_v47  ;;  %v12758_v37 = vstv %s12677_s12  ;;  %v6360_v30 = vld [vmem:[%s13649_s10 + $0x93] sm:$0x7f] }
 0x3c0   :  { %v4619_v23 = vadd.f32 %v4612_v43, %v4573_v38  ;;  %v4658_v29 = vmul.f32 %v6264_v7, %v12711_v60  ;;  %v2565_v26 = vadd.f32 %v12634_v32, %v2515_v35  ;;  %v5653_v59 = vsel %vm2709_vm14, 1.0, %v12753_v53 }
 0x3c1   :  { %5685 = vst [vmem:[%s13649_s10 + $0xf0] sm:$0xff] %v5653_v59  ;;  %v4688_v24 = vadd.f32 %v4681_v22, %v4642_v61  ;;  %v4750_v32 = vmul.f32 %v6296_v5, %v12758_v37  ;;  %v12769_v42 = vstv %s12687_s28  ;;  %v12775_v56 = vadd.f32 %v12544_v58, %v12588_v19  ;;  %v6368_v22 = vld [vmem:[%s13649_s10 + $0x94] sm:$0x7f] }
 0x3c2   :  { %v4665_v50 = vadd.f32 %v4658_v29, %v4619_v23  ;;  %v2662_v63 = vadd.f32 %v12643_v14, %v2565_v26  ;;  %v12779_v57 = vstv %s12699_s0  ;;  %v12785_v10 = vstv %s12701_s2  ;;  %s12799_s2 = sld [smem:[#allocation10 + $0x63]]  ;;  %v6182_v5 = vld [vmem:[%s13649_s10 + $0xd0] sm:$0x7f] }
 0x3c3   :  { %v4734_v58 = vadd.f32 %v4727_v39, %v4688_v24  ;;  %v4773_v7 = vmul.f32 %v6304_v40, %v12769_v42  ;;  %v4796_v14 = vmul.f32 %v6312_v6, %v12779_v57  ;;  %v12803_v38 = vstv %s12707_s1  ;;  %v6376_v6 = vld [vmem:[%s13649_s10 + $0x95] sm:$0x7f]  ;;  %s14646_s1 = sld [smem:[#allocation111_spill]] }
 0x3c4   :  { %v4711_v17 = vadd.f32 %v4704_v15, %v4665_v50  ;;  %v2694_v0 = vsub.f32 %v2662_v63, %v12658_v27  ;;  %v12806_v43 = vstv %s12719_s16  ;;  %v12812_v51 = vstv %s12721_s14  ;;  %v6352_v27 = vld [vmem:[%s13649_s10 + $0x92] sm:$0x7f] }
 0x3c5   :  { %v4780_v52 = vadd.f32 %v4773_v7, %v4734_v58  ;;  %v4819_v12 = vmul.f32 %v6320_v11, %v12785_v10  ;;  %v4842_v47 = vmul.f32 %v6328_v31, %v12803_v38  ;;  %v4866_v23 = vmul.f32 %v6336_v13, %v12806_v43  ;;  %v6392_v31 = vld [vmem:[%s13649_s10 + $0x97] sm:$0x7f]  ;;  %v6225_v58 = vld [vmem:[%s13649_s10 + $0x86] sm:$0x7f] }
 0x3c6   :  { %v4757_v19 = vadd.f32 %v4750_v32, %v4711_v17  ;;  %5670 = vst [vmem:[%s13652_s13 + $0xf8] sm:$0xff] %v2694_v0  ;;  %vm2710_vm15 = vcmp.gt.f32.partialorder %v2694_v0, 6.0  ;;  %v12824_v29 = vstv %s12738_s29  ;;  %v12830_v35 = vstv %s12740_s22  ;;  %v6190_v17 = vld [vmem:[%s13649_s10 + $0xd1] sm:$0x7f] }
 0x3c7   :  { %v5654_v61 = vsel %vm2710_vm15, 1.0, %v12753_v53  ;;  %v4826_v50 = vadd.f32 %v4819_v12, %v4780_v52  ;;  %v4889_v40 = vmul.f32 %v6344_v8, %v12812_v51  ;;  %v4394_v26 = vadd.f32 %v12547_v18, %v12590_v16  ;;  %v6384_v16 = vld [vmem:[%s13649_s10 + $0x96] sm:$0x7f] }
 0x3c8   :  { %v4803_v45 = vadd.f32 %v4796_v14, %v4757_v19  ;;  %5686 = vst [vmem:[%s13649_s10 + $0xf8] sm:$0xff] %v5654_v61  ;;  %v4912_v59 = vmul.f32 %v6352_v27, %v12824_v29  ;;  %v12850_v39 = vstv %s12760_s24  ;;  %v12853_v24 = vstv %s12762_s19  ;;  %v6233_v27 = vld [vmem:[%s13649_s10 + $0x87] sm:$0x7f]  ;;  %v14634_v61 = vld [vmem:[#allocation49_spill] sm:$0xff]  ;;  %s14643_s19 = sld [smem:[#allocation112_spill]] }
 0x3c9   :  { %v4873_v32 = vadd.f32 %v4866_v23, %v4826_v50  ;;  %v4935_v18 = vmul.f32 %v6360_v30, %v12830_v35  ;;  %v12863_v11 = vstv %s12771_s23  ;;  %v4411_v19 = vmul.f32 %v6182_v5, %v14615_v48  ;;  %s14632_s23 = sld [smem:[#allocation110_spill]]  ;;  %v6408_v48 = vld [vmem:[%s13649_s10 + $0x99] sm:$0x7f] }
 0x3ca   :  { %v4849_v15 = vadd.f32 %v4842_v47, %v4803_v45  ;;  %v4958_v7 = vmul.f32 %v6368_v22, %v12850_v39  ;;  %v4981_v14 = vmul.f32 %v6376_v6, %v12853_v24  ;;  %v12875_v13 = vstv %s12790_s27  ;;  %v6400_v45 = vld [vmem:[%s13649_s10 + $0x98] sm:$0x7f]  ;;  %v14635_v6 = vld [vmem:[#allocation101_spill] sm:$0xff] }
 0x3cb   :  { %v4919_v8 = vadd.f32 %v4912_v59, %v4873_v32  ;;  %v12884_v12 = vstv %s12797_s7  ;;  %v12890_v47 = vstv %s12799_s2  ;;  %v4434_v23 = vmul.f32 %v6190_v17, %v14616_v46  ;;  %v14633_v5 = vld [vmem:[#allocation106_spill] sm:$0xff]  ;;  %v14637_v17 = vld [vmem:[#allocation51_spill] sm:$0xff] }
 0x3cc   :  { %v4896_v63 = vadd.f32 %v4889_v40, %v4849_v15  ;;  %v5004_v30 = vmul.f32 %v6384_v16, %v12863_v11  ;;  %v5027_v22 = vmul.f32 %v6392_v31, %v12875_v13  ;;  %v4459_v50 = vadd.f32 %v14634_v61, %v14633_v5  ;;  %v14636_v59 = vld [vmem:[#allocation50_spill] sm:$0xff] }
 0x3cd   :  { %v4965_v15 = vadd.f32 %v4958_v7, %v4919_v8  ;;  %v4482_v32 = vadd.f32 %v14636_v59, %v14635_v6  ;;  %v5073_v46 = vmul.f32 %v6408_v48, %v12890_v47  ;;  %v4544_v31 = vmul.f32 %v6225_v58, %v12669_v54  ;;  %v6249_v7 = vld [vmem:[%s13649_s10 + $0x89] sm:$0x7f]  ;;  %v6265_v59 = vld [vmem:[%s13649_s10 + $0x91] sm:$0x7f] }
 0x3ce   :  { %v4942_v52 = vadd.f32 %v4935_v18, %v4896_v63  ;;  %v6241_v63 = vld [vmem:[%s13649_s10 + $0x88] sm:$0x7f]  ;;  %v5050_v18 = vmul.f32 %v6400_v45, %v12884_v12  ;;  %v4505_v16 = vadd.f32 %v14637_v17, %v4459_v50  ;;  %v4567_v61 = vmul.f32 %v6233_v27, %v12672_v49  ;;  %v6257_v45 = vld [vmem:[%s13649_s10 + $0x90] sm:$0x7f] }
 0x3cf   :  { %v5094_v0 = vld [vmem:[%s14632_s23] sm:$0x7f]  ;;  %v4590_v58 = vmul.f32 %v6241_v63, %v12682_v33  ;;  %v6206_v27 = vld [vmem:[%s13649_s10 + $0xd3] sm:$0x7f]  ;;  %v12933_v63 = vadd.f32 %v4411_v19, %v12775_v56  ;;  %v12935_v17 = vadd.f32 %v4434_v23, %v4394_v26  ;;  %v4659_v26 = vmul.f32 %v6265_v59, %v12711_v60 }
 0x3d0   :  { %v4988_v40 = vadd.f32 %v4981_v14, %v4942_v52  ;;  %vm5101_vm0 = vcmp.gt.f32.partialorder %v5094_v0, 2.0  ;;  %v5011_v14 = vadd.f32 %v5004_v30, %v4965_v15  ;;  %v14638_v52 = vld [vmem:[#allocation53_spill] sm:$0xff]  ;;  %v5122_v6 = vmul.f32 0.8, %v5094_v0 }
 0x3d1   :  { %v4528_v5 = vadd.f32 %v14638_v52, %v4482_v32  ;;  %v6416_v48 = vsel %vm5101_vm0, 1.0, %v12753_v53  ;;  %v4551_v50 = vadd.f32 %v4544_v31, %v4505_v16  ;;  %v6198_v30 = vld [vmem:[%s13649_s10 + $0xd2] sm:$0x7f]  ;;  %v4613_v0 = vmul.f32 %v6249_v7, %v12691_v3  ;;  %14639 = vst [vmem:[#allocation14_spill] sm:$0xff] %v12933_v63  ;;  %14640 = vst [vmem:[#allocation38_spill] sm:$0xff] %v12935_v17 }
 0x3d2   :  { %v5034_v8 = vadd.f32 %v5027_v22, %v4988_v40  ;;  %v5057_v22 = vadd.f32 %v5050_v18, %v5011_v14  ;;  %v6273_v32 = vld [vmem:[%s13649_s10 + $0x92] sm:$0x7f]  ;;  %v4636_v31 = vmul.f32 %v6257_v45, %v12694_v62  ;;  %v5136_v56 = vmul.f32 2.0, %v6416_v48 }
 0x3d3   :  { %v4574_v40 = vadd.f32 %v4567_v61, %v4528_v5  ;;  %v4597_v16 = vadd.f32 %v4590_v58, %v4551_v50  ;;  %v6281_v18 = vld [vmem:[%s13649_s10 + $0x93] sm:$0x7f]  ;;  %v12955_v52 = vmul.f32 %v6198_v30, %v14597_v9  ;;  %v12958_v5 = vmul.f32 %v6206_v27, %v14599_v28  ;;  %v6337_v28 = vld [vmem:[%s13649_s10 + $0xa0] sm:$0x7f] }
 0x3d4   :  { %v5080_v15 = vadd.f32 %v5073_v46, %v5034_v8  ;;  %v6289_v46 = vld [vmem:[%s13649_s10 + $0x94] sm:$0x7f]  ;;  %v4682_v45 = vmul.f32 %v6273_v32, %v12714_v44  ;;  %v6345_v30 = vld [vmem:[%s13649_s10 + $0xa1] sm:$0x7f] }
 0x3d5   :  { %v6297_v7 = vld [vmem:[%s13649_s10 + $0x95] sm:$0x7f]  ;;  %v4620_v19 = vadd.f32 %v4613_v0, %v4574_v40  ;;  %14641 = vst [vmem:[#allocation62_spill] sm:$0xff] %v12955_v52  ;;  %14642 = vst [vmem:[#allocation97_spill] sm:$0xff] %v12958_v5  ;;  %v4643_v61 = vadd.f32 %v4636_v31, %v4597_v16  ;;  %v4728_v9 = vmul.f32 %v6289_v46, %v12733_v4  ;;  %v6353_v27 = vld [vmem:[%s13649_s10 + $0xa2] sm:$0x7f] }
 0x3d6   :  { %v5087_v14 = vadd.f32 %v5080_v15, %v5057_v22  ;;  %v6305_v23 = vld [vmem:[%s13649_s10 + $0x96] sm:$0x7f]  ;;  %v4705_v22 = vmul.f32 %v6281_v18, %v12730_v25  ;;  %v6361_v32 = vld [vmem:[%s13649_s10 + $0xa3] sm:$0x7f] }
 0x3d7   :  { %v6313_v8 = vld [vmem:[%s13649_s10 + $0x97] sm:$0x7f]  ;;  %v4666_v59 = vadd.f32 %v4659_v26, %v4620_v19  ;;  %v4689_v15 = vadd.f32 %v4682_v45, %v4643_v61  ;;  %v4774_v40 = vmul.f32 %v6305_v23, %v12769_v42  ;;  %v6369_v16 = vld [vmem:[%s13649_s10 + $0xa4] sm:$0x7f]  ;;  %v4867_v26 = vmul.f32 %v6337_v28, %v12806_v43 }
 0x3d8   :  { %v6321_v48 = vld [vmem:[%s13649_s10 + $0x98] sm:$0x7f]  ;;  %v5129_v58 = vadd.f32 %v5122_v6, %v5087_v14  ;;  %v4751_v6 = vmul.f32 %v6297_v7, %v12758_v37  ;;  %v4797_v0 = vmul.f32 %v6313_v8, %v12779_v57  ;;  %v6377_v7 = vld [vmem:[%s13649_s10 + $0xa5] sm:$0x7f]  ;;  %v4890_v23 = vmul.f32 %v6345_v30, %v12812_v51  ;;  %v14653_v63 = vld [vmem:[#allocation73_spill] sm:$0xff] }
 0x3d9   :  { %v6329_v50 = vld [vmem:[%s13649_s10 + $0x99] sm:$0x7f]  ;;  %v4712_v18 = vadd.f32 %v4705_v22, %v4666_v59  ;;  %v4820_v46 = vmul.f32 %v6321_v48, %v12785_v10  ;;  %v4735_v19 = vadd.f32 %v4728_v9, %v4689_v15  ;;  %v4913_v8 = vmul.f32 %v6353_v27, %v12824_v29  ;;  %v5095_v61 = vld [vmem:[%s14632_s23 + $0x8] sm:$0x7f]  ;;  %v14648_v5 = vld [vmem:[#allocation31_spill] sm:$0xff] }
 0x3da   :  { %v5143_v31 = vsub.f32 %v5129_v58, %v5136_v56  ;;  %v4843_v14 = vmul.f32 %v6329_v50, %v12803_v38  ;;  %v6385_v56 = vld [vmem:[%s13649_s10 + $0xa6] sm:$0x7f]  ;;  %v6226_v45 = vld [vmem:[%s13649_s10 + $0x96] sm:$0x7f]  ;;  %v4936_v50 = vmul.f32 %v6361_v32, %v12830_v35  ;;  %v4959_v58 = vmul.f32 %v6369_v16, %v12850_v39 }
 0x3db   :  { %v4758_v48 = vadd.f32 %v4751_v6, %v4712_v18  ;;  %v6393_v59 = vld [vmem:[%s13649_s10 + $0xa7] sm:$0x7f]  ;;  %v6234_v22 = vld [vmem:[%s13649_s10 + $0x97] sm:$0x7f]  ;;  %v4781_v28 = vadd.f32 %v4774_v40, %v4735_v19  ;;  %v4982_v30 = vmul.f32 %v6377_v7, %v12853_v24  ;;  %vm5102_vm2 = vcmp.gt.f32.partialorder %v5095_v61, 2.0 }
 0x3dc   :  { %5178 = vst [vmem:[%s14643_s19] sm:$0x7f] %v5143_v31  ;;  %vm5150_vm1 = vcmp.gt.f32.partialorder %v5143_v31, 2.0  ;;  %v6401_v27 = vld [vmem:[%s13649_s10 + $0xa8] sm:$0x7f]  ;;  %v14645_v6 = vld [vmem:[#allocation26_spill] sm:$0xff]  ;;  %v5005_v31 = vmul.f32 %v6385_v56, %v12863_v11  ;;  %v14647_v18 = vld [vmem:[#allocation99_spill] sm:$0xff]  ;;  %v5028_v17 = vmul.f32 %v6393_v59, %v12875_v13  ;;  %v4484_v2 = vadd.f32 %v14654_v34, %v14653_v63 }
 0x3dd   :  { %v6423_v9 = vsel %vm5150_vm1, 1.0, %v12753_v53  ;;  %v14644_v15 = vld [vmem:[#allocation96_spill] sm:$0xff]  ;;  %v4804_v16 = vadd.f32 %v4797_v0, %v4758_v48  ;;  %v4483_v40 = vadd.f32 %v14648_v5, %v14647_v18  ;;  %v6242_v7 = vld [vmem:[%s13649_s10 + $0x98] sm:$0x7f]  ;;  %v4827_v19 = vadd.f32 %v4820_v46, %v4781_v28  ;;  %v6258_v59 = vld [vmem:[%s13649_s10 + $0xa0] sm:$0x7f] }
 0x3de   :  { %v4460_v32 = vadd.f32 %v14645_v6, %v14644_v15  ;;  %5171 = vst [vmem:[%s14646_s1] sm:$0x7f] %v6423_v9  ;;  %v6409_v15 = vld [vmem:[%s13649_s10 + $0xa9] sm:$0x7f]  ;;  %v14649_v6 = vld [vmem:[#allocation30_spill] sm:$0xff]  ;;  %v4545_v0 = vmul.f32 %v6226_v45, %v12669_v54  ;;  %v5051_v48 = vmul.f32 %v6401_v27, %v12884_v12  ;;  %v4568_v46 = vmul.f32 %v6234_v22, %v12672_v49 }
 0x3df   :  { %v6250_v56 = vld [vmem:[%s13649_s10 + $0x99] sm:$0x7f]  ;;  %v4850_v5 = vadd.f32 %v4843_v14, %v4804_v16  ;;  %v14650_v18 = vld [vmem:[#allocation32_spill] sm:$0xff]  ;;  %v4874_v28 = vadd.f32 %v4867_v26, %v4827_v19  ;;  %v4591_v45 = vmul.f32 %v6242_v7, %v12682_v33  ;;  %v6266_v14 = vld [vmem:[%s13649_s10 + $0xa1] sm:$0x7f]  ;;  %v5074_v27 = vmul.f32 %v6409_v15, %v12890_v47 }
 0x3e0   :  { %v4506_v9 = vadd.f32 %v14649_v6, %v4460_v32  ;;  %v4529_v52 = vadd.f32 %v14650_v18, %v4483_v40  ;;  %v6417_v32 = vsel %vm5102_vm2, 1.0, %v12753_v53  ;;  %v4614_v22 = vmul.f32 %v6250_v56, %v12691_v3  ;;  %v6274_v18 = vld [vmem:[%s13649_s10 + $0xa2] sm:$0x7f] }
 0x3e1   :  { %v4897_v16 = vadd.f32 %v4890_v23, %v4850_v5  ;;  %v6282_v26 = vld [vmem:[%s13649_s10 + $0xa3] sm:$0x7f]  ;;  %v4920_v19 = vadd.f32 %v4913_v8, %v4874_v28  ;;  %v5123_v7 = vmul.f32 0.8, %v5095_v61  ;;  %v13066_v56 = vmul.f32 2.0, %v6417_v32 }
 0x3e2   :  { %v4552_v6 = vadd.f32 %v4545_v0, %v4506_v9  ;;  %v4575_v40 = vadd.f32 %v4568_v46, %v4529_v52  ;;  %v4637_v0 = vmul.f32 %v6258_v59, %v12694_v62  ;;  %v6290_v23 = vld [vmem:[%s13649_s10 + $0xa4] sm:$0x7f]  ;;  %v4660_v46 = vmul.f32 %v6266_v14, %v12711_v60 }
 0x3e3   :  { %v6298_v52 = vld [vmem:[%s13649_s10 + $0xa5] sm:$0x7f]  ;;  %v4943_v15 = vadd.f32 %v4936_v50, %v4897_v16  ;;  %v4966_v59 = vadd.f32 %v4959_v58, %v4920_v19  ;;  %v6338_v58 = vld [vmem:[%s13649_s10 + $0xb0] sm:$0x7f] }
 0x3e4   :  { %v4598_v9 = vadd.f32 %v4591_v45, %v4552_v6  ;;  %v4621_v5 = vadd.f32 %v4614_v22, %v4575_v40  ;;  %v6306_v8 = vld [vmem:[%s13649_s10 + $0xa6] sm:$0x7f]  ;;  %v4683_v6 = vmul.f32 %v6274_v18, %v12714_v44  ;;  %v4706_v45 = vmul.f32 %v6282_v26, %v12730_v25  ;;  %v6346_v18 = vld [vmem:[%s13649_s10 + $0xb1] sm:$0x7f] }
 0x3e5   :  { %v6314_v61 = vld [vmem:[%s13649_s10 + $0xa7] sm:$0x7f]  ;;  %v4989_v14 = vadd.f32 %v4982_v30, %v4943_v15  ;;  %v4729_v40 = vmul.f32 %v6290_v23, %v12733_v4  ;;  %v4752_v22 = vmul.f32 %v6298_v52, %v12758_v37  ;;  %v5012_v26 = vadd.f32 %v5005_v31, %v4966_v59  ;;  %v6354_v30 = vld [vmem:[%s13649_s10 + $0xb2] sm:$0x7f] }
 0x3e6   :  { %v4644_v28 = vadd.f32 %v4637_v0, %v4598_v9  ;;  %v6322_v50 = vld [vmem:[%s13649_s10 + $0xa8] sm:$0x7f]  ;;  %v4667_v16 = vadd.f32 %v4660_v46, %v4621_v5  ;;  %v4775_v9 = vmul.f32 %v6306_v8, %v12769_v42  ;;  %v4798_v0 = vmul.f32 %v6314_v61, %v12779_v57  ;;  %v6362_v23 = vld [vmem:[%s13649_s10 + $0xb3] sm:$0x7f] }
 0x3e7   :  { %v6330_v32 = vld [vmem:[%s13649_s10 + $0xa9] sm:$0x7f]  ;;  %v5035_v52 = vadd.f32 %v5028_v17, %v4989_v14  ;;  %v4821_v5 = vmul.f32 %v6322_v50, %v12785_v10  ;;  %v6370_v31 = vld [vmem:[%s13649_s10 + $0xb4] sm:$0x7f]  ;;  %v5058_v61 = vadd.f32 %v5051_v48, %v5012_v26  ;;  %v4914_v14 = vmul.f32 %v6354_v30, %v12824_v29 }
 0x3e8   :  { %v4690_v19 = vadd.f32 %v4683_v6, %v4644_v28  ;;  %v4713_v15 = vadd.f32 %v4706_v45, %v4667_v16  ;;  %v4844_v46 = vmul.f32 %v6330_v32, %v12803_v38  ;;  %v6227_v8 = vld [vmem:[%s13649_s10 + $0xa6] sm:$0x7f]  ;;  %v4868_v28 = vmul.f32 %v6338_v58, %v12806_v43  ;;  %v6378_v17 = vld [vmem:[%s13649_s10 + $0xb5] sm:$0x7f] }
 0x3e9   :  { %v4891_v6 = vmul.f32 %v6346_v18, %v12812_v51  ;;  %v6235_v45 = vld [vmem:[%s13649_s10 + $0xa7] sm:$0x7f]  ;;  %v5081_v50 = vadd.f32 %v5074_v27, %v5035_v52  ;;  %v4937_v16 = vmul.f32 %v6362_v23, %v12830_v35  ;;  %v13121_v58 = vld [vmem:[%s14632_s23 + $0x10] sm:$0x7f]  ;;  %v4546_v23 = vmul.f32 %v6227_v8, %v12669_v54 }
 0x3ea   :  { %v4736_v59 = vadd.f32 %v4729_v40, %v4690_v19  ;;  %v4759_v32 = vadd.f32 %v4752_v22, %v4713_v15  ;;  %v4960_v40 = vmul.f32 %v6370_v31, %v12850_v39  ;;  %v14651_v18 = vld [vmem:[#allocation72_spill] sm:$0xff]  ;;  %v14652_v26 = vld [vmem:[#allocation65_spill] sm:$0xff]  ;;  %vm5103_vm3 = vcmp.gt.f32.partialorder %v13121_v58, 2.0 }
 0x3eb   :  { %v4461_v19 = vadd.f32 %v14652_v26, %v14651_v18  ;;  %v6243_v27 = vld [vmem:[%s13649_s10 + $0xa8] sm:$0x7f]  ;;  %v5088_v22 = vadd.f32 %v5081_v50, %v5058_v61  ;;  %v6386_v31 = vld [vmem:[%s13649_s10 + $0xb6] sm:$0x7f]  ;;  %v4569_v61 = vmul.f32 %v6235_v45, %v12672_v49 }
 0x3ec   :  { %v4782_v48 = vadd.f32 %v4775_v9, %v4736_v59  ;;  %v4805_v30 = vadd.f32 %v4798_v0, %v4759_v32  ;;  %v4983_v9 = vmul.f32 %v6378_v17, %v12853_v24  ;;  %v6251_v52 = vld [vmem:[%s13649_s10 + $0xa9] sm:$0x7f]  ;;  %v14656_v59 = vld [vmem:[#allocation66_spill] sm:$0xff]  ;;  %v6259_v0 = vld [vmem:[%s13649_s10 + $0xb0] sm:$0x7f] }
 0x3ed   :  { %v14655_v34 = vld [vmem:[#allocation104_spill] sm:$0xff]  ;;  %v4530_v18 = vadd.f32 %v14656_v59, %v4484_v2  ;;  %v5130_v8 = vadd.f32 %v5123_v7, %v5088_v22  ;;  %v6267_v50 = vld [vmem:[%s13649_s10 + $0xb1] sm:$0x7f]  ;;  %v4615_v26 = vmul.f32 %v6251_v52, %v12691_v3  ;;  %v6410_v52 = vld [vmem:[%s13649_s10 + $0xb9] sm:$0x7f] }
 0x3ee   :  { %v4828_v15 = vadd.f32 %v4821_v5, %v4782_v48  ;;  %v4507_v63 = vadd.f32 %v14655_v34, %v4461_v19  ;;  %v4851_v17 = vadd.f32 %v4844_v46, %v4805_v30  ;;  %v4592_v5 = vmul.f32 %v6243_v27, %v12682_v33  ;;  %v6394_v2 = vld [vmem:[%s13649_s10 + $0xb7] sm:$0x7f] }
 0x3ef   :  { %v4576_v48 = vadd.f32 %v4569_v61, %v4530_v18  ;;  %v6275_v7 = vld [vmem:[%s13649_s10 + $0xb2] sm:$0x7f]  ;;  %v13157_v46 = vsub.f32 %v5130_v8, %v13066_v56  ;;  %v5006_v27 = vmul.f32 %v6386_v31, %v12863_v11  ;;  %v5029_v34 = vmul.f32 %v6394_v2, %v12875_v13 }
 0x3f0   :  { %v4875_v32 = vadd.f32 %v4868_v28, %v4828_v15  ;;  %v4553_v45 = vadd.f32 %v4546_v23, %v4507_v63  ;;  %v4898_v19 = vadd.f32 %v4891_v6, %v4851_v17  ;;  %v4638_v28 = vmul.f32 %v6259_v0, %v12694_v62  ;;  %v6283_v22 = vld [vmem:[%s13649_s10 + $0xb3] sm:$0x7f] }
 0x3f1   :  { %v6402_v23 = vld [vmem:[%s13649_s10 + $0xb8] sm:$0x7f]  ;;  %v4622_v15 = vadd.f32 %v4615_v26, %v4576_v48  ;;  %v4661_v6 = vmul.f32 %v6267_v50, %v12711_v60  ;;  %5179 = vst [vmem:[%s14643_s19 + $0x8] sm:$0x7f] %v13157_v46  ;;  %v6418_v63 = vsel %vm5103_vm3, 1.0, %v12753_v53  ;;  %v4684_v59 = vmul.f32 %v6275_v7, %v12714_v44 }
 0x3f2   :  { %v4921_v30 = vadd.f32 %v4914_v14, %v4875_v32  ;;  %v4599_v56 = vadd.f32 %v4592_v5, %v4553_v45  ;;  %v6291_v31 = vld [vmem:[%s13649_s10 + $0xb4] sm:$0x7f]  ;;  %v4944_v14 = vadd.f32 %v4937_v16, %v4898_v19  ;;  %v4707_v17 = vmul.f32 %v6283_v22, %v12730_v25  ;;  %v6347_v22 = vld [vmem:[%s13649_s10 + $0xc1] sm:$0x7f] }
 0x3f3   :  { %v6299_v18 = vld [vmem:[%s13649_s10 + $0xb5] sm:$0x7f]  ;;  %v4668_v8 = vadd.f32 %v4661_v6, %v4622_v15  ;;  %v5052_v50 = vmul.f32 %v6402_v23, %v12884_v12  ;;  %v5075_v32 = vmul.f32 %v6410_v52, %v12890_v47  ;;  %v4730_v2 = vmul.f32 %v6291_v31, %v12733_v4 }
 0x3f4   :  { %v4967_v61 = vadd.f32 %v4960_v40, %v4921_v30  ;;  %v4645_v0 = vadd.f32 %v4638_v28, %v4599_v56  ;;  %v6307_v16 = vld [vmem:[%s13649_s10 + $0xb6] sm:$0x7f]  ;;  %v4990_v5 = vadd.f32 %v4983_v9, %v4944_v14  ;;  %v4753_v19 = vmul.f32 %v6299_v18, %v12758_v37  ;;  %v6339_v28 = vld [vmem:[%s13649_s10 + $0xc0] sm:$0x7f] }
 0x3f5   :  { %v6315_v45 = vld [vmem:[%s13649_s10 + $0xb7] sm:$0x7f]  ;;  %v4714_v7 = vadd.f32 %v4707_v17, %v4668_v8  ;;  %v5124_v23 = vmul.f32 0.8, %v13121_v58  ;;  %v4776_v52 = vmul.f32 %v6307_v16, %v12769_v42  ;;  %v6355_v56 = vld [vmem:[%s13649_s10 + $0xc2] sm:$0x7f] }
 0x3f6   :  { %v6323_v40 = vld [vmem:[%s13649_s10 + $0xb8] sm:$0x7f]  ;;  %v5013_v48 = vadd.f32 %v5006_v27, %v4967_v61  ;;  %v4691_v26 = vadd.f32 %v4684_v59, %v4645_v0  ;;  %v5036_v30 = vadd.f32 %v5029_v34, %v4990_v5  ;;  %v5138_v27 = vmul.f32 2.0, %v6418_v63  ;;  %v6363_v59 = vld [vmem:[%s13649_s10 + $0xc3] sm:$0x7f] }
 0x3f7   :  { %v6331_v9 = vld [vmem:[%s13649_s10 + $0xb9] sm:$0x7f]  ;;  %v4760_v31 = vadd.f32 %v4753_v19, %v4714_v7  ;;  %v4799_v14 = vmul.f32 %v6315_v45, %v12779_v57  ;;  %v6371_v58 = vld [vmem:[%s13649_s10 + $0xc4] sm:$0x7f]  ;;  %v4822_v63 = vmul.f32 %v6323_v40, %v12785_v10  ;;  %v4869_v61 = vmul.f32 %v6339_v28, %v12806_v43  ;;  %v14658_v7 = vld [vmem:[#allocation81_spill] sm:$0xff] }
 0x3f8   :  { %v5059_v15 = vadd.f32 %v5052_v50, %v5013_v48  ;;  %v4737_v6 = vadd.f32 %v4730_v2, %v4691_v26  ;;  %v5082_v34 = vadd.f32 %v5075_v32, %v5036_v30  ;;  %v4845_v18 = vmul.f32 %v6331_v9, %v12803_v38  ;;  %v6379_v0 = vld [vmem:[%s13649_s10 + $0xc5] sm:$0x7f]  ;;  %v6228_v8 = vld [vmem:[%s13649_s10 + $0xb6] sm:$0x7f] }
 0x3f9   :  { %v4806_v16 = vadd.f32 %v4799_v14, %v4760_v31  ;;  %v4892_v5 = vmul.f32 %v6347_v22, %v12812_v51  ;;  %v4915_v50 = vmul.f32 %v6355_v56, %v12824_v29  ;;  %v6387_v32 = vld [vmem:[%s13649_s10 + $0xc6] sm:$0x7f]  ;;  %v6236_v2 = vld [vmem:[%s13649_s10 + $0xb7] sm:$0x7f]  ;;  %v4938_v40 = vmul.f32 %v6363_v59, %v12830_v35 }
 0x3fa   :  { %v4783_v17 = vadd.f32 %v4776_v52, %v4737_v6  ;;  %v5089_v45 = vadd.f32 %v5082_v34, %v5059_v15  ;;  %v4961_v48 = vmul.f32 %v6371_v58, %v12850_v39  ;;  %v14657_v26 = vld [vmem:[#allocation69_spill] sm:$0xff]  ;;  %v4984_v22 = vmul.f32 %v6379_v0, %v12853_v24  ;;  %v5097_v30 = vld [vmem:[%s14632_s23 + $0x18] sm:$0x7f]  ;;  %v14660_v56 = vld [vmem:[#allocation63_spill] sm:$0xff] }
 0x3fb   :  { %v4462_v19 = vadd.f32 %v14658_v7, %v14657_v26  ;;  %v4852_v28 = vadd.f32 %v4845_v18, %v4806_v16  ;;  %v14659_v52 = vld [vmem:[#allocation70_spill] sm:$0xff]  ;;  %v5007_v14 = vmul.f32 %v6387_v32, %v12863_v11  ;;  %v4547_v34 = vmul.f32 %v6228_v8, %v12669_v54  ;;  %v14662_v16 = vld [vmem:[#allocation75_spill] sm:$0xff] }
 0x3fc   :  { %v4829_v9 = vadd.f32 %v4822_v63, %v4783_v17  ;;  %v4485_v6 = vadd.f32 %v14660_v56, %v14659_v52  ;;  %v6244_v15 = vld [vmem:[%s13649_s10 + $0xb8] sm:$0x7f]  ;;  %v5131_v31 = vadd.f32 %v5124_v23, %v5089_v45  ;;  %v6395_v17 = vld [vmem:[%s13649_s10 + $0xc7] sm:$0x7f]  ;;  %v4570_v45 = vmul.f32 %v6236_v2, %v12672_v49  ;;  %v6260_v8 = vld [vmem:[%s13649_s10 + $0xc0] sm:$0x7f] }
 0x3fd   :  { %v14661_v59 = vld [vmem:[#allocation74_spill] sm:$0xff]  ;;  %v4899_v0 = vadd.f32 %v4892_v5, %v4852_v28  ;;  %v6403_v23 = vld [vmem:[%s13649_s10 + $0xc8] sm:$0x7f]  ;;  %vm5104_vm4 = vcmp.gt.f32.partialorder %v5097_v30, 2.0  ;;  %v4593_v5 = vmul.f32 %v6244_v15, %v12682_v33  ;;  %v6268_v7 = vld [vmem:[%s13649_s10 + $0xc1] sm:$0x7f]  ;;  %v5030_v56 = vmul.f32 %v6395_v17, %v12875_v13 }
 0x3fe   :  { %v4508_v58 = vadd.f32 %v14661_v59, %v4462_v19  ;;  %v6252_v63 = vld [vmem:[%s13649_s10 + $0xb9] sm:$0x7f]  ;;  %v4876_v18 = vadd.f32 %v4869_v61, %v4829_v9  ;;  %v4531_v32 = vadd.f32 %v14662_v16, %v4485_v6  ;;  %v13268_v26 = vsub.f32 %v5131_v31, %v5138_v27  ;;  %v6411_v2 = vld [vmem:[%s13649_s10 + $0xc9] sm:$0x7f]  ;;  %v6276_v27 = vld [vmem:[%s13649_s10 + $0xc2] sm:$0x7f] }
 0x3ff   :  { %v4945_v9 = vadd.f32 %v4938_v40, %v4899_v0  ;;  %v4616_v52 = vmul.f32 %v6252_v63, %v12691_v3  ;;  %v4639_v6 = vmul.f32 %v6260_v8, %v12694_v62  ;;  %v6284_v15 = vld [vmem:[%s13649_s10 + $0xc3] sm:$0x7f]  ;;  %v6214_v31 = vld [vmem:[%s13649_s10 + $0xd4] sm:$0x7f]  ;;  %v4662_v63 = vmul.f32 %v6268_v7, %v12711_v60 }
 0x400   :  { %v4554_v61 = vadd.f32 %v4547_v34, %v4508_v58  ;;  %v4922_v19 = vadd.f32 %v4915_v50, %v4876_v18  ;;  %v4577_v28 = vadd.f32 %v4570_v45, %v4531_v32  ;;  %5180 = vst [vmem:[%s14643_s19 + $0x10] sm:$0x7f] %v13268_v26  ;;  %v5053_v50 = vmul.f32 %v6403_v23, %v12884_v12  ;;  %v6292_v18 = vld [vmem:[%s13649_s10 + $0xc4] sm:$0x7f] }
 0x401   :  { %v4991_v58 = vadd.f32 %v4984_v22, %v4945_v9  ;;  %v5076_v0 = vmul.f32 %v6411_v2, %v12890_v47  ;;  %v6419_v17 = vsel %vm5104_vm4, 1.0, %v12753_v53  ;;  %v4685_v16 = vmul.f32 %v6276_v27, %v12714_v44  ;;  %v6222_v22 = vld [vmem:[%s13649_s10 + $0xd5] sm:$0x7f] }
 0x402   :  { %v4600_v40 = vadd.f32 %v4593_v5, %v4554_v61  ;;  %v4968_v59 = vadd.f32 %v4961_v48, %v4922_v19  ;;  %v4623_v34 = vadd.f32 %v4616_v52, %v4577_v28  ;;  %v6300_v48 = vld [vmem:[%s13649_s10 + $0xc5] sm:$0x7f]  ;;  %v4708_v61 = vmul.f32 %v6284_v15, %v12730_v25 }
 0x403   :  { %v5037_v45 = vadd.f32 %v5030_v56, %v4991_v58  ;;  %v6308_v5 = vld [vmem:[%s13649_s10 + $0xc6] sm:$0x7f]  ;;  %v13313_v7 = vmul.f32 %v6214_v31, %v14601_v20  ;;  %v5125_v19 = vmul.f32 0.8, %v5097_v30  ;;  %v4731_v2 = vmul.f32 %v6292_v18, %v12733_v4  ;;  %v6340_v30 = vld [vmem:[%s13649_s10 + $0xd0] sm:$0x7f] }
 0x404   :  { %v4646_v23 = vadd.f32 %v4639_v6, %v4600_v40  ;;  %v5014_v32 = vadd.f32 %v5007_v14, %v4968_v59  ;;  %v4669_v8 = vadd.f32 %v4662_v63, %v4623_v34  ;;  %v6316_v28 = vld [vmem:[%s13649_s10 + $0xc7] sm:$0x7f]  ;;  %v4754_v40 = vmul.f32 %v6300_v48, %v12758_v37  ;;  %v6348_v6 = vld [vmem:[%s13649_s10 + $0xd1] sm:$0x7f] }
 0x405   :  { %v6324_v14 = vld [vmem:[%s13649_s10 + $0xc8] sm:$0x7f]  ;;  %v5083_v27 = vadd.f32 %v5076_v0, %v5037_v45  ;;  %v13333_v15 = vmul.f32 %v6222_v22, %v14622_v41  ;;  %v4777_v59 = vmul.f32 %v6308_v5, %v12769_v42  ;;  %v6356_v58 = vld [vmem:[%s13649_s10 + $0xd2] sm:$0x7f]  ;;  %v4800_v18 = vmul.f32 %v6316_v28, %v12779_v57 }
 0x406   :  { %v4692_v9 = vadd.f32 %v4685_v16, %v4646_v23  ;;  %v5060_v52 = vadd.f32 %v5053_v50, %v5014_v32  ;;  %v4715_v56 = vadd.f32 %v4708_v61, %v4669_v8  ;;  %v6332_v20 = vld [vmem:[%s13649_s10 + $0xc9] sm:$0x7f]  ;;  %v5139_v50 = vmul.f32 2.0, %v6419_v17  ;;  %v6364_v23 = vld [vmem:[%s13649_s10 + $0xd3] sm:$0x7f] }
 0x407   :  { %v4823_v0 = vmul.f32 %v6324_v14, %v12785_v10  ;;  %v6372_v41 = vld [vmem:[%s13649_s10 + $0xd4] sm:$0x7f]  ;;  %v6229_v17 = vld [vmem:[%s13649_s10 + $0xc6] sm:$0x7f]  ;;  %v4846_v48 = vmul.f32 %v6332_v20, %v12803_v38  ;;  %v4870_v22 = vmul.f32 %v6340_v30, %v12806_v43  ;;  %v4893_v32 = vmul.f32 %v6348_v6, %v12812_v51 }
 0x408   :  { %v4738_v31 = vadd.f32 %v4731_v2, %v4692_v9  ;;  %v5090_v34 = vadd.f32 %v5083_v27, %v5060_v52  ;;  %v4761_v63 = vadd.f32 %v4754_v40, %v4715_v56  ;;  %v6237_v45 = vld [vmem:[%s13649_s10 + $0xc7] sm:$0x7f]  ;;  %v4916_v5 = vmul.f32 %v6356_v58, %v12824_v29  ;;  %v6380_v9 = vld [vmem:[%s13649_s10 + $0xd5] sm:$0x7f] }
 0x409   :  { %v4463_v2 = vadd.f32 %v12550_v1, %v12464_v55  ;;  %v4939_v14 = vmul.f32 %v6364_v23, %v12830_v35  ;;  %v4962_v52 = vmul.f32 %v6372_v41, %v12850_v39  ;;  %v6388_v27 = vld [vmem:[%s13649_s10 + $0xd6] sm:$0x7f]  ;;  %v6245_v56 = vld [vmem:[%s13649_s10 + $0xc8] sm:$0x7f]  ;;  %v5098_v55 = vld [vmem:[%s14632_s23 + $0x20] sm:$0x7f]  ;;  %v4548_v6 = vmul.f32 %v6229_v17, %v12669_v54 }
 0x40a   :  { %v4784_v16 = vadd.f32 %v4777_v59, %v4738_v31  ;;  %v5132_v8 = vadd.f32 %v5125_v19, %v5090_v34  ;;  %v4807_v61 = vadd.f32 %v4800_v18, %v4761_v63  ;;  %v4486_v19 = vadd.f32 %v12556_v21, %v12472_v36  ;;  %v14663_v1 = vld [vmem:[#allocation109_spill] sm:$0xff]  ;;  %v6253_v31 = vld [vmem:[%s13649_s10 + $0xc9] sm:$0x7f]  ;;  %v6404_v23 = vld [vmem:[%s13649_s10 + $0xd8] sm:$0x7f] }
 0x40b   :  { %v4509_v30 = vadd.f32 %v14663_v1, %v4463_v2  ;;  %v4985_v21 = vmul.f32 %v6380_v9, %v12853_v24  ;;  %v14664_v59 = vld [vmem:[#allocation33_spill] sm:$0xff]  ;;  %v4571_v34 = vmul.f32 %v6237_v45, %v12672_v49  ;;  %v4594_v17 = vmul.f32 %v6245_v56, %v12682_v33  ;;  %v6412_v9 = vld [vmem:[%s13649_s10 + $0xd9] sm:$0x7f] }
 0x40c   :  { %v4830_v28 = vadd.f32 %v4823_v0, %v4784_v16  ;;  %v13372_v40 = vsub.f32 %v5132_v8, %v5139_v50  ;;  %v4853_v20 = vadd.f32 %v4846_v48, %v4807_v61  ;;  %v6396_v50 = vld [vmem:[%s13649_s10 + $0xd7] sm:$0x7f]  ;;  %v4532_v58 = vadd.f32 %v14664_v59, %v4486_v19  ;;  %v6261_v63 = vld [vmem:[%s13649_s10 + $0xd0] sm:$0x7f] }
 0x40d   :  { %v5008_v0 = vmul.f32 %v6388_v27, %v12863_v11  ;;  %v4555_v41 = vadd.f32 %v4548_v6, %v4509_v30  ;;  %v6269_v16 = vld [vmem:[%s13649_s10 + $0xd1] sm:$0x7f]  ;;  %vm5105_vm5 = vcmp.gt.f32.partialorder %v5098_v55, 2.0  ;;  %v4617_v45 = vmul.f32 %v6253_v31, %v12691_v3 }
 0x40e   :  { %v4877_v36 = vadd.f32 %v4870_v22, %v4830_v28  ;;  %5181 = vst [vmem:[%s14643_s19 + $0x18] sm:$0x7f] %v13372_v40  ;;  %v4900_v18 = vadd.f32 %v4893_v32, %v4853_v20  ;;  %v4578_v22 = vadd.f32 %v4571_v34, %v4532_v58  ;;  %v6277_v32 = vld [vmem:[%s13649_s10 + $0xd2] sm:$0x7f]  ;;  %v5031_v61 = vmul.f32 %v6396_v50, %v12875_v13 }
 0x40f   :  { %v4601_v2 = vadd.f32 %v4594_v17, %v4555_v41  ;;  %v4640_v28 = vmul.f32 %v6261_v63, %v12694_v62  ;;  %v5054_v19 = vmul.f32 %v6404_v23, %v12884_v12  ;;  %v4663_v20 = vmul.f32 %v6269_v16, %v12711_v60  ;;  %v6325_v34 = vld [vmem:[%s13649_s10 + $0xd8] sm:$0x7f]  ;;  %v6341_v17 = vld [vmem:[%s13649_s10 + $0xe0] sm:$0x7f] }
 0x410   :  { %v4923_v48 = vadd.f32 %v4916_v5, %v4877_v36  ;;  %v4946_v8 = vadd.f32 %v4939_v14, %v4900_v18  ;;  %v6285_v5 = vld [vmem:[%s13649_s10 + $0xd3] sm:$0x7f]  ;;  %v4624_v56 = vadd.f32 %v4617_v45, %v4578_v22  ;;  %v6420_v30 = vsel %vm5105_vm5, 1.0, %v12753_v53 }
 0x411   :  { %v6293_v14 = vld [vmem:[%s13649_s10 + $0xd4] sm:$0x7f]  ;;  %v4647_v6 = vadd.f32 %v4640_v28, %v4601_v2  ;;  %v4686_v31 = vmul.f32 %v6277_v32, %v12714_v44  ;;  %v5077_v50 = vmul.f32 %v6412_v9, %v12890_v47  ;;  %v4709_v58 = vmul.f32 %v6285_v5, %v12730_v25  ;;  %v6357_v32 = vld [vmem:[%s13649_s10 + $0xe2] sm:$0x7f] }
 0x412   :  { %v4969_v27 = vadd.f32 %v4962_v52, %v4923_v48  ;;  %v4992_v1 = vadd.f32 %v4985_v21, %v4946_v8  ;;  %v6301_v52 = vld [vmem:[%s13649_s10 + $0xd5] sm:$0x7f]  ;;  %v4670_v59 = vadd.f32 %v4663_v20, %v4624_v56  ;;  %v5126_v18 = vmul.f32 0.8, %v5098_v55  ;;  %v6349_v55 = vld [vmem:[%s13649_s10 + $0xe1] sm:$0x7f] }
 0x413   :  { %v6309_v21 = vld [vmem:[%s13649_s10 + $0xd6] sm:$0x7f]  ;;  %v4732_v23 = vmul.f32 %v6293_v14, %v12733_v4  ;;  %v5140_v48 = vmul.f32 2.0, %v6420_v30  ;;  %v4755_v45 = vmul.f32 %v6301_v52, %v12758_v37  ;;  %v6365_v28 = vld [vmem:[%s13649_s10 + $0xe3] sm:$0x7f]  ;;  %v4871_v20 = vmul.f32 %v6341_v17, %v12806_v43 }
 0x414   :  { %v5015_v36 = vadd.f32 %v5008_v0, %v4969_v27  ;;  %v6317_v53 = vld [vmem:[%s13649_s10 + $0xd7] sm:$0x7f]  ;;  %v5038_v63 = vadd.f32 %v5031_v61, %v4992_v1  ;;  %v4693_v0 = vadd.f32 %v4686_v31, %v4647_v6  ;;  %v4716_v22 = vadd.f32 %v4709_v58, %v4670_v59  ;;  %v6373_v14 = vld [vmem:[%s13649_s10 + $0xe4] sm:$0x7f] }
 0x415   :  { %v6333_v41 = vld [vmem:[%s13649_s10 + $0xd9] sm:$0x7f]  ;;  %v4778_v9 = vmul.f32 %v6309_v21, %v12769_v42  ;;  %v4801_v2 = vmul.f32 %v6317_v53, %v12779_v57  ;;  %v4894_v31 = vmul.f32 %v6349_v55, %v12812_v51  ;;  %v4917_v52 = vmul.f32 %v6357_v32, %v12824_v29  ;;  %v6381_v59 = vld [vmem:[%s13649_s10 + $0xe5] sm:$0x7f] }
 0x416   :  { %v5061_v16 = vadd.f32 %v5054_v19, %v5015_v36  ;;  %v5084_v8 = vadd.f32 %v5077_v50, %v5038_v63  ;;  %v4739_v61 = vadd.f32 %v4732_v23, %v4693_v0  ;;  %v6230_v5 = vld [vmem:[%s13649_s10 + $0xd6] sm:$0x7f]  ;;  %v4762_v27 = vadd.f32 %v4755_v45, %v4716_v22  ;;  %v6389_v32 = vld [vmem:[%s13649_s10 + $0xe6] sm:$0x7f] }
 0x417   :  { %v4824_v19 = vmul.f32 %v6325_v34, %v12785_v10  ;;  %v4847_v56 = vmul.f32 %v6333_v41, %v12803_v38  ;;  %v6238_v1 = vld [vmem:[%s13649_s10 + $0xd7] sm:$0x7f]  ;;  %v4940_v50 = vmul.f32 %v6365_v28, %v12830_v35  ;;  %v4549_v22 = vmul.f32 %v6230_v5, %v12669_v54  ;;  %v6262_v54 = vld [vmem:[%s13649_s10 + $0xe0] sm:$0x7f] }
 0x418   :  { %v5091_v30 = vadd.f32 %v5084_v8, %v5061_v16  ;;  %v4785_v6 = vadd.f32 %v4778_v9, %v4739_v61  ;;  %v4808_v36 = vadd.f32 %v4801_v2, %v4762_v27  ;;  %v14665_v58 = vld [vmem:[#allocation14_spill] sm:$0xff]  ;;  %v14668_v63 = vld [vmem:[#allocation97_spill] sm:$0xff]  ;;  %v4963_v16 = vmul.f32 %v6373_v14, %v12850_v39  ;;  %v5099_v8 = vld [vmem:[%s14632_s23 + $0x28] sm:$0x7f] }
 0x419   :  { %v14666_v21 = vld [vmem:[#allocation62_spill] sm:$0xff]  ;;  %v4572_v9 = vmul.f32 %v6238_v1, %v12672_v49  ;;  %v4986_v5 = vmul.f32 %v6381_v59, %v12853_v24  ;;  %v6397_v49 = vld [vmem:[%s13649_s10 + $0xe7] sm:$0x7f]  ;;  %v5009_v1 = vmul.f32 %v6389_v32, %v12863_v11  ;;  %vm5106_vm6 = vcmp.gt.f32.partialorder %v5099_v8, 2.0 }
 0x41a   :  { %v4464_v53 = vadd.f32 %v14666_v21, %v14665_v58  ;;  %v14667_v34 = vld [vmem:[#allocation38_spill] sm:$0xff]  ;;  %v5133_v41 = vadd.f32 %v5126_v18, %v5091_v30  ;;  %v4831_v17 = vadd.f32 %v4824_v19, %v4785_v6  ;;  %v4854_v55 = vadd.f32 %v4847_v56, %v4808_v36  ;;  %v6270_v19 = vld [vmem:[%s13649_s10 + $0xe1] sm:$0x7f] }
 0x41b   :  { %v4487_v0 = vadd.f32 %v14668_v63, %v14667_v34  ;;  %v6246_v23 = vld [vmem:[%s13649_s10 + $0xd8] sm:$0x7f]  ;;  %v4641_v30 = vmul.f32 %v6262_v54, %v12694_v62  ;;  %v6286_v6 = vld [vmem:[%s13649_s10 + $0xe3] sm:$0x7f]  ;;  %v4664_v58 = vmul.f32 %v6270_v19, %v12711_v60  ;;  %v5032_v62 = vmul.f32 %v6397_v49, %v12875_v13 }
 0x41c   :  { %v6254_v45 = vld [vmem:[%s13649_s10 + $0xd9] sm:$0x7f]  ;;  %v4510_v18 = vadd.f32 %v13313_v7, %v4464_v53  ;;  %v13498_v2 = vsub.f32 %v5133_v41, %v5140_v48  ;;  %v4878_v28 = vadd.f32 %v4871_v20, %v4831_v17  ;;  %v4595_v27 = vmul.f32 %v6246_v23, %v12682_v33  ;;  %v6278_v33 = vld [vmem:[%s13649_s10 + $0xe2] sm:$0x7f]  ;;  %v6334_v54 = vld [vmem:[%s13649_s10 + $0xe9] sm:$0x7f] }
 0x41d   :  { %v4533_v61 = vadd.f32 %v13333_v15, %v4487_v0  ;;  %v4901_v7 = vadd.f32 %v4894_v31, %v4854_v55  ;;  %v6405_v15 = vld [vmem:[%s13649_s10 + $0xe8] sm:$0x7f]  ;;  %v4618_v20 = vmul.f32 %v6254_v45, %v12691_v3  ;;  %v4687_v34 = vmul.f32 %v6278_v33, %v12714_v44 }
 0x41e   :  { %v4556_v48 = vadd.f32 %v4549_v22, %v4510_v18  ;;  %5182 = vst [vmem:[%s14643_s19 + $0x20] sm:$0x7f] %v13498_v2  ;;  %v4924_v14 = vadd.f32 %v4917_v52, %v4878_v28  ;;  %v6413_v31 = vld [vmem:[%s13649_s10 + $0xe9] sm:$0x7f]  ;;  %v5055_v53 = vmul.f32 %v6405_v15, %v12884_v12  ;;  %v4710_v60 = vmul.f32 %v6286_v6, %v12730_v25 }
 0x41f   :  { %v4579_v56 = vadd.f32 %v4572_v9, %v4533_v61  ;;  %v4947_v3 = vadd.f32 %v4940_v50, %v4901_v7  ;;  %v6294_v52 = vld [vmem:[%s13649_s10 + $0xe4] sm:$0x7f]  ;;  %vm5151_vm7 = vcmp.gt.f32.partialorder %v13157_v46, 2.0  ;;  %vm5152_vm8 = vcmp.gt.f32.partialorder %v13268_v26, 2.0 }
 0x420   :  { %v4602_v36 = vadd.f32 %v4595_v27, %v4556_v48  ;;  %v4970_v21 = vadd.f32 %v4963_v16, %v4924_v14  ;;  %v6302_v50 = vld [vmem:[%s13649_s10 + $0xe5] sm:$0x7f]  ;;  %v5078_v16 = vmul.f32 %v6413_v31, %v12890_v47  ;;  %v4733_v45 = vmul.f32 %v6294_v52, %v12733_v4  ;;  %v6342_v4 = vld [vmem:[%s13649_s10 + $0xf0] sm:$0x7f] }
 0x421   :  { %v4625_v59 = vadd.f32 %v4618_v20, %v4579_v56  ;;  %v4993_v63 = vadd.f32 %v4986_v5, %v4947_v3  ;;  %v6310_v41 = vld [vmem:[%s13649_s10 + $0xe6] sm:$0x7f]  ;;  %v4756_v61 = vmul.f32 %v6302_v50, %v12758_v37  ;;  %v5127_v5 = vmul.f32 0.8, %v5099_v8  ;;  %v6350_v37 = vld [vmem:[%s13649_s10 + $0xf1] sm:$0x7f] }
 0x422   :  { %v4648_v0 = vadd.f32 %v4641_v30, %v4602_v36  ;;  %v5016_v17 = vadd.f32 %v5009_v1, %v4970_v21  ;;  %v13542_v22 = vld [vmem:[#allocation2 + $0x8] sm:$0xff]  ;;  %v4779_v27 = vmul.f32 %v6310_v41, %v12769_v42  ;;  %v6358_v48 = vld [vmem:[%s13649_s10 + $0xf2] sm:$0x7f]  ;;  %v4848_v8 = vmul.f32 %v6334_v54, %v12803_v38 }
 0x423   :  { %v4671_v23 = vadd.f32 %v4664_v58, %v4625_v59  ;;  %v6421_v44 = vsel %vm5106_vm6, 1.0, %v13542_v22  ;;  %v6318_v55 = vld [vmem:[%s13649_s10 + $0xe7] sm:$0x7f]  ;;  %v5039_v32 = vadd.f32 %v5032_v62, %v4993_v63  ;;  %v4872_v42 = vmul.f32 %v6342_v4, %v12806_v43  ;;  %v6374_v3 = vld [vmem:[%s13649_s10 + $0xf4] sm:$0x7f] }
 0x424   :  { %v4694_v25 = vadd.f32 %v4687_v34, %v4648_v0  ;;  %v6326_v9 = vld [vmem:[%s13649_s10 + $0xe8] sm:$0x7f]  ;;  %v5062_v28 = vadd.f32 %v5055_v53, %v5016_v17  ;;  %v4802_v15 = vmul.f32 %v6318_v55, %v12779_v57  ;;  %v5141_v56 = vmul.f32 2.0, %v6421_v44  ;;  %v6366_v57 = vld [vmem:[%s13649_s10 + $0xf3] sm:$0x7f] }
 0x425   :  { %v4717_v18 = vadd.f32 %v4710_v60, %v4671_v23  ;;  %v5085_v19 = vadd.f32 %v5078_v16, %v5039_v32  ;;  %v4825_v20 = vmul.f32 %v6326_v9, %v12785_v10  ;;  %v4895_v30 = vmul.f32 %v6350_v37, %v12812_v51  ;;  %v5100_v21 = vld [vmem:[%s14632_s23 + $0x30] sm:$0x7f]  ;;  %v6406_v50 = vld [vmem:[%s13649_s10 + $0xf8] sm:$0x7f] }
 0x426   :  { %v4740_v7 = vadd.f32 %v4733_v45, %v4694_v25  ;;  %v4918_v6 = vmul.f32 %v6358_v48, %v12824_v29  ;;  %vm5153_vm9 = vcmp.gt.f32.partialorder %v13372_v40, 2.0  ;;  %v6424_v51 = vsel %vm5151_vm7, 1.0, %v13542_v22  ;;  %v6382_v29 = vld [vmem:[%s13649_s10 + $0xf5] sm:$0x7f] }
 0x427   :  { %v4763_v49 = vadd.f32 %v4756_v61, %v4717_v18  ;;  %v5092_v33 = vadd.f32 %v5085_v19, %v5062_v28  ;;  %v4941_v31 = vmul.f32 %v6366_v57, %v12830_v35  ;;  %5172 = vst [vmem:[%s14646_s1 + $0x8] sm:$0x7f] %v6424_v51  ;;  %v6425_v46 = vsel %vm5152_vm8, 1.0, %v13542_v22  ;;  %v6390_v35 = vld [vmem:[%s13649_s10 + $0xf6] sm:$0x7f] }
 0x428   :  { %v4786_v14 = vadd.f32 %v4779_v27, %v4740_v7  ;;  %v6426_v26 = vsel %vm5153_vm9, 1.0, %v13542_v22  ;;  %vm5154_vm10 = vcmp.gt.f32.partialorder %v13498_v2, 2.0  ;;  %5173 = vst [vmem:[%s14646_s1 + $0x10] sm:$0x7f] %v6425_v46  ;;  %v4964_v52 = vmul.f32 %v6374_v3, %v12850_v39  ;;  %v6398_v2 = vld [vmem:[%s13649_s10 + $0xf7] sm:$0x7f] }
 0x429   :  { %v4809_v1 = vadd.f32 %v4802_v15, %v4763_v49  ;;  %v5134_v10 = vadd.f32 %v5127_v5, %v5092_v33  ;;  %5174 = vst [vmem:[%s14646_s1 + $0x18] sm:$0x7f] %v6426_v26  ;;  %v6427_v58 = vsel %vm5154_vm10, 1.0, %v13542_v22  ;;  %v4987_v39 = vmul.f32 %v6382_v29, %v12853_v24  ;;  %v6414_v63 = vld [vmem:[%s13649_s10 + $0xf9] sm:$0x7f] }
 0x42a   :  { %v4832_v38 = vadd.f32 %v4825_v20, %v4786_v14  ;;  %5175 = vst [vmem:[%s14646_s1 + $0x20] sm:$0x7f] %v6427_v58  ;;  %v5010_v34 = vmul.f32 %v6390_v35, %v12863_v11  ;;  %v5033_v41 = vmul.f32 %v6398_v2, %v12875_v13  ;;  %vm5107_vm12 = vcmp.gt.f32.partialorder %v5100_v21, 2.0 }
 0x42b   :  { %v4855_v43 = vadd.f32 %v4848_v8, %v4809_v1  ;;  %v5148_v40 = vsub.f32 %v5134_v10, %v5141_v56  ;;  %v5056_v17 = vmul.f32 %v6406_v50, %v12884_v12  ;;  %v5079_v16 = vmul.f32 %v6414_v63, %v12890_v47 }
 0x42c   :  { %v4879_v36 = vadd.f32 %v4872_v42, %v4832_v38  ;;  %v6422_v44 = vsel %vm5107_vm12, 1.0, %v13542_v22  ;;  %v5128_v32 = vmul.f32 0.8, %v5100_v21 }
 0x42d   :  { %v4902_v59 = vadd.f32 %v4895_v30, %v4855_v43  ;;  %5183 = vst [vmem:[%s14643_s19 + $0x28] sm:$0x7f] %v5148_v40  ;;  %vm5155_vm11 = vcmp.gt.f32.partialorder %v5148_v40, 2.0  ;;  %v5142_v18 = vmul.f32 2.0, %v6422_v44 }
 0x42e   :  { %v4925_v62 = vadd.f32 %v4918_v6, %v4879_v36  ;;  %v6428_v0 = vsel %vm5155_vm11, 1.0, %v13542_v22 }
 0x42f   :  { %v4948_v53 = vadd.f32 %v4941_v31, %v4902_v59  ;;  %5176 = vst [vmem:[%s14646_s1 + $0x28] sm:$0x7f] %v6428_v0 }
 0x430   :  { %v4971_v23 = vadd.f32 %v4964_v52, %v4925_v62 }
 0x431   :  { %v4994_v60 = vadd.f32 %v4987_v39, %v4948_v53 }
 0x432   :  { %v5017_v24 = vadd.f32 %v5010_v34, %v4971_v23 }
 0x433   :  { %v5040_v11 = vadd.f32 %v5033_v41, %v4994_v60 }
 0x434   :  { %v5063_v45 = vadd.f32 %v5056_v17, %v5017_v24 }
 0x435   :  { %v5086_v55 = vadd.f32 %v5079_v16, %v5040_v11 }
 0x437   :  { %v5093_v25 = vadd.f32 %v5086_v55, %v5063_v45 }
 0x439   :  { %v5135_v61 = vadd.f32 %v5128_v32, %v5093_v25 }
 0x43b   :  { %v5149_v13 = vsub.f32 %v5135_v61, %v5142_v18 }
 0x43d   :  { %5184 = vst [vmem:[%s14643_s19 + $0x30] sm:$0x7f] %v5149_v13  ;;  %vm5156_vm13 = vcmp.gt.f32.partialorder %v5149_v13, 2.0 }
 0x43e   :  { %v6429_v9 = vsel %vm5156_vm13, 1.0, %v13542_v22 }
 0x43f   :  { %5177 = vst [vmem:[%s14646_s1 + $0x30] sm:$0x7f] %v6429_v9 }
 0x440   :  { %5205 = vsyncpa [#allocation7], 1 }
 0x441   :  { %5206 = vsyncpa [#allocation9], 1 }

</bundles_post_ra>
